<compile_context>
chip_gen: v6e
topology: v6e:2x2x1
jax: 0.10.0
libtpu: 0.0.40
codegen_flags: <defaults>
</compile_context>

<pallas_src>
import jax
import jax.numpy as jnp
from jax.experimental import pallas as pl
from jax.experimental.pallas import tpu as pltpu


def _rim_math(x, base, base_pre, eps,
              W_ge1x, W_ge2, W_enc, W_gb, W_head, W_ol1, W_ol2, b_pack,
              *, recip):
    """Shared math for the Pallas kernel body and the pure-JAX reference.

    x        : (QB, F)     query features (f32)
    base     : (B, F)      base-class node features (f32)
    base_pre : (B, E)      precomputed base @ W_ge1[:F]  (hoisted, f32)
    eps      : (QB, B, 2)  standard-normal draws [eps1 | eps2] (f32)
    W_ge1x   : (F, E)      x-half of gen_edge_emb layer-1 (bf16)
    W_ge2    : (E, E)      (bf16)
    W_enc    : (E, 2E)     [prior enc | posterior enc] (bf16)
    W_gb     : (2E, 4E)    block-diag: prior [g|b] / posterior [g|b] (bf16)
    W_head   : (4E, 8)     block-diag scalar heads as columns (bf16)
    W_ol1/2  : out_layer weights (bf16)
    b_pack   : (8, 4E)     packed biases (f32, see init_params)
    """
    f32 = jnp.float32
    bf16 = jnp.bfloat16
    relu = lambda v: jnp.maximum(v, 0.0)
    sp = jax.nn.softplus
    # bf16 operands, f32 accumulation (native MXU format on v5e/v6e/v7x).
    dot = lambda a, w: jnp.dot(a.astype(bf16), w, preferred_element_type=f32)

    QB, F = x.shape
    B = base.shape[0]
    E = W_ge2.shape[0]
    LD = W_ol1.shape[1]
    OD = W_ol2.shape[1]
    M = QB * B

    geb1 = b_pack[0:1, :E]
    geb2 = b_pack[1:2, :E]
    encb = b_pack[2:3, :2 * E]
    gbb = b_pack[3:4, :4 * E]
    headb = b_pack[4:5, :8]
    olb1 = b_pack[5:6, :LD]
    olb2 = b_pack[6:7, :OD]

    # ----- gen_edge_emb: h[q,b] = relu(base@W1[:F] (hoisted) + x@W1[F:] + b1) -----
    x_part = dot(x, W_ge1x)                                             # (QB, E)
    h3 = relu(base_pre[None, :, :] + x_part[:, None, :] + geb1)         # (QB, B, E)
    h = h3.reshape(M, E)                                                # (M, E)
    edge = dot(h, W_ge2) + geb2                                         # (M, E)

    # ----- encode_mean_std_pair.enc (prior & posterior, fused N=2E) -----
    enc_both = relu(dot(edge, W_enc) + encb)                            # (M, 2E)

    # ----- enc_g/enc_b of both branches: one block-diagonal matmul -----
    gb_all = relu(dot(enc_both, W_gb) + gbb)                            # (M, 4E)

    # ----- all 7 scalar heads: one block-diagonal matmul, column form -----
    heads = (dot(gb_all, W_head) + headb).reshape(QB, B, 8)             # (QB, B, 8)

    pr_mean = heads[:, :, 0:1]                                          # (QB, B, 1)
    pr_std = sp(heads[:, :, 1:2])
    pr_mij = 0.4 * jax.nn.sigmoid(heads[:, :, 2:3])
    po_mean_g = heads[:, :, 3:4]
    po_std_g = sp(heads[:, :, 4:5])
    po_mag = heads[:, :, 5:6]
    po_sag = sp(heads[:, :, 6:7])

    nij = sp(po_mag) + 0.01
    nij_ = 2.0 * nij * jnp.square(po_sag)
    po_mij = 0.5 * (1.0 + nij_ - jnp.sqrt(jnp.square(nij_) + 1.0))      # (QB, B, 1)

    # ----- sample_repara ('Train' path) -----
    eps1 = eps[:, :, 0:1]
    eps2 = eps[:, :, 1:2]
    std_alpha = jnp.sqrt(po_mij * (1.0 - po_mij))
    alpha_tilde = sp(eps1 * std_alpha + po_mij)                         # (QB, B, 1)
    mean_sij = alpha_tilde * po_mean_g
    std_sij = jnp.sqrt(alpha_tilde) * po_std_g
    s_ij = 0.01 * eps2 * std_sij + mean_sij
    alpha_bar = s_ij * alpha_tilde                                      # (QB, B, 1)
    ab_min = jnp.min(alpha_bar, axis=1, keepdims=True)                  # (QB, 1, 1)
    ab_max = jnp.max(alpha_bar, axis=1, keepdims=True)
    # epsilon guards the degenerate all-equal case (NaN fix flagged in review)
    alpha_bars = (alpha_bar - ab_min) * recip(ab_max - ab_min + 1e-8)   # (QB, B, 1)

    # ----- KL terms -----
    eps_k = 1e-6
    eye = (jax.lax.broadcasted_iota(jnp.int32, (B, B), 0)
           == jax.lax.broadcasted_iota(jnp.int32, (B, B), 1)).astype(f32)
    # lane-form (QB,1,B) copies of the prior mean/std via mask + sublane reduction
    pr_mean_row = jnp.sum(pr_mean * eye[None], axis=1, keepdims=True)   # (QB, 1, B)
    pr_std_row = jnp.sum(pr_std * eye[None], axis=1, keepdims=True)     # (QB, 1, B)

    a1 = mean_sij                                                       # (QB, B, 1)
    a2 = std_sij                                                        # (QB, B, 1)
    a3 = alpha_tilde * pr_mean_row                                      # (QB, B, B)
    a4 = jnp.sqrt(alpha_tilde) * pr_std_row                             # (QB, B, B)
    inv_a4sq = recip(jnp.square(a4 + eps_k))
    kld_g = (2.0 * jnp.log(a4 + eps_k) - 2.0 * jnp.log(a2 + eps_k)
             + (jnp.square(a2) + jnp.square(a1 - a3)) * inv_a4sq - 1.0)  # (QB, B, B)
    kl_g = 0.5 * jnp.sum(jnp.sum(jnp.abs(kld_g), axis=2),
                         axis=1, keepdims=True)                          # (QB, 1)

    kld_b = pr_mij - po_mij + po_mij * (jnp.log(po_mij + eps_k)
                                        - jnp.log(pr_mij + eps_k))       # (QB, B, 1)
    kl_b = jnp.sum(jnp.abs(kld_b), axis=1)                               # (QB, 1)

    # lane-form alpha_bars for the packed output
    ab_row = jnp.sum(alpha_bars * eye[None], axis=1)                     # (QB, B)

    # ----- graph readout (per query): sum_b alpha_bars[q,b] * base[b] -----
    H_raw = jnp.sum(alpha_bars * base[None, :, :], axis=1)               # (QB, F)
    inv_l1 = recip(jnp.sum(jnp.abs(H_raw), axis=-1, keepdims=True))      # (QB, 1)
    H_g = 0.5 * (H_raw * inv_l1) + 0.5 * x                               # (QB, F)

    h1 = dot(H_g, W_ol1) + olb1                                          # (QB, LD)
    x_out = dot(h1, W_ol2) + olb2                                        # (QB, OD)
    return x_out, kl_g, kl_b, ab_row, H_g


def rim_kernel(x_ref, eps_ref, base_ref, bpre_ref,
               wge1x_ref, wge2_ref, wenc_ref, wgb_ref, whead_ref,
               wol1_ref, wol2_ref, bpack_ref, out_ref):
    x_out, kl_g, kl_b, ab_row, H_g = _rim_math(
        x_ref[...], base_ref[...], bpre_ref[...], eps_ref[...],
        wge1x_ref[...], wge2_ref[...], wenc_ref[...], wgb_ref[...],
        whead_ref[...], wol1_ref[...], wol2_ref[...], bpack_ref[...],
        recip=lambda v: pl.reciprocal(v, approx=False))

    qb = x_out.shape[0]
    slab_w = out_ref.shape[-1] // 2
    pad0 = slab_w - (x_out.shape[1] + 2 + ab_row.shape[1])
    pad1 = slab_w - H_g.shape[1]
    pieces = [x_out, kl_g, kl_b, ab_row]
    if pad0 > 0:
        pieces.append(jnp.zeros((qb, pad0), jnp.float32))
    pieces.append(H_g)
    if pad1 > 0:
        pieces.append(jnp.zeros((qb, pad1), jnp.float32))
    # single lane-dense store; one dense output DMA per grid step
    out_ref[...] = jnp.concatenate(pieces, axis=-1)


def rim_forward(x, base_nodes, eps1, eps2, params, *, qb=8):
    """x: (Q, F); eps1/eps2: (Q, B). QB queries per grid step (M = QB*B matmul rows)."""
    Q, F = x.shape
    B = base_nodes.shape[0]
    E = params["W_ge2"].shape[0]
    LD = params["W_ol1"].shape[1]
    OD = params["W_ol2"].shape[1]
    assert Q % qb == 0, (Q, qb)
    assert F % 128 == 0 and qb % 8 == 0
    nq = Q // qb

    payload = OD + 2 + B
    slab_w = max(F, 128 * pl.cdiv(payload, 128))
    assert payload <= slab_w and F <= slab_w

    # merged eps input + hoisted query-invariant gen_edge_emb half (f32 precompute)
    eps_pack = jnp.stack([eps1, eps2], axis=-1)                          # (Q, B, 2)
    base_pre = jnp.dot(base_nodes, params["W_ge1_base"],
                       preferred_element_type=jnp.float32)               # (B, E)

    def wspec(shape):
        n = len(shape)
        return pl.BlockSpec(shape, lambda g, n=n: (0,) * n)              # VMEM-resident

    in_specs = [
        pl.BlockSpec((qb, F), lambda g: (g, 0)),        # x
        pl.BlockSpec((qb, B, 2), lambda g: (g, 0, 0)),  # eps_pack
        wspec((B, F)),                                  # base
        wspec((B, E)),                                  # base_pre
        wspec((F, E)),                                  # W_ge1_x
        wspec((E, E)),                                  # W_ge2
        wspec((E, 2 * E)),                              # W_enc
        wspec((2 * E, 4 * E)),                          # W_gb_bd
        wspec((4 * E, 8)),                              # W_head_bd
        wspec((F, LD)),                                 # W_ol1
        wspec((LD, OD)),                                # W_ol2
        wspec((8, 4 * E)),                              # b_pack
    ]
    out_specs = pl.BlockSpec((qb, 2 * slab_w), lambda g: (g, 0))
    out_shape = jax.ShapeDtypeStruct((Q, 2 * slab_w), jnp.float32)

    fn = pl.pallas_call(
        rim_kernel,
        out_shape=out_shape,
        grid_spec=pltpu.PrefetchScalarGridSpec(
            num_scalar_prefetch=0,
            grid=(nq,),
            in_specs=in_specs,
            out_specs=out_specs,
        ),
        compiler_params=pltpu.CompilerParams(
            # 'parallel' lets v7x split grid steps across its two TensorCores;
            # harmless on v5e/v6e (single TC). nq kept a multiple of 2 by the caller.
            dimension_semantics=("parallel",)),
    )
    slab = fn(x, eps_pack, base_nodes, base_pre,
              params["W_ge1_x"], params["W_ge2"], params["W_enc"],
              params["W_gb_bd"], params["W_head_bd"],
              params["W_ol1"], params["W_ol2"], params["b_pack"])

    x_out = slab[:, 0:OD]
    kl_g = slab[:, OD:OD + 1]
    kl_b = slab[:, OD + 1:OD + 2]
    alpha_bars = slab[:, OD + 2:OD + 2 + B]
    H_g = slab[:, slab_w:slab_w + F]
    return x_out, kl_g, kl_b, alpha_bars, H_g


def init_params(key, F, E, LD, OD):
    """Random packed RIM parameters (layouts documented in _rim_math)."""
    f32, bf16 = jnp.float32, jnp.bfloat16

    def rnd(i, shape):
        return 0.05 * jax.random.normal(jax.random.fold_in(key, i), shape, f32)

    # --- fused block-diagonal enc_g/enc_b weight: (2E, 4E) ---
    W_gb_pr = rnd(7, (E, 2 * E))
    W_gb_po = rnd(8, (E, 2 * E))
    z_e2e = jnp.zeros((E, 2 * E), f32)
    W_gb_bd = jnp.concatenate([
        jnp.concatenate([W_gb_pr, z_e2e], axis=1),
        jnp.concatenate([z_e2e, W_gb_po], axis=1)], axis=0)              # (2E, 4E)

    # --- fused block-diagonal scalar heads: (4E, 8) columns ---
    z_e1 = jnp.zeros((E, 1), f32)
    g_head = lambda i: jnp.concatenate([rnd(i, (E, 1)), z_e1], axis=0)   # reads g-half
    b_head = lambda i: jnp.concatenate([z_e1, rnd(i, (E, 1))], axis=0)   # reads b-half
    pr_head = jnp.concatenate([g_head(0), g_head(1), b_head(2)], axis=1)            # (2E,3)
    po_head = jnp.concatenate([g_head(3), g_head(4), b_head(5), b_head(6)], axis=1)  # (2E,4)
    top = jnp.concatenate([pr_head, jnp.zeros((2 * E, 5), f32)], axis=1)             # (2E,8)
    bot = jnp.concatenate([jnp.zeros((2 * E, 3), f32), po_head,
                           jnp.zeros((2 * E, 1), f32)], axis=1)                       # (2E,8)
    W_head_bd = jnp.concatenate([top, bot], axis=0)                                   # (4E,8)

    W4 = 4 * E
    def pad_row(v):
        return jnp.concatenate([v, jnp.zeros((1, W4 - v.shape[1]), f32)], axis=1)

    b_pack = jnp.concatenate([
        pad_row(rnd(10, (1, E))),                                        # 0: gen_edge_emb bias 1
        pad_row(rnd(11, (1, E))),                                        # 1: gen_edge_emb bias 2
        pad_row(rnd(12, (1, 2 * E))),                                    # 2: [pr enc | po enc] bias
        jnp.concatenate([rnd(13, (1, 2 * E)), rnd(14, (1, 2 * E))], 1),  # 3: [pr g|b ; po g|b] bias
        pad_row(rnd(15, (1, 7))),                                        # 4: 7 scalar head biases
        pad_row(rnd(16, (1, LD))),                                       # 5: out_layer bias 1
        pad_row(rnd(17, (1, OD))),                                       # 6: out_layer bias 2
        jnp.zeros((1, W4), f32),                                         # 7: pad
    ], axis=0)                                                           # (8, 4E)

    return {
        "W_ge1_base": rnd(20, (F, E)),                # f32: hoisted wrapper precompute
        "W_ge1_x": rnd(21, (F, E)).astype(bf16),
        "W_ge2": rnd(22, (E, E)).astype(bf16),
        "W_enc": rnd(23, (E, 2 * E)).astype(bf16),    # [prior enc | posterior enc]
        "W_gb_bd": W_gb_bd.astype(bf16),
        "W_head_bd": W_head_bd.astype(bf16),
        "W_ol1": rnd(24, (F, LD)).astype(bf16),
        "W_ol2": rnd(25, (LD, OD)).astype(bf16),
        "b_pack": b_pack,                             # f32
    }


if __name__ == "__main__":
    # small shapes: feature_dim = edge_dim = 128, base_num = 16, last_dense = 64,
    # out_dim = 32; Q = 16 queries, QB = 8 per grid step -> grid=(2,) (v7x-friendly)
    F_DIM, E_DIM, B_NUM, LAST_DENSE, OUT_DIM = 128, 128, 16, 64, 32
    Q, QB = 16, 8

    key = jax.random.PRNGKey(0)
    kx, kb, ke1, ke2, kp = jax.random.split(key, 5)
    x = jax.random.normal(kx, (Q, F_DIM), jnp.float32)                 # query node features
    base_nodes = jax.random.normal(kb, (B_NUM, F_DIM), jnp.float32)
    eps1 = jax.random.normal(ke1, (Q, B_NUM), jnp.float32)             # torch .normal_() #1
    eps2 = jax.random.normal(ke2, (Q, B_NUM), jnp.float32)             # torch .normal_() #2
    params = init_params(kp, F_DIM, E_DIM, LAST_DENSE, OUT_DIM)

    outs = rim_forward(x, base_nodes, eps1, eps2, params, qb=QB)
    outs = jax.block_until_ready(outs)

    # pure-JAX reference: same math run once over all Q queries (per-query reductions)
    base_pre = jnp.dot(base_nodes, params["W_ge1_base"],
                       preferred_element_type=jnp.float32)
    eps_pack = jnp.stack([eps1, eps2], axis=-1)
    ref = _rim_math(x, base_nodes, base_pre, eps_pack,
                    params["W_ge1_x"], params["W_ge2"], params["W_enc"],
                    params["W_gb_bd"], params["W_head_bd"],
                    params["W_ol1"], params["W_ol2"], params["b_pack"],
                    recip=lambda v: 1.0 / v)

    names = ("x_out", "kl_g", "kl_b", "alpha_bars", "H_g")
    for name, o, r in zip(names, outs, ref):
        assert o.shape == r.shape, (name, o.shape, r.shape)
        assert bool(jnp.all(jnp.isfinite(o))), name
        assert bool(jnp.allclose(o, r, rtol=1e-2, atol=2e-3)), \
            (name, float(jnp.max(jnp.abs(o - r))))

    print("KERNEL_OK")
</pallas_src>

<mosaic_0001>
module attributes {stable_mosaic.version = 11 : i64} {
  func.func @rim_kernel(%arg0: i32, %arg1: memref<8x128xf32, #tpu.memory_space<vmem>>, %arg2: memref<8x16x2xf32, #tpu.memory_space<vmem>>, %arg3: memref<16x128xf32, #tpu.memory_space<vmem>>, %arg4: memref<16x128xf32, #tpu.memory_space<vmem>>, %arg5: memref<128x128xbf16, #tpu.memory_space<vmem>>, %arg6: memref<128x128xbf16, #tpu.memory_space<vmem>>, %arg7: memref<128x256xbf16, #tpu.memory_space<vmem>>, %arg8: memref<256x512xbf16, #tpu.memory_space<vmem>>, %arg9: memref<512x8xbf16, #tpu.memory_space<vmem>>, %arg10: memref<128x64xbf16, #tpu.memory_space<vmem>>, %arg11: memref<64x32xbf16, #tpu.memory_space<vmem>>, %arg12: memref<8x512xf32, #tpu.memory_space<vmem>>, %arg13: memref<8x256xf32, #tpu.memory_space<vmem>>) attributes {dimension_semantics = [#tpu.dimension_semantics<parallel>], iteration_bounds = array<i64: 2>, scalar_prefetch = 0 : i64, scratch_operands = 0 : i64, tpu.core_type = #tpu.core_type<tc>, window_params = [{transform_indices = @transform_0, window_bounds = array<i64: 8, 128>}, {transform_indices = @transform_1, window_bounds = array<i64: 8, 16, 2>}, {pipeline_mode = #tpu.pipeline_mode<synchronous>, transform_indices = @transform_2, window_bounds = array<i64: 16, 128>}, {pipeline_mode = #tpu.pipeline_mode<synchronous>, transform_indices = @transform_3, window_bounds = array<i64: 16, 128>}, {pipeline_mode = #tpu.pipeline_mode<synchronous>, transform_indices = @transform_4, window_bounds = array<i64: 128, 128>}, {pipeline_mode = #tpu.pipeline_mode<synchronous>, transform_indices = @transform_5, window_bounds = array<i64: 128, 128>}, {pipeline_mode = #tpu.pipeline_mode<synchronous>, transform_indices = @transform_6, window_bounds = array<i64: 128, 256>}, {pipeline_mode = #tpu.pipeline_mode<synchronous>, transform_indices = @transform_7, window_bounds = array<i64: 256, 512>}, {pipeline_mode = #tpu.pipeline_mode<synchronous>, transform_indices = @transform_8, window_bounds = array<i64: 512, 8>}, {pipeline_mode = #tpu.pipeline_mode<synchronous>, transform_indices = @transform_9, window_bounds = array<i64: 128, 64>}, {pipeline_mode = #tpu.pipeline_mode<synchronous>, transform_indices = @transform_10, window_bounds = array<i64: 64, 32>}, {pipeline_mode = #tpu.pipeline_mode<synchronous>, transform_indices = @transform_11, window_bounds = array<i64: 8, 512>}, {transform_indices = @transform_12, window_bounds = array<i64: 8, 256>}]} {
    %c0 = arith.constant 0 : index
    %c0_0 = arith.constant 0 : index
    %0 = vector.load %arg1[%c0, %c0_0] : memref<8x128xf32, #tpu.memory_space<vmem>>, vector<8x128xf32>
    %c0_1 = arith.constant 0 : index
    %c0_2 = arith.constant 0 : index
    %1 = vector.load %arg3[%c0_1, %c0_2] : memref<16x128xf32, #tpu.memory_space<vmem>>, vector<16x128xf32>
    %c0_3 = arith.constant 0 : index
    %c0_4 = arith.constant 0 : index
    %2 = vector.load %arg4[%c0_3, %c0_4] : memref<16x128xf32, #tpu.memory_space<vmem>>, vector<16x128xf32>
    %c0_5 = arith.constant 0 : index
    %c0_6 = arith.constant 0 : index
    %c0_7 = arith.constant 0 : index
    %3 = vector.load %arg2[%c0_5, %c0_6, %c0_7] : memref<8x16x2xf32, #tpu.memory_space<vmem>>, vector<8x16x2xf32>
    %c0_8 = arith.constant 0 : index
    %c0_9 = arith.constant 0 : index
    %4 = vector.load %arg5[%c0_8, %c0_9] : memref<128x128xbf16, #tpu.memory_space<vmem>>, vector<128x128xbf16>
    %c0_10 = arith.constant 0 : index
    %c0_11 = arith.constant 0 : index
    %5 = vector.load %arg6[%c0_10, %c0_11] : memref<128x128xbf16, #tpu.memory_space<vmem>>, vector<128x128xbf16>
    %c0_12 = arith.constant 0 : index
    %c0_13 = arith.constant 0 : index
    %6 = vector.load %arg7[%c0_12, %c0_13] : memref<128x256xbf16, #tpu.memory_space<vmem>>, vector<128x256xbf16>
    %c0_14 = arith.constant 0 : index
    %c0_15 = arith.constant 0 : index
    %7 = vector.load %arg8[%c0_14, %c0_15] : memref<256x512xbf16, #tpu.memory_space<vmem>>, vector<256x512xbf16>
    %c0_16 = arith.constant 0 : index
    %c0_17 = arith.constant 0 : index
    %8 = vector.load %arg9[%c0_16, %c0_17] : memref<512x8xbf16, #tpu.memory_space<vmem>>, vector<512x8xbf16>
    %c0_18 = arith.constant 0 : index
    %c0_19 = arith.constant 0 : index
    %9 = vector.load %arg10[%c0_18, %c0_19] : memref<128x64xbf16, #tpu.memory_space<vmem>>, vector<128x64xbf16>
    %c0_20 = arith.constant 0 : index
    %c0_21 = arith.constant 0 : index
    %10 = vector.load %arg11[%c0_20, %c0_21] : memref<64x32xbf16, #tpu.memory_space<vmem>>, vector<64x32xbf16>
    %c0_22 = arith.constant 0 : index
    %c0_23 = arith.constant 0 : index
    %11 = vector.load %arg12[%c0_22, %c0_23] : memref<8x512xf32, #tpu.memory_space<vmem>>, vector<8x512xf32>
    %12 = vector.extract_strided_slice %11 {offsets = [0, 0], sizes = [1, 128], strides = [1, 1]} : vector<8x512xf32> to vector<1x128xf32>
    %13 = vector.extract_strided_slice %11 {offsets = [1, 0], sizes = [1, 128], strides = [1, 1]} : vector<8x512xf32> to vector<1x128xf32>
    %14 = vector.extract_strided_slice %11 {offsets = [2, 0], sizes = [1, 256], strides = [1, 1]} : vector<8x512xf32> to vector<1x256xf32>
    %15 = vector.extract_strided_slice %11 {offsets = [3, 0], sizes = [1, 512], strides = [1, 1]} : vector<8x512xf32> to vector<1x512xf32>
    %16 = vector.extract_strided_slice %11 {offsets = [4, 0], sizes = [1, 8], strides = [1, 1]} : vector<8x512xf32> to vector<1x8xf32>
    %17 = vector.extract_strided_slice %11 {offsets = [5, 0], sizes = [1, 64], strides = [1, 1]} : vector<8x512xf32> to vector<1x64xf32>
    %18 = vector.extract_strided_slice %11 {offsets = [6, 0], sizes = [1, 32], strides = [1, 1]} : vector<8x512xf32> to vector<1x32xf32>
    %19 = arith.truncf %0 : vector<8x128xf32> to vector<8x128xbf16>
    %cst = arith.constant dense<0.000000e+00> : vector<8x128xf32>
    %20 = tpu.matmul %19, %4, %cst {dimension_numbers = #tpu.dot_dimension_numbers<[1], [0], [0], [1], [0, 0, 1, 1], [], []>} : vector<8x128xbf16>, vector<128x128xbf16>, vector<8x128xf32> -> vector<8x128xf32>
    %21 = vector.shape_cast %2 : vector<16x128xf32> to vector<1x16x128xf32>
    %22 = vector.shape_cast %20 : vector<8x128xf32> to vector<8x1x128xf32>
    %23 = vector.broadcast %21 : vector<1x16x128xf32> to vector<8x16x128xf32>
    %24 = vector.broadcast %22 : vector<8x1x128xf32> to vector<8x16x128xf32>
    %25 = arith.addf %23, %24 : vector<8x16x128xf32>
    %26 = vector.shape_cast %12 : vector<1x128xf32> to vector<1x1x128xf32>
    %27 = vector.broadcast %26 : vector<1x1x128xf32> to vector<8x16x128xf32>
    %28 = arith.addf %25, %27 : vector<8x16x128xf32>
    %cst_24 = arith.constant 0.000000e+00 : f32
    %29 = vector.broadcast %cst_24 : f32 to vector<8x16x128xf32>
    %30 = arith.maximumf %28, %29 : vector<8x16x128xf32>
    %31 = vector.shape_cast %30 : vector<8x16x128xf32> to vector<128x128xf32>
    %32 = arith.truncf %31 : vector<128x128xf32> to vector<128x128xbf16>
    %cst_25 = arith.constant dense<0.000000e+00> : vector<128x128xf32>
    %33 = tpu.matmul %32, %5, %cst_25 {dimension_numbers = #tpu.dot_dimension_numbers<[1], [0], [0], [1], [0, 0, 1, 1], [], []>} : vector<128x128xbf16>, vector<128x128xbf16>, vector<128x128xf32> -> vector<128x128xf32>
    %34 = vector.broadcast %13 : vector<1x128xf32> to vector<128x128xf32>
    %35 = arith.addf %33, %34 : vector<128x128xf32>
    %36 = arith.truncf %35 : vector<128x128xf32> to vector<128x128xbf16>
    %cst_26 = arith.constant dense<0.000000e+00> : vector<128x256xf32>
    %37 = tpu.matmul %36, %6, %cst_26 {dimension_numbers = #tpu.dot_dimension_numbers<[1], [0], [0], [1], [0, 0, 1, 1], [], []>} : vector<128x128xbf16>, vector<128x256xbf16>, vector<128x256xf32> -> vector<128x256xf32>
    %38 = vector.broadcast %14 : vector<1x256xf32> to vector<128x256xf32>
    %39 = arith.addf %37, %38 : vector<128x256xf32>
    %cst_27 = arith.constant 0.000000e+00 : f32
    %40 = vector.broadcast %cst_27 : f32 to vector<128x256xf32>
    %41 = arith.maximumf %39, %40 : vector<128x256xf32>
    %42 = arith.truncf %41 : vector<128x256xf32> to vector<128x256xbf16>
    %cst_28 = arith.constant dense<0.000000e+00> : vector<128x512xf32>
    %43 = tpu.matmul %42, %7, %cst_28 {dimension_numbers = #tpu.dot_dimension_numbers<[1], [0], [0], [1], [0, 0, 1, 1], [], []>} : vector<128x256xbf16>, vector<256x512xbf16>, vector<128x512xf32> -> vector<128x512xf32>
    %44 = vector.broadcast %15 : vector<1x512xf32> to vector<128x512xf32>
    %45 = arith.addf %43, %44 : vector<128x512xf32>
    %cst_29 = arith.constant 0.000000e+00 : f32
    %46 = vector.broadcast %cst_29 : f32 to vector<128x512xf32>
    %47 = arith.maximumf %45, %46 : vector<128x512xf32>
    %48 = arith.truncf %47 : vector<128x512xf32> to vector<128x512xbf16>
    %cst_30 = arith.constant dense<0.000000e+00> : vector<128x8xf32>
    %49 = tpu.matmul %48, %8, %cst_30 {dimension_numbers = #tpu.dot_dimension_numbers<[1], [0], [0], [1], [0, 0, 1, 1], [], []>} : vector<128x512xbf16>, vector<512x8xbf16>, vector<128x8xf32> -> vector<128x8xf32>
    %50 = vector.broadcast %16 : vector<1x8xf32> to vector<128x8xf32>
    %51 = arith.addf %49, %50 : vector<128x8xf32>
    %52 = vector.shape_cast %51 : vector<128x8xf32> to vector<8x16x8xf32>
    %53 = vector.extract_strided_slice %52 {offsets = [0, 0, 0], sizes = [8, 16, 1], strides = [1, 1, 1]} : vector<8x16x8xf32> to vector<8x16x1xf32>
    %54 = vector.extract_strided_slice %52 {offsets = [0, 0, 1], sizes = [8, 16, 1], strides = [1, 1, 1]} : vector<8x16x8xf32> to vector<8x16x1xf32>
    %cst_31 = arith.constant 0.000000e+00 : f32
    %55 = vector.broadcast %cst_31 : f32 to vector<8x16x1xf32>
    %56 = arith.maximumf %54, %55 : vector<8x16x1xf32>
    %57 = vector.broadcast %cst_31 : f32 to vector<8x16x1xf32>
    %58 = arith.subf %54, %57 : vector<8x16x1xf32>
    %59 = arith.cmpf one, %58, %58 : vector<8x16x1xf32>
    %60 = vector.broadcast %cst_31 : f32 to vector<8x16x1xf32>
    %61 = arith.addf %54, %60 : vector<8x16x1xf32>
    %62 = math.absf %58 : vector<8x16x1xf32>
    %cst_32 = arith.constant 0.000000e+00 : f32
    %63 = vector.broadcast %cst_32 : f32 to vector<8x16x1xf32>
    %64 = arith.subf %63, %62 : vector<8x16x1xf32>
    %65 = math.exp %64 : vector<8x16x1xf32>
    %66 = math.log1p %65 : vector<8x16x1xf32>
    %67 = arith.addf %56, %66 : vector<8x16x1xf32>
    %68 = arith.select %59, %61, %67 : vector<8x16x1xi1>, vector<8x16x1xf32>
    %69 = vector.extract_strided_slice %52 {offsets = [0, 0, 2], sizes = [8, 16, 1], strides = [1, 1, 1]} : vector<8x16x8xf32> to vector<8x16x1xf32>
    %70 = arith.negf %69 : vector<8x16x1xf32>
    %71 = math.exp %70 : vector<8x16x1xf32>
    %cst_33 = arith.constant 1.000000e+00 : f32
    %72 = vector.broadcast %cst_33 : f32 to vector<8x16x1xf32>
    %73 = arith.addf %72, %71 : vector<8x16x1xf32>
    %74 = arith.divf %72, %73 : vector<8x16x1xf32>
    %cst_34 = arith.constant 4.000000e-01 : f32
    %75 = vector.broadcast %cst_34 : f32 to vector<8x16x1xf32>
    %76 = arith.mulf %75, %74 : vector<8x16x1xf32>
    %77 = vector.extract_strided_slice %52 {offsets = [0, 0, 3], sizes = [8, 16, 1], strides = [1, 1, 1]} : vector<8x16x8xf32> to vector<8x16x1xf32>
    %78 = vector.extract_strided_slice %52 {offsets = [0, 0, 4], sizes = [8, 16, 1], strides = [1, 1, 1]} : vector<8x16x8xf32> to vector<8x16x1xf32>
    %cst_35 = arith.constant 0.000000e+00 : f32
    %79 = vector.broadcast %cst_35 : f32 to vector<8x16x1xf32>
    %80 = arith.maximumf %78, %79 : vector<8x16x1xf32>
    %81 = vector.broadcast %cst_35 : f32 to vector<8x16x1xf32>
    %82 = arith.subf %78, %81 : vector<8x16x1xf32>
    %83 = arith.cmpf one, %82, %82 : vector<8x16x1xf32>
    %84 = vector.broadcast %cst_35 : f32 to vector<8x16x1xf32>
    %85 = arith.addf %78, %84 : vector<8x16x1xf32>
    %86 = math.absf %82 : vector<8x16x1xf32>
    %cst_36 = arith.constant 0.000000e+00 : f32
    %87 = vector.broadcast %cst_36 : f32 to vector<8x16x1xf32>
    %88 = arith.subf %87, %86 : vector<8x16x1xf32>
    %89 = math.exp %88 : vector<8x16x1xf32>
    %90 = math.log1p %89 : vector<8x16x1xf32>
    %91 = arith.addf %80, %90 : vector<8x16x1xf32>
    %92 = arith.select %83, %85, %91 : vector<8x16x1xi1>, vector<8x16x1xf32>
    %93 = vector.extract_strided_slice %52 {offsets = [0, 0, 5], sizes = [8, 16, 1], strides = [1, 1, 1]} : vector<8x16x8xf32> to vector<8x16x1xf32>
    %94 = vector.extract_strided_slice %52 {offsets = [0, 0, 6], sizes = [8, 16, 1], strides = [1, 1, 1]} : vector<8x16x8xf32> to vector<8x16x1xf32>
    %cst_37 = arith.constant 0.000000e+00 : f32
    %95 = vector.broadcast %cst_37 : f32 to vector<8x16x1xf32>
    %96 = arith.maximumf %94, %95 : vector<8x16x1xf32>
    %97 = vector.broadcast %cst_37 : f32 to vector<8x16x1xf32>
    %98 = arith.subf %94, %97 : vector<8x16x1xf32>
    %99 = arith.cmpf one, %98, %98 : vector<8x16x1xf32>
    %100 = vector.broadcast %cst_37 : f32 to vector<8x16x1xf32>
    %101 = arith.addf %94, %100 : vector<8x16x1xf32>
    %102 = math.absf %98 : vector<8x16x1xf32>
    %cst_38 = arith.constant 0.000000e+00 : f32
    %103 = vector.broadcast %cst_38 : f32 to vector<8x16x1xf32>
    %104 = arith.subf %103, %102 : vector<8x16x1xf32>
    %105 = math.exp %104 : vector<8x16x1xf32>
    %106 = math.log1p %105 : vector<8x16x1xf32>
    %107 = arith.addf %96, %106 : vector<8x16x1xf32>
    %108 = arith.select %99, %101, %107 : vector<8x16x1xi1>, vector<8x16x1xf32>
    %cst_39 = arith.constant 0.000000e+00 : f32
    %109 = vector.broadcast %cst_39 : f32 to vector<8x16x1xf32>
    %110 = arith.maximumf %93, %109 : vector<8x16x1xf32>
    %111 = vector.broadcast %cst_39 : f32 to vector<8x16x1xf32>
    %112 = arith.subf %93, %111 : vector<8x16x1xf32>
    %113 = arith.cmpf one, %112, %112 : vector<8x16x1xf32>
    %114 = vector.broadcast %cst_39 : f32 to vector<8x16x1xf32>
    %115 = arith.addf %93, %114 : vector<8x16x1xf32>
    %116 = math.absf %112 : vector<8x16x1xf32>
    %cst_40 = arith.constant 0.000000e+00 : f32
    %117 = vector.broadcast %cst_40 : f32 to vector<8x16x1xf32>
    %118 = arith.subf %117, %116 : vector<8x16x1xf32>
    %119 = math.exp %118 : vector<8x16x1xf32>
    %120 = math.log1p %119 : vector<8x16x1xf32>
    %121 = arith.addf %110, %120 : vector<8x16x1xf32>
    %122 = arith.select %113, %115, %121 : vector<8x16x1xi1>, vector<8x16x1xf32>
    %cst_41 = arith.constant 0.00999999977 : f32
    %123 = vector.broadcast %cst_41 : f32 to vector<8x16x1xf32>
    %124 = arith.addf %122, %123 : vector<8x16x1xf32>
    %cst_42 = arith.constant 2.000000e+00 : f32
    %125 = vector.broadcast %cst_42 : f32 to vector<8x16x1xf32>
    %126 = arith.mulf %125, %124 : vector<8x16x1xf32>
    %127 = arith.mulf %108, %108 : vector<8x16x1xf32>
    %128 = arith.mulf %126, %127 : vector<8x16x1xf32>
    %cst_43 = arith.constant 1.000000e+00 : f32
    %129 = vector.broadcast %cst_43 : f32 to vector<8x16x1xf32>
    %130 = arith.addf %129, %128 : vector<8x16x1xf32>
    %131 = arith.mulf %128, %128 : vector<8x16x1xf32>
    %cst_44 = arith.constant 1.000000e+00 : f32
    %132 = vector.broadcast %cst_44 : f32 to vector<8x16x1xf32>
    %133 = arith.addf %131, %132 : vector<8x16x1xf32>
    %134 = math.sqrt %133 : vector<8x16x1xf32>
    %135 = arith.subf %130, %134 : vector<8x16x1xf32>
    %cst_45 = arith.constant 5.000000e-01 : f32
    %136 = vector.broadcast %cst_45 : f32 to vector<8x16x1xf32>
    %137 = arith.mulf %136, %135 : vector<8x16x1xf32>
    %138 = vector.extract_strided_slice %3 {offsets = [0, 0, 0], sizes = [8, 16, 1], strides = [1, 1, 1]} : vector<8x16x2xf32> to vector<8x16x1xf32>
    %139 = vector.extract_strided_slice %3 {offsets = [0, 0, 1], sizes = [8, 16, 1], strides = [1, 1, 1]} : vector<8x16x2xf32> to vector<8x16x1xf32>
    %cst_46 = arith.constant 1.000000e+00 : f32
    %140 = vector.broadcast %cst_46 : f32 to vector<8x16x1xf32>
    %141 = arith.subf %140, %137 : vector<8x16x1xf32>
    %142 = arith.mulf %137, %141 : vector<8x16x1xf32>
    %143 = math.sqrt %142 : vector<8x16x1xf32>
    %144 = arith.mulf %138, %143 : vector<8x16x1xf32>
    %145 = arith.addf %144, %137 : vector<8x16x1xf32>
    %cst_47 = arith.constant 0.000000e+00 : f32
    %146 = vector.broadcast %cst_47 : f32 to vector<8x16x1xf32>
    %147 = arith.maximumf %145, %146 : vector<8x16x1xf32>
    %148 = vector.broadcast %cst_47 : f32 to vector<8x16x1xf32>
    %149 = arith.subf %145, %148 : vector<8x16x1xf32>
    %150 = arith.cmpf one, %149, %149 : vector<8x16x1xf32>
    %151 = vector.broadcast %cst_47 : f32 to vector<8x16x1xf32>
    %152 = arith.addf %145, %151 : vector<8x16x1xf32>
    %153 = math.absf %149 : vector<8x16x1xf32>
    %cst_48 = arith.constant 0.000000e+00 : f32
    %154 = vector.broadcast %cst_48 : f32 to vector<8x16x1xf32>
    %155 = arith.subf %154, %153 : vector<8x16x1xf32>
    %156 = math.exp %155 : vector<8x16x1xf32>
    %157 = math.log1p %156 : vector<8x16x1xf32>
    %158 = arith.addf %147, %157 : vector<8x16x1xf32>
    %159 = arith.select %150, %152, %158 : vector<8x16x1xi1>, vector<8x16x1xf32>
    %160 = arith.mulf %159, %77 : vector<8x16x1xf32>
    %161 = math.sqrt %159 : vector<8x16x1xf32>
    %162 = arith.mulf %161, %92 : vector<8x16x1xf32>
    %cst_49 = arith.constant 0.00999999977 : f32
    %163 = vector.broadcast %cst_49 : f32 to vector<8x16x1xf32>
    %164 = arith.mulf %163, %139 : vector<8x16x1xf32>
    %165 = arith.mulf %164, %162 : vector<8x16x1xf32>
    %166 = arith.addf %165, %160 : vector<8x16x1xf32>
    %167 = arith.mulf %166, %159 : vector<8x16x1xf32>
    %cst_50 = arith.constant dense<0x7F800000> : vector<8x1xf32>
    %168 = vector.multi_reduction <minimumf>, %167, %cst_50 [1] : vector<8x16x1xf32> to vector<8x1xf32>
    %169 = vector.shape_cast %168 : vector<8x1xf32> to vector<8x1x1xf32>
    %cst_51 = arith.constant dense<0xFF800000> : vector<8x1xf32>
    %170 = vector.multi_reduction <maximumf>, %167, %cst_51 [1] : vector<8x16x1xf32> to vector<8x1xf32>
    %171 = vector.shape_cast %170 : vector<8x1xf32> to vector<8x1x1xf32>
    %172 = vector.broadcast %169 : vector<8x1x1xf32> to vector<8x16x1xf32>
    %173 = arith.subf %167, %172 : vector<8x16x1xf32>
    %174 = arith.subf %171, %169 : vector<8x1x1xf32>
    %cst_52 = arith.constant 9.99999993E-9 : f32
    %175 = vector.broadcast %cst_52 : f32 to vector<8x1x1xf32>
    %176 = arith.addf %174, %175 : vector<8x1x1xf32>
    %177 = tpu.reciprocal %176 : vector<8x1x1xf32> -> vector<8x1x1xf32>
    %178 = vector.broadcast %177 : vector<8x1x1xf32> to vector<8x16x1xf32>
    %179 = arith.mulf %173, %178 : vector<8x16x1xf32>
    %180 = tpu.iota {dimensions = array<i32: 0>} : vector<16x16xi32>
    %181 = tpu.iota {dimensions = array<i32: 1>} : vector<16x16xi32>
    %182 = arith.cmpi eq, %180, %181 : vector<16x16xi32>
    %183 = arith.extui %182 : vector<16x16xi1> to vector<16x16xi32>
    %184 = arith.sitofp %183 : vector<16x16xi32> to vector<16x16xf32>
    %185 = vector.shape_cast %184 : vector<16x16xf32> to vector<1x16x16xf32>
    %186 = vector.broadcast %53 : vector<8x16x1xf32> to vector<8x16x16xf32>
    %187 = vector.broadcast %185 : vector<1x16x16xf32> to vector<8x16x16xf32>
    %188 = arith.mulf %186, %187 : vector<8x16x16xf32>
    %cst_53 = arith.constant dense<0.000000e+00> : vector<8x16xf32>
    %189 = vector.multi_reduction <add>, %188, %cst_53 [1] : vector<8x16x16xf32> to vector<8x16xf32>
    %190 = vector.shape_cast %189 : vector<8x16xf32> to vector<8x1x16xf32>
    %191 = vector.shape_cast %184 : vector<16x16xf32> to vector<1x16x16xf32>
    %192 = vector.broadcast %68 : vector<8x16x1xf32> to vector<8x16x16xf32>
    %193 = vector.broadcast %191 : vector<1x16x16xf32> to vector<8x16x16xf32>
    %194 = arith.mulf %192, %193 : vector<8x16x16xf32>
    %cst_54 = arith.constant dense<0.000000e+00> : vector<8x16xf32>
    %195 = vector.multi_reduction <add>, %194, %cst_54 [1] : vector<8x16x16xf32> to vector<8x16xf32>
    %196 = vector.shape_cast %195 : vector<8x16xf32> to vector<8x1x16xf32>
    %197 = vector.broadcast %159 : vector<8x16x1xf32> to vector<8x16x16xf32>
    %198 = vector.broadcast %190 : vector<8x1x16xf32> to vector<8x16x16xf32>
    %199 = arith.mulf %197, %198 : vector<8x16x16xf32>
    %200 = math.sqrt %159 : vector<8x16x1xf32>
    %201 = vector.broadcast %200 : vector<8x16x1xf32> to vector<8x16x16xf32>
    %202 = vector.broadcast %196 : vector<8x1x16xf32> to vector<8x16x16xf32>
    %203 = arith.mulf %201, %202 : vector<8x16x16xf32>
    %cst_55 = arith.constant 9.99999997E-7 : f32
    %204 = vector.broadcast %cst_55 : f32 to vector<8x16x16xf32>
    %205 = arith.addf %203, %204 : vector<8x16x16xf32>
    %206 = arith.mulf %205, %205 : vector<8x16x16xf32>
    %207 = tpu.reciprocal %206 : vector<8x16x16xf32> -> vector<8x16x16xf32>
    %cst_56 = arith.constant 9.99999997E-7 : f32
    %208 = vector.broadcast %cst_56 : f32 to vector<8x16x16xf32>
    %209 = arith.addf %203, %208 : vector<8x16x16xf32>
    %210 = math.log %209 : vector<8x16x16xf32>
    %cst_57 = arith.constant 2.000000e+00 : f32
    %211 = vector.broadcast %cst_57 : f32 to vector<8x16x16xf32>
    %212 = arith.mulf %211, %210 : vector<8x16x16xf32>
    %cst_58 = arith.constant 9.99999997E-7 : f32
    %213 = vector.broadcast %cst_58 : f32 to vector<8x16x1xf32>
    %214 = arith.addf %162, %213 : vector<8x16x1xf32>
    %215 = math.log %214 : vector<8x16x1xf32>
    %cst_59 = arith.constant 2.000000e+00 : f32
    %216 = vector.broadcast %cst_59 : f32 to vector<8x16x1xf32>
    %217 = arith.mulf %216, %215 : vector<8x16x1xf32>
    %218 = vector.broadcast %217 : vector<8x16x1xf32> to vector<8x16x16xf32>
    %219 = arith.subf %212, %218 : vector<8x16x16xf32>
    %220 = arith.mulf %162, %162 : vector<8x16x1xf32>
    %221 = vector.broadcast %160 : vector<8x16x1xf32> to vector<8x16x16xf32>
    %222 = arith.subf %221, %199 : vector<8x16x16xf32>
    %223 = arith.mulf %222, %222 : vector<8x16x16xf32>
    %224 = vector.broadcast %220 : vector<8x16x1xf32> to vector<8x16x16xf32>
    %225 = arith.addf %224, %223 : vector<8x16x16xf32>
    %226 = arith.mulf %225, %207 : vector<8x16x16xf32>
    %227 = arith.addf %219, %226 : vector<8x16x16xf32>
    %cst_60 = arith.constant 1.000000e+00 : f32
    %228 = vector.broadcast %cst_60 : f32 to vector<8x16x16xf32>
    %229 = arith.subf %227, %228 : vector<8x16x16xf32>
    %230 = math.absf %229 : vector<8x16x16xf32>
    %cst_61 = arith.constant dense<0.000000e+00> : vector<8x16xf32>
    %231 = vector.multi_reduction <add>, %230, %cst_61 [2] : vector<8x16x16xf32> to vector<8x16xf32>
    %cst_62 = arith.constant dense<0.000000e+00> : vector<8xf32>
    %232 = vector.multi_reduction <add>, %231, %cst_62 [1] : vector<8x16xf32> to vector<8xf32>
    %233 = vector.shape_cast %232 : vector<8xf32> to vector<8x1xf32>
    %cst_63 = arith.constant 5.000000e-01 : f32
    %234 = vector.broadcast %cst_63 : f32 to vector<8x1xf32>
    %235 = arith.mulf %234, %233 : vector<8x1xf32>
    %236 = arith.subf %76, %137 : vector<8x16x1xf32>
    %cst_64 = arith.constant 9.99999997E-7 : f32
    %237 = vector.broadcast %cst_64 : f32 to vector<8x16x1xf32>
    %238 = arith.addf %137, %237 : vector<8x16x1xf32>
    %239 = math.log %238 : vector<8x16x1xf32>
    %cst_65 = arith.constant 9.99999997E-7 : f32
    %240 = vector.broadcast %cst_65 : f32 to vector<8x16x1xf32>
    %241 = arith.addf %76, %240 : vector<8x16x1xf32>
    %242 = math.log %241 : vector<8x16x1xf32>
    %243 = arith.subf %239, %242 : vector<8x16x1xf32>
    %244 = arith.mulf %137, %243 : vector<8x16x1xf32>
    %245 = arith.addf %236, %244 : vector<8x16x1xf32>
    %246 = math.absf %245 : vector<8x16x1xf32>
    %cst_66 = arith.constant dense<0.000000e+00> : vector<8x1xf32>
    %247 = vector.multi_reduction <add>, %246, %cst_66 [1] : vector<8x16x1xf32> to vector<8x1xf32>
    %248 = vector.shape_cast %184 : vector<16x16xf32> to vector<1x16x16xf32>
    %249 = vector.broadcast %179 : vector<8x16x1xf32> to vector<8x16x16xf32>
    %250 = vector.broadcast %248 : vector<1x16x16xf32> to vector<8x16x16xf32>
    %251 = arith.mulf %249, %250 : vector<8x16x16xf32>
    %cst_67 = arith.constant dense<0.000000e+00> : vector<8x16xf32>
    %252 = vector.multi_reduction <add>, %251, %cst_67 [1] : vector<8x16x16xf32> to vector<8x16xf32>
    %253 = vector.shape_cast %1 : vector<16x128xf32> to vector<1x16x128xf32>
    %254 = vector.broadcast %179 : vector<8x16x1xf32> to vector<8x16x128xf32>
    %255 = vector.broadcast %253 : vector<1x16x128xf32> to vector<8x16x128xf32>
    %256 = arith.mulf %254, %255 : vector<8x16x128xf32>
    %cst_68 = arith.constant dense<0.000000e+00> : vector<8x128xf32>
    %257 = vector.multi_reduction <add>, %256, %cst_68 [1] : vector<8x16x128xf32> to vector<8x128xf32>
    %258 = math.absf %257 : vector<8x128xf32>
    %cst_69 = arith.constant dense<0.000000e+00> : vector<8xf32>
    %259 = vector.multi_reduction <add>, %258, %cst_69 [1] : vector<8x128xf32> to vector<8xf32>
    %260 = vector.shape_cast %259 : vector<8xf32> to vector<8x1xf32>
    %261 = tpu.reciprocal %260 : vector<8x1xf32> -> vector<8x1xf32>
    %262 = vector.broadcast %261 : vector<8x1xf32> to vector<8x128xf32>
    %263 = arith.mulf %257, %262 : vector<8x128xf32>
    %cst_70 = arith.constant 5.000000e-01 : f32
    %264 = vector.broadcast %cst_70 : f32 to vector<8x128xf32>
    %265 = arith.mulf %264, %263 : vector<8x128xf32>
    %cst_71 = arith.constant 5.000000e-01 : f32
    %266 = vector.broadcast %cst_71 : f32 to vector<8x128xf32>
    %267 = arith.mulf %266, %0 : vector<8x128xf32>
    %268 = arith.addf %265, %267 : vector<8x128xf32>
    %269 = arith.truncf %268 : vector<8x128xf32> to vector<8x128xbf16>
    %cst_72 = arith.constant dense<0.000000e+00> : vector<8x64xf32>
    %270 = tpu.matmul %269, %9, %cst_72 {dimension_numbers = #tpu.dot_dimension_numbers<[1], [0], [0], [1], [0, 0, 1, 1], [], []>} : vector<8x128xbf16>, vector<128x64xbf16>, vector<8x64xf32> -> vector<8x64xf32>
    %271 = vector.broadcast %17 : vector<1x64xf32> to vector<8x64xf32>
    %272 = arith.addf %270, %271 : vector<8x64xf32>
    %273 = arith.truncf %272 : vector<8x64xf32> to vector<8x64xbf16>
    %cst_73 = arith.constant dense<0.000000e+00> : vector<8x32xf32>
    %274 = tpu.matmul %273, %10, %cst_73 {dimension_numbers = #tpu.dot_dimension_numbers<[1], [0], [0], [1], [0, 0, 1, 1], [], []>} : vector<8x64xbf16>, vector<64x32xbf16>, vector<8x32xf32> -> vector<8x32xf32>
    %275 = vector.broadcast %18 : vector<1x32xf32> to vector<8x32xf32>
    %276 = arith.addf %274, %275 : vector<8x32xf32>
    %cst_74 = arith.constant 0.000000e+00 : f32
    %277 = vector.broadcast %cst_74 : f32 to vector<8x78xf32>
    %278 = tpu.concatenate %276, %235, %247, %252, %277, %268 in 1 : vector<8x32xf32>, vector<8x1xf32>, vector<8x1xf32>, vector<8x16xf32>, vector<8x78xf32>, vector<8x128xf32> -> vector<8x256xf32>
    %c0_75 = arith.constant 0 : index
    %c0_76 = arith.constant 0 : index
    %279 = vector.load %arg13[%c0_75, %c0_76] : memref<8x256xf32, #tpu.memory_space<vmem>>, vector<8x256xf32>
    tpu.vector_store %arg13[%c0_75, %c0_76], %278 {strides = array<i32>} : memref<8x256xf32, #tpu.memory_space<vmem>>, vector<8x256xf32>,
    return
  }
  func.func @transform_0(%arg0: i32) -> (i32, i32) {
    %c0_i32 = arith.constant 0 : i32
    %c0_i32_0 = arith.constant 0 : i32
    return %arg0, %c0_i32 : i32, i32
  }
  func.func @transform_1(%arg0: i32) -> (i32, i32, i32) {
    %c0_i32 = arith.constant 0 : i32
    %c0_i32_0 = arith.constant 0 : i32
    %c0_i32_1 = arith.constant 0 : i32
    return %arg0, %c0_i32, %c0_i32_0 : i32, i32, i32
  }
  func.func @transform_2(%arg0: i32) -> (i32, i32) {
    %c0_i32 = arith.constant 0 : i32
    %c0_i32_0 = arith.constant 0 : i32
    %c0_i32_1 = arith.constant 0 : i32
    return %c0_i32, %c0_i32_0 : i32, i32
  }
  func.func @transform_3(%arg0: i32) -> (i32, i32) {
    %c0_i32 = arith.constant 0 : i32
    %c0_i32_0 = arith.constant 0 : i32
    %c0_i32_1 = arith.constant 0 : i32
    return %c0_i32, %c0_i32_0 : i32, i32
  }
  func.func @transform_4(%arg0: i32) -> (i32, i32) {
    %c0_i32 = arith.constant 0 : i32
    %c0_i32_0 = arith.constant 0 : i32
    %c0_i32_1 = arith.constant 0 : i32
    return %c0_i32, %c0_i32_0 : i32, i32
  }
  func.func @transform_5(%arg0: i32) -> (i32, i32) {
    %c0_i32 = arith.constant 0 : i32
    %c0_i32_0 = arith.constant 0 : i32
    %c0_i32_1 = arith.constant 0 : i32
    return %c0_i32, %c0_i32_0 : i32, i32
  }
  func.func @transform_6(%arg0: i32) -> (i32, i32) {
    %c0_i32 = arith.constant 0 : i32
    %c0_i32_0 = arith.constant 0 : i32
    %c0_i32_1 = arith.constant 0 : i32
    return %c0_i32, %c0_i32_0 : i32, i32
  }
  func.func @transform_7(%arg0: i32) -> (i32, i32) {
    %c0_i32 = arith.constant 0 : i32
    %c0_i32_0 = arith.constant 0 : i32
    %c0_i32_1 = arith.constant 0 : i32
    return %c0_i32, %c0_i32_0 : i32, i32
  }
  func.func @transform_8(%arg0: i32) -> (i32, i32) {
    %c0_i32 = arith.constant 0 : i32
    %c0_i32_0 = arith.constant 0 : i32
    %c0_i32_1 = arith.constant 0 : i32
    return %c0_i32, %c0_i32_0 : i32, i32
  }
  func.func @transform_9(%arg0: i32) -> (i32, i32) {
    %c0_i32 = arith.constant 0 : i32
    %c0_i32_0 = arith.constant 0 : i32
    %c0_i32_1 = arith.constant 0 : i32
    return %c0_i32, %c0_i32_0 : i32, i32
  }
  func.func @transform_10(%arg0: i32) -> (i32, i32) {
    %c0_i32 = arith.constant 0 : i32
    %c0_i32_0 = arith.constant 0 : i32
    %c0_i32_1 = arith.constant 0 : i32
    return %c0_i32, %c0_i32_0 : i32, i32
  }
  func.func @transform_11(%arg0: i32) -> (i32, i32) {
    %c0_i32 = arith.constant 0 : i32
    %c0_i32_0 = arith.constant 0 : i32
    %c0_i32_1 = arith.constant 0 : i32
    return %c0_i32, %c0_i32_0 : i32, i32
  }
  func.func @transform_12(%arg0: i32) -> (i32, i32) {
    %c0_i32 = arith.constant 0 : i32
    %c0_i32_0 = arith.constant 0 : i32
    return %arg0, %c0_i32 : i32, i32
  }
}

</mosaic_0001>

<bundles_post_ra>
// kernel: tpu_custom_call.1
= control target key start
LH: loop header
LB: loop body
LE: loop exit
PB: predicated region body
PF: predicated region fallthrough
CT: control target
= control target key end

     0   :  { %s12268_s0 = inlined_call_operand.hbm [shape: f32[16,128], index: 0, kind: input, shape index: {}]   ;;  %s12269_s1 = inlined_call_operand.vmem [shape: f32[16,16,2], index: 1, kind: input, shape index: {}]   ;;  %s12270_s2 = inlined_call_operand.hbm [shape: f32[16,128], index: 2, kind: input, shape index: {}]   ;;  %s12271_s3 = inlined_call_operand.hbm [shape: f32[16,128], index: 3, kind: input, shape index: {}]   ;;  %s12272_s4 = inlined_call_operand.vmem [shape: bf16[128,128], index: 4, kind: input, shape index: {}]   ;;  %s12273_s5 = inlined_call_operand.hbm [shape: bf16[128,128], index: 5, kind: input, shape index: {}]   ;;  %s12274_s6 = inlined_call_operand.vmem [shape: bf16[128,256], index: 6, kind: input, shape index: {}]   ;;  %s12275_s7 = inlined_call_operand.vmem [shape: bf16[256,512], index: 7, kind: input, shape index: {}]   ;;  %s12276_s8 = inlined_call_operand.vmem [shape: bf16[512,8], index: 8, kind: input, shape index: {}]   ;;  %s12277_s9 = inlined_call_operand.vmem [shape: bf16[128,64], index: 9, kind: input, shape index: {}]   ;;  %s12278_s10 = inlined_call_operand.vmem [shape: bf16[64,32], index: 10, kind: input, shape index: {}]   ;;  %s12279_s11 = inlined_call_operand.hbm [shape: f32[8,512], index: 11, kind: input, shape index: {}]   ;;  %s12280_s12 = inlined_call_operand.hbm [shape: f32[16,256], index: 12, kind: output, shape index: {}]  }
   0x1   :  { %12467 = sst [smem:[#allocation113_spill]] %s12270_s2 }
   0x2   :  { %12468 = sst [smem:[#allocation114_spill]] %s12271_s3 }
   0x3   :  { %12469 = sst [smem:[#allocation115_spill]] %s12273_s5 }
   0x4   :  { %12470 = sst [smem:[#allocation116_spill]] %s12279_s11 }
   0x5   :  { %17 = vsyncpa [#allocation3], 0 }
   0x6   :  { %19 = vsyncpa [#allocation3 + $0x1], 0 }
   0x7   :  { %20 = vsyncpa [#allocation6], 0 }
   0x8   :  { %21 = vsyncpa [#allocation9], 0 }
   0x9   :  { %22 = vsyncpa [#allocation4], 0 }
   0xa   :  { %24 = vsyncpa [#allocation4 + $0x1], 0  ;;  %s8326_s21 = smov 0   ;;  %s8328_s22 = smov 0  }
   0xb   :  { %s8330_s23 = smov 0   ;;  %s8332_s24 = smov 0  }
   0xc LB: > { %12471 = sst [smem:[#allocation16_spill]] %s8232_s23  ;;  %s8238_s25 = smov [#allocation5]   ;;  %s8236_s24 = sphi %s8332_s24, %s12876_s24   ;;  %s8232_s23 = sphi %s8330_s23, %s12878_s23   ;;  %s8228_s22 = sphi %s8328_s22, %s12880_s22   ;;  %s8224_s21 = sphi %s8326_s21, %s12879_s21  }
   0xd   : > { %s335_s26 = sshll.u32 %s8238_s25, 4  ;;  %s8347_s27 = sadd.s32 4294967295, %s8236_s24   ;;  %s336_s26 = int_to_ptr.vmem [resolvable:$true] %s335_s26 }
   0xe   : > { %p6806_p0 = scmp.ge.s32.totalorder %s8236_s24, 1  ;;  %p12281_p1 = scmp.eq.s32.totalorder %s8347_s27, 0 }
   0xf   : > { %p323_p2 = scmp.lt.s32.totalorder %s8236_s24, 3  ;;  %s8239_s29 = smov [#allocation8]  }
  0x10   : > { %s364_s30 = sshll.u32 %s8239_s29, 4  ;;  %s8240_s14 = smov [#allocation7]   ;;  %s8365_s30 = int_to_ptr.vmem [resolvable:$true] %s364_s30 }
  0x11   : > { %p8352_p3 = pnand %p6806_p0, %p323_p2  ;;  %s8367_s15 = sshll.u32 %s8240_s14, 4  ;;  %s349_s15 = int_to_ptr.vmem [resolvable:$true] %s8367_s15 }
  0x12   : > { %s8043_s16 = scalar_lea.vmem %s336_s26, 256  ;;  %p8051_p11 = scmp.lt.s32.totalorder %s336_s26, %s336_s26 }
  0x13   : > { %s12472_s28 = scalar_select %p8352_p3, 1, 0 }
  0x14   : > { %p7277_p5 = pneg %p8352_p3  ;;  %p8044_p8 = scmp.ne.s32.totalorder %s336_s26, %s8043_s16 }
  0x15   : > { %p8052_p12 = scmp.lt.s32.totalorder %s8043_s16, %s8043_s16 }
  0x16   : > { %p8361_p6 = pnand %p7277_p5, %p12281_p1 }
  0x17   : > { %p8053_p13 = por %p8052_p12, %p8051_p11 }
  0x18   : > { %p8034_p7 = pneg %p8361_p6 }
  0x1a   : > { %p8046_p9 = pnand %p8044_p8, %p8034_p7 }
  0x1c   : > { %p8047_p10 = pneg %p8046_p9 }
  0x1e   : > { %p8054_p0 = pnand %p8053_p13, %p8047_p10 }
  0x20   : > { %8057 = shalt.err (!%p8054_p0)
}
  0x21   : > { %s8241_s17 = smov 128   ;;  %s8242_s18 = smov 8  }
  0x22   : > { %s12474_s2 = sld [smem:[#allocation113_spill]]  ;;  %s8069_s25 = scalar_lea.vmem %s8365_s30, 1024 }
  0x23   : > { %p8070_p2 = scmp.ne.s32.totalorder %s8365_s30, %s8069_s25  ;;  %p8077_p9 = scmp.lt.s32.totalorder %s8365_s30, %s8365_s30 }
  0x24   : > { %p8078_p10 = scmp.lt.s32.totalorder %s8069_s25, %s8069_s25 }
  0x25   : > { %p8072_p5 = pnand %p8070_p2, %p8034_p7 }
  0x26   : > { %p8079_p11 = por %p8078_p10, %p8077_p9 }
  0x27   : > { %p8073_p8 = pneg %p8072_p5 }
  0x28   : > { %7280 = dma.hbm_to_vmem [thread:$0]  (!%p8361_p6), %s12474_s2, 256, %s336_s26, [#allocation6], %s8241_s17, %s8241_s17, %s8242_s18  }
  0x29   : > { %p8080_p12 = pnand %p8079_p11, %p8073_p8 }
  0x2b   : > { %8083 = shalt.err (!%p8080_p12)
}
  0x2c   : > { %s8243_s29 = smov 64   ;;  %s8244_s14 = smov 4  }
  0x2d   : > { %s12475_s5 = sld [smem:[#allocation115_spill]]  ;;  %s8095_s19 = scalar_lea.vmem %s349_s15, 256 }
  0x2e   : > { %p8096_p13 = scmp.ne.s32.totalorder %s349_s15, %s8095_s19  ;;  %p8103_p5 = scmp.lt.s32.totalorder %s349_s15, %s349_s15 }
  0x2f   : > { %p8104_p8 = scmp.lt.s32.totalorder %s8095_s19, %s8095_s19 }
  0x30   : > { %p8098_p0 = pnand %p8096_p13, %p8034_p7 }
  0x31   : > { %p8105_p9 = por %p8104_p8, %p8103_p5 }
  0x32   : > { %p8099_p2 = pneg %p8098_p0 }
  0x33   : > { %7286 = dma.hbm_to_vmem [thread:$0]  (!%p8361_p6), %s12475_s5, 1024, %s8365_s30, [#allocation9], %s8243_s29, %s8243_s29, %s8244_s14  }
  0x34   : > { %p8106_p10 = pnand %p8105_p9, %p8099_p2 }
  0x36   : > { %8109 = shalt.err (!%p8106_p10)
}
  0x37   : > { %s12476_s3 = sld [smem:[#allocation114_spill]]  ;;  %s8245_s30 = smov [#allocation10]  }
  0x38   : > { %s393_s29 = sshll.u32 %s8245_s30, 4  ;;  %s394_s29 = int_to_ptr.vmem [resolvable:$true] %s393_s29 }
  0x39   : > { %s8121_s14 = scalar_lea.vmem %s394_s29, 512  ;;  %p8129_p0 = scmp.lt.s32.totalorder %s394_s29, %s394_s29 }
  0x3a   : > { %p8122_p11 = scmp.ne.s32.totalorder %s394_s29, %s8121_s14  ;;  %p8130_p5 = scmp.lt.s32.totalorder %s8121_s14, %s8121_s14 }
  0x3c   : > { %p8124_p12 = pnand %p8122_p11, %p8034_p7  ;;  %p8131_p2 = por %p8130_p5, %p8129_p0 }
  0x3d   : > { %7283 = dma.hbm_to_vmem [thread:$0]  (!%p8361_p6), %s12476_s3, 256, %s349_s15, [#allocation6], %s8241_s17, %s8241_s17, %s8242_s18  }
  0x3e   : > { %p8125_p13 = pneg %p8124_p12 }
  0x40   : > { %p8132_p8 = pnand %p8131_p2, %p8125_p13 }
  0x42   : > { %8135 = shalt.err (!%p8132_p8)
}
  0x43   : > { %s12477_s11 = sld [smem:[#allocation116_spill]]  ;;  %s6805_s15 = sadd.s32 4294967294, %s8236_s24  }
  0x44   : > { %s8411_s13 = sadd.s32 1, %s8236_s24   ;;  %s37_s18 = sadd.s32 1, %s8232_s23 }
  0x45   : > { %12478 = sst [smem:[#allocation17_spill]] %s8411_s13  ;;  %s34_s17 = ssub.s32 %s8236_s24, %s8411_s13 }
  0x46   : > { %p35_p7 = scmp.eq.s32.totalorder %s34_s17, 0  ;;  %p44_p9 = scmp.ne.s32.totalorder %s8232_s23, %s8228_s22 }
  0x47   : > { %p45_p10 = scmp.eq.s32.totalorder %s8236_s24, 0  ;;  %p50_p11 = scmp.ne.s32.totalorder %s8228_s22, %s8224_s21 }
  0x48   : > { %s8422_s19 = scalar_select %p35_p7, %s8232_s23, %s37_s18  }
  0x49   : > { %7289 = dma.hbm_to_vmem [thread:$0]  (!%p8361_p6), %s12477_s11, 512, %s394_s29, [#allocation9]  }
  0x4a   : > { %12479 = sst [smem:[#allocation18_spill]] %s8422_s19  ;;  %p8424_p12 = por %p45_p10, %p44_p9 }
  0x4b   : > { %p8430_p6 = por %p12281_p1, %p50_p11  ;;  %p310_p13 = scmp.eq.s32.totalorder %s8347_s27, 1 }
  0x4c   : > { %p316_p0 = scmp.eq.s32.totalorder %s6805_s15, 1  ;;  %p7302_p5 = scmp.lt.s32.totalorder %s8236_s24, 2 }
  0x4d   : > { %s12481_s25 = scalar_select %p8430_p6, 1, 0 }
  0x4e   : > { %s404_s30 = sand.u32 1, %s8232_s23   ;;  %p8437_p2 = por %p310_p13, %p44_p9 }
  0x4f   : > { %p8441_p8 = por %p316_p0, %p50_p11  ;;  %s6812_s26 = sshll.u32 %s404_s30, 3 }
  0x50   : > { %s12482_s29 = scalar_select %p8437_p2, 1, 0 }
  0x51   : > { %s12483_s14 = scalar_select %p8441_p8, 1, 0 }
  0x52   : > { %s6813_s16 = sshll.u32 %s8236_s24, 7  ;;  %s408_s15 = scalar_lea.vmem [#allocation2], %s6812_s26 }
  0x53   : > { %s8449_s2 = scalar_lea.hbm %s12268_s0, %s6813_s16  ;;  %s415_s3 = sshll.u32 %s408_s15, 4  ;;  %s416_s3 = int_to_ptr.vmem [resolvable:$true] %s415_s3 }
  0x54   : > { %p8453_p7 = pnand %p7302_p5, %p8424_p12  ;;  %s405_s11 = scalar_lea.sflag [#allocation3], %s404_s30 }
  0x55   : > { %s8136_s19 = scalar_lea.hbm %s8449_s2, 128  ;;  %s8141_s18 = scalar_lea.hbm %s12268_s0, 256 }
  0x56   : > { %p8137_p9 = scmp.ne.s32.totalorder %s8449_s2, %s8136_s19  ;;  %p8138_p10 = pneg %p8453_p7 }
  0x57   : > { %p8142_p0 = scmp.lt.s32.totalorder %s8449_s2, %s12268_s0  ;;  %p8143_p12 = scmp.lt.s32.totalorder %s8141_s18, %s8136_s19 }
  0x58   : > { %p8139_p11 = pnand %p8138_p10, %p8137_p9 }
  0x59   : > { %p8144_p5 = por %p8143_p12, %p8142_p0 }
  0x5a   : > { %p8140_p13 = pneg %p8139_p11 }
  0x5c   : > { %p8145_p4 = pnand %p8144_p5, %p8140_p13 }
  0x5e   : > { %8148 = shalt.err (!%p8145_p4)
}
  0x5f   : > { %s8149_s20 = scalar_lea.vmem %s416_s3, 128  ;;  %s8246_s30 = smov [#allocation2]  }
  0x60   : > { %p8150_p1 = scmp.ne.s32.totalorder %s416_s3, %s8149_s20  ;;  %s8154_s23 = sshll.u32 %s8246_s30, 4  ;;  %s8155_s23 = int_to_ptr.vmem [resolvable:$false] %s8154_s23 }
  0x61   : > { %s8156_s13 = scalar_lea.vmem %s8155_s23, 256  ;;  %p8157_p9 = scmp.lt.s32.totalorder %s416_s3, %s8155_s23 }
  0x62   : > { %p8152_p8 = pnand %p8150_p1, %p8138_p10  ;;  %p8158_p11 = scmp.lt.s32.totalorder %s8156_s13, %s8149_s20 }
  0x64   : > { %p8153_p2 = pneg %p8152_p8  ;;  %p8159_p6 = por %p8158_p11, %p8157_p9 }
  0x66   : > { %p8160_p3 = pnand %p8159_p6, %p8153_p2 }
  0x68   : > { %8163 = shalt.err (!%p8160_p3)
}
  0x69   : > { %7293 = dma.hbm_to_vmem [thread:$0]  (!%p8453_p7), %s8449_s2, 128, %s416_s3, %s405_s11  }
  0x6a   : > { %p12485_p13 = scmp.ne.s32.totalorder %s12472_s28, 0 }
  0x6c   : > { %434 = sbr.rel (%p12485_p13) target bundleno = 2653 (0xa5d), region = 68 }
  0x71   : > { %s8474_s19 = sand.u32 1, %s8228_s22   ;;  %p12486_p1 = scmp.ne.s32.totalorder %s12481_s25, 0 }
  0x72   : > { %s6815_s16 = sshll.u32 %s8474_s19, 3  ;;  %s437_s17 = scalar_lea.sflag [#allocation3], %s8474_s19 }
  0x73   : > { %s8478_s23 = scalar_lea.vmem [#allocation2], %s6815_s16 }
  0x74   : > { %8207 = dma.done.wait (%p12486_p1), %s437_s17, 128  }
  0x75   : > { %8209 = vsyncadd (%p12486_p1), %s437_s17, 4294967168  ;;  %p12487_p3 = scmp.eq.s32.totalorder %s8347_s27, 0 }
  0x77   : > { %8211 = dma.done.wait (%p12487_p3), [#allocation6], 512   ;;  %p12488_p4 = pmov %p12487_p3 }
  0x78   : > { %p12489_p6 = pmov %p12487_p3 }
  0x79   : > { %8213 = vsyncadd (%p12488_p4), [#allocation6], 4294966784 }
  0x7a   : > { %8215 = dma.done.wait (%p12489_p6), [#allocation9], 1536   ;;  %p12490_p2 = pmov %p12487_p3 }
  0x7b   : > { %v12289_v0 = vmov 0.0   ;;  %vm8248_vm0 = vmmov 0   ;;  %v7367_v1 = vld [vmem:[%s12272_s4 + $0x38] sm:$0xff]   ;;  %v7368_v2 = vld [vmem:[%s12272_s4 + $0x30] sm:$0xff]   ;;  %v7369_v3 = vld [vmem:[%s12272_s4 + $0x28] sm:$0xff]   ;;  %v12288_v33 = vlaneseq  ;;  %s8251_s5 = smov 127  }
  0x7c   : > { %8217 = vsyncadd (%p12490_p2), [#allocation9], 4294965760  ;;  %7173 = vmatprep.subr.bf16.mxu0 %v12289_v0  ;;  %7189 = vmatprep.mubr.msk.bf16.mxu0 %vm8248_vm0, %v12289_v0  ;;  %v7370_v4 = vld [vmem:[%s12272_s4 + $0x20] sm:$0xff]   ;;  %v7375_v5 = vld [vmem:[#allocation8 + $0x38] sm:$0xff]   ;;  %v8249_v31 = vmov 1966171168  }
  0x7d   : > { %7174 = vmatpush3.bf16.msra.mxu0 %v7367_v1  ;;  %v7376_v6 = vld [vmem:[#allocation8 + $0x30] sm:$0xff]   ;;  %7193 = vmatprep.subr.bf16.mxu1 %v7375_v5  ;;  %v7371_v7 = vld [vmem:[%s12272_s4 + $0x18] sm:$0xff]   ;;  %v7378_v9 = vld [vmem:[#allocation8 + $0x20] sm:$0xff]   ;;  %v828_v32 = vunpack.c.l.s4 %v8249_v31  ;;  %v8564_v35 = vshrl.u32 %v12288_v33, 7  ;;  %s8252_s11 = smov 125   ;;  %s8253_s28 = smov 123  }
  0x7e   : > { %7175 = vmatprep.subr.bf16.mxu0 %v12289_v0  ;;  %7194 = vmatpush3.bf16.msra.mxu1 %v7375_v5  ;;  %v7377_v8 = vld [vmem:[#allocation8 + $0x28] sm:$0xff]   ;;  %v7372_v10 = vld [vmem:[%s12272_s4 + $0x10] sm:$0xff]   ;;  %v7373_v11 = vld [vmem:[%s12272_s4 + $0x8] sm:$0xff]   ;;  %s8254_s13 = smov 124   ;;  %s6821_s25 = sshll.u32 %s8347_s27, 3 }
  0x7f   : > { %7195 = vmatprep.subr.bf16.mxu1 %v7376_v6  ;;  %v7374_v12 = vld [vmem:[%s12272_s4] sm:$0xff]   ;;  %v7379_v15 = vld [vmem:[#allocation8 + $0x18] sm:$0xff]   ;;  %v7381_v17 = vld [vmem:[#allocation8 + $0x8] sm:$0xff]   ;;  %v829_v34 = vunpack.c.0.s8 %v828_v32  ;;  %12491 = vst [vmem:[#allocation19_spill] sm:$0xff] %v8564_v35  ;;  %v8568_v40 = vsub.s32 0, %v8564_v35  ;;  %p504_p8 = scmp.lt.s32.totalorder %s6821_s25, 15 }
  0x80   : > { %v511_v13 = vld [vmem:[%s8478_s23] sm:$0xff]  ;;  %v7382_v18 = vld [vmem:[#allocation8] sm:$0xff]   ;;  %s8255_s30 = smov 1   ;;  %s8257_s3 = smov 3  }
  0x81   : > { %7176 = vmatpush3.bf16.msra.mxu0 %v7368_v2  ;;  %v736_v14 = vpack.c.bf16 %v511_v13, %v511_v13  ;;  %v7380_v16 = vld [vmem:[#allocation8 + $0x10] sm:$0xff]   ;;  %v7383_v19 = vld [vmem:[%s12274_s6 + $0x70] ss:$8 sps:$4 sm:$0xff]   ;;  %v7385_v20 = vld [vmem:[%s12274_s6 + $0x74] ss:$8 sps:$4 sm:$0xff]   ;;  %v832_v36 = vsub.s32 %v829_v34, %v8564_v35  ;;  %s12882_s25 = smov (!%p504_p8, %s6821_s25), 15 }
  0x82   : > { %7177 = vmatprep.subr.bf16.mxu0 %v12289_v0  ;;  %7196 = vmatpush3.bf16.msra.mxu1 %v7376_v6  ;;  %v7388_v21 = vld [vmem:[%s12274_s6 + $0x64] ss:$8 sps:$4 sm:$0xff]   ;;  %v7386_v22 = vld [vmem:[%s12274_s6 + $0x60] ss:$8 sps:$4 sm:$0xff]   ;;  %v7391_v23 = vld [vmem:[%s12274_s6 + $0x54] ss:$8 sps:$4 sm:$0xff]  }
  0x83   : > { %7197 = vmatprep.subr.bf16.mxu1 %v7377_v8  ;;  %v7389_v24 = vld [vmem:[%s12274_s6 + $0x50] ss:$8 sps:$4 sm:$0xff]   ;;  %v7394_v25 = vld [vmem:[%s12274_s6 + $0x44] ss:$8 sps:$4 sm:$0xff]   ;;  %v7392_v26 = vld [vmem:[%s12274_s6 + $0x40] ss:$8 sps:$4 sm:$0xff]  }
  0x84   : > { %v7397_v27 = vld [vmem:[%s12274_s6 + $0x34] ss:$8 sps:$4 sm:$0xff]   ;;  %v7395_v28 = vld [vmem:[%s12274_s6 + $0x30] ss:$8 sps:$4 sm:$0xff]   ;;  %v7400_v29 = vld [vmem:[%s12274_s6 + $0x24] ss:$8 sps:$4 sm:$0xff]  }
  0x85   : > { %7178 = vmatpush3.bf16.msra.mxu0 %v7369_v3  ;;  %v7398_v30 = vld [vmem:[%s12274_s6 + $0x20] ss:$8 sps:$4 sm:$0xff]   ;;  %v8570_v42 = vld [vmem:[#allocation10] sm:$0xff]  ;;  %s7004_s18 = sshll.u32 %s12882_s25, 4  ;;  %s8259_s16 = smov 34  }
  0x86   : > { %7179 = vmatprep.subr.bf16.mxu0 %v12289_v0  ;;  %7198 = vmatpush3.bf16.msra.mxu1 %v7377_v8  ;;  %v8572_v51 = vld [vmem:[#allocation7] sm:$0xff]  ;;  %v8574_v52 = vld [vmem:[#allocation7 + $0x8] sm:$0xff]  ;;  %v8579_v54 = vrot.slane %v8570_v42, %v8568_v40  ;;  %s10088_s20 = scalar_lea.vmem %s12269_s1, %s7004_s18  ;;  %s7005_s17 = sshll.u32 %s8347_s27, 8 }
  0x87   : > { %7199 = vmatprep.subr.bf16.mxu1 %v7378_v9  ;;  %p12873_p10 = scmp.ne.s32.totalorder %s12482_s29, 0  ;;  %s8260_s27 = smov [#allocation11]  }
  0x88   : > { %s8168_s18 = sshll.u32 %s8260_s27, 4  ;;  %s8169_s18 = int_to_ptr.vmem [resolvable:$false] %s8168_s18 }
  0x89   : > { %7180 = vmatpush3.bf16.msra.mxu0 %v7370_v4  ;;  %s8170_s26 = scalar_lea.vmem %s8169_s18, 512 }
  0x8a   : > { %7181 = vmatprep.subr.bf16.mxu0 %v12289_v0  ;;  %7200 = vmatpush3.bf16.msra.mxu1 %v7378_v9 }
  0x8b   : > { %7201 = vmatprep.subr.bf16.mxu1 %v7379_v15 }
  0x8d   : > { %7182 = vmatpush3.bf16.msra.mxu0 %v7371_v7 }
  0x8e   : > { %7183 = vmatprep.subr.bf16.mxu0 %v12289_v0  ;;  %7202 = vmatpush3.bf16.msra.mxu1 %v7379_v15 }
  0x8f   : > { %7203 = vmatprep.subr.bf16.mxu1 %v7380_v16 }
  0x91   : > { %7184 = vmatpush3.bf16.msra.mxu0 %v7372_v10 }
  0x92   : > { %7185 = vmatprep.subr.bf16.mxu0 %v12289_v0  ;;  %7204 = vmatpush3.bf16.msra.mxu1 %v7380_v16 }
  0x93   : > { %7205 = vmatprep.subr.bf16.mxu1 %v7381_v17 }
  0x95   : > { %7186 = vmatpush3.bf16.msra.mxu0 %v7373_v11 }
  0x96   : > { %7187 = vmatprep.subr.bf16.mxu0 %v12289_v0  ;;  %7206 = vmatpush3.bf16.msra.mxu1 %v7381_v17 }
  0x97   : > { %7207 = vmatprep.subr.bf16.mxu1 %v7382_v18 }
  0x99   : > { %7188 = vmatpush3.bf16.msra.mxu0 %v7374_v12 }
  0x9a   : > { %7208 = vmatpush3.bf16.msra.mxu1 %v7382_v18  ;;  %1220 = vmatprep.subr.bf16.mxu0 %v7385_v20 }
  0x9c   : > { %7190 = vmatmul.mubr.bf16.vlgmr.msra.gmra.mxu0 %v736_v14 }
  0x9d   : > { %1221 = vmatpush1.bf16.msra.mxu0 %v7383_v19 }
  0x9e   : > { %1222 = vmatprep.subr.bf16.mxu0 %v7388_v21 }
  0xa1   : > { %1223 = vmatpush1.bf16.msra.mxu0 %v7386_v22 }
  0xa2   : > { %1224 = vmatprep.subr.bf16.mxu0 %v7391_v23 }
  0xa5   : > { %1225 = vmatpush1.bf16.msra.mxu0 %v7389_v24 }
  0xa6   : > { %1226 = vmatprep.subr.bf16.mxu0 %v7394_v25 }
  0xa9   : > { %1227 = vmatpush1.bf16.msra.mxu0 %v7392_v26 }
  0xaa   : > { %1228 = vmatprep.subr.bf16.mxu0 %v7397_v27 }
  0xad   : > { %1229 = vmatpush1.bf16.msra.mxu0 %v7395_v28 }
  0xae   : > { %1230 = vmatprep.subr.bf16.mxu0 %v7400_v29 }
  0xb1   : > { %1231 = vmatpush1.bf16.msra.mxu0 %v7398_v30 }
 0x15c   : > { %v819_v37 = vpop.f32.mrf.mxu0 }
 0x15d   : > { %v826_v38 = vcombine.high %v819_v37, %v819_v37  ;;  %v833_v39 = vrot.slane %v819_v37, %v832_v36 }
 0x15e   : > { %v7191_v41 = vpop.f32.mrf.mxu0 }
 0x15f   : > { %v840_v43 = vrot.slane %v826_v38, %v832_v36  ;;  %v841_v44 = vcombine.high %v833_v39, %v833_v39  ;;  %v849_v45 = vrot.slane %v833_v39, %v832_v36 }
 0x160   : > { %v822_v46 = vpop.f32.mrf.mxu0 }
 0x161   : > { %v842_v47 = vcombine.high %v840_v43, %v840_v43  ;;  %v856_v48 = vrot.slane %v840_v43, %v832_v36  ;;  %v863_v49 = vrot.slane %v841_v44, %v832_v36  ;;  %v871_v50 = vcombine.high %v849_v45, %v849_v45 }
 0x162   : > { %v878_v53 = vrot.slane %v849_v45, %v8568_v40  ;;  %v7192_v55 = vpop.f32.mrf.mxu0 }
 0x163   : > { %v873_v56 = vcombine.high %v863_v49, %v863_v49  ;;  %v882_v57 = vrot.slane %v863_v49, %v8568_v40  ;;  %v886_v58 = vrot.slane %v871_v50, %v8568_v40  ;;  %v870_v61 = vrot.slane %v842_v47, %v832_v36 }
 0x164   : > { %v915_v59 = vadd.f32 %v878_v53, %v8572_v51  ;;  %v916_v60 = vadd.f32 %v878_v53, %v8574_v52  ;;  %v894_v63 = vrot.slane %v856_v48, %v8568_v40  ;;  %v872_v13 = vcombine.high %v856_v48, %v856_v48 }
 0x165   : > { %v890_v62 = vrot.slane %v873_v56, %v8568_v40  ;;  %v917_v3 = vadd.f32 %v882_v57, %v8572_v51  ;;  %v918_v4 = vadd.f32 %v882_v57, %v8574_v52  ;;  %v919_v5 = vadd.f32 %v886_v58, %v8572_v51 }
 0x166   : > { %v935_v1 = vadd.f32 %v8579_v54, %v915_v59  ;;  %v936_v2 = vadd.f32 %v8579_v54, %v916_v60  ;;  %v920_v6 = vadd.f32 %v886_v58, %v8574_v52  ;;  %v923_v19 = vadd.f32 %v894_v63, %v8572_v51 }
 0x167   : > { %v921_v7 = vadd.f32 %v890_v62, %v8572_v51  ;;  %v922_v8 = vadd.f32 %v890_v62, %v8574_v52  ;;  %v937_v11 = vadd.f32 %v8579_v54, %v917_v3  ;;  %v938_v12 = vadd.f32 %v8579_v54, %v918_v4  ;;  %v7406_v3 = vld [vmem:[%s12274_s6 + $0x4] ss:$8 sps:$4 sm:$0xff]  }
 0x168   : > { %v951_v9 = vmax.f32 %v935_v1, 0.0  ;;  %v952_v10 = vmax.f32 %v936_v2, 0.0  ;;  %v939_v14 = vadd.f32 %v8579_v54, %v919_v5  ;;  %v940_v15 = vadd.f32 %v8579_v54, %v920_v6  ;;  %v7407_v5 = vld [vmem:[%s12275_s7 + $0xe0] ss:$16 sps:$4 sm:$0xff]   ;;  %v7409_v6 = vld [vmem:[%s12275_s7 + $0xe4] ss:$16 sps:$4 sm:$0xff]  }
 0x169   : > { %v953_v17 = vmax.f32 %v937_v11, 0.0  ;;  %v954_v18 = vmax.f32 %v938_v12, 0.0  ;;  %v898_v20 = vrot.slane %v870_v61, %v8568_v40  ;;  %v941_v24 = vadd.f32 %v8579_v54, %v921_v7  ;;  %v7412_v7 = vld [vmem:[%s12275_s7 + $0xec] ss:$16 sps:$4 sm:$0xff]   ;;  %1717 = vmatprep.subr.bf16.mxu1 %v7409_v6  ;;  %v7419_v11 = vld [vmem:[%s12275_s7 + $0xa0] ss:$16 sps:$4 sm:$0xff]  }
 0x16a   : > { %v967_v16 = vpack.c.bf16 %v952_v10, %v951_v9  ;;  %v955_v21 = vmax.f32 %v939_v14, 0.0  ;;  %v956_v22 = vmax.f32 %v940_v15, 0.0  ;;  %v942_v25 = vadd.f32 %v8579_v54, %v922_v8  ;;  %v7415_v8 = vld [vmem:[%s12275_s7 + $0xc4] ss:$16 sps:$4 sm:$0xff]   ;;  %v7413_v9 = vld [vmem:[%s12275_s7 + $0xc0] ss:$16 sps:$4 sm:$0xff]  }
 0x16b   : > { %v968_v23 = vpack.c.bf16 %v954_v18, %v953_v17  ;;  %v924_v26 = vadd.f32 %v894_v63, %v8574_v52  ;;  %v902_v27 = vrot.slane %v872_v13, %v8568_v40  ;;  %v943_v29 = vadd.f32 %v8579_v54, %v923_v19  ;;  %v7421_v10 = vld [vmem:[%s12275_s7 + $0xa4] ss:$16 sps:$4 sm:$0xff]   ;;  %v7425_v13 = vld [vmem:[%s12275_s7 + $0x80] ss:$16 sps:$4 sm:$0xff]   ;;  %v7448_v6 = vld [vmem:[%s12275_s7 + $0x2c] ss:$16 sps:$4 sm:$0xff]  }
 0x16c   : > { %7209 = vmatprep.mubr.bf16.mxu1 %v967_v16  ;;  %v969_v28 = vpack.c.bf16 %v956_v22, %v955_v21  ;;  %v874_v31 = vcombine.high %v870_v61, %v870_v61  ;;  %v957_v32 = vmax.f32 %v941_v24, 0.0  ;;  %v958_v34 = vmax.f32 %v942_v25, 0.0  ;;  %v7427_v12 = vld [vmem:[%s12275_s7 + $0x84] ss:$16 sps:$4 sm:$0xff]   ;;  %v7431_v15 = vld [vmem:[%s12275_s7 + $0x60] ss:$16 sps:$4 sm:$0xff]  }
 0x16d   : > { %7210 = vmatmul.mubr.bf16.vlgmr.msra.gmra.mxu1 %v968_v23  ;;  %v944_v30 = vadd.f32 %v8579_v54, %v924_v26  ;;  %v925_v36 = vadd.f32 %v898_v20, %v8572_v51  ;;  %v926_v37 = vadd.f32 %v898_v20, %v8574_v52  ;;  %v959_v38 = vmax.f32 %v943_v29, 0.0  ;;  %v7433_v14 = vld [vmem:[%s12275_s7 + $0x64] ss:$16 sps:$4 sm:$0xff]   ;;  %v7437_v17 = vld [vmem:[%s12275_s7 + $0x40] ss:$16 sps:$4 sm:$0xff]  }
 0x16e   : > { %7213 = vmatprep.mubr.bf16.mxu1 %v969_v28  ;;  %v927_v41 = vadd.f32 %v902_v27, %v8572_v51  ;;  %v928_v43 = vadd.f32 %v902_v27, %v8574_v52  ;;  %v970_v44 = vpack.c.bf16 %v958_v34, %v957_v32  ;;  %v906_v47 = vrot.slane %v874_v31, %v8568_v40  ;;  %v7439_v16 = vld [vmem:[%s12275_s7 + $0x44] ss:$16 sps:$4 sm:$0xff]   ;;  %v7443_v19 = vld [vmem:[%s12275_s7 + $0x20] ss:$16 sps:$4 sm:$0xff]  }
 0x16f   : > { %v960_v39 = vmax.f32 %v944_v30, 0.0  ;;  %v945_v45 = vadd.f32 %v8579_v54, %v925_v36  ;;  %v946_v46 = vadd.f32 %v8579_v54, %v926_v37  ;;  %v12291_v4 = vmov 0   ;;  %1718 = vmatpush1.bf16.msra.mxu1 %v7407_v5  ;;  %v7445_v18 = vld [vmem:[%s12275_s7 + $0x24] ss:$16 sps:$4 sm:$0xff]   ;;  %v7449_v21 = vld [vmem:[%s12275_s7] ss:$16 sps:$4 sm:$0xff]  }
 0x170   : > { %v947_v49 = vadd.f32 %v8579_v54, %v927_v41  ;;  %v948_v50 = vadd.f32 %v8579_v54, %v928_v43  ;;  %v929_v56 = vadd.f32 %v906_v47, %v8572_v51  ;;  %v930_v57 = vadd.f32 %v906_v47, %v8574_v52  ;;  %v7401_v51 = vld [vmem:[%s12274_s6 + $0x10] ss:$8 sps:$4 sm:$0xff]   ;;  %v7403_v52 = vld [vmem:[%s12274_s6 + $0x14] ss:$8 sps:$4 sm:$0xff]   ;;  %1252 = vmatprep.mubr.bf16.mxu0 %v12291_v4 }
 0x171   : > { %v971_v48 = vpack.c.bf16 %v960_v39, %v959_v38  ;;  %v961_v53 = vmax.f32 %v945_v45, 0.0  ;;  %v962_v55 = vmax.f32 %v946_v46, 0.0  ;;  %1232 = vmatprep.subr.bf16.mxu0 %v7403_v52  ;;  %7361 = vset.pattern.permute.xlu1 %v12291_v4  ;;  %v7451_v20 = vld [vmem:[%s12275_s7 + $0x4] ss:$16 sps:$4 sm:$0xff]   ;;  %v7455_v23 = vld [vmem:[%s12275_s7 + $0x1e0] ss:$16 sps:$4 sm:$0xff]  }
 0x172   : > { %v963_v58 = vmax.f32 %v947_v49, 0.0  ;;  %v964_v59 = vmax.f32 %v948_v50, 0.0  ;;  %v949_v61 = vadd.f32 %v8579_v54, %v929_v56  ;;  %v950_v40 = vadd.f32 %v8579_v54, %v930_v57  ;;  %1233 = vmatpush1.bf16.msra.mxu0 %v7401_v51  ;;  %v7404_v54 = vld [vmem:[%s12274_s6] ss:$8 sps:$4 sm:$0xff]   ;;  %1719 = vmatprep.subr.bf16.mxu1 %v7415_v8  ;;  %v7457_v22 = vld [vmem:[%s12275_s7 + $0x1e4] ss:$16 sps:$4 sm:$0xff]  }
 0x173   : > { %v972_v60 = vpack.c.bf16 %v962_v55, %v961_v53  ;;  %1234 = vmatprep.subr.bf16.mxu0 %v7406_v3  ;;  %1720 = vmatpush1.bf16.msra.mxu1 %v7413_v9  ;;  %v7463_v24 = vld [vmem:[%s12275_s7 + $0x1c4] ss:$16 sps:$4 sm:$0xff]   ;;  %v7461_v25 = vld [vmem:[%s12275_s7 + $0x1c0] ss:$16 sps:$4 sm:$0xff]   ;;  %v977_v34 = vsub.s32 1, %v8564_v35 }
 0x174   : > { %v973_v62 = vpack.c.bf16 %v964_v59, %v963_v58  ;;  %v965_v63 = vmax.f32 %v949_v61, 0.0  ;;  %v966_v1 = vmax.f32 %v950_v40, 0.0  ;;  %1721 = vmatprep.subr.bf16.mxu1 %v7421_v10  ;;  %v7469_v26 = vld [vmem:[%s12275_s7 + $0x1a4] ss:$16 sps:$4 sm:$0xff]   ;;  %v7467_v27 = vld [vmem:[%s12275_s7 + $0x1a0] ss:$16 sps:$4 sm:$0xff]  }
 0x175   : > { %7214 = vmatmul.mubr.bf16.gmra.mxu1 %v970_v44  ;;  %v7475_v28 = vld [vmem:[%s12275_s7 + $0x184] ss:$16 sps:$4 sm:$0xff]   ;;  %v7473_v29 = vld [vmem:[%s12275_s7 + $0x180] ss:$16 sps:$4 sm:$0xff]   ;;  %v8717_v38 = vrot.slane %v8570_v42, %v977_v34  ;;  %v7410_v45 = vld [vmem:[%s12275_s7 + $0xe8] ss:$16 sps:$4 sm:$0xff]  }
 0x176   : > { %7217 = vmatprep.mubr.bf16.mxu1 %v971_v48  ;;  %v974_v2 = vpack.c.bf16 %v966_v1, %v965_v63  ;;  %1235 = vmatpush1.bf16.msra.mxu0 %v7404_v54  ;;  %v7481_v30 = vld [vmem:[%s12275_s7 + $0x164] ss:$16 sps:$4 sm:$0xff]   ;;  %v7479_v31 = vld [vmem:[%s12275_s7 + $0x160] ss:$16 sps:$4 sm:$0xff]   ;;  %v7418_v47 = vld [vmem:[%s12275_s7 + $0xcc] ss:$16 sps:$4 sm:$0xff]  }
 0x177   : > { %1830 = vmatprep.subr.bf16.mxu0 %v7412_v7  ;;  %1722 = vmatpush1.bf16.msra.mxu1 %v7419_v11  ;;  %v7416_v49 = vld [vmem:[%s12275_s7 + $0xc8] ss:$16 sps:$4 sm:$0xff]   ;;  %v7424_v53 = vld [vmem:[%s12275_s7 + $0xac] ss:$16 sps:$4 sm:$0xff]  }
 0x178   : > { %1723 = vmatprep.subr.bf16.mxu1 %v7427_v12  ;;  %v7422_v57 = vld [vmem:[%s12275_s7 + $0xa8] ss:$16 sps:$4 sm:$0xff]   ;;  %v7430_v59 = vld [vmem:[%s12275_s7 + $0x8c] ss:$16 sps:$4 sm:$0xff]  }
 0x179   : > { %v7428_v61 = vld [vmem:[%s12275_s7 + $0x88] ss:$16 sps:$4 sm:$0xff]   ;;  %v7442_v52 = vld [vmem:[%s12275_s7 + $0x4c] ss:$16 sps:$4 sm:$0xff]  }
 0x17a   : > { %v7440_v3 = vld [vmem:[%s12275_s7 + $0x48] ss:$16 sps:$4 sm:$0xff]   ;;  %v7454_v11 = vld [vmem:[%s12275_s7 + $0xc] ss:$16 sps:$4 sm:$0xff]  }
 0x17b   : > { %1724 = vmatpush1.bf16.msra.mxu1 %v7425_v13  ;;  %v7446_v9 = vld [vmem:[%s12275_s7 + $0x28] ss:$16 sps:$4 sm:$0xff]   ;;  %v7484_v34 = vld [vmem:[%s12275_s7 + $0x16c] ss:$16 sps:$4 sm:$0xff]  }
 0x17c   : > { %1725 = vmatprep.subr.bf16.mxu1 %v7433_v14  ;;  %v7452_v13 = vld [vmem:[%s12275_s7 + $0x8] ss:$16 sps:$4 sm:$0xff]  }
 0x17d   : > { %7218 = vmatmul.mubr.bf16.gmra.mxu1 %v972_v60 }
 0x17e   : > { %7221 = vmatprep.mubr.bf16.mxu1 %v973_v62  ;;  %v7436_v62 = vld [vmem:[%s12275_s7 + $0x6c] ss:$16 sps:$4 sm:$0xff]  }
 0x17f   : > { %1726 = vmatpush1.bf16.msra.mxu1 %v7431_v15  ;;  %v7460_v15 = vld [vmem:[%s12275_s7 + $0x1ec] ss:$16 sps:$4 sm:$0xff]  }
 0x180   : > { %1727 = vmatprep.subr.bf16.mxu1 %v7439_v16 }
 0x183   : > { %1728 = vmatpush1.bf16.msra.mxu1 %v7437_v17 }
 0x184   : > { %1729 = vmatprep.subr.bf16.mxu1 %v7445_v18  ;;  %v7458_v18 = vld [vmem:[%s12275_s7 + $0x1e8] ss:$16 sps:$4 sm:$0xff]  }
 0x185   : > { %7222 = vmatmul.mubr.bf16.gmra.mxu1 %v974_v2  ;;  %v7434_v2 = vld [vmem:[%s12275_s7 + $0x68] ss:$16 sps:$4 sm:$0xff]  }
 0x187   : > { %1730 = vmatpush1.bf16.msra.mxu1 %v7443_v19 }
 0x188   : > { %1731 = vmatprep.subr.bf16.mxu1 %v7451_v20  ;;  %v7466_v20 = vld [vmem:[%s12275_s7 + $0x1cc] ss:$16 sps:$4 sm:$0xff]  }
 0x18b   : > { %1732 = vmatpush1.bf16.msra.mxu1 %v7449_v21 }
 0x18c   : > { %1733 = vmatprep.subr.bf16.mxu1 %v7457_v22  ;;  %v7464_v22 = vld [vmem:[%s12275_s7 + $0x1c8] ss:$16 sps:$4 sm:$0xff]  }
 0x18f   : > { %1734 = vmatpush2.bf16.msra.mxu1 %v7455_v23 }
 0x190   : > { %1735 = vmatprep.subr.bf16.mxu1 %v7463_v24  ;;  %v7472_v24 = vld [vmem:[%s12275_s7 + $0x1ac] ss:$16 sps:$4 sm:$0xff]  }
 0x193   : > { %1736 = vmatpush2.bf16.msra.mxu1 %v7461_v25 }
 0x194   : > { %1737 = vmatprep.subr.bf16.mxu1 %v7469_v26 }
 0x197   : > { %1738 = vmatpush2.bf16.msra.mxu1 %v7467_v27  ;;  %v7470_v27 = vld [vmem:[%s12275_s7 + $0x1a8] ss:$16 sps:$4 sm:$0xff]  }
 0x198   : > { %1739 = vmatprep.subr.bf16.mxu1 %v7475_v28 }
 0x19b   : > { %1740 = vmatpush2.bf16.msra.mxu1 %v7473_v29  ;;  %v7478_v29 = vld [vmem:[%s12275_s7 + $0x18c] ss:$16 sps:$4 sm:$0xff]  }
 0x19c   : > { %1741 = vmatprep.subr.bf16.mxu1 %v7481_v30 }
 0x19f   : > { %1742 = vmatpush2.bf16.msra.mxu1 %v7479_v31  ;;  %v7476_v31 = vld [vmem:[%s12275_s7 + $0x188] ss:$16 sps:$4 sm:$0xff]  }
 0x22d   : > { %v7211_v32 = vpop.f32.mrf.mxu1 }
 0x22e   : > { %v1070_v56 = vadd.f32 %v7211_v32, %v8717_v38 }
 0x22f   : > { %v1061_v36 = vpop.f32.mrf.mxu1 }
 0x230   : > { %v1062_v41 = vadd.f32 %v1061_v36, %v8717_v38 }
 0x231   : > { %v7212_v37 = vpop.f32.mrf.mxu1 }
 0x232   : > { %v1073_v50 = vadd.f32 %v7212_v37, %v8717_v38  ;;  %v7482_v37 = vld [vmem:[%s12275_s7 + $0x168] ss:$16 sps:$4 sm:$0xff]  }
 0x233   : > { %v1064_v39 = vpop.f32.mrf.mxu1 }
 0x234   : > { %v1065_v43 = vadd.f32 %v1064_v39, %v8717_v38  ;;  %v1125_v58 = vpack.c.bf16 %v1073_v50, %v1070_v56  ;;  %v7494_v50 = vld [vmem:[%s12275_s7 + $0x128] ss:$16 sps:$4 sm:$0xff]   ;;  %v7497_v56 = vld [vmem:[%s12275_s7 + $0x100] ss:$16 sps:$4 sm:$0xff]  }
 0x235   : > { %v7215_v44 = vpop.f32.mrf.mxu1 }
 0x236   : > { %v1124_v46 = vpack.c.bf16 %v1065_v43, %v1062_v41  ;;  %v1086_v8 = vadd.f32 %v7215_v44, %v8717_v38 }
 0x237   : > { %v1077_v48 = vpop.f32.mrf.mxu1 }
 0x238   : > { %1253 = vmatmul.mubr.bf16.vlgmr.msra.gmra.mxu0 %v1124_v46  ;;  %v1078_v1 = vadd.f32 %v1077_v48, %v8717_v38  ;;  %v7487_v46 = vld [vmem:[%s12275_s7 + $0x144] ss:$16 sps:$4 sm:$0xff]   ;;  %v7490_v48 = vld [vmem:[%s12275_s7 + $0x14c] ss:$16 sps:$4 sm:$0xff]  }
 0x239   : > { %1262 = vmatprep.mubr.bf16.mxu0 %v12291_v4  ;;  %1831 = vmatpush1.bf16.msra.mxu0 %v7410_v45  ;;  %v7216_v55 = vpop.f32.mrf.mxu1  ;;  %v7485_v45 = vld [vmem:[%s12275_s7 + $0x140] ss:$16 sps:$4 sm:$0xff]  }
 0x23a   : > { %1832 = vmatprep.subr.bf16.mxu0 %v7418_v47  ;;  %v1089_v5 = vadd.f32 %v7216_v55, %v8717_v38  ;;  %v7488_v47 = vld [vmem:[%s12275_s7 + $0x148] ss:$16 sps:$4 sm:$0xff]   ;;  %1743 = vmatprep.subr.bf16.mxu1 %v7487_v46  ;;  %v7499_v55 = vld [vmem:[%s12275_s7 + $0x104] ss:$16 sps:$4 sm:$0xff]  }
 0x23b   : > { %v1080_v60 = vpop.f32.mrf.mxu1  ;;  %1744 = vmatpush2.bf16.msra.mxu1 %v7485_v45  ;;  %v7515_v45 = vld [vmem:[%s12276_s8 + $0x60] sm:$0xff]  }
 0x23c   : > { %v1081_v40 = vadd.f32 %v1080_v60, %v8717_v38  ;;  %v1127_v10 = vpack.c.bf16 %v1089_v5, %v1086_v8  ;;  %v7505_v60 = vld [vmem:[%s12276_s8 + $0xf8] sm:$0xff]   ;;  %v7517_v46 = vld [vmem:[%s12276_s8 + $0xe0] sm:$0xff]  }
 0x23d   : > { %1833 = vmatpush1.bf16.msra.mxu0 %v7416_v49  ;;  %v7219_v63 = vpop.f32.mrf.mxu1  ;;  %v7493_v49 = vld [vmem:[%s12275_s7 + $0x124] ss:$16 sps:$4 sm:$0xff]  }
 0x23e   : > { %1834 = vmatprep.subr.bf16.mxu0 %v7424_v53  ;;  %v1126_v51 = vpack.c.bf16 %v1081_v40, %v1078_v1  ;;  %v1102_v26 = vadd.f32 %v7219_v63, %v8717_v38  ;;  %v7496_v53 = vld [vmem:[%s12275_s7 + $0x12c] ss:$16 sps:$4 sm:$0xff]   ;;  %1745 = vmatprep.subr.bf16.mxu1 %v7493_v49 }
 0x23f   : > { %v1093_v54 = vpop.f32.mrf.mxu1  ;;  %v8860_v40 = vld [vmem:[#allocation10 + $0x8] sm:$0xff] }
 0x240   : > { %1263 = vmatmul.mubr.bf16.gmra.mxu0 %v1125_v58  ;;  %v1094_v17 = vadd.f32 %v1093_v54, %v8717_v38  ;;  %v7500_v58 = vld [vmem:[%s12275_s7 + $0x108] ss:$16 sps:$4 sm:$0xff]  }
 0x241   : > { %1272 = vmatprep.mubr.bf16.mxu0 %v12291_v4  ;;  %1835 = vmatpush1.bf16.msra.mxu0 %v7422_v57  ;;  %v7220_v7 = vpop.f32.mrf.mxu1  ;;  %v7502_v57 = vld [vmem:[%s12275_s7 + $0x10c] ss:$16 sps:$4 sm:$0xff]  }
 0x242   : > { %1836 = vmatprep.subr.bf16.mxu0 %v7430_v59  ;;  %v1105_v23 = vadd.f32 %v7220_v7, %v8717_v38  ;;  %v7503_v59 = vld [vmem:[%s12276_s8 + $0x78] sm:$0xff]  }
 0x243   : > { %v1096_v12 = vpop.f32.mrf.mxu1 }
 0x244   : > { %v1097_v14 = vadd.f32 %v1096_v12, %v8717_v38  ;;  %v1129_v28 = vpack.c.bf16 %v1105_v23, %v1102_v26  ;;  %v7510_v26 = vld [vmem:[%s12276_s8 + $0xb0] sm:$0xff]  }
 0x245   : > { %1837 = vmatpush1.bf16.msra.mxu0 %v7428_v61  ;;  %v7223_v16 = vpop.f32.mrf.mxu1  ;;  %v1134_v61 = vsub.s32 2, %v8564_v35 }
 0x246   : > { %1838 = vmatprep.subr.bf16.mxu0 %v7436_v62  ;;  %v1128_v19 = vpack.c.bf16 %v1097_v14, %v1094_v17  ;;  %v1118_v43 = vadd.f32 %v7223_v16, %v8717_v38  ;;  %v7504_v14 = vld [vmem:[%s12276_s8 + $0x38] sm:$0xff]  }
 0x247   : > { %v1109_v21 = vpop.f32.mrf.mxu1  ;;  %v8863_v63 = vrot.slane %v8860_v40, %v1134_v61  ;;  %v8866_v1 = vrot.slane %v8570_v42, %v1134_v61 }
 0x248   : > { %1273 = vmatmul.mubr.bf16.gmra.mxu0 %v1126_v51  ;;  %v1110_v36 = vadd.f32 %v1109_v21, %v8717_v38 }
 0x249   : > { %1282 = vmatprep.mubr.bf16.mxu0 %v12291_v4  ;;  %1839 = vmatpush1.bf16.msra.mxu0 %v7434_v2  ;;  %v7224_v25 = vpop.f32.mrf.mxu1 }
 0x24a   : > { %1840 = vmatprep.subr.bf16.mxu0 %v7442_v52  ;;  %v1121_v41 = vadd.f32 %v7224_v25, %v8717_v38  ;;  %v7508_v25 = vld [vmem:[%s12276_s8 + $0x30] sm:$0xff]  }
 0x24b   : > { %v1112_v30 = vpop.f32.mrf.mxu1 }
 0x24c   : > { %v1113_v32 = vadd.f32 %v1112_v30, %v8717_v38  ;;  %v1131_v44 = vpack.c.bf16 %v1121_v41, %v1118_v43  ;;  %v7491_v38 = vld [vmem:[%s12275_s7 + $0x120] ss:$16 sps:$4 sm:$0xff]   ;;  %v7513_v30 = vld [vmem:[%s12276_s8 + $0xe8] sm:$0xff]  }
 0x24d   : > { %1841 = vmatpush1.bf16.msra.mxu0 %v7440_v3  ;;  %1746 = vmatpush2.bf16.msra.mxu1 %v7491_v38  ;;  %v7514_v41 = vld [vmem:[%s12276_s8 + $0xa8] sm:$0xff]  }
 0x24e   : > { %1842 = vmatprep.subr.bf16.mxu0 %v7448_v6  ;;  %v1130_v39 = vpack.c.bf16 %v1113_v32, %v1110_v36  ;;  %1747 = vmatprep.subr.bf16.mxu1 %v7499_v55  ;;  %v7518_v55 = vld [vmem:[%s12276_s8 + $0xa0] sm:$0xff]  }
 0x250   : > { %1283 = vmatmul.mubr.bf16.gmra.mxu0 %v1127_v10 }
 0x251   : > { %1292 = vmatprep.mubr.bf16.mxu0 %v12291_v4  ;;  %1843 = vmatpush1.bf16.msra.mxu0 %v7446_v9 }
 0x252   : > { %1844 = vmatprep.subr.bf16.mxu0 %v7454_v11  ;;  %1748 = vmatpush2.bf16.msra.mxu1 %v7497_v56 }
 0x253   : > { %7031 = vmatprep.subr.bf16.mxu1 %v7503_v59  ;;  %v7521_v59 = vld [vmem:[%s12276_s8 + $0xd8] sm:$0xff]  }
 0x255   : > { %1845 = vmatpush1.bf16.msra.mxu0 %v7452_v13 }
 0x256   : > { %1846 = vmatprep.subr.bf16.mxu0 %v7460_v15  ;;  %v7506_v15 = vld [vmem:[%s12276_s8 + $0xb8] sm:$0xff]  }
 0x258   : > { %1293 = vmatmul.mubr.bf16.gmra.mxu0 %v1128_v19  ;;  %v7509_v19 = vld [vmem:[%s12276_s8 + $0xf0] sm:$0xff]  }
 0x259   : > { %1302 = vmatprep.mubr.bf16.mxu0 %v12291_v4  ;;  %1847 = vmatpush2.bf16.msra.mxu0 %v7458_v18  ;;  %v7507_v18 = vld [vmem:[%s12276_s8 + $0x70] sm:$0xff]  }
 0x25a   : > { %1848 = vmatprep.subr.bf16.mxu0 %v7466_v20 }
 0x25d   : > { %1849 = vmatpush2.bf16.msra.mxu0 %v7464_v22 }
 0x25e   : > { %1850 = vmatprep.subr.bf16.mxu0 %v7472_v24 }
 0x260   : > { %1303 = vmatmul.mubr.bf16.gmra.mxu0 %v1129_v28 }
 0x261   : > { %1312 = vmatprep.mubr.bf16.mxu0 %v12291_v4  ;;  %1851 = vmatpush2.bf16.msra.mxu0 %v7470_v27 }
 0x262   : > { %1852 = vmatprep.subr.bf16.mxu0 %v7478_v29  ;;  %v7511_v29 = vld [vmem:[%s12276_s8 + $0x68] sm:$0xff]  }
 0x265   : > { %1853 = vmatpush2.bf16.msra.mxu0 %v7476_v31 }
 0x266   : > { %1854 = vmatprep.subr.bf16.mxu0 %v7484_v34 }
 0x268   : > { %1313 = vmatmul.mubr.bf16.gmra.mxu0 %v1130_v39  ;;  %v7512_v39 = vld [vmem:[%s12276_s8 + $0x28] sm:$0xff]  }
 0x269   : > { %1322 = vmatprep.mubr.bf16.mxu0 %v12291_v4  ;;  %1855 = vmatpush2.bf16.msra.mxu0 %v7482_v37 }
 0x26a   : > { %1856 = vmatprep.subr.bf16.mxu0 %v7490_v48 }
 0x26d   : > { %1857 = vmatpush2.bf16.msra.mxu0 %v7488_v47 }
 0x26e   : > { %1858 = vmatprep.subr.bf16.mxu0 %v7496_v53  ;;  %v7516_v53 = vld [vmem:[%s12276_s8 + $0x20] sm:$0xff]  }
 0x270   : > { %1323 = vmatmul.mubr.bf16.gmra.mxu0 %v1131_v44 }
 0x271   : > { %1859 = vmatpush2.bf16.msra.mxu0 %v7494_v50 }
 0x272   : > { %1860 = vmatprep.subr.bf16.mxu0 %v7502_v57 }
 0x275   : > { %1861 = vmatpush2.bf16.msra.mxu0 %v7500_v58  ;;  %v7519_v58 = vld [vmem:[%s12276_s8 + $0x58] sm:$0xff]  }
 0x276   : > { %7095 = vmatprep.subr.bf16.mxu0 %v7505_v60 }
 0x2f8   : > { %v1254_v62 = vpop.f32.mrf.mxu0 }
 0x2f9   : > { %v1255_v3 = vadd.f32 %v1254_v62, %v8866_v1 }
 0x2fa   : > { %v1256_v2 = vpop.f32.mrf.mxu0 }
 0x2fb   : > { %v1257_v52 = vadd.f32 %v1256_v2, %v8863_v63  ;;  %v1333_v11 = vmax.f32 %v1255_v3, 0.0 }
 0x2fc   : > { %v1258_v51 = vpop.f32.mrf.mxu0 }
 0x2fd   : > { %v1259_v54 = vadd.f32 %v1258_v51, %v8866_v1  ;;  %v1334_v9 = vmax.f32 %v1257_v52, 0.0  ;;  %v7520_v52 = vld [vmem:[%s12276_s8 + $0x18] sm:$0xff]  }
 0x2fe   : > { %v1260_v5 = vpop.f32.mrf.mxu0 }
 0x2ff   : > { %v1261_v6 = vadd.f32 %v1260_v5, %v8863_v63  ;;  %v1335_v7 = vmax.f32 %v1259_v54, 0.0  ;;  %v7522_v54 = vld [vmem:[%s12276_s8 + $0x98] sm:$0xff]  }
 0x300   : > { %v1264_v8 = vpop.f32.mrf.mxu0 }
 0x301   : > { %v1336_v10 = vmax.f32 %v1261_v6, 0.0  ;;  %v1365_v16 = vpack.c.bf16 %v1335_v7, %v1333_v11  ;;  %v1265_v22 = vadd.f32 %v1264_v8, %v8866_v1  ;;  %v7523_v6 = vld [vmem:[%s12276_s8 + $0x50] sm:$0xff]  }
 0x302   : > { %v1266_v12 = vpop.f32.mrf.mxu0  ;;  %v7525_v7 = vld [vmem:[%s12276_s8 + $0xd0] sm:$0xff]  }
 0x303   : > { %v1366_v13 = vpack.c.bf16 %v1336_v10, %v1334_v9  ;;  %v1267_v20 = vadd.f32 %v1266_v12, %v8863_v63  ;;  %v1337_v34 = vmax.f32 %v1265_v22, 0.0 }
 0x304   : > { %v1268_v17 = vpop.f32.mrf.mxu0 }
 0x305   : > { %v1269_v21 = vadd.f32 %v1268_v17, %v8866_v1  ;;  %1749 = vmatprep.mubr.bf16.mxu1 %v1366_v13  ;;  %1862 = vmatprep.mubr.bf16.mxu0 %v1366_v13  ;;  %v1338_v31 = vmax.f32 %v1267_v20, 0.0  ;;  %v7524_v13 = vld [vmem:[%s12276_s8 + $0x10] sm:$0xff]   ;;  %v7527_v17 = vld [vmem:[%s12276_s8 + $0x48] sm:$0xff]  }
 0x306   : > { %v1270_v23 = vpop.f32.mrf.mxu0  ;;  %1750 = vmatmul.mubr.bf16.vlgmr.msra.gmra.mxu1 %v1365_v16  ;;  %1863 = vmatmul.mubr.bf16.vlgmr.msra.gmra.mxu0 %v1365_v16 }
 0x307   : > { %v1271_v24 = vadd.f32 %v1270_v23, %v8863_v63  ;;  %7032 = vmatpush3.bf16.msra.mxu1 %v7504_v14  ;;  %7096 = vmatpush3.bf16.msra.mxu0 %v7506_v15  ;;  %v1339_v27 = vmax.f32 %v1269_v21, 0.0  ;;  %v7526_v14 = vld [vmem:[%s12276_s8 + $0x90] sm:$0xff]  }
 0x308   : > { %v1274_v28 = vpop.f32.mrf.mxu0  ;;  %7033 = vmatprep.subr.bf16.mxu1 %v7507_v18  ;;  %7097 = vmatprep.subr.bf16.mxu0 %v7509_v19  ;;  %v7529_v18 = vld [vmem:[%s12276_s8 + $0xc8] sm:$0xff]  }
 0x309   : > { %v1340_v32 = vmax.f32 %v1271_v24, 0.0  ;;  %v1367_v43 = vpack.c.bf16 %v1339_v27, %v1337_v34  ;;  %v1275_v38 = vadd.f32 %v1274_v28, %v8866_v1  ;;  %v7528_v24 = vld [vmem:[%s12276_s8 + $0x8] sm:$0xff]  }
 0x30a   : > { %v1276_v36 = vpop.f32.mrf.mxu0 }
 0x30b   : > { %v1368_v37 = vpack.c.bf16 %v1340_v32, %v1338_v31  ;;  %7034 = vmatpush3.bf16.msra.mxu1 %v7508_v25  ;;  %7098 = vmatpush3.bf16.msra.mxu0 %v7510_v26  ;;  %v1277_v47 = vadd.f32 %v1276_v36, %v8863_v63  ;;  %v1341_v62 = vmax.f32 %v1275_v38, 0.0 }
 0x30c   : > { %v1278_v44 = vpop.f32.mrf.mxu0  ;;  %7035 = vmatprep.subr.bf16.mxu1 %v7511_v29  ;;  %7099 = vmatprep.subr.bf16.mxu0 %v7513_v30 }
 0x30d   : > { %v1279_v48 = vadd.f32 %v1278_v44, %v8866_v1  ;;  %1759 = vmatprep.mubr.bf16.mxu1 %v1368_v37  ;;  %1872 = vmatprep.mubr.bf16.mxu0 %v1368_v37  ;;  %v1342_v60 = vmax.f32 %v1277_v47, 0.0 }
 0x30e   : > { %v1280_v49 = vpop.f32.mrf.mxu0  ;;  %1760 = vmatmul.mubr.bf16.gmra.mxu1 %v1367_v43  ;;  %1873 = vmatmul.mubr.bf16.gmra.mxu0 %v1367_v43 }
 0x30f   : > { %v1281_v50 = vadd.f32 %v1280_v49, %v8863_v63  ;;  %7036 = vmatpush3.bf16.msra.mxu1 %v7512_v39  ;;  %7100 = vmatpush3.bf16.msra.mxu0 %v7514_v41  ;;  %v1343_v56 = vmax.f32 %v1279_v48, 0.0 }
 0x310   : > { %v1284_v57 = vpop.f32.mrf.mxu0  ;;  %7037 = vmatprep.subr.bf16.mxu1 %v7515_v45  ;;  %7101 = vmatprep.subr.bf16.mxu0 %v7517_v46 }
 0x311   : > { %v1344_v61 = vmax.f32 %v1281_v50, 0.0  ;;  %v1369_v3 = vpack.c.bf16 %v1343_v56, %v1341_v62  ;;  %v1285_v10 = vadd.f32 %v1284_v57, %v8866_v1 }
 0x312   : > { %v1286_v2 = vpop.f32.mrf.mxu0 }
 0x313   : > { %v1370_v51 = vpack.c.bf16 %v1344_v61, %v1342_v60  ;;  %7038 = vmatpush3.bf16.msra.mxu1 %v7516_v53  ;;  %7102 = vmatpush3.bf16.msra.mxu0 %v7518_v55  ;;  %v1287_v8 = vadd.f32 %v1286_v2, %v8863_v63  ;;  %v1345_v21 = vmax.f32 %v1285_v10, 0.0 }
 0x314   : > { %v1288_v5 = vpop.f32.mrf.mxu0  ;;  %7039 = vmatprep.subr.bf16.mxu1 %v7519_v58  ;;  %7103 = vmatprep.subr.bf16.mxu0 %v7521_v59 }
 0x315   : > { %v1289_v9 = vadd.f32 %v1288_v5, %v8866_v1  ;;  %1769 = vmatprep.mubr.bf16.mxu1 %v1370_v51  ;;  %1882 = vmatprep.mubr.bf16.mxu0 %v1370_v51  ;;  %v1346_v19 = vmax.f32 %v1287_v8, 0.0 }
 0x316   : > { %v1290_v11 = vpop.f32.mrf.mxu0  ;;  %1770 = vmatmul.mubr.bf16.gmra.mxu1 %v1369_v3  ;;  %1883 = vmatmul.mubr.bf16.gmra.mxu0 %v1369_v3 }
 0x317   : > { %v1291_v12 = vadd.f32 %v1290_v11, %v8863_v63  ;;  %7040 = vmatpush3.bf16.msra.mxu1 %v7520_v52  ;;  %7104 = vmatpush3.bf16.msra.mxu0 %v7522_v54  ;;  %v1347_v15 = vmax.f32 %v1289_v9, 0.0 }
 0x318   : > { %v1294_v16 = vpop.f32.mrf.mxu0  ;;  %7041 = vmatprep.subr.bf16.mxu1 %v7523_v6  ;;  %7105 = vmatprep.subr.bf16.mxu0 %v7525_v7 }
 0x319   : > { %v1348_v20 = vmax.f32 %v1291_v12, 0.0  ;;  %v1371_v25 = vpack.c.bf16 %v1347_v15, %v1345_v21  ;;  %v1295_v29 = vadd.f32 %v1294_v16, %v8866_v1 }
 0x31a   : > { %v1296_v22 = vpop.f32.mrf.mxu0 }
 0x31b   : > { %v1372_v23 = vpack.c.bf16 %v1348_v20, %v1346_v19  ;;  %7042 = vmatpush3.bf16.msra.mxu1 %v7524_v13  ;;  %7106 = vmatpush3.bf16.msra.mxu0 %v7526_v14  ;;  %v1297_v27 = vadd.f32 %v1296_v22, %v8863_v63  ;;  %v1349_v39 = vmax.f32 %v1295_v29, 0.0  ;;  %v734_v29 = vld [vmem:[#allocation10 + $0x10] sm:$0xff] }
 0x31c   : > { %v1298_v26 = vpop.f32.mrf.mxu0  ;;  %7043 = vmatprep.subr.bf16.mxu1 %v7527_v17  ;;  %7107 = vmatprep.subr.bf16.mxu0 %v7529_v18 }
 0x31d   : > { %v1299_v28 = vadd.f32 %v1298_v26, %v8866_v1  ;;  %1779 = vmatprep.mubr.bf16.mxu1 %v1372_v23  ;;  %1892 = vmatprep.mubr.bf16.mxu0 %v1372_v23  ;;  %v1350_v36 = vmax.f32 %v1297_v27, 0.0  ;;  %v7534_v26 = vld [vmem:[%s12276_s8 + $0x80] sm:$0xff]   ;;  %v1383_v27 = vsub.s32 3, %v8564_v35 }
 0x31e   : > { %v1300_v30 = vpop.f32.mrf.mxu0  ;;  %1780 = vmatmul.mubr.bf16.gmra.mxu1 %v1371_v25  ;;  %1893 = vmatmul.mubr.bf16.gmra.mxu0 %v1371_v25  ;;  %v7533_v25 = vld [vmem:[%s12276_s8 + $0xc0] sm:$0xff]  }
 0x31f   : > { %v1301_v31 = vadd.f32 %v1300_v30, %v8863_v63  ;;  %7044 = vmatpush3.bf16.msra.mxu1 %v7528_v24  ;;  %v1351_v32 = vmax.f32 %v1299_v28, 0.0  ;;  %v7530_v24 = vld [vmem:[%s12276_s8 + $0x88] sm:$0xff]  }
 0x320   : > { %v1304_v34 = vpop.f32.mrf.mxu0  ;;  %7108 = vmatpush3.bf16.msra.mxu0 %v7530_v24  ;;  %v735_v28 = vld [vmem:[#allocation10 + $0x18] sm:$0xff] }
 0x321   : > { %v1352_v37 = vmax.f32 %v1301_v31, 0.0  ;;  %v1373_v44 = vpack.c.bf16 %v1351_v32, %v1349_v39  ;;  %v1305_v48 = vadd.f32 %v1304_v34, %v8866_v1  ;;  %7109 = vmatprep.subr.bf16.mxu0 %v7533_v25  ;;  %v8993_v32 = vrot.slane %v8860_v40, %v1383_v27 }
 0x322   : > { %v1306_v41 = vpop.f32.mrf.mxu0  ;;  %v8995_v34 = vrot.slane %v735_v28, %v1383_v27 }
 0x323   : > { %v1374_v43 = vpack.c.bf16 %v1352_v37, %v1350_v36  ;;  %v1307_v46 = vadd.f32 %v1306_v41, %v8863_v63  ;;  %v1353_v57 = vmax.f32 %v1305_v48, 0.0  ;;  %v8998_v36 = vrot.slane %v8570_v42, %v1383_v27 }
 0x324   : > { %v1308_v45 = vpop.f32.mrf.mxu0  ;;  %7110 = vmatpush3.bf16.msra.mxu0 %v7534_v26  ;;  %v9000_v37 = vrot.slane %v734_v29, %v1383_v27 }
 0x325   : > { %v1309_v47 = vadd.f32 %v1308_v45, %v8866_v1  ;;  %1789 = vmatprep.mubr.bf16.mxu1 %v1374_v43  ;;  %1902 = vmatprep.mubr.bf16.mxu0 %v1374_v43  ;;  %v1354_v55 = vmax.f32 %v1307_v46, 0.0 }
 0x326   : > { %v1310_v38 = vpop.f32.mrf.mxu0  ;;  %1790 = vmatmul.mubr.bf16.gmra.mxu1 %v1373_v44  ;;  %1903 = vmatmul.mubr.bf16.gmra.mxu0 %v1373_v44 }
 0x327   : > { %v1311_v49 = vadd.f32 %v1310_v38, %v8863_v63  ;;  %v1355_v50 = vmax.f32 %v1309_v47, 0.0 }
 0x328   : > { %v1314_v53 = vpop.f32.mrf.mxu0 }
 0x329   : > { %v1356_v56 = vmax.f32 %v1311_v49, 0.0  ;;  %v1375_v60 = vpack.c.bf16 %v1355_v50, %v1353_v57  ;;  %v1315_v51 = vadd.f32 %v1314_v53, %v8866_v1 }
 0x32a   : > { %v1316_v58 = vpop.f32.mrf.mxu0 }
 0x32b   : > { %v1376_v59 = vpack.c.bf16 %v1356_v56, %v1354_v55  ;;  %v1317_v62 = vadd.f32 %v1316_v58, %v8863_v63  ;;  %v1357_v8 = vmax.f32 %v1315_v51, 0.0 }
 0x32c   : > { %v1318_v61 = vpop.f32.mrf.mxu0 }
 0x32d   : > { %v1319_v2 = vadd.f32 %v1318_v61, %v8866_v1  ;;  %1799 = vmatprep.mubr.bf16.mxu1 %v1376_v59  ;;  %1912 = vmatprep.mubr.bf16.mxu0 %v1376_v59  ;;  %v1358_v6 = vmax.f32 %v1317_v62, 0.0 }
 0x32e   : > { %v1320_v52 = vpop.f32.mrf.mxu0  ;;  %1800 = vmatmul.mubr.bf16.gmra.mxu1 %v1375_v60  ;;  %1913 = vmatmul.mubr.bf16.gmra.mxu0 %v1375_v60 }
 0x32f   : > { %v1321_v54 = vadd.f32 %v1320_v52, %v8863_v63  ;;  %v1359_v3 = vmax.f32 %v1319_v2, 0.0 }
 0x330   : > { %v1324_v5 = vpop.f32.mrf.mxu0 }
 0x331   : > { %v1360_v7 = vmax.f32 %v1321_v54, 0.0  ;;  %v1377_v11 = vpack.c.bf16 %v1359_v3, %v1357_v8  ;;  %v1325_v15 = vadd.f32 %v1324_v5, %v8866_v1 }
 0x332   : > { %v1326_v9 = vpop.f32.mrf.mxu0 }
 0x333   : > { %v1378_v10 = vpack.c.bf16 %v1360_v7, %v1358_v6  ;;  %v1327_v13 = vadd.f32 %v1326_v9, %v8863_v63  ;;  %v1361_v21 = vmax.f32 %v1325_v15, 0.0 }
 0x334   : > { %v1328_v12 = vpop.f32.mrf.mxu0 }
 0x335   : > { %v1329_v14 = vadd.f32 %v1328_v12, %v8866_v1  ;;  %1809 = vmatprep.mubr.bf16.mxu1 %v1378_v10  ;;  %1922 = vmatprep.mubr.bf16.mxu0 %v1378_v10  ;;  %v1362_v19 = vmax.f32 %v1327_v13, 0.0  ;;  %v7531_v1 = vld [vmem:[%s12276_s8 + $0x40] sm:$0xff]  }
 0x336   : > { %v1330_v16 = vpop.f32.mrf.mxu0  ;;  %1810 = vmatmul.mubr.bf16.gmra.mxu1 %v1377_v11  ;;  %1923 = vmatmul.mubr.bf16.gmra.mxu0 %v1377_v11 }
 0x337   : > { %v1331_v17 = vadd.f32 %v1330_v16, %v8863_v63  ;;  %v1363_v18 = vmax.f32 %v1329_v14, 0.0  ;;  %7045 = vmatprep.subr.bf16.mxu1 %v7531_v1  ;;  %v7532_v63 = vld [vmem:[%s12276_s8] sm:$0xff]  }
 0x338   : > { %7046 = vmatpush3.bf16.msra.mxu1 %v7532_v63 }
 0x339   : > { %v1364_v20 = vmax.f32 %v1331_v17, 0.0  ;;  %v1379_v23 = vpack.c.bf16 %v1363_v18, %v1361_v21  ;;  %7225 = vmatprep.subr.bf16.mxu1 %v12289_v0 }
 0x33b   : > { %v1380_v22 = vpack.c.bf16 %v1364_v20, %v1362_v19 }
 0x33d   : > { %1819 = vmatprep.mubr.bf16.mxu1 %v1380_v22  ;;  %1932 = vmatprep.mubr.bf16.mxu0 %v1380_v22 }
 0x33e   : > { %1820 = vmatmul.mubr.bf16.gmra.mxu1 %v1379_v23  ;;  %1933 = vmatmul.mubr.bf16.gmra.mxu0 %v1379_v23 }
 0x3c6   : > { %v1751_v30 = vpop.f32.mrf.mxu1  ;;  %v1864_v31 = vpop.f32.mrf.mxu0 }
 0x3c7   : > { %v1752_v48 = vadd.f32 %v1751_v30, %v8998_v36  ;;  %v1865_v38 = vadd.f32 %v1864_v31, %v9000_v37 }
 0x3c8   : > { %v1753_v39 = vpop.f32.mrf.mxu1  ;;  %v1866_v41 = vpop.f32.mrf.mxu0 }
 0x3c9   : > { %v1754_v45 = vadd.f32 %v1753_v39, %v8993_v32  ;;  %v1867_v46 = vadd.f32 %v1866_v41, %v8995_v34  ;;  %v1943_v2 = vmax.f32 %v1752_v48, 0.0  ;;  %v1945_v51 = vmax.f32 %v1865_v38, 0.0 }
 0x3ca   : > { %v1755_v43 = vpop.f32.mrf.mxu1  ;;  %v1868_v44 = vpop.f32.mrf.mxu0 }
 0x3cb   : > { %v1756_v47 = vadd.f32 %v1755_v43, %v8998_v36  ;;  %v1869_v40 = vadd.f32 %v1868_v44, %v9000_v37  ;;  %v1944_v59 = vmax.f32 %v1754_v45, 0.0  ;;  %v1946_v60 = vmax.f32 %v1867_v46, 0.0 }
 0x3cc   : > { %v1757_v42 = vpop.f32.mrf.mxu1  ;;  %v1870_v49 = vpop.f32.mrf.mxu0 }
 0x3cd   : > { %v1758_v50 = vadd.f32 %v1757_v42, %v8993_v32  ;;  %v1871_v53 = vadd.f32 %v1870_v49, %v8995_v34  ;;  %v1947_v55 = vmax.f32 %v1756_v47, 0.0  ;;  %v1949_v56 = vmax.f32 %v1869_v40, 0.0 }
 0x3ce   : > { %v1761_v57 = vpop.f32.mrf.mxu1  ;;  %v1874_v58 = vpop.f32.mrf.mxu0 }
 0x3cf   : > { %v1948_v61 = vmax.f32 %v1758_v50, 0.0  ;;  %v1950_v62 = vmax.f32 %v1871_v53, 0.0  ;;  %v2007_v6 = vpack.c.bf16 %v1947_v55, %v1943_v2  ;;  %v2009_v7 = vpack.c.bf16 %v1949_v56, %v1945_v51 }
 0x3d0   : > { %v1763_v52 = vpop.f32.mrf.mxu1  ;;  %v1876_v54 = vpop.f32.mrf.mxu0  ;;  %v1762_v14 = vadd.f32 %v1761_v57, %v8998_v36  ;;  %v1875_v15 = vadd.f32 %v1874_v58, %v9000_v37 }
 0x3d1   : > { %v2008_v3 = vpack.c.bf16 %v1948_v61, %v1944_v59  ;;  %v2010_v5 = vpack.c.bf16 %v1950_v62, %v1946_v60  ;;  %v1764_v8 = vadd.f32 %v1763_v52, %v8993_v32  ;;  %v1877_v11 = vadd.f32 %v1876_v54, %v8995_v34 }
 0x3d2   : > { %v1765_v9 = vpop.f32.mrf.mxu1  ;;  %v1878_v10 = vpop.f32.mrf.mxu0  ;;  %v1951_v26 = vmax.f32 %v1762_v14, 0.0  ;;  %v1953_v27 = vmax.f32 %v1875_v15, 0.0 }
 0x3d3   : > { %v1766_v12 = vadd.f32 %v1765_v9, %v8998_v36  ;;  %v1879_v13 = vadd.f32 %v1878_v10, %v9000_v37  ;;  %2267 = vmatprep.mubr.bf16.mxu1 %v2008_v3  ;;  %2364 = vmatprep.mubr.bf16.mxu0 %v2010_v5  ;;  %v1952_v24 = vmax.f32 %v1764_v8, 0.0  ;;  %v1954_v1 = vmax.f32 %v1877_v11, 0.0 }
 0x3d4   : > { %v1767_v16 = vpop.f32.mrf.mxu1  ;;  %v1880_v17 = vpop.f32.mrf.mxu0  ;;  %2268 = vmatmul.mubr.bf16.vlgmr.msra.gmra.mxu1 %v2007_v6  ;;  %2365 = vmatmul.mubr.bf16.vlgmr.msra.gmra.mxu0 %v2009_v7 }
 0x3d5   : > { %v1768_v18 = vadd.f32 %v1767_v16, %v8993_v32  ;;  %v1881_v19 = vadd.f32 %v1880_v17, %v8995_v34  ;;  %v1955_v20 = vmax.f32 %v1766_v12, 0.0  ;;  %v1957_v21 = vmax.f32 %v1879_v13, 0.0 }
 0x3d6   : > { %v1771_v22 = vpop.f32.mrf.mxu1  ;;  %v1884_v23 = vpop.f32.mrf.mxu0 }
 0x3d7   : > { %v1956_v63 = vmax.f32 %v1768_v18, 0.0  ;;  %v1958_v25 = vmax.f32 %v1881_v19, 0.0  ;;  %v2011_v39 = vpack.c.bf16 %v1955_v20, %v1951_v26  ;;  %v2013_v41 = vpack.c.bf16 %v1957_v21, %v1953_v27 }
 0x3d8   : > { %v1773_v28 = vpop.f32.mrf.mxu1  ;;  %v1886_v29 = vpop.f32.mrf.mxu0  ;;  %v1772_v48 = vadd.f32 %v1771_v22, %v8998_v36  ;;  %v1885_v38 = vadd.f32 %v1884_v23, %v9000_v37 }
 0x3d9   : > { %v2012_v30 = vpack.c.bf16 %v1956_v63, %v1952_v24  ;;  %v2014_v31 = vpack.c.bf16 %v1958_v25, %v1954_v1  ;;  %v1774_v43 = vadd.f32 %v1773_v28, %v8993_v32  ;;  %v1887_v46 = vadd.f32 %v1886_v29, %v8995_v34 }
 0x3da   : > { %v1775_v44 = vpop.f32.mrf.mxu1  ;;  %v1888_v45 = vpop.f32.mrf.mxu0  ;;  %v1959_v2 = vmax.f32 %v1772_v48, 0.0  ;;  %v1961_v51 = vmax.f32 %v1885_v38, 0.0 }
 0x3db   : > { %v1776_v47 = vadd.f32 %v1775_v44, %v8998_v36  ;;  %v1889_v40 = vadd.f32 %v1888_v45, %v9000_v37  ;;  %2275 = vmatprep.mubr.bf16.mxu1 %v2012_v30  ;;  %2372 = vmatprep.mubr.bf16.mxu0 %v2014_v31  ;;  %v1960_v59 = vmax.f32 %v1774_v43, 0.0  ;;  %v1962_v60 = vmax.f32 %v1887_v46, 0.0 }
 0x3dc   : > { %v1777_v42 = vpop.f32.mrf.mxu1  ;;  %v1890_v49 = vpop.f32.mrf.mxu0  ;;  %2276 = vmatmul.mubr.bf16.gmra.mxu1 %v2011_v39  ;;  %2373 = vmatmul.mubr.bf16.gmra.mxu0 %v2013_v41 }
 0x3dd   : > { %v1778_v50 = vadd.f32 %v1777_v42, %v8993_v32  ;;  %v1891_v53 = vadd.f32 %v1890_v49, %v8995_v34  ;;  %v1963_v55 = vmax.f32 %v1776_v47, 0.0  ;;  %v1965_v56 = vmax.f32 %v1889_v40, 0.0 }
 0x3de   : > { %v1781_v57 = vpop.f32.mrf.mxu1  ;;  %v1894_v58 = vpop.f32.mrf.mxu0 }
 0x3df   : > { %v1964_v61 = vmax.f32 %v1778_v50, 0.0  ;;  %v1966_v62 = vmax.f32 %v1891_v53, 0.0  ;;  %v2015_v6 = vpack.c.bf16 %v1963_v55, %v1959_v2  ;;  %v2017_v7 = vpack.c.bf16 %v1965_v56, %v1961_v51 }
 0x3e0   : > { %v1783_v52 = vpop.f32.mrf.mxu1  ;;  %v1896_v54 = vpop.f32.mrf.mxu0  ;;  %v1782_v14 = vadd.f32 %v1781_v57, %v8998_v36  ;;  %v1895_v15 = vadd.f32 %v1894_v58, %v9000_v37 }
 0x3e1   : > { %v2016_v3 = vpack.c.bf16 %v1964_v61, %v1960_v59  ;;  %v2018_v5 = vpack.c.bf16 %v1966_v62, %v1962_v60  ;;  %v1784_v8 = vadd.f32 %v1783_v52, %v8993_v32  ;;  %v1897_v11 = vadd.f32 %v1896_v54, %v8995_v34 }
 0x3e2   : > { %v1785_v9 = vpop.f32.mrf.mxu1  ;;  %v1898_v10 = vpop.f32.mrf.mxu0  ;;  %v1967_v26 = vmax.f32 %v1782_v14, 0.0  ;;  %v1969_v27 = vmax.f32 %v1895_v15, 0.0 }
 0x3e3   : > { %v1786_v12 = vadd.f32 %v1785_v9, %v8998_v36  ;;  %v1899_v13 = vadd.f32 %v1898_v10, %v9000_v37  ;;  %2283 = vmatprep.mubr.bf16.mxu1 %v2016_v3  ;;  %2380 = vmatprep.mubr.bf16.mxu0 %v2018_v5  ;;  %v1968_v24 = vmax.f32 %v1784_v8, 0.0  ;;  %v1970_v1 = vmax.f32 %v1897_v11, 0.0 }
 0x3e4   : > { %v1787_v16 = vpop.f32.mrf.mxu1  ;;  %v1900_v17 = vpop.f32.mrf.mxu0  ;;  %2284 = vmatmul.mubr.bf16.gmra.mxu1 %v2015_v6  ;;  %2381 = vmatmul.mubr.bf16.gmra.mxu0 %v2017_v7 }
 0x3e5   : > { %v1788_v18 = vadd.f32 %v1787_v16, %v8993_v32  ;;  %v1901_v19 = vadd.f32 %v1900_v17, %v8995_v34  ;;  %v1971_v20 = vmax.f32 %v1786_v12, 0.0  ;;  %v1973_v21 = vmax.f32 %v1899_v13, 0.0 }
 0x3e6   : > { %v1791_v22 = vpop.f32.mrf.mxu1  ;;  %v1904_v23 = vpop.f32.mrf.mxu0 }
 0x3e7   : > { %v1972_v63 = vmax.f32 %v1788_v18, 0.0  ;;  %v1974_v25 = vmax.f32 %v1901_v19, 0.0  ;;  %v2019_v39 = vpack.c.bf16 %v1971_v20, %v1967_v26  ;;  %v2021_v41 = vpack.c.bf16 %v1973_v21, %v1969_v27 }
 0x3e8   : > { %v1793_v28 = vpop.f32.mrf.mxu1  ;;  %v1906_v29 = vpop.f32.mrf.mxu0  ;;  %v1792_v48 = vadd.f32 %v1791_v22, %v8998_v36  ;;  %v1905_v38 = vadd.f32 %v1904_v23, %v9000_v37 }
 0x3e9   : > { %v2020_v30 = vpack.c.bf16 %v1972_v63, %v1968_v24  ;;  %v2022_v31 = vpack.c.bf16 %v1974_v25, %v1970_v1  ;;  %v1794_v43 = vadd.f32 %v1793_v28, %v8993_v32  ;;  %v1907_v46 = vadd.f32 %v1906_v29, %v8995_v34 }
 0x3ea   : > { %v1795_v44 = vpop.f32.mrf.mxu1  ;;  %v1908_v45 = vpop.f32.mrf.mxu0  ;;  %v1975_v2 = vmax.f32 %v1792_v48, 0.0  ;;  %v1977_v51 = vmax.f32 %v1905_v38, 0.0 }
 0x3eb   : > { %v1796_v47 = vadd.f32 %v1795_v44, %v8998_v36  ;;  %v1909_v40 = vadd.f32 %v1908_v45, %v9000_v37  ;;  %2291 = vmatprep.mubr.bf16.mxu1 %v2020_v30  ;;  %2388 = vmatprep.mubr.bf16.mxu0 %v2022_v31  ;;  %v1976_v59 = vmax.f32 %v1794_v43, 0.0  ;;  %v1978_v60 = vmax.f32 %v1907_v46, 0.0 }
 0x3ec   : > { %v1797_v42 = vpop.f32.mrf.mxu1  ;;  %v1910_v49 = vpop.f32.mrf.mxu0  ;;  %2292 = vmatmul.mubr.bf16.gmra.mxu1 %v2019_v39  ;;  %2389 = vmatmul.mubr.bf16.gmra.mxu0 %v2021_v41 }
 0x3ed   : > { %v1798_v50 = vadd.f32 %v1797_v42, %v8993_v32  ;;  %v1911_v53 = vadd.f32 %v1910_v49, %v8995_v34  ;;  %v1979_v55 = vmax.f32 %v1796_v47, 0.0  ;;  %v1981_v56 = vmax.f32 %v1909_v40, 0.0 }
 0x3ee   : > { %v1801_v57 = vpop.f32.mrf.mxu1  ;;  %v1914_v58 = vpop.f32.mrf.mxu0 }
 0x3ef   : > { %v1980_v61 = vmax.f32 %v1798_v50, 0.0  ;;  %v1982_v62 = vmax.f32 %v1911_v53, 0.0  ;;  %v2023_v6 = vpack.c.bf16 %v1979_v55, %v1975_v2  ;;  %v2025_v7 = vpack.c.bf16 %v1981_v56, %v1977_v51 }
 0x3f0   : > { %v1803_v52 = vpop.f32.mrf.mxu1  ;;  %v1916_v54 = vpop.f32.mrf.mxu0  ;;  %v1802_v14 = vadd.f32 %v1801_v57, %v8998_v36  ;;  %v1915_v15 = vadd.f32 %v1914_v58, %v9000_v37 }
 0x3f1   : > { %v2024_v3 = vpack.c.bf16 %v1980_v61, %v1976_v59  ;;  %v2026_v5 = vpack.c.bf16 %v1982_v62, %v1978_v60  ;;  %v1804_v8 = vadd.f32 %v1803_v52, %v8993_v32  ;;  %v1917_v11 = vadd.f32 %v1916_v54, %v8995_v34 }
 0x3f2   : > { %v1805_v9 = vpop.f32.mrf.mxu1  ;;  %v1918_v10 = vpop.f32.mrf.mxu0  ;;  %v1983_v26 = vmax.f32 %v1802_v14, 0.0  ;;  %v1985_v27 = vmax.f32 %v1915_v15, 0.0 }
 0x3f3   : > { %v1806_v12 = vadd.f32 %v1805_v9, %v8998_v36  ;;  %v1919_v13 = vadd.f32 %v1918_v10, %v9000_v37  ;;  %2299 = vmatprep.mubr.bf16.mxu1 %v2024_v3  ;;  %2396 = vmatprep.mubr.bf16.mxu0 %v2026_v5  ;;  %v1984_v24 = vmax.f32 %v1804_v8, 0.0  ;;  %v1986_v1 = vmax.f32 %v1917_v11, 0.0 }
 0x3f4   : > { %v1807_v16 = vpop.f32.mrf.mxu1  ;;  %v1920_v17 = vpop.f32.mrf.mxu0  ;;  %2300 = vmatmul.mubr.bf16.gmra.mxu1 %v2023_v6  ;;  %2397 = vmatmul.mubr.bf16.gmra.mxu0 %v2025_v7 }
 0x3f5   : > { %v1808_v18 = vadd.f32 %v1807_v16, %v8993_v32  ;;  %v1921_v19 = vadd.f32 %v1920_v17, %v8995_v34  ;;  %v1987_v20 = vmax.f32 %v1806_v12, 0.0  ;;  %v1989_v21 = vmax.f32 %v1919_v13, 0.0 }
 0x3f6   : > { %v1811_v22 = vpop.f32.mrf.mxu1  ;;  %v1924_v23 = vpop.f32.mrf.mxu0 }
 0x3f7   : > { %v1988_v63 = vmax.f32 %v1808_v18, 0.0  ;;  %v1990_v25 = vmax.f32 %v1921_v19, 0.0  ;;  %v2027_v39 = vpack.c.bf16 %v1987_v20, %v1983_v26  ;;  %v2029_v41 = vpack.c.bf16 %v1989_v21, %v1985_v27 }
 0x3f8   : > { %v1813_v28 = vpop.f32.mrf.mxu1  ;;  %v1926_v29 = vpop.f32.mrf.mxu0  ;;  %v1812_v48 = vadd.f32 %v1811_v22, %v8998_v36  ;;  %v1925_v38 = vadd.f32 %v1924_v23, %v9000_v37 }
 0x3f9   : > { %v2028_v30 = vpack.c.bf16 %v1988_v63, %v1984_v24  ;;  %v2030_v31 = vpack.c.bf16 %v1990_v25, %v1986_v1  ;;  %v1814_v43 = vadd.f32 %v1813_v28, %v8993_v32  ;;  %v1927_v46 = vadd.f32 %v1926_v29, %v8995_v34  ;;  %v8013_v29 = vld [vmem:[#allocation10] sm:$0xff] }
 0x3fa   : > { %v1815_v44 = vpop.f32.mrf.mxu1  ;;  %v1928_v45 = vpop.f32.mrf.mxu0  ;;  %v1991_v2 = vmax.f32 %v1812_v48, 0.0  ;;  %v1993_v51 = vmax.f32 %v1925_v38, 0.0 }
 0x3fb   : > { %v1816_v47 = vadd.f32 %v1815_v44, %v8998_v36  ;;  %v1929_v40 = vadd.f32 %v1928_v45, %v9000_v37  ;;  %2307 = vmatprep.mubr.bf16.mxu1 %v2028_v30  ;;  %2404 = vmatprep.mubr.bf16.mxu0 %v2030_v31  ;;  %v1992_v59 = vmax.f32 %v1814_v43, 0.0  ;;  %v1994_v60 = vmax.f32 %v1927_v46, 0.0 }
 0x3fc   : > { %v1817_v42 = vpop.f32.mrf.mxu1  ;;  %v1930_v49 = vpop.f32.mrf.mxu0  ;;  %2308 = vmatmul.mubr.bf16.gmra.mxu1 %v2027_v39  ;;  %2405 = vmatmul.mubr.bf16.gmra.mxu0 %v2029_v41 }
 0x3fd   : > { %v1818_v50 = vadd.f32 %v1817_v42, %v8993_v32  ;;  %v1931_v53 = vadd.f32 %v1930_v49, %v8995_v34  ;;  %v1995_v55 = vmax.f32 %v1816_v47, 0.0  ;;  %v1997_v56 = vmax.f32 %v1929_v40, 0.0 }
 0x3fe   : > { %v1821_v57 = vpop.f32.mrf.mxu1  ;;  %v1934_v58 = vpop.f32.mrf.mxu0 }
 0x3ff   : > { %v1996_v61 = vmax.f32 %v1818_v50, 0.0  ;;  %v1998_v62 = vmax.f32 %v1931_v53, 0.0  ;;  %v2031_v6 = vpack.c.bf16 %v1995_v55, %v1991_v2  ;;  %v2033_v7 = vpack.c.bf16 %v1997_v56, %v1993_v51 }
 0x400   : > { %v1823_v52 = vpop.f32.mrf.mxu1  ;;  %v1936_v54 = vpop.f32.mrf.mxu0  ;;  %v1822_v14 = vadd.f32 %v1821_v57, %v8998_v36  ;;  %v1935_v15 = vadd.f32 %v1934_v58, %v9000_v37 }
 0x401   : > { %v2032_v3 = vpack.c.bf16 %v1996_v61, %v1992_v59  ;;  %v2034_v5 = vpack.c.bf16 %v1998_v62, %v1994_v60  ;;  %v1824_v8 = vadd.f32 %v1823_v52, %v8993_v32  ;;  %v1937_v11 = vadd.f32 %v1936_v54, %v8995_v34 }
 0x402   : > { %v1825_v9 = vpop.f32.mrf.mxu1  ;;  %v1938_v10 = vpop.f32.mrf.mxu0  ;;  %v1999_v63 = vmax.f32 %v1822_v14, 0.0  ;;  %v2001_v25 = vmax.f32 %v1935_v15, 0.0 }
 0x403   : > { %v1826_v12 = vadd.f32 %v1825_v9, %v8998_v36  ;;  %v1939_v13 = vadd.f32 %v1938_v10, %v9000_v37  ;;  %2315 = vmatprep.mubr.bf16.mxu1 %v2032_v3  ;;  %2412 = vmatprep.mubr.bf16.mxu0 %v2034_v5  ;;  %v2000_v22 = vmax.f32 %v1824_v8, 0.0  ;;  %v2002_v23 = vmax.f32 %v1937_v11, 0.0 }
 0x404   : > { %v1827_v16 = vpop.f32.mrf.mxu1  ;;  %v1940_v17 = vpop.f32.mrf.mxu0  ;;  %2316 = vmatmul.mubr.bf16.gmra.mxu1 %v2031_v6  ;;  %2413 = vmatmul.mubr.bf16.gmra.mxu0 %v2033_v7 }
 0x405   : > { %v1828_v18 = vadd.f32 %v1827_v16, %v8993_v32  ;;  %v1941_v19 = vadd.f32 %v1940_v17, %v8995_v34  ;;  %v2003_v20 = vmax.f32 %v1826_v12, 0.0  ;;  %v2005_v21 = vmax.f32 %v1939_v13, 0.0 }
 0x406   : > { %v2041_v32 = vsub.s32 4, %v8564_v35 }
 0x407   : > { %v2004_v24 = vmax.f32 %v1828_v18, 0.0  ;;  %v2006_v1 = vmax.f32 %v1941_v19, 0.0  ;;  %v2035_v27 = vpack.c.bf16 %v2003_v20, %v1999_v63  ;;  %v2037_v37 = vpack.c.bf16 %v2005_v21, %v2001_v25 }
 0x408   : > { %v9069_v30 = vrot.slane %v8013_v29, %v2041_v32 }
 0x409   : > { %v2036_v26 = vpack.c.bf16 %v2004_v24, %v2000_v22  ;;  %v2038_v36 = vpack.c.bf16 %v2006_v1, %v2002_v23 }
 0x40b   : > { %2323 = vmatprep.mubr.bf16.mxu1 %v2036_v26  ;;  %2420 = vmatprep.mubr.bf16.mxu0 %v2038_v36 }
 0x40c   : > { %2324 = vmatmul.mubr.bf16.gmra.mxu1 %v2035_v27  ;;  %2421 = vmatmul.mubr.bf16.gmra.mxu0 %v2037_v37 }
 0x40d   : > { %7241 = vmatprep.mubr.msk.bf16.mxu1 %vm8248_vm0, %v12289_v0 }
 0x494   : > { %v7047_v34 = vpop.f32.mrf.mxu1  ;;  %v7111_v28 = vpop.f32.mrf.mxu0 }
 0x496   : > { %v7048_v31 = vpop.f32.mrf.mxu1  ;;  %v7112_v39 = vpop.f32.mrf.mxu0 }
 0x497   : > { %v7049_v41 = vadd.f32 %v7048_v31, %v7047_v34  ;;  %v7113_v46 = vadd.f32 %v7112_v39, %v7111_v28 }
 0x498   : > { %v7050_v43 = vpop.f32.mrf.mxu1  ;;  %v7114_v44 = vpop.f32.mrf.mxu0 }
 0x499   : > { %v2270_v45 = vadd.f32 %v7049_v41, %v9069_v30 }
 0x49a   : > { %v7051_v47 = vpop.f32.mrf.mxu1  ;;  %v7115_v40 = vpop.f32.mrf.mxu0 }
 0x49b   : > { %v9072_v48 = vadd.f32 %v7113_v46, %v2270_v45  ;;  %v7052_v38 = vadd.f32 %v7051_v47, %v7050_v43  ;;  %v7116_v55 = vadd.f32 %v7115_v40, %v7114_v44 }
 0x49c   : > { %v7053_v42 = vpop.f32.mrf.mxu1  ;;  %v7117_v49 = vpop.f32.mrf.mxu0 }
 0x49d   : > { %12492 = vst [vmem:[#allocation20_spill] sm:$0xff] %v9072_v48  ;;  %v2477_v50 = vand.u32 2147483647, %v9072_v48  ;;  %v2273_v53 = vadd.f32 %v7052_v38, %v9069_v30  ;;  %vm2445_vm2 = vcmp.ne.f32.partialorder %v9072_v48, %v9072_v48 }
 0x49e   : > { %v7054_v56 = vpop.f32.mrf.mxu1  ;;  %v7118_v57 = vpop.f32.mrf.mxu0 }
 0x49f   : > { %v2493_v58 = vsub.f32 0.0, %v2477_v50  ;;  %v9076_v59 = vadd.f32 %v7116_v55, %v2273_v53  ;;  %v7055_v60 = vadd.f32 %v7054_v56, %v7053_v42  ;;  %v7119_v54 = vadd.f32 %v7118_v57, %v7117_v49 }
 0x4a0   : > { %v7056_v61 = vpop.f32.mrf.mxu1  ;;  %v7120_v62 = vpop.f32.mrf.mxu0 }
 0x4a1   : > { %12493 = vst [vmem:[#allocation21_spill] sm:$0xff] %v9076_v59  ;;  %v2509_v2 = vmul.f32 1.442695, %v2493_v58  ;;  %v2478_v51 = vand.u32 2147483647, %v9076_v59  ;;  %v2278_v52 = vadd.f32 %v7055_v60, %v9069_v30  ;;  %vm2446_vm4 = vcmp.ne.f32.partialorder %v9076_v59, %v9076_v59 }
 0x4a2   : > { %v7057_v3 = vpop.f32.mrf.mxu1  ;;  %v7121_v5 = vpop.f32.mrf.mxu0 }
 0x4a3   : > { %7547 = vpow2.f32 %v2509_v2  ;;  %v2494_v6 = vsub.f32 0.0, %v2478_v51  ;;  %v9080_v7 = vadd.f32 %v7119_v54, %v2278_v52  ;;  %v7058_v8 = vadd.f32 %v7057_v3, %v7056_v61 }
 0x4a4   : > { %v7059_v9 = vpop.f32.mrf.mxu1  ;;  %v7123_v10 = vpop.f32.mrf.mxu0  ;;  %v7122_v14 = vadd.f32 %v7121_v5, %v7120_v62 }
 0x4a5   : > { %12494 = vst [vmem:[#allocation22_spill] sm:$0xff] %v9080_v7  ;;  %v2511_v11 = vmul.f32 1.442695, %v2494_v6  ;;  %v2479_v12 = vand.u32 2147483647, %v9080_v7  ;;  %v2281_v13 = vadd.f32 %v7058_v8, %v9069_v30  ;;  %vm2447_vm6 = vcmp.ne.f32.partialorder %v9080_v7, %v9080_v7 }
 0x4a6   : > { %v7060_v15 = vpop.f32.mrf.mxu1  ;;  %v7124_v16 = vpop.f32.mrf.mxu0 }
 0x4a7   : > { %7549 = vpow2.f32 %v2511_v11  ;;  %v2495_v17 = vsub.f32 0.0, %v2479_v12  ;;  %v9084_v18 = vadd.f32 %v7122_v14, %v2281_v13  ;;  %v7061_v19 = vadd.f32 %v7060_v15, %v7059_v9 }
 0x4a8   : > { %v7062_v20 = vpop.f32.mrf.mxu1  ;;  %v7126_v21 = vpop.f32.mrf.mxu0  ;;  %v7125_v1 = vadd.f32 %v7124_v16, %v7123_v10  ;;  %v2429_v9 = vmax.f32 %v9072_v48, 0.0  ;;  %v2430_v11 = vmax.f32 %v9076_v59, 0.0  ;;  %v2431_v12 = vmax.f32 %v9080_v7, 0.0 }
 0x4a9   : > { %12495 = vst [vmem:[#allocation23_spill] sm:$0xff] %v9084_v18  ;;  %v2513_v22 = vmul.f32 1.442695, %v2495_v17  ;;  %v2480_v23 = vand.u32 2147483647, %v9084_v18  ;;  %v2286_v24 = vadd.f32 %v7061_v19, %v9069_v30  ;;  %vm2448_vm8 = vcmp.ne.f32.partialorder %v9084_v18, %v9084_v18 }
 0x4aa   : > { %v7063_v63 = vpop.f32.mrf.mxu1  ;;  %v7127_v25 = vpop.f32.mrf.mxu0 }
 0x4ab   : > { %7551 = vpow2.f32 %v2513_v22  ;;  %v2496_v26 = vsub.f32 0.0, %v2480_v23  ;;  %v9088_v36 = vadd.f32 %v7125_v1, %v2286_v24  ;;  %v7064_v27 = vadd.f32 %v7063_v63, %v7062_v20 }
 0x4ac   : > { %v7065_v37 = vpop.f32.mrf.mxu1  ;;  %v7129_v32 = vpop.f32.mrf.mxu0  ;;  %v7128_v31 = vadd.f32 %v7127_v25, %v7126_v21  ;;  %v2432_v22 = vmax.f32 %v9084_v18, 0.0 }
 0x4ad   : > { %12496 = vst [vmem:[#allocation24_spill] sm:$0xff] %v9088_v36  ;;  %v2515_v34 = vmul.f32 1.442695, %v2496_v26  ;;  %v2481_v28 = vand.u32 2147483647, %v9088_v36  ;;  %v2289_v29 = vadd.f32 %v7064_v27, %v9069_v30  ;;  %vm2449_vm10 = vcmp.ne.f32.partialorder %v9088_v36, %v9088_v36 }
 0x4ae   : > { %v7066_v39 = vpop.f32.mrf.mxu1  ;;  %v7130_v41 = vpop.f32.mrf.mxu0 }
 0x4af   : > { %7553 = vpow2.f32 %v2515_v34  ;;  %v2497_v43 = vsub.f32 0.0, %v2481_v28  ;;  %v9092_v44 = vadd.f32 %v7128_v31, %v2289_v29  ;;  %v7067_v45 = vadd.f32 %v7066_v39, %v7065_v37 }
 0x4b0   : > { %v9094_v46 = vpop.eup %7547  ;;  %v7131_v47 = vadd.f32 %v7130_v41, %v7129_v32  ;;  %v7068_v40 = vpop.f32.mrf.mxu1  ;;  %v2433_v32 = vmax.f32 %v9088_v36, 0.0 }
 0x4b1   : > { %12497 = vst [vmem:[#allocation25_spill] sm:$0xff] %v9092_v44  ;;  %v7132_v38 = vpop.f32.mrf.mxu0  ;;  %v2517_v42 = vmul.f32 1.442695, %v2497_v43  ;;  %v2482_v49 = vand.u32 2147483647, %v9092_v44  ;;  %v2294_v50 = vadd.f32 %v7067_v45, %v9069_v30  ;;  %v2541_v53 = vadd.f32 1.0, %v9094_v46 }
 0x4b2   : > { %v7069_v55 = vpop.f32.mrf.mxu1  ;;  %v2544_v10 = vmul.f32 -0.5, %v9094_v46  ;;  %v2547_v20 = vand.u32 2147483647, %v9094_v46  ;;  %v2434_v34 = vmax.f32 %v9092_v44, 0.0  ;;  %vm2450_vm12 = vcmp.ne.f32.partialorder %v9092_v44, %v9092_v44 }
 0x4b3   : > { %v7133_v56 = vpop.f32.mrf.mxu0  ;;  %7555 = vpow2.f32 %v2517_v42  ;;  %v2498_v57 = vsub.f32 0.0, %v2482_v49  ;;  %v9099_v58 = vadd.f32 %v7131_v47, %v2294_v50  ;;  %v7070_v60 = vadd.f32 %v7069_v55, %v7068_v40 }
 0x4b4   : > { %v9101_v61 = vpop.eup %7549  ;;  %v7134_v62 = vadd.f32 %v7133_v56, %v7132_v38  ;;  %v7071_v2 = vpop.f32.mrf.mxu1  ;;  %7557 = vlog2.f32 %v2541_v53  ;;  %v2545_v27 = vadd.f32 1.0, %v2544_v10  ;;  %vm9127_vm1 = vcmp.lt.f32.partialorder %v2547_v20, 0.0004427343 }
 0x4b5   : > { %12498 = vst [vmem:[#allocation26_spill] sm:$0xff] %v9099_v58  ;;  %v7135_v51 = vpop.f32.mrf.mxu0  ;;  %v2519_v52 = vmul.f32 1.442695, %v2498_v57  ;;  %v2483_v54 = vand.u32 2147483647, %v9099_v58  ;;  %v2297_v3 = vadd.f32 %v7070_v60, %v9069_v30  ;;  %v2550_v5 = vadd.f32 1.0, %v9101_v61 }
 0x4b6   : > { %v7072_v6 = vpop.f32.mrf.mxu1  ;;  %v2553_v21 = vmul.f32 -0.5, %v9101_v61  ;;  %v2556_v38 = vand.u32 2147483647, %v9101_v61  ;;  %v2546_v57 = vmul.f32 %v9094_v46, %v2545_v27  ;;  %vm2451_vm14 = vcmp.ne.f32.partialorder %v9099_v58, %v9099_v58 }
 0x4b7   : > { %v7136_v8 = vpop.f32.mrf.mxu0  ;;  %7559 = vpow2.f32 %v2519_v52  ;;  %v2499_v13 = vsub.f32 0.0, %v2483_v54  ;;  %v9110_v14 = vadd.f32 %v7134_v62, %v2297_v3  ;;  %v7073_v15 = vadd.f32 %v7072_v6, %v7071_v2 }
 0x4b8   : > { %v9112_v16 = vpop.eup %7551  ;;  %v7074_v17 = vpop.f32.mrf.mxu1  ;;  %7561 = vlog2.f32 %v2550_v5  ;;  %v7137_v1 = vadd.f32 %v7136_v8, %v7135_v51  ;;  %v2554_v40 = vadd.f32 1.0, %v2553_v21  ;;  %vm9145_vm3 = vcmp.lt.f32.partialorder %v2556_v38, 0.0004427343 }
 0x4b9   : > { %12499 = vst [vmem:[#allocation27_spill] sm:$0xff] %v9110_v14  ;;  %v7138_v19 = vpop.f32.mrf.mxu0  ;;  %v2484_v23 = vand.u32 2147483647, %v9110_v14  ;;  %v2302_v24 = vadd.f32 %v7073_v15, %v9069_v30  ;;  %v2559_v63 = vadd.f32 1.0, %v9112_v16  ;;  %v2562_v37 = vmul.f32 -0.5, %v9112_v16 }
 0x4ba   : > { %v7075_v25 = vpop.f32.mrf.mxu1  ;;  %v2521_v28 = vmul.f32 1.442695, %v2499_v13  ;;  %v2565_v62 = vand.u32 2147483647, %v9112_v16  ;;  %v2555_v46 = vmul.f32 %v9101_v61, %v2554_v40  ;;  %vm2452_vm15 = vcmp.ne.f32.partialorder %v9110_v14, %v9110_v14 }
 0x4bb   : > { %v7139_v26 = vpop.f32.mrf.mxu0  ;;  %v2500_v29 = vsub.f32 0.0, %v2484_v23  ;;  %v9123_v31 = vadd.f32 %v7137_v1, %v2302_v24  ;;  %v7076_v39 = vadd.f32 %v7075_v25, %v7074_v17  ;;  %7563 = vlog2.f32 %v2559_v63 }
 0x4bc   : > { %v9125_v41 = vpop.eup %7553  ;;  %v7077_v43 = vpop.f32.mrf.mxu1  ;;  %v7140_v50 = vadd.f32 %v7139_v26, %v7138_v19  ;;  %v2563_v60 = vadd.f32 1.0, %v2562_v37  ;;  %7565 = vpow2.f32 %v2521_v28  ;;  %vm9160_vm5 = vcmp.lt.f32.partialorder %v2565_v62, 0.0004427343 }
 0x4bd   : > { %12500 = vst [vmem:[#allocation28_spill] sm:$0xff] %v9123_v31  ;;  %v7141_v45 = vpop.f32.mrf.mxu0  ;;  %v2485_v42 = vand.u32 2147483647, %v9123_v31  ;;  %v2305_v49 = vadd.f32 %v7076_v39, %v9069_v30  ;;  %v2568_v53 = vadd.f32 1.0, %v9125_v41  ;;  %v2571_v2 = vmul.f32 -0.5, %v9125_v41 }
 0x4be   : > { %v7078_v55 = vpop.f32.mrf.mxu1  ;;  %v2523_v51 = vmul.f32 1.442695, %v2500_v29  ;;  %v9153_v1 = vmul.f32 %v9112_v16, %v2563_v60  ;;  %v2574_v37 = vand.u32 2147483647, %v9125_v41 }
 0x4bf   : > { %v7142_v56 = vpop.f32.mrf.mxu0  ;;  %v9138_v52 = vadd.f32 %v7140_v50, %v2305_v49  ;;  %v7079_v54 = vadd.f32 %v7078_v55, %v7077_v43  ;;  %v2501_v5 = vsub.f32 0.0, %v2485_v42  ;;  %7567 = vlog2.f32 %v2568_v53 }
 0x4c0   : > { %v9142_v3 = vpop.eup %7555  ;;  %v7080_v6 = vpop.f32.mrf.mxu1  ;;  %v7143_v19 = vadd.f32 %v7142_v56, %v7141_v45  ;;  %v2572_v61 = vadd.f32 1.0, %v2571_v2  ;;  %7569 = vpow2.f32 %v2523_v51  ;;  %vm9181_vm7 = vcmp.lt.f32.partialorder %v2574_v37, 0.0004427343 }
 0x4c1   : > { %12503 = vst [vmem:[#allocation29_spill] sm:$0xff] %v9138_v52  ;;  %v7144_v8 = vpop.f32.mrf.mxu0  ;;  %v7558_v13 = vpop.eup %7557  ;;  %v2486_v15 = vand.u32 2147483647, %v9138_v52  ;;  %v2310_v17 = vadd.f32 %v7079_v54, %v9069_v30  ;;  %v2577_v20 = vadd.f32 1.0, %v9142_v3  ;;  %v2580_v63 = vmul.f32 -0.5, %v9142_v3 }
 0x4c2   : > { %v7081_v21 = vpop.f32.mrf.mxu1  ;;  %v2543_v24 = vmul.f32 0.6931472, %v7558_v13  ;;  %v2525_v16 = vmul.f32 1.442695, %v2501_v5  ;;  %v9174_v60 = vmul.f32 %v9125_v41, %v2572_v61 }
 0x4c3   : > { %v7145_v23 = vpop.f32.mrf.mxu0  ;;  %v9156_v25 = vadd.f32 %v7143_v19, %v2310_v17  ;;  %v7082_v26 = vadd.f32 %v7081_v21, %v7080_v6  ;;  %v2502_v29 = vsub.f32 0.0, %v2486_v15  ;;  %7571 = vlog2.f32 %v2577_v20 }
 0x4c4   : > { %v9165_v28 = vpop.eup %7559  ;;  %v7083_v39 = vpop.f32.mrf.mxu1  ;;  %v2549_v45 = vsel %vm9127_vm1, %v2546_v57, %v2543_v24  ;;  %v7146_v49 = vadd.f32 %v7145_v23, %v7144_v8  ;;  %v2581_v62 = vadd.f32 1.0, %v2580_v63  ;;  %vm2453_vm1 = vcmp.ne.f32.partialorder %v9123_v31, %v9123_v31 }
 0x4c5   : > { %12506 = vst [vmem:[#allocation30_spill] sm:$0xff] %v9156_v25  ;;  %v7147_v43 = vpop.f32.mrf.mxu0  ;;  %v7562_v40 = vpop.eup %7561  ;;  %v2487_v38 = vand.u32 2147483647, %v9156_v25  ;;  %v2313_v42 = vadd.f32 %v7082_v26, %v9069_v30  ;;  %v2685_v50 = vadd.f32 %v2549_v45, %v2429_v9  ;;  %v2586_v47 = vadd.f32 1.0, %v9165_v28 }
 0x4c6   : > { %v7084_v53 = vpop.f32.mrf.mxu1  ;;  %v2552_v56 = vmul.f32 0.6931472, %v7562_v40  ;;  %v2583_v9 = vand.u32 2147483647, %v9142_v3  ;;  %v2527_v5 = vmul.f32 1.442695, %v2502_v29  ;;  %v9201_v10 = vmul.f32 %v9142_v3, %v2581_v62 }
 0x4c7   : > { %v7148_v55 = vpop.f32.mrf.mxu0  ;;  %v2503_v57 = vsub.f32 0.0, %v2487_v38  ;;  %v9177_v2 = vadd.f32 %v7146_v49, %v2313_v42  ;;  %v7085_v51 = vadd.f32 %v7084_v53, %v7083_v39  ;;  %v9190_v8 = vsel %vm2445_vm2, %v9072_v48, %v2685_v50 }
 0x4c8   : > { %v7086_v6 = vpop.f32.mrf.mxu1  ;;  %12512 = vst [vmem:[#allocation32_spill] sm:$0xff] %v9190_v8  ;;  %v2558_v13 = vsel %vm9145_vm3, %v2555_v46, %v2552_v56  ;;  %7573 = vlog2.f32 %v2586_v47  ;;  %v7564_v15 = vpop.eup %7563  ;;  %v7149_v20 = vadd.f32 %v7148_v55, %v7147_v43  ;;  %v2861_v21 = vmul.f32 %v9190_v8, %v9190_v8 }
 0x4c9   : > { %12509 = vst [vmem:[#allocation31_spill] sm:$0xff] %v9177_v2  ;;  %v7150_v41 = vpop.f32.mrf.mxu0  ;;  %v2488_v17 = vand.u32 2147483647, %v9177_v2  ;;  %v2318_v19 = vadd.f32 %v7085_v51, %v9069_v30  ;;  %7575 = vpow2.f32 %v2525_v16  ;;  %v2686_v61 = vadd.f32 %v2558_v13, %v2430_v11  ;;  %v9212_v29 = vpop.eup %7565 }
 0x4ca   : > { %v7087_v23 = vpop.f32.mrf.mxu1  ;;  %v2561_v63 = vmul.f32 0.6931472, %v7564_v15  ;;  %v2529_v46 = vmul.f32 1.442695, %v2503_v57  ;;  %2893 = vrot.lane.b32.xlu0 %v2861_v21, %s8251_s5  ;;  %vm9208_vm9 = vcmp.lt.f32.partialorder %v2583_v9, 0.0004427343  ;;  %7577 = vpow2.f32 %v2527_v5 }
 0x4cb   : > { %v7151_v24 = vpop.f32.mrf.mxu0  ;;  %v9203_v26 = vadd.f32 %v7149_v20, %v2318_v19  ;;  %v7088_v37 = vadd.f32 %v7087_v23, %v7086_v6  ;;  %v2504_v11 = vsub.f32 0.0, %v2488_v17  ;;  %v9218_v43 = vsel %vm2446_vm4, %v9076_v59, %v2686_v61 }
 0x4cc   : > { %v7089_v3 = vpop.f32.mrf.mxu1  ;;  %v2567_v45 = vsel %vm9160_vm5, %v9153_v1, %v2561_v63  ;;  %v7568_v40 = vpop.eup %7567  ;;  %v7152_v49 = vadd.f32 %v7151_v24, %v7150_v41  ;;  %v2862_v50 = vmul.f32 %v9218_v43, %v9218_v43  ;;  %v2589_v47 = vmul.f32 -0.5, %v9165_v28 }
 0x4cd   : > { %12513 = vst [vmem:[#allocation33_spill] sm:$0xff] %v9203_v26  ;;  %v7153_v39 = vpop.f32.mrf.mxu0  ;;  %v2489_v38 = vand.u32 2147483647, %v9203_v26  ;;  %v2321_v42 = vadd.f32 %v7088_v37, %v9069_v30  ;;  %v2687_v56 = vadd.f32 %v2567_v45, %v2431_v12  ;;  %v2570_v62 = vmul.f32 0.6931472, %v7568_v40  ;;  %v9236_v9 = vpop.eup %7569 }
 0x4ce   : > { %v7090_v53 = vpop.f32.mrf.mxu1  ;;  %v2592_v27 = vand.u32 2147483647, %v9165_v28  ;;  %7579 = vpow2.f32 %v2529_v46  ;;  %2895 = vrot.lane.b32.xlu0 %v2862_v50, %s8251_s5  ;;  %v2531_v5 = vmul.f32 1.442695, %v2504_v11  ;;  %v2595_v15 = vadd.f32 1.0, %v9212_v29 }
 0x4cf   : > { %v7154_v55 = vpop.f32.mrf.mxu0  ;;  %v2505_v1 = vsub.f32 0.0, %v2489_v38  ;;  %v9231_v57 = vadd.f32 %v7152_v49, %v2321_v42  ;;  %v7091_v51 = vadd.f32 %v7090_v53, %v7089_v3  ;;  %v9242_v41 = vsel %vm2447_vm6, %v9080_v7, %v2687_v56 }
 0x4d0   : > { %v7092_v6 = vpop.f32.mrf.mxu1  ;;  %12517 = vst [vmem:[#allocation35_spill] sm:$0xff] %v9242_v41  ;;  %v2576_v13 = vsel %vm9181_vm7, %v9174_v60, %v2570_v62  ;;  %v7572_v17 = vpop.eup %7571  ;;  %v7155_v21 = vadd.f32 %v7154_v55, %v7153_v39  ;;  %v2863_v23 = vmul.f32 %v9242_v41, %v9242_v41  ;;  %v2590_v37 = vadd.f32 1.0, %v2589_v47 }
 0x4d1   : > { %12516 = vst [vmem:[#allocation34_spill] sm:$0xff] %v9231_v57  ;;  %v7156_v12 = vpop.f32.mrf.mxu0  ;;  %v2490_v19 = vand.u32 2147483647, %v9231_v57  ;;  %v2326_v20 = vadd.f32 %v7091_v51, %v9069_v30  ;;  %v2688_v63 = vadd.f32 %v2576_v13, %v2432_v22  ;;  %v2579_v46 = vmul.f32 0.6931472, %v7572_v17 }
 0x4d2   : > { %v7093_v24 = vpop.f32.mrf.mxu1  ;;  %7581 = vlog2.f32 %v2595_v15  ;;  %v2533_v60 = vmul.f32 1.442695, %v2505_v1  ;;  %2897 = vrot.lane.b32.xlu1 %v2863_v23, %s8251_s5  ;;  %v2591_v56 = vmul.f32 %v9165_v28, %v2590_v37  ;;  %vm2593_vm11 = vcmp.lt.f32.partialorder %v2592_v27, 0.0004427343 }
 0x4d3   : > { %v7157_v61 = vpop.f32.mrf.mxu0  ;;  %v2506_v54 = vsub.f32 0.0, %v2490_v19  ;;  %v9254_v11 = vadd.f32 %v7155_v21, %v2326_v20  ;;  %v7094_v3 = vadd.f32 %v7093_v24, %v7092_v6  ;;  %7583 = vpow2.f32 %v2531_v5 }
 0x4d4   : > { %v7158_v39 = vadd.f32 %v7157_v61, %v7156_v12  ;;  %v9261_v45 = vsel %vm2448_vm8, %v9084_v18, %v2688_v63  ;;  %v2585_v22 = vsel %vm9208_vm9, %v9201_v10, %v2579_v46  ;;  %7585 = vpow2.f32 %v2533_v60 }
 0x4d5   : > { %12518 = vst [vmem:[#allocation36_spill] sm:$0xff] %v9254_v11  ;;  %12519 = vst [vmem:[#allocation37_spill] sm:$0xff] %v9261_v45  ;;  %v7574_v40 = vpop.eup %7573  ;;  %v2535_v38 = vmul.f32 1.442695, %v2506_v54  ;;  %v2491_v42 = vand.u32 2147483647, %v9254_v11  ;;  %v2329_v49 = vadd.f32 %v7094_v3, %v9069_v30  ;;  %v2864_v50 = vmul.f32 %v9261_v45, %v9261_v45 }
 0x4d6   : > { %v2689_v53 = vadd.f32 %v2585_v22, %v2433_v32  ;;  %v2588_v55 = vmul.f32 0.6931472, %v7574_v40  ;;  %v9273_v62 = vpop.eup %7575  ;;  %v2598_v30 = vmul.f32 -0.5, %v9212_v29  ;;  %v2604_v28 = vadd.f32 1.0, %v9236_v9 }
 0x4d7   : > { %v2507_v10 = vsub.f32 0.0, %v2491_v42  ;;  %v9275_v16 = vadd.f32 %v7158_v39, %v2329_v49  ;;  %2899 = vrot.lane.b32.xlu1 %v2864_v50, %s8251_s5  ;;  %7587 = vpow2.f32 %v2535_v38  ;;  %v9286_v27 = vpop.eup %7577  ;;  %v2613_v20 = vadd.f32 1.0, %v9273_v62 }
 0x4d8   : > { %v9283_v32 = vsel %vm2449_vm10, %v9088_v36, %v2689_v53  ;;  %v2594_v47 = vsel %vm2593_vm11, %v2591_v56, %v2588_v55  ;;  %7589 = vlog2.f32 %v2604_v28  ;;  %v2599_v19 = vadd.f32 1.0, %v2598_v30 }
 0x4d9   : > { %12520 = vst [vmem:[#allocation38_spill] sm:$0xff] %v9275_v16  ;;  %v2537_v1 = vmul.f32 1.442695, %v2507_v10  ;;  %v2492_v51 = vand.u32 2147483647, %v9275_v16  ;;  %v2865_v5 = vmul.f32 %v9283_v32, %v9283_v32  ;;  %v2690_v6 = vadd.f32 %v2594_v47, %v2434_v34 }
 0x4da   : > { %v2601_v21 = vand.u32 2147483647, %v9212_v29  ;;  %v2622_v23 = vadd.f32 1.0, %v9286_v27  ;;  %v2600_v63 = vmul.f32 %v9212_v29, %v2599_v19  ;;  %v2607_v46 = vmul.f32 -0.5, %v9236_v9 }
 0x4db   : > { %v2508_v12 = vsub.f32 0.0, %v2492_v51  ;;  %2901 = vrot.lane.b32.xlu0 %v2865_v5, %s8251_s5  ;;  %v9297_v13 = vsel %vm2450_vm12, %v9092_v44, %v2690_v6  ;;  %v9299_v15 = vpop.eup %7579  ;;  %7591 = vpow2.f32 %v2537_v1  ;;  %v2435_v60 = vmax.f32 %v9099_v58, 0.0 }
 0x4dc   : > { %12521 = vst [vmem:[#allocation39_spill] sm:$0xff] %v9297_v13  ;;  %v2866_v17 = vmul.f32 %v9297_v13, %v9297_v13  ;;  %7593 = vlog2.f32 %v2613_v20  ;;  %vm2602_vm13 = vcmp.lt.f32.partialorder %v2601_v21, 0.0004427343  ;;  %v2631_v54 = vadd.f32 1.0, %v9299_v15 }
 0x4dd   : > { %v2539_v34 = vmul.f32 1.442695, %v2508_v12  ;;  %v2608_v40 = vadd.f32 1.0, %v2607_v46  ;;  %v2616_v29 = vmul.f32 -0.5, %v9273_v62  ;;  %v2610_v50 = vand.u32 2147483647, %v9236_v9 }
 0x4de   : > { %2903 = vrot.lane.b32.xlu1 %v2866_v17, %s8251_s5  ;;  %v2436_v55 = vmax.f32 %v9110_v14, 0.0  ;;  %v2625_v56 = vmul.f32 -0.5, %v9286_v27  ;;  %v2437_v30 = vmax.f32 %v9123_v31, 0.0  ;;  %v2619_v47 = vand.u32 2147483647, %v9273_v62 }
 0x4df   : > { %v7582_v24 = vpop.eup %7581  ;;  %7595 = vpow2.f32 %v2539_v34  ;;  %v2609_v51 = vmul.f32 %v9236_v9, %v2608_v40  ;;  %v2617_v5 = vadd.f32 1.0, %v2616_v29  ;;  %v2628_v6 = vand.u32 2147483647, %v9286_v27 }
 0x4e0   : > { %v2597_v61 = vmul.f32 0.6931472, %v7582_v24  ;;  %7597 = vlog2.f32 %v2622_v23  ;;  %v9309_v37 = vpop.eup %7583  ;;  %vm2611_vm2 = vcmp.lt.f32.partialorder %v2610_v50, 0.0004427343  ;;  %v2634_v12 = vmul.f32 -0.5, %v9299_v15 }
 0x4e1   : > { %7599 = vlog2.f32 %v2631_v54  ;;  %v9313_v22 = vpop.eup %7585  ;;  %v2640_v38 = vadd.f32 1.0, %v9309_v37  ;;  %v2438_v34 = vmax.f32 %v9138_v52, 0.0  ;;  %vm2454_vm3 = vcmp.ne.f32.partialorder %v9138_v52, %v9138_v52 }
 0x4e2   : > { %v2603_v3 = vsel %vm2602_vm13, %v2600_v63, %v2597_v61  ;;  %v2649_v28 = vadd.f32 1.0, %v9313_v22  ;;  %v2626_v9 = vadd.f32 1.0, %v2625_v56  ;;  %vm9346_vm4 = vcmp.lt.f32.partialorder %v2619_v47, 0.0004427343 }
 0x4e3   : > { %v2691_v39 = vadd.f32 %v2603_v3, %v2435_v60  ;;  %7601 = vlog2.f32 %v2640_v38  ;;  %v2643_v61 = vmul.f32 -0.5, %v9309_v37  ;;  %v2618_v60 = vmul.f32 %v9273_v62, %v2617_v5 }
 0x4e4   : > { %v9319_v42 = vpop.eup %7587  ;;  %7603 = vlog2.f32 %v2649_v28  ;;  %vm9354_vm5 = vcmp.lt.f32.partialorder %v2628_v6, 0.0004427343  ;;  %v2439_v3 = vmax.f32 %v9156_v25, 0.0  ;;  %vm2455_vm6 = vcmp.ne.f32.partialorder %v9156_v25, %v9156_v25 }
 0x4e5   : > { %v9322_v49 = vsel %vm2451_vm14, %v9099_v58, %v2691_v39  ;;  %v7590_v10 = vpop.eup %7589  ;;  %v2658_v17 = vadd.f32 1.0, %v9319_v42  ;;  %v2635_v29 = vadd.f32 1.0, %v2634_v12  ;;  %v2637_v38 = vand.u32 2147483647, %v9299_v15 }
 0x4e6   : > { %v2867_v53 = vmul.f32 %v9322_v49, %v9322_v49  ;;  %v2606_v1 = vmul.f32 0.6931472, %v7590_v10  ;;  %v2627_v56 = vmul.f32 %v9286_v27, %v2626_v9  ;;  %v2644_v47 = vadd.f32 1.0, %v2643_v61 }
 0x4e7   : > { %7605 = vlog2.f32 %v2658_v17  ;;  %v2652_v28 = vmul.f32 -0.5, %v9313_v22  ;;  %v2646_v5 = vand.u32 2147483647, %v9309_v37  ;;  %v2661_v6 = vmul.f32 -0.5, %v9319_v42 }
 0x4e8   : > { %2905 = vrot.lane.b32.xlu0 %v2867_v53, %s8251_s5  ;;  %v9341_v19 = vpop.eup %7591  ;;  %v2612_v20 = vsel %vm2611_vm2, %v2609_v51, %v2606_v1  ;;  %vm2638_vm7 = vcmp.lt.f32.partialorder %v2637_v38, 0.0004427343  ;;  %vm2456_vm8 = vcmp.ne.f32.partialorder %v9177_v2, %v9177_v2  ;;  %vm2457_vm12 = vcmp.ne.f32.partialorder %v9203_v26, %v9203_v26 }
 0x4e9   : > { %v7594_v21 = vpop.eup %7593  ;;  %v2692_v23 = vadd.f32 %v2612_v20, %v2436_v55  ;;  %v2667_v62 = vadd.f32 1.0, %v9341_v19  ;;  %v2636_v20 = vmul.f32 %v9299_v15, %v2635_v29  ;;  %v2440_v29 = vmax.f32 %v9177_v2, 0.0 }
 0x4ea   : > { %v2615_v46 = vmul.f32 0.6931472, %v7594_v21  ;;  %v2655_v21 = vand.u32 2147483647, %v9313_v22  ;;  %vm2647_vm9 = vcmp.lt.f32.partialorder %v2646_v5, 0.0004427343  ;;  %vm2458_vm13 = vcmp.ne.f32.partialorder %v9231_v57, %v9231_v57 }
 0x4eb   : > { %v9363_v40 = vsel %vm2452_vm15, %v9110_v14, %v2692_v23  ;;  %7607 = vlog2.f32 %v2667_v62  ;;  %v2670_v38 = vmul.f32 -0.5, %v9341_v19  ;;  %vm2459_vm15 = vcmp.ne.f32.partialorder %v9254_v11, %v9254_v11 }
 0x4ec   : > { %v9351_v63 = vpop.eup %7595  ;;  %12526 = vst [vmem:[#allocation40_spill] sm:$0xff] %v9363_v40  ;;  %v2868_v50 = vmul.f32 %v9363_v40, %v9363_v40  ;;  %v2621_v53 = vsel %vm9346_vm4, %v2618_v60, %v2615_v46  ;;  %v2653_v46 = vadd.f32 1.0, %v2652_v28  ;;  %vm2656_vm10 = vcmp.lt.f32.partialorder %v2655_v21, 0.0004427343 }
 0x4ed   : > { %v7598_v39 = vpop.eup %7597  ;;  %v2693_v10 = vadd.f32 %v2621_v53, %v2437_v30  ;;  %v2676_v12 = vadd.f32 1.0, %v9351_v63  ;;  %v2664_v53 = vand.u32 2147483647, %v9319_v42  ;;  %v2679_v5 = vmul.f32 -0.5, %v9351_v63 }
 0x4ee   : > { %v2624_v55 = vmul.f32 0.6931472, %v7598_v39  ;;  %v7600_v1 = vpop.eup %7599  ;;  %2907 = vrot.lane.b32.xlu1 %v2868_v50, %s8251_s5  ;;  %v2662_v39 = vadd.f32 1.0, %v2661_v6  ;;  %v2441_v50 = vmax.f32 %v9203_v26, 0.0  ;;  %vm2460_vm2 = vcmp.ne.f32.partialorder %v9275_v16, %v9275_v16 }
 0x4ef   : > { %v9385_v27 = vsel %vm2453_vm1, %v9123_v31, %v2693_v10  ;;  %v2633_v17 = vmul.f32 0.6931472, %v7600_v1  ;;  %7609 = vlog2.f32 %v2676_v12  ;;  %v2442_v1 = vmax.f32 %v9231_v57, 0.0 }
 0x4f0   : > { %v2630_v51 = vsel %vm9354_vm5, %v2627_v56, %v2624_v55  ;;  %v2869_v9 = vmul.f32 %v9385_v27, %v9385_v27  ;;  %v7602_v23 = vpop.eup %7601  ;;  %vm2665_vm11 = vcmp.lt.f32.partialorder %v2664_v53, 0.0004427343 }
 0x4f1   : > { %v2694_v30 = vadd.f32 %v2630_v51, %v2438_v34  ;;  %v2639_v61 = vsel %vm2638_vm7, %v2636_v20, %v2633_v17  ;;  %v2645_v34 = vmul.f32 %v9309_v37, %v2644_v47  ;;  %v2642_v54 = vmul.f32 0.6931472, %v7602_v23  ;;  %v7604_v62 = vpop.eup %7603 }
 0x4f2   : > { %2909 = vrot.lane.b32.xlu0 %v2869_v9, %s8251_s5  ;;  %v2695_v60 = vadd.f32 %v2639_v61, %v2439_v3  ;;  %v2651_v10 = vmul.f32 0.6931472, %v7604_v62  ;;  %v2654_v47 = vmul.f32 %v9313_v22, %v2653_v46  ;;  %v2663_v51 = vmul.f32 %v9319_v42, %v2662_v39 }
 0x4f3   : > { %v9395_v24 = vsel %vm2454_vm3, %v9138_v52, %v2694_v30  ;;  %v2648_v3 = vsel %vm2647_vm9, %v2645_v34, %v2642_v54  ;;  %v2671_v17 = vadd.f32 1.0, %v2670_v38  ;;  %v2673_v42 = vand.u32 2147483647, %v9341_v19 }
 0x4f4   : > { %12527 = vst [vmem:[#allocation41_spill] sm:$0xff] %v9395_v24  ;;  %v2870_v15 = vmul.f32 %v9395_v24, %v9395_v24  ;;  %v9410_v37 = vsel %vm2455_vm6, %v9156_v25, %v2695_v60  ;;  %v2696_v56 = vadd.f32 %v2648_v3, %v2440_v29  ;;  %v7606_v28 = vpop.eup %7605  ;;  %v2657_v12 = vsel %vm2656_vm10, %v2654_v47, %v2651_v10 }
 0x4f5   : > { %12528 = vst [vmem:[#allocation42_spill] sm:$0xff] %v9410_v37  ;;  %v2871_v55 = vmul.f32 %v9410_v37, %v9410_v37  ;;  %v2660_v30 = vmul.f32 0.6931472, %v7606_v28  ;;  %v2697_v20 = vadd.f32 %v2657_v12, %v2441_v50  ;;  %v2680_v34 = vadd.f32 1.0, %v2679_v5 }
 0x4f6   : > { %2911 = vrot.lane.b32.xlu1 %v2870_v15, %s8251_s5  ;;  %v9425_v6 = vsel %vm2456_vm8, %v9177_v2, %v2696_v56  ;;  %v2672_v60 = vmul.f32 %v9341_v19, %v2671_v17  ;;  %v2682_v54 = vand.u32 2147483647, %v9351_v63  ;;  %v2443_v29 = vmax.f32 %v9254_v11, 0.0 }
 0x4f7   : > { %2913 = vrot.lane.b32.xlu0 %v2871_v55, %s8251_s5  ;;  %12529 = vst [vmem:[#allocation43_spill] sm:$0xff] %v9425_v6  ;;  %v2872_v22 = vmul.f32 %v9425_v6, %v9425_v6  ;;  %v2666_v9 = vsel %vm2665_vm11, %v2663_v51, %v2660_v30  ;;  %v9434_v23 = vsel %vm2457_vm12, %v9203_v26, %v2697_v20  ;;  %vm2674_vm14 = vcmp.lt.f32.partialorder %v2673_v42, 0.0004427343 }
 0x4f8   : > { %v7608_v21 = vpop.eup %7607  ;;  %12530 = vst [vmem:[#allocation44_spill] sm:$0xff] %v9434_v23  ;;  %v2698_v61 = vadd.f32 %v2666_v9, %v2442_v1  ;;  %v2873_v46 = vmul.f32 %v9434_v23, %v9434_v23  ;;  %v2681_v55 = vmul.f32 %v9351_v63, %v2680_v34  ;;  %v2444_v19 = vmax.f32 %v9275_v16, 0.0 }
 0x4f9   : > { %v2669_v15 = vmul.f32 0.6931472, %v7608_v21  ;;  %vm2683_vm1 = vcmp.lt.f32.partialorder %v2682_v54, 0.0004427343  ;;  %v2829_v51 = vadd.f32 0.01, %v9190_v8 }
 0x4fa   : > { %2915 = vrot.lane.b32.xlu1 %v2872_v22, %s8251_s5  ;;  %v9443_v39 = vsel %vm2458_vm13, %v9231_v57, %v2698_v61  ;;  %v2830_v12 = vadd.f32 0.01, %v9218_v43  ;;  %v2831_v42 = vadd.f32 0.01, %v9242_v41 }
 0x4fb   : > { %12531 = vst [vmem:[#allocation45_spill] sm:$0xff] %v9443_v39  ;;  %2917 = vrot.lane.b32.xlu0 %v2873_v46, %s8251_s5  ;;  %v2874_v62 = vmul.f32 %v9443_v39, %v9443_v39  ;;  %v2675_v3 = vsel %vm2674_vm14, %v2672_v60, %v2669_v15  ;;  %v2845_v5 = vmul.f32 2.0, %v2829_v51  ;;  %v2832_v46 = vadd.f32 0.01, %v9261_v45 }
 0x4fc   : > { %v7610_v38 = vpop.eup %7609  ;;  %v2699_v50 = vadd.f32 %v2675_v3, %v2443_v29  ;;  %v2846_v20 = vmul.f32 2.0, %v2830_v12  ;;  %v2847_v34 = vmul.f32 2.0, %v2831_v42  ;;  %v2833_v3 = vadd.f32 0.01, %v9283_v32 }
 0x4fd   : > { %v2678_v53 = vmul.f32 0.6931472, %v7610_v38 }
 0x4fe   : > { %2919 = vrot.lane.b32.xlu1 %v2874_v62, %s8251_s5  ;;  %v9455_v56 = vsel %vm2459_vm15, %v9254_v11, %v2699_v50  ;;  %v2848_v62 = vmul.f32 2.0, %v2832_v46 }
 0x4ff   : > { %12532 = vst [vmem:[#allocation46_spill] sm:$0xff] %v9455_v56  ;;  %v2684_v10 = vsel %vm2683_vm1, %v2681_v55, %v2678_v53  ;;  %v2875_v47 = vmul.f32 %v9455_v56, %v9455_v56 }
 0x500   : > { %v2700_v28 = vadd.f32 %v2684_v10, %v2444_v19  ;;  %v2849_v19 = vmul.f32 2.0, %v2833_v3  ;;  %v2834_v10 = vadd.f32 0.01, %v9297_v13 }
 0x501   : > { %2921 = vrot.lane.b32.xlu0 %v2875_v47, %s8251_s5 }
 0x502   : > { %v9463_v63 = vsel %vm2460_vm2, %v9275_v16, %v2700_v28  ;;  %v2850_v12 = vmul.f32 2.0, %v2834_v10 }
 0x503   : > { %12533 = vst [vmem:[#allocation47_spill] sm:$0xff] %v9463_v63  ;;  %v2876_v1 = vmul.f32 %v9463_v63, %v9463_v63 }
 0x505   : > { %2923 = vrot.lane.b32.xlu1 %v2876_v1, %s8251_s5  ;;  %3757 = vrot.lane.b32.xlu0 %v9072_v48, %s8252_s11 }
 0x509   : > { %3759 = vrot.lane.b32.xlu1 %v9076_v59, %s8252_s11  ;;  %3761 = vrot.lane.b32.xlu0 %v9080_v7, %s8252_s11 }
 0x50d   : > { %3763 = vrot.lane.b32.xlu1 %v9084_v18, %s8252_s11  ;;  %3765 = vrot.lane.b32.xlu0 %v9088_v36, %s8252_s11 }
 0x511   : > { %3767 = vrot.lane.b32.xlu1 %v9092_v44, %s8252_s11  ;;  %3769 = vrot.lane.b32.xlu0 %v9099_v58, %s8252_s11 }
 0x515   : > { %3771 = vrot.lane.b32.xlu1 %v9110_v14, %s8252_s11  ;;  %3773 = vrot.lane.b32.xlu0 %v9123_v31, %s8252_s11  ;;  %v519_v14 = vld [vmem:[%s10088_s20 + $0x18] sm:$0xff] }
 0x519   : > { %3775 = vrot.lane.b32.xlu1 %v9138_v52, %s8252_s11  ;;  %3777 = vrot.lane.b32.xlu0 %v9156_v25, %s8252_s11 }
 0x51d   : > { %3779 = vrot.lane.b32.xlu1 %v9177_v2, %s8252_s11  ;;  %3781 = vrot.lane.b32.xlu0 %v9203_v26, %s8252_s11 }
 0x521   : > { %3783 = vrot.lane.b32.xlu1 %v9231_v57, %s8252_s11  ;;  %3785 = vrot.lane.b32.xlu0 %v9254_v11, %s8252_s11 }
 0x525   : > { %3787 = vrot.lane.b32.xlu1 %v9275_v16, %s8252_s11 }
 0x53c   : > { %v2894_v30 = vpop.permute.xlu0 %2893 }
 0x53d   : > { %v2941_v17 = vmul.f32 %v2894_v30, %v2845_v5 }
 0x53f   : > { %v2973_v22 = vmul.f32 %v2941_v17, %v2941_v17 }
 0x540   : > { %v2896_v9 = vpop.permute.xlu0 %2895 }
 0x541   : > { %v2989_v21 = vadd.f32 1.0, %v2973_v22  ;;  %v2942_v61 = vmul.f32 %v2896_v9, %v2846_v20 }
 0x543   : > { %7611 = vrsqrt.f32 %v2989_v21  ;;  %v2974_v15 = vmul.f32 %v2942_v61, %v2942_v61  ;;  %vm3007_vm3 = vcmp.eq.f32.partialorder %v2989_v21, inf  ;;  %v3010_v46 = vand.u32 2147483648, %v2989_v21 }
 0x544   : > { %v2898_v60 = vpop.permute.xlu1 %2897  ;;  %vm3009_vm4 = vcmp.eq.f32.partialorder %v2989_v21, 0.0  ;;  %v2958_v33 = vadd.f32 1.0, %v2942_v61 }
 0x545   : > { %v9504_v54 = vmul.f32 %v2898_v60, %v2847_v34  ;;  %v2990_v29 = vadd.f32 1.0, %v2974_v15  ;;  %v2835_v34 = vadd.f32 0.01, %v9322_v49  ;;  %v2836_v15 = vadd.f32 0.01, %v9363_v40 }
 0x546   : > { %v2837_v60 = vadd.f32 0.01, %v9385_v27 }
 0x547   : > { %v2975_v38 = vmul.f32 %v9504_v54, %v9504_v54  ;;  %7613 = vrsqrt.f32 %v2990_v29  ;;  %vm3014_vm5 = vcmp.eq.f32.partialorder %v2990_v29, inf  ;;  %vm3016_vm6 = vcmp.eq.f32.partialorder %v2990_v29, 0.0 }
 0x549   : > { %v2900_v50 = vpop.permute.xlu1 %2899  ;;  %v9509_v53 = vadd.f32 1.0, %v2975_v38  ;;  %v2957_v38 = vadd.f32 1.0, %v2941_v17  ;;  %v9538_v17 = vmul.f32 2.0, %v2837_v60 }
 0x54a   : > { %v9511_v55 = vmul.f32 %v2900_v50, %v2848_v62 }
 0x54b   : > { %7615 = vrsqrt.f32 %v9509_v53  ;;  %vm3021_vm7 = vcmp.eq.f32.partialorder %v9509_v53, inf  ;;  %v3024_v61 = vand.u32 2147483648, %v9509_v53  ;;  %vm3023_vm8 = vcmp.eq.f32.partialorder %v9509_v53, 0.0 }
 0x54c   : > { %v2976_v47 = vmul.f32 %v9511_v55, %v9511_v55 }
 0x54d   : > { %v2902_v28 = vpop.permute.xlu0 %2901 }
 0x54e   : > { %v9517_v1 = vmul.f32 %v2902_v28, %v2849_v19  ;;  %v9519_v51 = vadd.f32 1.0, %v2976_v47  ;;  %v2851_v47 = vmul.f32 2.0, %v2835_v34  ;;  %v2838_v28 = vadd.f32 0.01, %v9395_v24 }
 0x550   : > { %v2977_v5 = vmul.f32 %v9517_v1, %v9517_v1  ;;  %v2904_v30 = vpop.permute.xlu1 %2903  ;;  %v7612_v22 = vpop.eup %7611  ;;  %7617 = vrsqrt.f32 %v9519_v51  ;;  %vm3028_vm9 = vcmp.eq.f32.partialorder %v9519_v51, inf  ;;  %vm3030_vm10 = vcmp.eq.f32.partialorder %v9519_v51, 0.0 }
 0x551   : > { %v3006_v20 = vmul.f32 %v7612_v22, %v2989_v21  ;;  %v9526_v9 = vmul.f32 %v2904_v30, %v2850_v12  ;;  %v2852_v22 = vmul.f32 2.0, %v2836_v15  ;;  %v2841_v15 = vadd.f32 0.01, %v9434_v23 }
 0x552   : > { %v9524_v42 = vadd.f32 1.0, %v2977_v5  ;;  %v2839_v5 = vadd.f32 0.01, %v9410_v37  ;;  %v2961_v4 = vadd.f32 1.0, %v9517_v1  ;;  %v2844_v1 = vadd.f32 0.01, %v9463_v63 }
 0x553   : > { %v3008_v62 = vsel %vm3007_vm3, %v2989_v21, %v3006_v20  ;;  %v2978_v50 = vmul.f32 %v9526_v9, %v9526_v9  ;;  %v3017_v20 = vand.u32 2147483648, %v2990_v29 }
 0x554   : > { %7619 = vrsqrt.f32 %v9524_v42  ;;  %v3011_v3 = vsel %vm3009_vm4, %v3010_v46, %v3008_v62  ;;  %v7614_v19 = vpop.eup %7613  ;;  %v2840_v46 = vadd.f32 0.01, %v9425_v6  ;;  %vm3035_vm11 = vcmp.eq.f32.partialorder %v9524_v42, inf }
 0x555   : > { %v3117_v10 = vsub.f32 %v2957_v38, %v3011_v3  ;;  %v3013_v12 = vmul.f32 %v7614_v19, %v2990_v29  ;;  %v9536_v30 = vadd.f32 1.0, %v2978_v50  ;;  %vm3037_vm12 = vcmp.eq.f32.partialorder %v9524_v42, 0.0 }
 0x557   : > { %v9540_v21 = vmul.f32 0.5, %v3117_v10  ;;  %v3015_v38 = vsel %vm3014_vm5, %v2990_v29, %v3013_v12  ;;  %7621 = vrsqrt.f32 %v9536_v30  ;;  %v2959_v10 = vadd.f32 1.0, %v9504_v54 }
 0x558   : > { %v7616_v62 = vpop.eup %7615  ;;  %v3018_v34 = vsel %vm3016_vm6, %v3017_v20, %v3015_v38  ;;  %v2842_v54 = vadd.f32 0.01, %v9443_v39  ;;  %vm3042_vm13 = vcmp.eq.f32.partialorder %v9536_v30, inf  ;;  %vm3044_vm14 = vcmp.eq.f32.partialorder %v9536_v30, 0.0 }
 0x559   : > { %12534 = vst [vmem:[#allocation48_spill] sm:$0xff] %v9540_v21  ;;  %v3020_v3 = vmul.f32 %v7616_v62, %v9509_v53  ;;  %3389 = vrot.lane.b32.xlu0 %v9540_v21, %s8253_s28  ;;  %v3149_v60 = vsub.f32 1.0, %v9540_v21  ;;  %v3118_v19 = vsub.f32 %v2958_v33, %v3018_v34  ;;  %v9563_v34 = vmul.f32 2.0, %v2838_v28 }
 0x55a   : > { %v2906_v50 = vpop.permute.xlu0 %2905 }
 0x55b   : > { %v9551_v29 = vmul.f32 %v2906_v50, %v2851_v47  ;;  %v3022_v12 = vsel %vm3021_vm7, %v9509_v53, %v3020_v3  ;;  %v9557_v20 = vmul.f32 %v3149_v60, %v9540_v21  ;;  %v9559_v62 = vmul.f32 0.5, %v3118_v19 }
 0x55c   : > { %v3025_v38 = vsel %vm3023_vm8, %v3024_v61, %v3022_v12  ;;  %v9565_v50 = vmul.f32 2.0, %v2839_v5  ;;  %v9574_v60 = vmul.f32 2.0, %v2840_v46  ;;  %v3031_v5 = vand.u32 2147483648, %v9519_v51 }
 0x55d   : > { %12535 = vst [vmem:[#allocation49_spill] sm:$0xff] %v9559_v62  ;;  %v2979_v33 = vmul.f32 %v9551_v29, %v9551_v29  ;;  %v7618_v0 = vpop.eup %7617  ;;  %v3119_v47 = vsub.f32 %v2959_v10, %v3025_v38  ;;  %7623 = vrsqrt.f32 %v9557_v20  ;;  %3391 = vrot.lane.b32.xlu1 %v9559_v62, %s8253_s28  ;;  %v3150_v28 = vsub.f32 1.0, %v9559_v62 }
 0x55e   : > { %v3027_v53 = vmul.f32 %v7618_v0, %v9519_v51  ;;  %v9581_v61 = vmul.f32 2.0, %v2841_v15  ;;  %v2960_v0 = vadd.f32 1.0, %v9511_v55  ;;  %v3038_v55 = vand.u32 2147483648, %v9524_v42 }
 0x55f   : > { %v9570_v3 = vadd.f32 1.0, %v2979_v33  ;;  %v9577_v19 = vmul.f32 0.5, %v3119_v47  ;;  %v9592_v15 = vmul.f32 %v3150_v28, %v9559_v62  ;;  %v2843_v28 = vadd.f32 0.01, %v9455_v56 }
 0x560   : > { %v3029_v12 = vsel %vm3028_vm9, %v9519_v51, %v3027_v53  ;;  %v2908_v33 = vpop.permute.xlu1 %2907  ;;  %vm3183_vm15 = vcmp.eq.f32.partialorder %v9557_v20, inf  ;;  %vm3185_vm1 = vcmp.eq.f32.partialorder %v9557_v20, 0.0 }
 0x561   : > { %12536 = vst [vmem:[#allocation50_spill] sm:$0xff] %v9577_v19  ;;  %v7620_v10 = vpop.eup %7619  ;;  %7625 = vrsqrt.f32 %v9570_v3  ;;  %v3032_v46 = vsel %vm3030_vm10, %v3031_v5, %v3029_v12  ;;  %3393 = vrot.lane.b32.xlu0 %v9577_v19, %s8253_s28  ;;  %v2948_v53 = vmul.f32 %v2908_v33, %v2852_v22  ;;  %v3151_v51 = vsub.f32 1.0, %v9577_v19 }
 0x562   : > { %v3034_v38 = vmul.f32 %v7620_v10, %v9524_v42  ;;  %v3120_v47 = vsub.f32 %v2960_v0, %v3032_v46  ;;  %v9599_v10 = vmul.f32 2.0, %v2842_v54  ;;  %7627 = vrsqrt.f32 %v9592_v15 }
 0x563   : > { %v2980_v35 = vmul.f32 %v2948_v53, %v2948_v53  ;;  %v9606_v22 = vmul.f32 %v3151_v51, %v9577_v19  ;;  %v3045_v33 = vand.u32 2147483648, %v9536_v30  ;;  %v9631_v51 = vmul.f32 2.0, %v2843_v28 }
 0x564   : > { %v3036_v5 = vsel %vm3035_vm11, %v9524_v42, %v3034_v38  ;;  %v9601_v12 = vmul.f32 0.5, %v3120_v47  ;;  %v7622_v0 = vpop.eup %7621  ;;  %v2910_v62 = vpop.permute.xlu0 %2909  ;;  %vm3049_vm2 = vcmp.eq.f32.partialorder %v9570_v3, inf  ;;  %vm3051_vm3 = vcmp.eq.f32.partialorder %v9570_v3, 0.0 }
 0x565   : > { %v3039_v21 = vsel %vm3037_vm12, %v3038_v55, %v3036_v5  ;;  %v3041_v42 = vmul.f32 %v7622_v0, %v9536_v30  ;;  %v9610_v54 = vadd.f32 1.0, %v2980_v35  ;;  %v9613_v38 = vmul.f32 %v2910_v62, %v9538_v17 }
 0x566   : > { %12537 = vst [vmem:[#allocation51_spill] sm:$0xff] %v9601_v12  ;;  %v3121_v46 = vsub.f32 %v2961_v4, %v3039_v21  ;;  %3395 = vrot.lane.b32.xlu1 %v9601_v12, %s8253_s28  ;;  %v3152_v4 = vsub.f32 1.0, %v9601_v12  ;;  %7629 = vrsqrt.f32 %v9606_v22  ;;  %v2962_v35 = vadd.f32 1.0, %v9526_v9 }
 0x567   : > { %v3043_v55 = vsel %vm3042_vm13, %v9536_v30, %v3041_v42  ;;  %7631 = vrsqrt.f32 %v9610_v54  ;;  %v2981_v62 = vmul.f32 %v9613_v38, %v9613_v38  ;;  %v9633_v5 = vmul.f32 2.0, %v2844_v1 }
 0x568   : > { %v9618_v21 = vmul.f32 0.5, %v3121_v46  ;;  %v2912_v47 = vpop.permute.xlu1 %2911  ;;  %v3046_v17 = vsel %vm3044_vm14, %v3045_v33, %v3043_v55  ;;  %v2963_v9 = vadd.f32 1.0, %v9551_v29  ;;  %v9638_v19 = vmul.f32 %v3152_v4, %v9601_v12 }
 0x569   : > { %v3122_v46 = vsub.f32 %v2962_v35, %v3046_v17  ;;  %v2950_v42 = vmul.f32 %v2912_v47, %v9563_v34  ;;  %v2914_v30 = vpop.permute.xlu0 %2913  ;;  %v9640_v33 = vadd.f32 1.0, %v2981_v62  ;;  %v3186_v29 = vand.u32 2147483648, %v9557_v20 }
 0x56a   : > { %12538 = vst [vmem:[#allocation52_spill] sm:$0xff] %v9618_v21  ;;  %3397 = vrot.lane.b32.xlu0 %v9618_v21, %s8253_s28  ;;  %v7624_v0 = vpop.eup %7623  ;;  %v2951_v55 = vmul.f32 %v2914_v30, %v9565_v50  ;;  %v3052_v4 = vand.u32 2147483648, %v9570_v3  ;;  %v9659_v62 = vadd.f32 1.0, %v2948_v53  ;;  %vm3190_vm4 = vcmp.eq.f32.partialorder %v9592_v15, inf }
 0x56b   : > { %v3182_v16 = vmul.f32 %v7624_v0, %v9557_v20  ;;  %v9645_v28 = vmul.f32 0.5, %v3122_v46  ;;  %v2982_v1 = vmul.f32 %v2950_v42, %v2950_v42  ;;  %7633 = vrsqrt.f32 %v9640_v33 }
 0x56c   : > { %v2916_v50 = vpop.permute.xlu1 %2915  ;;  %v2983_v17 = vmul.f32 %v2951_v55, %v2951_v55  ;;  %7635 = vrsqrt.f32 %v9638_v19  ;;  %vm3197_vm5 = vcmp.eq.f32.partialorder %v9606_v22, inf  ;;  %vm3056_vm6 = vcmp.eq.f32.partialorder %v9610_v54, inf }
 0x56d   : > { %12539 = vst [vmem:[#allocation53_spill] sm:$0xff] %v9645_v28  ;;  %v9654_v35 = vadd.f32 1.0, %v2982_v1  ;;  %3399 = vrot.lane.b32.xlu1 %v9645_v28, %s8253_s28  ;;  %v9662_v0 = vmul.f32 %v2916_v50, %v9574_v60  ;;  %v3184_v46 = vsel %vm3183_vm15, %v9557_v20, %v3182_v16  ;;  %v2918_v1 = vpop.permute.xlu0 %2917  ;;  %vm3058_vm7 = vcmp.eq.f32.partialorder %v9610_v54, 0.0 }
 0x56e   : > { %v7626_v34 = vpop.eup %7625  ;;  %v9676_v60 = vadd.f32 1.0, %v2983_v17  ;;  %vm3192_vm8 = vcmp.eq.f32.partialorder %v9592_v15, 0.0  ;;  %v9682_v12 = vmul.f32 %v2918_v1, %v9581_v61  ;;  %vm3199_vm9 = vcmp.eq.f32.partialorder %v9606_v22, 0.0 }
 0x56f   : > { %v3048_v47 = vmul.f32 %v7626_v34, %v9570_v3  ;;  %7637 = vrsqrt.f32 %v9654_v35  ;;  %v3193_v34 = vand.u32 2147483648, %v9592_v15  ;;  %v7628_v16 = vpop.eup %7627  ;;  %v9689_v17 = vadd.f32 1.0, %v9613_v38 }
 0x570   : > { %7639 = vrsqrt.f32 %v9676_v60  ;;  %v9694_v61 = vadd.f32 1.0, %v2950_v42  ;;  %v2985_v20 = vmul.f32 %v9682_v12, %v9682_v12  ;;  %vm3063_vm10 = vcmp.eq.f32.partialorder %v9640_v33, inf }
 0x571   : > { %v3050_v30 = vsel %vm3049_vm2, %v9570_v3, %v3048_v47  ;;  %v2984_v47 = vmul.f32 %v9662_v0, %v9662_v0  ;;  %v3187_v3 = vsel %vm3185_vm1, %v3186_v29, %v3184_v46  ;;  %v3153_v29 = vsub.f32 1.0, %v9618_v21 }
 0x572   : > { %v3053_v53 = vsel %vm3051_vm3, %v3052_v4, %v3050_v30  ;;  %v2920_v4 = vpop.permute.xlu1 %2919  ;;  %v3059_v30 = vand.u32 2147483648, %v9610_v54  ;;  %3309 = vrot.lane.b32.xlu0 %v3187_v3, %s8253_s28  ;;  %v3189_v3 = vmul.f32 %v7628_v16, %v9592_v15  ;;  %vm3065_vm11 = vcmp.eq.f32.partialorder %v9640_v33, 0.0 }
 0x573   : > { %v3123_v50 = vsub.f32 %v2963_v9, %v3053_v53  ;;  %v3200_v9 = vand.u32 2147483648, %v9606_v22  ;;  %v7630_v53 = vpop.eup %7629  ;;  %v9696_v1 = vadd.f32 1.0, %v2984_v47  ;;  %v9704_v38 = vmul.f32 %v2920_v4, %v9599_v10  ;;  %v2922_v47 = vpop.permute.xlu0 %2921 }
 0x574   : > { %v7632_v46 = vpop.eup %7631  ;;  %v3196_v2 = vmul.f32 %v7630_v53, %v9606_v22  ;;  %v3066_v48 = vand.u32 2147483648, %v9640_v33  ;;  %v9715_v52 = vadd.f32 1.0, %v2985_v20  ;;  %v3191_v4 = vsel %vm3190_vm4, %v9592_v15, %v3189_v3 }
 0x575   : > { %v9701_v57 = vmul.f32 0.5, %v3123_v50  ;;  %v3055_v42 = vmul.f32 %v7632_v46, %v9610_v54  ;;  %7641 = vrsqrt.f32 %v9696_v1  ;;  %v9713_v50 = vadd.f32 1.0, %v2951_v55 }
 0x576   : > { %v2986_v10 = vmul.f32 %v9704_v38, %v9704_v38  ;;  %v9728_v53 = vmul.f32 %v2922_v47, %v9631_v51  ;;  %v3198_v55 = vsel %vm3197_vm5, %v9606_v22, %v3196_v2  ;;  %7643 = vrsqrt.f32 %v9715_v52 }
 0x577   : > { %12540 = vst [vmem:[#allocation54_spill] sm:$0xff] %v9701_v57  ;;  %3401 = vrot.lane.b32.xlu0 %v9701_v57, %s8253_s28  ;;  %v3057_v16 = vsel %vm3056_vm6, %v9610_v54, %v3055_v42  ;;  %vm3204_vm12 = vcmp.eq.f32.partialorder %v9638_v19, inf  ;;  %vm3206_vm13 = vcmp.eq.f32.partialorder %v9638_v19, 0.0  ;;  %vm3070_vm14 = vcmp.eq.f32.partialorder %v9654_v35, inf  ;;  %v2924_v2 = vpop.permute.xlu1 %2923 }
 0x578   : > { %v3060_v20 = vsel %vm3058_vm7, %v3059_v30, %v3057_v16  ;;  %v7634_v46 = vpop.eup %7633  ;;  %v9740_v51 = vadd.f32 1.0, %v2986_v10  ;;  %v3194_v3 = vsel %vm3192_vm8, %v3193_v34, %v3191_v4  ;;  %vm3072_vm15 = vcmp.eq.f32.partialorder %v9654_v35, 0.0 }
 0x579   : > { %v3124_v42 = vsub.f32 %v9659_v62, %v3060_v20  ;;  %v7636_v47 = vpop.eup %7635  ;;  %v3062_v54 = vmul.f32 %v7634_v46, %v9640_v33  ;;  %3311 = vrot.lane.b32.xlu1 %v3194_v3, %s8253_s28  ;;  %v2987_v30 = vmul.f32 %v9728_v53, %v9728_v53  ;;  %v3201_v62 = vsel %vm3199_vm9, %v3200_v9, %v3198_v55 }
 0x57a   : > { %v3073_v10 = vand.u32 2147483648, %v9654_v35  ;;  %vm3077_vm1 = vcmp.eq.f32.partialorder %v9676_v60, inf  ;;  %v9754_v15 = vadd.f32 1.0, %v9662_v0  ;;  %7645 = vrsqrt.f32 %v9740_v51 }
 0x57b   : > { %3313 = vrot.lane.b32.xlu0 %v3201_v62, %s8253_s28  ;;  %v9758_v16 = vmul.f32 0.5, %v3124_v42  ;;  %v3064_v4 = vsel %vm3063_vm10, %v9640_v33, %v3062_v54  ;;  %v9763_v22 = vadd.f32 1.0, %v2987_v30  ;;  %v9766_v9 = vmul.f32 %v2924_v2, %v9633_v5 }
 0x57c   : > { %v7638_v34 = vpop.eup %7637  ;;  %v3067_v0 = vsel %vm3065_vm11, %v3066_v48, %v3064_v4  ;;  %v3203_v20 = vmul.f32 %v7636_v47, %v9638_v19  ;;  %v9773_v46 = vmul.f32 %v3153_v29, %v9618_v21  ;;  %vm3079_vm2 = vcmp.eq.f32.partialorder %v9676_v60, 0.0 }
 0x57d   : > { %12541 = vst [vmem:[#allocation55_spill] sm:$0xff] %v9758_v16  ;;  %v3069_v55 = vmul.f32 %v7638_v34, %v9654_v35  ;;  %v3125_v42 = vsub.f32 %v9689_v17, %v3067_v0  ;;  %v3080_v3 = vand.u32 2147483648, %v9676_v60  ;;  %7647 = vrsqrt.f32 %v9763_v22  ;;  %3403 = vrot.lane.b32.xlu1 %v9758_v16, %s8253_s28  ;;  %v7640_v5 = vpop.eup %7639 }
 0x57e   : > { %v9785_v33 = vadd.f32 1.0, %v9682_v12  ;;  %v2988_v17 = vmul.f32 %v9766_v9, %v9766_v9  ;;  %v3207_v29 = vand.u32 2147483648, %v9638_v19  ;;  %v3076_v54 = vmul.f32 %v7640_v5, %v9676_v60 }
 0x57f   : > { %v3071_v48 = vsel %vm3070_vm14, %v9654_v35, %v3069_v55  ;;  %v9790_v2 = vmul.f32 0.5, %v3125_v42  ;;  %v3205_v30 = vsel %vm3204_vm12, %v9638_v19, %v3203_v20  ;;  %7649 = vrsqrt.f32 %v9773_v46 }
 0x580   : > { %v3074_v47 = vsel %vm3072_vm15, %v3073_v10, %v3071_v48  ;;  %v9799_v12 = vadd.f32 1.0, %v2988_v17  ;;  %v3208_v34 = vsel %vm3206_vm13, %v3207_v29, %v3205_v30  ;;  %v3078_v35 = vsel %vm3077_vm1, %v9676_v60, %v3076_v54 }
 0x581   : > { %12542 = vst [vmem:[#allocation56_spill] sm:$0xff] %v9790_v2  ;;  %v3126_v62 = vsub.f32 %v9694_v61, %v3074_v47  ;;  %vm3084_vm3 = vcmp.eq.f32.partialorder %v9696_v1, inf  ;;  %vm3086_vm4 = vcmp.eq.f32.partialorder %v9696_v1, 0.0  ;;  %v3087_v10 = vand.u32 2147483648, %v9696_v1  ;;  %3315 = vrot.lane.b32.xlu1 %v3208_v34, %s8253_s28  ;;  %3405 = vrot.lane.b32.xlu0 %v9790_v2, %s8253_s28 }
 0x582   : > { %v7642_v4 = vpop.eup %7641  ;;  %v3081_v19 = vsel %vm3079_vm2, %v3080_v3, %v3078_v35  ;;  %v9817_v0 = vadd.f32 1.0, %v9704_v38  ;;  %7651 = vrsqrt.f32 %v9799_v12  ;;  %vm3091_vm5 = vcmp.eq.f32.partialorder %v9715_v52, inf }
 0x583   : > { %v3083_v61 = vmul.f32 %v7642_v4, %v9696_v1  ;;  %v9820_v55 = vmul.f32 0.5, %v3126_v62  ;;  %v3127_v20 = vsub.f32 %v9713_v50, %v3081_v19  ;;  %vm3093_vm6 = vcmp.eq.f32.partialorder %v9715_v52, 0.0  ;;  %v7644_v42 = vpop.eup %7643 }
 0x584   : > { %v3154_v60 = vsub.f32 1.0, %v9645_v28  ;;  %v3155_v3 = vsub.f32 1.0, %v9701_v57  ;;  %v3156_v38 = vsub.f32 1.0, %v9758_v16  ;;  %v3090_v17 = vmul.f32 %v7644_v42, %v9715_v52 }
 0x585   : > { %12543 = vst [vmem:[#allocation57_spill] sm:$0xff] %v9820_v55  ;;  %v3085_v5 = vsel %vm3084_vm3, %v9696_v1, %v3083_v61  ;;  %v3094_v50 = vand.u32 2147483648, %v9715_v52  ;;  %3407 = vrot.lane.b32.xlu1 %v9820_v55, %s8253_s28  ;;  %v3157_v29 = vsub.f32 1.0, %v9790_v2  ;;  %vm3098_vm7 = vcmp.eq.f32.partialorder %v9740_v51, inf }
 0x586   : > { %v3088_v48 = vsel %vm3086_vm4, %v3087_v10, %v3085_v5  ;;  %v2971_v47 = vadd.f32 1.0, %v9728_v53  ;;  %v9839_v54 = vmul.f32 %v3154_v60, %v9645_v28  ;;  %v9842_v30 = vmul.f32 %v3155_v3, %v9701_v57 }
 0x587   : > { %v7646_v1 = vpop.eup %7645  ;;  %v9844_v62 = vmul.f32 0.5, %v3127_v20  ;;  %v3128_v34 = vsub.f32 %v9754_v15, %v3088_v48  ;;  %v3092_v4 = vsel %vm3091_vm5, %v9715_v52, %v3090_v17  ;;  %vm3100_vm8 = vcmp.eq.f32.partialorder %v9740_v51, 0.0 }
 0x588   : > { %v3095_v53 = vsel %vm3093_vm6, %v3094_v50, %v3092_v4  ;;  %v3097_v35 = vmul.f32 %v7646_v1, %v9740_v51  ;;  %7653 = vrsqrt.f32 %v9839_v54  ;;  %v9856_v10 = vmul.f32 %v3156_v38, %v9758_v16 }
 0x589   : > { %12544 = vst [vmem:[#allocation58_spill] sm:$0xff] %v9844_v62  ;;  %v3129_v19 = vsub.f32 %v9785_v33, %v3095_v53  ;;  %v3101_v15 = vand.u32 2147483648, %v9740_v51  ;;  %vm3105_vm9 = vcmp.eq.f32.partialorder %v9763_v22, inf  ;;  %v9862_v61 = vmul.f32 %v3157_v29, %v9790_v2 }
 0x58a   : > { %v7648_v20 = vpop.eup %7647  ;;  %v3099_v52 = vsel %vm3098_vm7, %v9740_v51, %v3097_v35  ;;  %vm3107_vm10 = vcmp.eq.f32.partialorder %v9763_v22, 0.0  ;;  %v3108_v42 = vand.u32 2147483648, %v9763_v22  ;;  %7655 = vrsqrt.f32 %v9842_v30 }
 0x58b   : > { %v3102_v5 = vsel %vm3100_vm8, %v3101_v15, %v3099_v52  ;;  %v3104_v33 = vmul.f32 %v7648_v20, %v9763_v22  ;;  %v3158_v60 = vsub.f32 1.0, %v9820_v55  ;;  %v3159_v3 = vsub.f32 1.0, %v9844_v62 }
 0x58c   : > { %v9873_v38 = vmul.f32 0.5, %v3128_v34  ;;  %v9875_v48 = vmul.f32 0.5, %v3129_v19  ;;  %vm3211_vm11 = vcmp.eq.f32.partialorder %v9773_v46, inf  ;;  %7657 = vrsqrt.f32 %v9856_v10  ;;  %v7650_v51 = vpop.eup %7649 }
 0x58d   : > { %v3130_v17 = vsub.f32 %v9817_v0, %v3102_v5  ;;  %v3106_v50 = vsel %vm3105_vm9, %v9763_v22, %v3104_v33  ;;  %vm3213_vm12 = vcmp.eq.f32.partialorder %v9773_v46, 0.0  ;;  %7659 = vrsqrt.f32 %v9862_v61 }
 0x58e   : > { %12545 = vst [vmem:[#allocation59_spill] sm:$0xff] %v9873_v38  ;;  %12546 = vst [vmem:[#allocation60_spill] sm:$0xff] %v9875_v48  ;;  %v3109_v29 = vsel %vm3107_vm10, %v3108_v42, %v3106_v50  ;;  %vm3112_vm13 = vcmp.eq.f32.partialorder %v9799_v12, inf  ;;  %v3210_v1 = vmul.f32 %v7650_v51, %v9773_v46  ;;  %v3214_v34 = vand.u32 2147483648, %v9773_v46 }
 0x58f   : > { %v7652_v4 = vpop.eup %7651  ;;  %v3131_v53 = vsub.f32 %v2971_v47, %v3109_v29  ;;  %v3115_v0 = vand.u32 2147483648, %v9799_v12  ;;  %v9892_v35 = vmul.f32 %v3158_v60, %v9820_v55  ;;  %v9895_v19 = vmul.f32 %v3159_v3, %v9844_v62 }
 0x590   : > { %v3111_v15 = vmul.f32 %v7652_v4, %v9799_v12  ;;  %v3212_v22 = vsel %vm3211_vm11, %v9773_v46, %v3210_v1  ;;  %v3160_v20 = vsub.f32 1.0, %v9873_v38  ;;  %v3161_v52 = vsub.f32 1.0, %v9875_v48 }
 0x591   : > { %v9903_v42 = vmul.f32 0.5, %v3130_v17  ;;  %v9905_v47 = vmul.f32 0.5, %v3131_v53  ;;  %v3215_v5 = vsel %vm3213_vm12, %v3214_v34, %v3212_v22  ;;  %7661 = vrsqrt.f32 %v9892_v35 }
 0x592   : > { %v2972_v33 = vadd.f32 1.0, %v9766_v9  ;;  %v3113_v60 = vsel %vm3112_vm13, %v9799_v12, %v3111_v15  ;;  %vm3114_vm14 = vcmp.eq.f32.partialorder %v9799_v12, 0.0  ;;  %3317 = vrot.lane.b32.xlu0 %v3215_v5, %s8253_s28  ;;  %7663 = vrsqrt.f32 %v9895_v19 }
 0x593   : > { %12547 = vst [vmem:[#allocation61_spill] sm:$0xff] %v9903_v42  ;;  %12548 = vst [vmem:[#allocation62_spill] sm:$0xff] %v9905_v47  ;;  %v3116_v3 = vsel %vm3114_vm14, %v3115_v0, %v3113_v60  ;;  %v9918_v17 = vmul.f32 %v3160_v20, %v9873_v38  ;;  %v9921_v46 = vmul.f32 %v3161_v52, %v9875_v48  ;;  %v3162_v9 = vsub.f32 1.0, %v9903_v42 }
 0x594   : > { %v3132_v51 = vsub.f32 %v2972_v33, %v3116_v3  ;;  %v3163_v29 = vsub.f32 1.0, %v9905_v47  ;;  %vm3218_vm15 = vcmp.eq.f32.partialorder %v9839_v54, inf  ;;  %vm3220_vm1 = vcmp.eq.f32.partialorder %v9839_v54, 0.0 }
 0x595   : > { %v7654_v50 = vpop.eup %7653  ;;  %v3221_v4 = vand.u32 2147483648, %v9839_v54  ;;  %7665 = vrsqrt.f32 %v9921_v46  ;;  %vm3225_vm2 = vcmp.eq.f32.partialorder %v9842_v30, inf  ;;  %v3228_v20 = vand.u32 2147483648, %v9842_v30 }
 0x596   : > { %v9925_v1 = vmul.f32 0.5, %v3132_v51  ;;  %v3217_v12 = vmul.f32 %v7654_v50, %v9839_v54  ;;  %3409 = vrot.lane.b32.xlu0 %v9844_v62, %s8253_s28  ;;  %7667 = vrsqrt.f32 %v9918_v17  ;;  %v9940_v52 = vmul.f32 %v3162_v9, %v9903_v42  ;;  %v518_v62 = vld [vmem:[%s10088_s20 + $0x10] sm:$0xff] }
 0x597   : > { %v7656_v34 = vpop.eup %7655  ;;  %v9943_v5 = vmul.f32 %v3163_v29, %v9905_v47  ;;  %vm3227_vm3 = vcmp.eq.f32.partialorder %v9842_v30, 0.0  ;;  %vm3232_vm4 = vcmp.eq.f32.partialorder %v9856_v10, inf  ;;  %v3235_v29 = vand.u32 2147483648, %v9856_v10 }
 0x598   : > { %12549 = vst [vmem:[#allocation63_spill] sm:$0xff] %v9925_v1  ;;  %v3219_v53 = vsel %vm3218_vm15, %v9839_v54, %v3217_v12  ;;  %v3224_v0 = vmul.f32 %v7656_v34, %v9842_v30  ;;  %v3164_v3 = vsub.f32 1.0, %v9925_v1  ;;  %7669 = vrsqrt.f32 %v9940_v52 }
 0x599   : > { %v7658_v15 = vpop.eup %7657  ;;  %v3222_v22 = vsel %vm3220_vm1, %v3221_v4, %v3219_v53  ;;  %7671 = vrsqrt.f32 %v9943_v5  ;;  %vm3239_vm5 = vcmp.eq.f32.partialorder %v9862_v61, inf  ;;  %vm3234_vm6 = vcmp.eq.f32.partialorder %v9856_v10, 0.0 }
 0x59a   : > { %v7660_v33 = vpop.eup %7659  ;;  %3319 = vrot.lane.b32.xlu1 %v3222_v22, %s8253_s28  ;;  %v3226_v54 = vsel %vm3225_vm2, %v9842_v30, %v3224_v0  ;;  %v3231_v60 = vmul.f32 %v7658_v15, %v9856_v10  ;;  %v9963_v34 = vmul.f32 %v3164_v3, %v9925_v1  ;;  %v3242_v0 = vand.u32 2147483648, %v9862_v61 }
 0x59b   : > { %v3229_v51 = vsel %vm3227_vm3, %v3228_v20, %v3226_v54  ;;  %v3238_v50 = vmul.f32 %v7660_v33, %v9862_v61  ;;  %vm3241_vm7 = vcmp.eq.f32.partialorder %v9862_v61, 0.0  ;;  %vm3246_vm8 = vcmp.eq.f32.partialorder %v9892_v35, inf }
 0x59c   : > { %3321 = vrot.lane.b32.xlu0 %v3229_v51, %s8253_s28  ;;  %v3233_v9 = vsel %vm3232_vm4, %v9856_v10, %v3231_v60  ;;  %7673 = vrsqrt.f32 %v9963_v34  ;;  %v3249_v60 = vand.u32 2147483648, %v9892_v35  ;;  %vm3253_vm9 = vcmp.eq.f32.partialorder %v9895_v19, inf }
 0x59d   : > { %v3240_v12 = vsel %vm3239_vm5, %v9862_v61, %v3238_v50  ;;  %v3236_v53 = vsel %vm3234_vm6, %v3235_v29, %v3233_v9  ;;  %vm3248_vm10 = vcmp.eq.f32.partialorder %v9892_v35, 0.0  ;;  %v3256_v50 = vand.u32 2147483648, %v9895_v19 }
 0x59e   : > { %v7662_v30 = vpop.eup %7661  ;;  %3411 = vrot.lane.b32.xlu1 %v9873_v38, %s8253_s28  ;;  %v3243_v22 = vsel %vm3241_vm7, %v3242_v0, %v3240_v12  ;;  %vm3255_vm11 = vcmp.eq.f32.partialorder %v9895_v19, 0.0  ;;  %v9988_v12 = vpop.permute.xlu0 %3757  ;;  %vm3267_vm12 = vcmp.eq.f32.partialorder %v9921_v46, inf  ;;  %vm3260_vm13 = vcmp.eq.f32.partialorder %v9918_v17, inf  ;;  %v517_v38 = vld [vmem:[%s10088_s20 + $0x8] sm:$0xff] }
 0x59f   : > { %v7664_v4 = vpop.eup %7663  ;;  %v3245_v15 = vmul.f32 %v7662_v30, %v9892_v35  ;;  %v3270_v0 = vand.u32 2147483648, %v9921_v46  ;;  %vm3269_vm14 = vcmp.eq.f32.partialorder %v9921_v46, 0.0  ;;  %vm3281_vm15 = vcmp.eq.f32.partialorder %v9943_v5, inf }
 0x5a0   : > { %3413 = vrot.lane.b32.xlu0 %v9875_v48, %s8253_s28  ;;  %v3252_v10 = vmul.f32 %v7664_v4, %v9895_v19  ;;  %vm3262_vm1 = vcmp.eq.f32.partialorder %v9918_v17, 0.0  ;;  %vm3274_vm2 = vcmp.eq.f32.partialorder %v9940_v52, inf  ;;  %vm3283_vm3 = vcmp.eq.f32.partialorder %v9943_v5, 0.0 }
 0x5a1   : > { %v3247_v33 = vsel %vm3246_vm8, %v9892_v35, %v3245_v15  ;;  %vm3276_vm4 = vcmp.eq.f32.partialorder %v9940_v52, 0.0  ;;  %vm3288_vm5 = vcmp.eq.f32.partialorder %v9963_v34, inf  ;;  %vm3290_vm6 = vcmp.eq.f32.partialorder %v9963_v34, 0.0 }
 0x5a2   : > { %3323 = vrot.lane.b32.xlu1 %v3236_v53, %s8253_s28  ;;  %v7666_v20 = vpop.eup %7665  ;;  %v3254_v61 = vsel %vm3253_vm9, %v9895_v19, %v3252_v10  ;;  %v3250_v51 = vsel %vm3248_vm10, %v3249_v60, %v3247_v33  ;;  %v3263_v10 = vand.u32 2147483648, %v9918_v17 }
 0x5a3   : > { %v7668_v54 = vpop.eup %7667  ;;  %v3266_v3 = vmul.f32 %v7666_v20, %v9921_v46  ;;  %v3257_v4 = vsel %vm3255_vm11, %v3256_v50, %v3254_v61 }
 0x5a4   : > { %3325 = vrot.lane.b32.xlu0 %v3243_v22, %s8253_s28  ;;  %v3259_v29 = vmul.f32 %v7668_v54, %v9918_v17  ;;  %v10006_v54 = vpop.permute.xlu0 %3761 }
 0x5a5   : > { %v7670_v9 = vpop.eup %7669  ;;  %v3268_v35 = vsel %vm3267_vm12, %v9921_v46, %v3266_v3  ;;  %v3284_v46 = vand.u32 2147483648, %v9943_v5 }
 0x5a6   : > { %3415 = vrot.lane.b32.xlu1 %v9903_v42, %s8253_s28  ;;  %v7672_v30 = vpop.eup %7671  ;;  %v3261_v19 = vsel %vm3260_vm13, %v9918_v17, %v3259_v29  ;;  %v3273_v15 = vmul.f32 %v7670_v9, %v9940_v52  ;;  %v3271_v20 = vsel %vm3269_vm14, %v3270_v0, %v3268_v35  ;;  %v3277_v17 = vand.u32 2147483648, %v9940_v52 }
 0x5a7   : > { %v3280_v53 = vmul.f32 %v7672_v30, %v9943_v5  ;;  %v3264_v60 = vsel %vm3262_vm1, %v3263_v10, %v3261_v19 }
 0x5a8   : > { %3417 = vrot.lane.b32.xlu0 %v9905_v47, %s8253_s28  ;;  %v3275_v61 = vsel %vm3274_vm2, %v9940_v52, %v3273_v15  ;;  %v10022_v30 = vpop.permute.xlu0 %3765 }
 0x5a9   : > { %v7674_v22 = vpop.eup %7673  ;;  %v3282_v33 = vsel %vm3281_vm15, %v9943_v5, %v3280_v53  ;;  %v3278_v9 = vsel %vm3276_vm4, %v3277_v17, %v3275_v61  ;;  %v3291_v5 = vand.u32 2147483648, %v9963_v34 }
 0x5aa   : > { %3327 = vrot.lane.b32.xlu1 %v3250_v51, %s8253_s28  ;;  %v3287_v3 = vmul.f32 %v7674_v22, %v9963_v34  ;;  %v10014_v51 = vpop.permute.xlu1 %3759  ;;  %v3285_v50 = vsel %vm3283_vm3, %v3284_v46, %v3282_v33 }
 0x5ac   : > { %3329 = vrot.lane.b32.xlu0 %v3257_v4, %s8253_s28  ;;  %v3289_v29 = vsel %vm3288_vm5, %v9963_v34, %v3287_v3  ;;  %v10032_v52 = vpop.permute.xlu0 %3769 }
 0x5ad   : > { %v3292_v35 = vsel %vm3290_vm6, %v3291_v5, %v3289_v29 }
 0x5ae   : > { %3419 = vrot.lane.b32.xlu1 %v9925_v1, %s8253_s28  ;;  %v10027_v4 = vpop.permute.xlu1 %3763 }
 0x5b0   : > { %3333 = vrot.lane.b32.xlu0 %v3271_v20, %s8253_s28  ;;  %v10042_v34 = vpop.permute.xlu0 %3773 }
 0x5b2   : > { %3331 = vrot.lane.b32.xlu1 %v3264_v60, %s8253_s28  ;;  %v10036_v53 = vpop.permute.xlu1 %3767 }
 0x5b4   : > { %3337 = vrot.lane.b32.xlu0 %v3285_v50, %s8253_s28  ;;  %v10052_v19 = vpop.permute.xlu0 %3777  ;;  %v516_v50 = vld [vmem:[%s10088_s20] sm:$0xff] }
 0x5b6   : > { %3335 = vrot.lane.b32.xlu1 %v3278_v9, %s8253_s28  ;;  %v10046_v0 = vpop.permute.xlu1 %3771 }
 0x5b8   : > { %3949 = vrot.lane.b32.xlu0 %v9190_v8, %s8254_s13  ;;  %v10062_v22 = vpop.permute.xlu0 %3781 }
 0x5ba   : > { %3339 = vrot.lane.b32.xlu1 %v3292_v35, %s8253_s28  ;;  %v10056_v15 = vpop.permute.xlu1 %3775  ;;  %s12230_s28 = scalar_lea.hbm %s12280_s12, %s7005_s17 }
 0x5bc   : > { %3953 = vrot.lane.b32.xlu0 %v9242_v41, %s8254_s13  ;;  %v10073_v20 = vpop.permute.xlu0 %3785 }
 0x5be   : > { %3951 = vrot.lane.b32.xlu1 %v9218_v43, %s8254_s13  ;;  %v10066_v10 = vpop.permute.xlu1 %3779 }
 0x5c0   : > { %3957 = vrot.lane.b32.xlu0 %v9283_v32, %s8254_s13 }
 0x5c2   : > { %3955 = vrot.lane.b32.xlu1 %v9261_v45, %s8254_s13  ;;  %v10077_v33 = vpop.permute.xlu1 %3783 }
 0x5c4   : > { %3961 = vrot.lane.b32.xlu0 %v9322_v49, %s8254_s13 }
 0x5c6   : > { %3959 = vrot.lane.b32.xlu1 %v9297_v13, %s8254_s13  ;;  %v10083_v46 = vpop.permute.xlu1 %3787 }
 0x5c8   : > { %3965 = vrot.lane.b32.xlu0 %v9385_v27, %s8254_s13 }
 0x5ca   : > { %3963 = vrot.lane.b32.xlu1 %v9363_v40, %s8254_s13 }
 0x5cb   : > { %v3390_v60 = vpop.permute.xlu0 %3389 }
 0x5cc   : > { %3969 = vrot.lane.b32.xlu0 %v9410_v37, %s8254_s13 }
 0x5ce   : > { %3967 = vrot.lane.b32.xlu1 %v9395_v24, %s8254_s13 }
 0x5cf   : > { %v3392_v3 = vpop.permute.xlu1 %3391 }
 0x5d0   : > { %3973 = vrot.lane.b32.xlu0 %v9434_v23, %s8254_s13  ;;  %v521_v23 = vld [vmem:[%s10088_s20 + $0x28] sm:$0xff] }
 0x5d2   : > { %3971 = vrot.lane.b32.xlu1 %v9425_v6, %s8254_s13 }
 0x5d3   : > { %v3394_v61 = vpop.permute.xlu0 %3393 }
 0x5d4   : > { %3977 = vrot.lane.b32.xlu0 %v9455_v56, %s8254_s13 }
 0x5d6   : > { %3975 = vrot.lane.b32.xlu1 %v9443_v39, %s8254_s13 }
 0x5d8   : > { %v3396_v9 = vpop.permute.xlu1 %3395 }
 0x5da   : > { %3979 = vrot.lane.b32.xlu1 %v9463_v63, %s8254_s13  ;;  %s6671_s13 = scalar_lea.sflag [#allocation4], %s8474_s19 }
 0x5dc   : > { %v3398_v17 = vpop.permute.xlu0 %3397 }
 0x5df   : > { %v10093_v1 = vpop.permute.xlu1 %3399 }
 0x5e4   : > { %v3310_v29 = vpop.permute.xlu0 %3309 }
 0x5e5   : > { %v3357_v5 = vmul.f32 %v3310_v29, %v516_v50 }
 0x5e7   : > { %v10091_v35 = vadd.f32 %v3390_v60, %v3357_v5 }
 0x5e9   : > { %v10095_v42 = vpop.permute.xlu0 %3401  ;;  %v3501_v47 = vand.u32 2147483647, %v10091_v35  ;;  %vm3469_vm8 = vcmp.ne.f32.partialorder %v10091_v35, %v10091_v35 }
 0x5eb   : > { %v3517_v48 = vsub.f32 0.0, %v3501_v47  ;;  %v3312_v55 = vpop.permute.xlu1 %3311 }
 0x5ec   : > { %v3358_v16 = vmul.f32 %v3312_v55, %v517_v38 }
 0x5ed   : > { %v3533_v2 = vmul.f32 1.442695, %v3517_v48  ;;  %v3314_v57 = vpop.permute.xlu0 %3313 }
 0x5ee   : > { %v3359_v28 = vmul.f32 %v3314_v57, %v518_v62  ;;  %v10100_v21 = vadd.f32 %v3392_v3, %v3358_v16 }
 0x5ef   : > { %7675 = vpow2.f32 %v3533_v2  ;;  %v10102_v60 = vpop.permute.xlu1 %3403 }
 0x5f0   : > { %v10104_v50 = vadd.f32 %v3394_v61, %v3359_v28  ;;  %v3502_v29 = vand.u32 2147483647, %v10100_v21  ;;  %vm3470_vm11 = vcmp.ne.f32.partialorder %v10100_v21, %v10100_v21 }
 0x5f2   : > { %v3503_v5 = vand.u32 2147483647, %v10104_v50  ;;  %v3518_v44 = vsub.f32 0.0, %v3502_v29  ;;  %v520_v29 = vld [vmem:[%s10088_s20 + $0x20] sm:$0xff]  ;;  %vm3471_vm12 = vcmp.ne.f32.partialorder %v10104_v50, %v10104_v50 }
 0x5f3   : > { %v3316_v18 = vpop.permute.xlu1 %3315  ;;  %v10112_v3 = vpop.permute.xlu0 %3405 }
 0x5f4   : > { %v3519_v47 = vsub.f32 0.0, %v3503_v5  ;;  %v3535_v48 = vmul.f32 1.442695, %v3518_v44  ;;  %v3360_v55 = vmul.f32 %v3316_v18, %v519_v14 }
 0x5f6   : > { %v3537_v38 = vmul.f32 1.442695, %v3519_v47  ;;  %7677 = vpow2.f32 %v3535_v48  ;;  %v10109_v57 = vadd.f32 %v3396_v9, %v3360_v55 }
 0x5f7   : > { %v10118_v48 = vpop.permute.xlu1 %3407 }
 0x5f8   : > { %7679 = vpow2.f32 %v3537_v38  ;;  %v3504_v16 = vand.u32 2147483647, %v10109_v57  ;;  %vm3472_vm14 = vcmp.ne.f32.partialorder %v10109_v57, %v10109_v57 }
 0x5fa   : > { %v3520_v28 = vsub.f32 0.0, %v3504_v16 }
 0x5fc   : > { %v7676_v2 = vpop.eup %7675  ;;  %v3539_v61 = vmul.f32 1.442695, %v3520_v28 }
 0x5fd   : > { %v3565_v62 = vadd.f32 1.0, %v7676_v2  ;;  %v3568_v18 = vmul.f32 -0.5, %v7676_v2  ;;  %v3571_v28 = vand.u32 2147483647, %v7676_v2 }
 0x5ff   : > { %7681 = vlog2.f32 %v3565_v62  ;;  %v3569_v38 = vadd.f32 1.0, %v3568_v18  ;;  %vm3572_vm7 = vcmp.lt.f32.partialorder %v3571_v28, 0.0004427343 }
 0x600   : > { %7683 = vpow2.f32 %v3539_v61 }
 0x603   : > { %v7678_v5 = vpop.eup %7677 }
 0x604   : > { %v3574_v44 = vadd.f32 1.0, %v7678_v5  ;;  %v3318_v14 = vpop.permute.xlu0 %3317  ;;  %v3577_v37 = vmul.f32 -0.5, %v7678_v5  ;;  %v3580_v45 = vand.u32 2147483647, %v7678_v5 }
 0x605   : > { %v10115_v56 = vpop.eup %7679  ;;  %v3361_v47 = vmul.f32 %v3318_v14, %v520_v29  ;;  %v3453_v29 = vmax.f32 %v10091_v35, 0.0  ;;  %v3570_v14 = vmul.f32 %v7676_v2, %v3569_v38 }
 0x606   : > { %v3583_v9 = vadd.f32 1.0, %v10115_v56  ;;  %7685 = vlog2.f32 %v3574_v44  ;;  %vm10150_vm9 = vcmp.lt.f32.partialorder %v3580_v45, 0.0004427343 }
 0x607   : > { %v10120_v55 = vadd.f32 %v3398_v17, %v3361_v47  ;;  %v3586_v17 = vmul.f32 -0.5, %v10115_v56 }
 0x608   : > { %7687 = vlog2.f32 %v3583_v9  ;;  %v10122_v16 = vpop.permute.xlu0 %3409  ;;  %v522_v9 = vld [vmem:[%s10088_s20 + $0x30] sm:$0xff] }
 0x609   : > { %v3505_v62 = vand.u32 2147483647, %v10120_v55  ;;  %vm3473_vm1 = vcmp.ne.f32.partialorder %v10120_v55, %v10120_v55 }
 0x60b   : > { %v3521_v63 = vsub.f32 0.0, %v3505_v62 }
 0x60c   : > { %v7682_v61 = vpop.eup %7681  ;;  %v3320_v6 = vpop.permute.xlu1 %3319 }
 0x60d   : > { %v10126_v39 = vpop.eup %7683  ;;  %v3567_v44 = vmul.f32 0.6931472, %v7682_v61  ;;  %v3541_v47 = vmul.f32 1.442695, %v3521_v63  ;;  %v3362_v40 = vmul.f32 %v3320_v6, %v521_v23  ;;  %v3578_v61 = vadd.f32 1.0, %v3577_v37 }
 0x60e   : > { %v3592_v18 = vadd.f32 1.0, %v10126_v39  ;;  %v3322_v13 = vpop.permute.xlu0 %3321  ;;  %v3587_v63 = vadd.f32 1.0, %v3586_v17  ;;  %v3589_v6 = vand.u32 2147483647, %v10115_v56  ;;  %v3454_v37 = vmax.f32 %v10100_v21, 0.0 }
 0x60f   : > { %v3573_v24 = vsel %vm3572_vm7, %v3570_v14, %v3567_v44  ;;  %v10135_v2 = vadd.f32 %v10093_v1, %v3362_v40  ;;  %v3363_v28 = vmul.f32 %v3322_v13, %v522_v9  ;;  %v3595_v17 = vmul.f32 -0.5, %v10126_v39 }
 0x610   : > { %v3709_v62 = vadd.f32 %v3573_v24, %v3453_v29  ;;  %7689 = vlog2.f32 %v3592_v18  ;;  %v10137_v38 = vpop.permute.xlu1 %3411  ;;  %v3579_v29 = vmul.f32 %v7678_v5, %v3578_v61  ;;  %v3588_v9 = vmul.f32 %v10115_v56, %v3587_v63 }
 0x611   : > { %7691 = vpow2.f32 %v3541_v47  ;;  %v3506_v23 = vand.u32 2147483647, %v10135_v2  ;;  %v10145_v24 = vadd.f32 %v10095_v42, %v3363_v28  ;;  %v523_v47 = vld [vmem:[%s10088_s20 + $0x38] sm:$0xff]  ;;  %v3455_v28 = vmax.f32 %v10104_v50, 0.0 }
 0x612   : > { %v10140_v41 = vsel %vm3469_vm8, %v10091_v35, %v3709_v62  ;;  %vm3590_vm10 = vcmp.lt.f32.partialorder %v3589_v6, 0.0004427343  ;;  %v10165_v61 = vpop.permute.xlu0 %3413  ;;  %v3596_v6 = vadd.f32 1.0, %v3595_v17  ;;  %vm3474_vm3 = vcmp.ne.f32.partialorder %v10135_v2, %v10135_v2 }
 0x613   : > { %4205 = vrot.lane.b32.xlu0 %v10140_v41, %s8255_s30  ;;  %v7686_v40 = vpop.eup %7685  ;;  %v3522_v44 = vsub.f32 0.0, %v3506_v23  ;;  %v10156_v14 = vmul.f32 %v9988_v12, %v10140_v41  ;;  %v3507_v18 = vand.u32 2147483647, %v10145_v24  ;;  %vm3823_vm4 = vcmp.eq.f32.partialorder %v10140_v41, inf }
 0x614   : > { %v3576_v35 = vmul.f32 0.6931472, %v7686_v40  ;;  %v3324_v45 = vpop.permute.xlu1 %3323  ;;  %v3826_v8 = vand.u32 2147483648, %v10140_v41  ;;  %vm3825_vm6 = vcmp.eq.f32.partialorder %v10140_v41, 0.0  ;;  %vm3475_vm7 = vcmp.ne.f32.partialorder %v10145_v24, %v10145_v24 }
 0x615   : > { %v7688_v1 = vpop.eup %7687  ;;  %12552 = vst [vmem:[#allocation64_spill] sm:$0xff] %v10156_v14  ;;  %v3543_v5 = vmul.f32 1.442695, %v3522_v44  ;;  %v3523_v63 = vsub.f32 0.0, %v3507_v18  ;;  %v3364_v40 = vmul.f32 %v3324_v45, %v523_v47  ;;  %v3597_v47 = vmul.f32 %v10126_v39, %v3596_v6 }
 0x616   : > { %v3585_v42 = vmul.f32 0.6931472, %v7688_v1  ;;  %v3582_v62 = vsel %vm10150_vm9, %v3579_v29, %v3576_v35 }
 0x617   : > { %4125 = vrot.lane.b32.xlu0 %v10156_v14, %s8255_s30  ;;  %v3710_v12 = vadd.f32 %v3582_v62, %v3454_v37  ;;  %7693 = vpow2.f32 %v3543_v5  ;;  %v3598_v37 = vand.u32 2147483647, %v10126_v39  ;;  %v3545_v35 = vmul.f32 1.442695, %v3523_v63 }
 0x618   : > { %v3591_v56 = vsel %vm3590_vm10, %v3588_v9, %v3585_v42  ;;  %v10182_v29 = vpop.permute.xlu1 %3415  ;;  %v10187_v44 = vadd.f32 %v10102_v60, %v3364_v40  ;;  %v524_v42 = vld [vmem:[%s10088_s20 + $0x40] sm:$0xff]  ;;  %v3326_v9 = vpop.permute.xlu0 %3325  ;;  %v3456_v62 = vmax.f32 %v10109_v57, 0.0 }
 0x619   : > { %v3711_v23 = vadd.f32 %v3591_v56, %v3455_v28  ;;  %v10172_v13 = vsel %vm3470_vm11, %v10100_v21, %v3710_v12  ;;  %vm3599_vm13 = vcmp.lt.f32.partialorder %v3598_v37, 0.0004427343  ;;  %7695 = vpow2.f32 %v3545_v35 }
 0x61a   : > { %4207 = vrot.lane.b32.xlu1 %v10172_v13, %s8255_s30  ;;  %v3508_v39 = vand.u32 2147483647, %v10187_v44  ;;  %vm3830_vm8 = vcmp.eq.f32.partialorder %v10172_v13, inf  ;;  %vm3832_vm9 = vcmp.eq.f32.partialorder %v10172_v13, 0.0  ;;  %vm3476_vm11 = vcmp.ne.f32.partialorder %v10187_v44, %v10187_v44 }
 0x61b   : > { %v10177_v1 = vsel %vm3471_vm12, %v10104_v50, %v3711_v23  ;;  %v10192_v50 = vmul.f32 %v10014_v51, %v10172_v13  ;;  %v3365_v51 = vmul.f32 %v3326_v9, %v524_v42 }
 0x61c   : > { %4209 = vrot.lane.b32.xlu0 %v10177_v1, %s8255_s30  ;;  %v10197_v45 = vmul.f32 %v10006_v54, %v10177_v1  ;;  %v525_v54 = vld [vmem:[%s10088_s20 + $0x48] sm:$0xff]  ;;  %v3328_v12 = vpop.permute.xlu1 %3327  ;;  %v3524_v23 = vsub.f32 0.0, %v3508_v39  ;;  %v10216_v6 = vpop.permute.xlu0 %3417  ;;  %vm3837_vm12 = vcmp.eq.f32.partialorder %v10177_v1, inf }
 0x61d   : > { %v7690_v21 = vpop.eup %7689  ;;  %12553 = vst [vmem:[#allocation65_spill] sm:$0xff] %v10192_v50  ;;  %v10212_v63 = vadd.f32 %v10112_v3, %v3365_v51  ;;  %v3366_v40 = vmul.f32 %v3328_v12, %v525_v54 }
 0x61e   : > { %v7692_v17 = vpop.eup %7691  ;;  %v3594_v18 = vmul.f32 0.6931472, %v7690_v21  ;;  %12554 = vst [vmem:[#allocation66_spill] sm:$0xff] %v10197_v45  ;;  %4127 = vrot.lane.b32.xlu1 %v10192_v50, %s8255_s30  ;;  %v3547_v3 = vmul.f32 1.442695, %v3524_v23 }
 0x61f   : > { %v3601_v60 = vadd.f32 1.0, %v7692_v17  ;;  %v3604_v21 = vmul.f32 -0.5, %v7692_v17  ;;  %v10226_v9 = vadd.f32 %v10118_v48, %v3366_v40  ;;  %v3457_v48 = vmax.f32 %v10120_v55, 0.0 }
 0x620   : > { %v3600_v28 = vsel %vm3599_vm13, %v3597_v47, %v3594_v18  ;;  %4129 = vrot.lane.b32.xlu0 %v10197_v45, %s8255_s30  ;;  %v526_v47 = vld [vmem:[%s10088_s20 + $0x50] sm:$0xff]  ;;  %v10232_v39 = vpop.permute.xlu1 %3419 }
 0x621   : > { %v3712_v5 = vadd.f32 %v3600_v28, %v3456_v62  ;;  %7697 = vlog2.f32 %v3601_v60  ;;  %v3605_v18 = vadd.f32 1.0, %v3604_v21  ;;  %v3330_v62 = vpop.permute.xlu0 %3329  ;;  %v3607_v60 = vand.u32 2147483647, %v7692_v17  ;;  %v528_v21 = vld [vmem:[%s10088_s20 + $0x60] sm:$0xff] }
 0x622   : > { %v3510_v51 = vand.u32 2147483647, %v10226_v9  ;;  %v3367_v54 = vmul.f32 %v3330_v62, %v526_v47 }
 0x623   : > { %v10209_v56 = vsel %vm3472_vm14, %v10109_v57, %v3712_v5  ;;  %v3509_v57 = vand.u32 2147483647, %v10212_v63  ;;  %v3606_v23 = vmul.f32 %v7692_v17, %v3605_v18  ;;  %vm3608_vm15 = vcmp.lt.f32.partialorder %v3607_v60, 0.0004427343 }
 0x624   : > { %4211 = vrot.lane.b32.xlu1 %v10209_v56, %s8255_s30  ;;  %v7694_v37 = vpop.eup %7693  ;;  %v10220_v35 = vmul.f32 %v10027_v4, %v10209_v56  ;;  %v3526_v14 = vsub.f32 0.0, %v3510_v51  ;;  %v10239_v47 = vadd.f32 %v10122_v16, %v3367_v54  ;;  %vm3839_vm14 = vcmp.eq.f32.partialorder %v10177_v1, 0.0 }
 0x625   : > { %v3610_v42 = vadd.f32 1.0, %v7694_v37  ;;  %v3525_v28 = vsub.f32 0.0, %v3509_v57  ;;  %v3334_v57 = vpop.permute.xlu0 %3333  ;;  %v3616_v60 = vand.u32 2147483647, %v7694_v37 }
 0x626   : > { %12555 = vst [vmem:[#allocation67_spill] sm:$0xff] %v10220_v35  ;;  %v10229_v4 = vpop.eup %7695  ;;  %v3369_v18 = vmul.f32 %v3334_v57, %v528_v21  ;;  %v3511_v54 = vand.u32 2147483647, %v10239_v47 }
 0x627   : > { %7699 = vlog2.f32 %v3610_v42  ;;  %v3613_v42 = vmul.f32 -0.5, %v7694_v37  ;;  %v3549_v40 = vmul.f32 1.442695, %v3525_v28  ;;  %v3619_v45 = vadd.f32 1.0, %v10229_v4  ;;  %v527_v28 = vld [vmem:[%s10088_s20 + $0x58] sm:$0xff] }
 0x628   : > { %4131 = vrot.lane.b32.xlu1 %v10220_v35, %s8255_s30  ;;  %7701 = vpow2.f32 %v3547_v3  ;;  %vm3617_vm2 = vcmp.lt.f32.partialorder %v3616_v60, 0.0004427343 }
 0x629   : > { %7703 = vrsqrt.f32 %v10140_v41  ;;  %v3614_v17 = vadd.f32 1.0, %v3613_v42  ;;  %v3338_v51 = vpop.permute.xlu0 %3337 }
 0x62a   : > { %7705 = vpow2.f32 %v3549_v40 }
 0x62b   : > { %7707 = vlog2.f32 %v3619_v45  ;;  %v3615_v42 = vmul.f32 %v7694_v37, %v3614_v17 }
 0x62e   : > { %v7698_v5 = vpop.eup %7697 }
 0x62f   : > { %v3603_v12 = vmul.f32 0.6931472, %v7698_v5  ;;  %v3332_v5 = vpop.permute.xlu1 %3331 }
 0x630   : > { %v3368_v21 = vmul.f32 %v3332_v5, %v527_v28  ;;  %v529_v5 = vld [vmem:[%s10088_s20 + $0x68] sm:$0xff] }
 0x631   : > { %v3609_v3 = vsel %vm3608_vm15, %v3606_v23, %v3603_v12  ;;  %v3551_v12 = vmul.f32 1.442695, %v3526_v14  ;;  %v530_v23 = vld [vmem:[%s10088_s20 + $0x70] sm:$0xff]  ;;  %vm3844_vm15 = vcmp.eq.f32.partialorder %v10209_v56, inf }
 0x632   : > { %v3713_v35 = vadd.f32 %v3609_v3, %v3457_v48  ;;  %v3371_v45 = vmul.f32 %v3338_v51, %v530_v23  ;;  %v3527_v3 = vsub.f32 0.0, %v3511_v54  ;;  %v10260_v37 = vadd.f32 %v10137_v38, %v3368_v21 }
 0x633   : > { %7709 = vpow2.f32 %v3551_v12  ;;  %v3336_v12 = vpop.permute.xlu1 %3335  ;;  %v3622_v38 = vmul.f32 -0.5, %v10229_v4 }
 0x634   : > { %v10244_v62 = vsel %vm3473_vm1, %v10120_v55, %v3713_v35  ;;  %v7700_v16 = vpop.eup %7699  ;;  %v10252_v55 = vadd.f32 %v10165_v61, %v3369_v18  ;;  %v3458_v35 = vmax.f32 %v10135_v2, 0.0  ;;  %v10267_v60 = vadd.f32 %v10216_v6, %v3371_v45 }
 0x635   : > { %4213 = vrot.lane.b32.xlu0 %v10244_v62, %s8255_s30  ;;  %v3612_v48 = vmul.f32 0.6931472, %v7700_v16  ;;  %v10255_v40 = vpop.eup %7701  ;;  %7711 = vrsqrt.f32 %v10172_v13  ;;  %v3553_v23 = vmul.f32 1.442695, %v3527_v3  ;;  %v3512_v51 = vand.u32 2147483647, %v10260_v37 }
 0x636   : > { %v3513_v61 = vand.u32 2147483647, %v10252_v55  ;;  %v7704_v17 = vpop.eup %7703  ;;  %v3628_v28 = vadd.f32 1.0, %v10255_v40  ;;  %v3370_v54 = vmul.f32 %v3336_v12, %v529_v5  ;;  %v3515_v6 = vand.u32 2147483647, %v10267_v60 }
 0x637   : > { %v3618_v14 = vsel %vm3617_vm2, %v3615_v42, %v3612_v48  ;;  %v3822_v16 = vmul.f32 %v7704_v17, %v10140_v41  ;;  %v10278_v48 = vpop.eup %7705  ;;  %v531_v42 = vld [vmem:[%s10088_s20 + $0x78] sm:$0xff]  ;;  %v3340_v21 = vpop.permute.xlu1 %3339  ;;  %v3623_v45 = vadd.f32 1.0, %v3622_v38  ;;  %vm3846_vm1 = vcmp.eq.f32.partialorder %v10209_v56, 0.0 }
 0x638   : > { %v3714_v57 = vadd.f32 %v3618_v14, %v3458_v35  ;;  %7713 = vlog2.f32 %v3628_v28  ;;  %v7708_v35 = vpop.eup %7707  ;;  %v3625_v14 = vand.u32 2147483647, %v10229_v4  ;;  %v3637_v17 = vadd.f32 1.0, %v10278_v48 }
 0x639   : > { %7715 = vpow2.f32 %v3553_v23  ;;  %v10286_v5 = vadd.f32 %v10182_v29, %v3370_v54  ;;  %v3531_v12 = vsub.f32 0.0, %v3515_v6  ;;  %v3372_v28 = vmul.f32 %v3340_v21, %v531_v42 }
 0x63a   : > { %v10264_v18 = vsel %vm3474_vm3, %v10135_v2, %v3714_v57  ;;  %v3529_v2 = vsub.f32 0.0, %v3513_v61  ;;  %v3528_v57 = vsub.f32 0.0, %v3512_v51  ;;  %v3824_v61 = vsel %vm3823_vm4, %v10140_v41, %v3822_v16 }
 0x63b   : > { %4215 = vrot.lane.b32.xlu1 %v10264_v18, %s8255_s30  ;;  %v3621_v50 = vmul.f32 0.6931472, %v7708_v35  ;;  %7717 = vrsqrt.f32 %v10177_v1  ;;  %v3624_v23 = vmul.f32 %v10229_v4, %v3623_v45  ;;  %vm10293_vm5 = vcmp.lt.f32.partialorder %v3625_v14, 0.0004427343  ;;  %v3950_v35 = vpop.permute.xlu0 %3949 }
 0x63c   : > { %v3557_v3 = vmul.f32 1.442695, %v3529_v2  ;;  %v3555_v2 = vmul.f32 1.442695, %v3528_v57  ;;  %v10298_v29 = vsel %vm3825_vm6, %v3826_v8, %v3824_v61  ;;  %v10302_v16 = vmul.f32 %v10022_v30, %v10244_v62 }
 0x63d   : > { %v3514_v54 = vand.u32 2147483647, %v10286_v5  ;;  %v3561_v6 = vmul.f32 1.442695, %v3531_v12  ;;  %v10306_v4 = vadd.f32 %v10232_v39, %v3372_v28  ;;  %v3627_v42 = vsel %vm10293_vm5, %v3624_v23, %v3621_v50 }
 0x63e   : > { %7719 = vpow2.f32 %v3557_v3  ;;  %12558 = vst [vmem:[#allocation68_spill] sm:$0xff] %v10302_v16  ;;  %4133 = vrot.lane.b32.xlu0 %v10302_v16, %s8255_s30  ;;  %v3459_v30 = vmax.f32 %v10145_v24, 0.0  ;;  %v3631_v45 = vmul.f32 -0.5, %v10255_v40  ;;  %v10317_v39 = vmul.f32 %v3950_v35, %v10298_v29 }
 0x63f   : > { %7721 = vlog2.f32 %v3637_v17  ;;  %v3530_v57 = vsub.f32 0.0, %v3514_v54  ;;  %v3516_v50 = vand.u32 2147483647, %v10306_v4  ;;  %v3634_v23 = vand.u32 2147483647, %v10255_v40 }
 0x640   : > { %v10290_v38 = vpop.eup %7709  ;;  %7723 = vrsqrt.f32 %v10209_v56  ;;  %12559 = vst [vmem:[#allocation69_spill] sm:$0xff] %v10317_v39  ;;  %v3715_v14 = vadd.f32 %v3627_v42, %v3459_v30  ;;  %v3632_v17 = vadd.f32 1.0, %v3631_v45  ;;  %v10342_v35 = vmul.f32 %v10036_v53, %v10264_v18 }
 0x641   : > { %v3646_v21 = vadd.f32 1.0, %v10290_v38  ;;  %7725 = vpow2.f32 %v3555_v2  ;;  %v3559_v51 = vmul.f32 1.442695, %v3530_v57  ;;  %v3532_v2 = vsub.f32 0.0, %v3516_v50 }
 0x642   : > { %v7712_v8 = vpop.eup %7711  ;;  %7727 = vpow2.f32 %v3561_v6  ;;  %4045 = vrot.lane.b32.xlu0 %v10317_v39, %s8255_s30  ;;  %v10329_v28 = vsel %vm3475_vm7, %v10145_v24, %v3715_v14  ;;  %v3633_v30 = vmul.f32 %v10255_v40, %v3632_v17  ;;  %12560 = vst [vmem:[#allocation70_spill] sm:$0xff] %v10342_v35  ;;  %vm10346_vm10 = vcmp.lt.f32.partialorder %v3634_v23, 0.0004427343  ;;  %4135 = vrot.lane.b32.xlu1 %v10342_v35, %s8255_s30 }
 0x643   : > { %7729 = vlog2.f32 %v3646_v21  ;;  %v3829_v3 = vmul.f32 %v7712_v8, %v10172_v13  ;;  %v3640_v21 = vmul.f32 -0.5, %v10278_v48  ;;  %v3833_v8 = vand.u32 2147483648, %v10172_v13 }
 0x644   : > { %7731 = vpow2.f32 %v3559_v51  ;;  %v3563_v57 = vmul.f32 1.442695, %v3532_v2  ;;  %v3460_v23 = vmax.f32 %v10187_v44, 0.0  ;;  %v3649_v2 = vmul.f32 -0.5, %v10290_v38 }
 0x645   : > { %v7714_v61 = vpop.eup %7713  ;;  %v3831_v6 = vsel %vm3830_vm8, %v10172_v13, %v3829_v3  ;;  %7733 = vrsqrt.f32 %v10244_v62  ;;  %v3641_v51 = vadd.f32 1.0, %v3640_v21  ;;  %v3840_v35 = vand.u32 2147483648, %v10177_v1 }
 0x646   : > { %v10326_v12 = vpop.eup %7715  ;;  %v3630_v54 = vmul.f32 0.6931472, %v7714_v61  ;;  %4217 = vrot.lane.b32.xlu0 %v10329_v28, %s8255_s30  ;;  %v10350_v50 = vsel %vm3832_vm9, %v3833_v8, %v3831_v6  ;;  %v3643_v61 = vand.u32 2147483647, %v10278_v48  ;;  %v3952_v6 = vpop.permute.xlu1 %3951  ;;  %vm3477_vm3 = vcmp.ne.f32.partialorder %v10212_v63, %v10212_v63 }
 0x647   : > { %v3655_v24 = vadd.f32 1.0, %v10326_v12  ;;  %vm3478_vm4 = vcmp.ne.f32.partialorder %v10226_v9, %v10226_v9  ;;  %vm3851_vm5 = vcmp.eq.f32.partialorder %v10244_v62, inf  ;;  %vm3853_vm7 = vcmp.eq.f32.partialorder %v10244_v62, 0.0 }
 0x648   : > { %v7718_v42 = vpop.eup %7717  ;;  %v3636_v40 = vsel %vm10346_vm10, %v3633_v30, %v3630_v54  ;;  %v10363_v54 = vmul.f32 %v3952_v6, %v10350_v50  ;;  %vm10372_vm13 = vcmp.lt.f32.partialorder %v3643_v61, 0.0004427343  ;;  %v10387_v61 = vmul.f32 %v10032_v52, %v10329_v28 }
 0x649   : > { %v3836_v17 = vmul.f32 %v7718_v42, %v10177_v1  ;;  %7735 = vlog2.f32 %v3655_v24  ;;  %v3716_v42 = vadd.f32 %v3636_v40, %v3460_v23  ;;  %v3642_v40 = vmul.f32 %v10278_v48, %v3641_v51 }
 0x64a   : > { %12563 = vst [vmem:[#allocation71_spill] sm:$0xff] %v10363_v54  ;;  %7737 = vpow2.f32 %v3563_v57  ;;  %4047 = vrot.lane.b32.xlu1 %v10363_v54, %s8255_s30  ;;  %v3650_v57 = vadd.f32 1.0, %v3649_v2  ;;  %v3652_v23 = vand.u32 2147483647, %v10290_v38  ;;  %12566 = vst [vmem:[#allocation72_spill] sm:$0xff] %v10387_v61  ;;  %4137 = vrot.lane.b32.xlu0 %v10387_v61, %s8255_s30  ;;  %v3461_v52 = vmax.f32 %v10212_v63, 0.0 }
 0x64b   : > { %v10344_v45 = vpop.eup %7719  ;;  %v3838_v24 = vsel %vm3837_vm12, %v10177_v1, %v3836_v17  ;;  %v10393_v17 = vsel %vm3476_vm11, %v10187_v44, %v3716_v42  ;;  %v3847_v42 = vand.u32 2147483648, %v10209_v56  ;;  %vm3479_vm9 = vcmp.ne.f32.partialorder %v10239_v47, %v10239_v47 }
 0x64c   : > { %v7722_v3 = vpop.eup %7721  ;;  %v3673_v8 = vadd.f32 1.0, %v10344_v45  ;;  %v3651_v44 = vmul.f32 %v10290_v38, %v3650_v57  ;;  %vm10417_vm2 = vcmp.lt.f32.partialorder %v3652_v23, 0.0004427343  ;;  %v3658_v57 = vmul.f32 -0.5, %v10326_v12 }
 0x64d   : > { %v7724_v53 = vpop.eup %7723  ;;  %v3639_v21 = vmul.f32 0.6931472, %v7722_v3  ;;  %v3462_v23 = vmax.f32 %v10226_v9, 0.0  ;;  %vm3481_vm10 = vcmp.ne.f32.partialorder %v10252_v55, %v10252_v55 }
 0x64e   : > { %v10365_v30 = vpop.eup %7725  ;;  %v3843_v6 = vmul.f32 %v7724_v53, %v10209_v56  ;;  %7739 = vlog2.f32 %v3673_v8  ;;  %v10396_v53 = vsel %vm3839_vm14, %v3840_v35, %v3838_v24  ;;  %4219 = vrot.lane.b32.xlu1 %v10393_v17, %s8255_s30  ;;  %v3954_v35 = vpop.permute.xlu0 %3953  ;;  %vm3865_vm14 = vcmp.eq.f32.partialorder %v10329_v28, inf }
 0x64f   : > { %v10370_v14 = vpop.eup %7727  ;;  %v3664_v3 = vadd.f32 1.0, %v10365_v30  ;;  %v3645_v51 = vsel %vm10372_vm13, %v3642_v40, %v3639_v21  ;;  %v10410_v16 = vmul.f32 %v3954_v35, %v10396_v53  ;;  %v3659_v35 = vadd.f32 1.0, %v3658_v57 }
 0x650   : > { %v7730_v39 = vpop.eup %7729  ;;  %v3691_v48 = vadd.f32 1.0, %v10370_v14  ;;  %v3845_v8 = vsel %vm3844_vm15, %v10209_v56, %v3843_v6  ;;  %v3717_v21 = vadd.f32 %v3645_v51, %v3461_v52  ;;  %vm3858_vm13 = vcmp.eq.f32.partialorder %v10264_v18, inf }
 0x651   : > { %v3648_v2 = vmul.f32 0.6931472, %v7730_v39  ;;  %7741 = vlog2.f32 %v3664_v3  ;;  %12567 = vst [vmem:[#allocation73_spill] sm:$0xff] %v10410_v16  ;;  %v10415_v39 = vmul.f32 %v10046_v0, %v10393_v17  ;;  %v10421_v38 = vsel %vm3846_vm1, %v3847_v42, %v3845_v8  ;;  %v10423_v6 = vpop.eup %7731  ;;  %4049 = vrot.lane.b32.xlu0 %v10410_v16, %s8255_s30  ;;  %v3956_v3 = vpop.permute.xlu1 %3955 }
 0x652   : > { %7743 = vlog2.f32 %v3691_v48  ;;  %12571 = vst [vmem:[#allocation75_spill] sm:$0xff] %v10421_v38  ;;  %v7734_v0 = vpop.eup %7733  ;;  %v10438_v48 = vmul.f32 %v3956_v3, %v10421_v38  ;;  %v3682_v52 = vadd.f32 1.0, %v10423_v6  ;;  %v3676_v42 = vmul.f32 -0.5, %v10344_v45 }
 0x653   : > { %12568 = vst [vmem:[#allocation74_spill] sm:$0xff] %v10415_v39  ;;  %v3654_v40 = vsel %vm10417_vm2, %v3651_v44, %v3648_v2  ;;  %7745 = vrsqrt.f32 %v10264_v18  ;;  %4139 = vrot.lane.b32.xlu1 %v10415_v39, %s8255_s30  ;;  %v10441_v2 = vsel %vm3477_vm3, %v10212_v63, %v3717_v21  ;;  %v3850_v24 = vmul.f32 %v7734_v0, %v10244_v62 }
 0x654   : > { %7747 = vrsqrt.f32 %v10329_v28  ;;  %12572 = vst [vmem:[#allocation76_spill] sm:$0xff] %v10438_v48  ;;  %12573 = vst [vmem:[#allocation77_spill] sm:$0xff] %v10441_v2  ;;  %v3718_v8 = vadd.f32 %v3654_v40, %v3462_v23  ;;  %v3661_v21 = vand.u32 2147483647, %v10326_v12  ;;  %v3660_v0 = vmul.f32 %v10326_v12, %v3659_v35 }
 0x655   : > { %4221 = vrot.lane.b32.xlu0 %v10441_v2, %s8255_s30  ;;  %7749 = vlog2.f32 %v3682_v52  ;;  %v3677_v3 = vadd.f32 1.0, %v3676_v42  ;;  %v3852_v61 = vsel %vm3851_vm5, %v10244_v62, %v3850_v24  ;;  %v3679_v16 = vand.u32 2147483647, %v10344_v45 }
 0x656   : > { %v7736_v51 = vpop.eup %7735  ;;  %v10456_v23 = vsel %vm3478_vm4, %v10226_v9, %v3718_v8  ;;  %v3694_v9 = vmul.f32 -0.5, %v10370_v14  ;;  %v3854_v8 = vand.u32 2147483648, %v10244_v62  ;;  %vm10468_vm6 = vcmp.lt.f32.partialorder %v3661_v21, 0.0004427343 }
 0x657   : > { %v10444_v44 = vpop.eup %7737  ;;  %4051 = vrot.lane.b32.xlu1 %v10438_v48, %s8255_s30  ;;  %v3657_v63 = vmul.f32 0.6931472, %v7736_v51  ;;  %v3667_v51 = vmul.f32 -0.5, %v10365_v30  ;;  %v10475_v12 = vmul.f32 %v10042_v34, %v10441_v2  ;;  %v3463_v21 = vmax.f32 %v10239_v47, 0.0 }
 0x658   : > { %v3700_v57 = vadd.f32 1.0, %v10444_v44  ;;  %v10479_v24 = vsel %vm3853_vm7, %v3854_v8, %v3852_v61  ;;  %v3678_v54 = vmul.f32 %v10344_v45, %v3677_v3  ;;  %vm10486_vm8 = vcmp.lt.f32.partialorder %v3679_v16, 0.0004427343 }
 0x659   : > { %12576 = vst [vmem:[#allocation78_spill] sm:$0xff] %v10475_v12  ;;  %v3663_v42 = vsel %vm10468_vm6, %v3660_v0, %v3657_v63  ;;  %12577 = vst [vmem:[#allocation79_spill] sm:$0xff] %v10479_v24  ;;  %4141 = vrot.lane.b32.xlu0 %v10475_v12, %s8255_s30  ;;  %v3668_v34 = vadd.f32 1.0, %v3667_v51  ;;  %v3695_v63 = vadd.f32 1.0, %v3694_v9  ;;  %v3697_v3 = vand.u32 2147483647, %v10370_v14 }
 0x65a   : > { %7751 = vlog2.f32 %v3700_v57  ;;  %v3958_v57 = vpop.permute.xlu0 %3957  ;;  %v3719_v0 = vadd.f32 %v3663_v42, %v3463_v21  ;;  %v3670_v51 = vand.u32 2147483647, %v10365_v30  ;;  %v3465_v16 = vmax.f32 %v10252_v55, 0.0 }
 0x65b   : > { %v7740_v40 = vpop.eup %7739  ;;  %4223 = vrot.lane.b32.xlu1 %v10456_v23, %s8255_s30  ;;  %7753 = vrsqrt.f32 %v10393_v17  ;;  %v10495_v8 = vmul.f32 %v3958_v57, %v10479_v24  ;;  %v3685_v52 = vmul.f32 -0.5, %v10423_v6  ;;  %v3464_v42 = vmax.f32 %v10260_v37, 0.0 }
 0x65c   : > { %v3675_v39 = vmul.f32 0.6931472, %v7740_v40  ;;  %7755 = vrsqrt.f32 %v10441_v2  ;;  %v3669_v12 = vmul.f32 %v10365_v30, %v3668_v34  ;;  %vm3698_vm11 = vcmp.lt.f32.partialorder %v3697_v3, 0.0004427343 }
 0x65d   : > { %12580 = vst [vmem:[#allocation80_spill] sm:$0xff] %v10495_v8  ;;  %4053 = vrot.lane.b32.xlu0 %v10495_v8, %s8255_s30  ;;  %vm10515_vm12 = vcmp.lt.f32.partialorder %v3670_v51, 0.0004427343  ;;  %v3686_v8 = vadd.f32 1.0, %v3685_v52  ;;  %vm3860_vm15 = vcmp.eq.f32.partialorder %v10264_v18, 0.0  ;;  %vm3867_vm1 = vcmp.eq.f32.partialorder %v10329_v28, 0.0 }
 0x65e   : > { %v7742_v35 = vpop.eup %7741  ;;  %v3681_v45 = vsel %vm10486_vm8, %v3678_v54, %v3675_v39  ;;  %v3696_v39 = vmul.f32 %v10370_v14, %v3695_v63  ;;  %vm3483_vm2 = vcmp.ne.f32.partialorder %v10267_v60, %v10267_v60  ;;  %vm3480_vm4 = vcmp.ne.f32.partialorder %v10260_v37, %v10260_v37 }
 0x65f   : > { %v7744_v48 = vpop.eup %7743  ;;  %v3666_v21 = vmul.f32 0.6931472, %v7742_v35  ;;  %v3721_v54 = vadd.f32 %v3681_v45, %v3465_v16  ;;  %v3467_v35 = vmax.f32 %v10267_v60, 0.0  ;;  %v3688_v45 = vand.u32 2147483647, %v10423_v6 }
 0x660   : > { %v7746_v40 = vpop.eup %7745  ;;  %v3693_v9 = vmul.f32 0.6931472, %v7744_v48  ;;  %v10511_v48 = vsel %vm3479_vm9, %v10239_v47, %v3719_v0  ;;  %v3703_v47 = vmul.f32 -0.5, %v10444_v44  ;;  %v3868_v0 = vand.u32 2147483648, %v10329_v28 }
 0x661   : > { %v7748_v61 = vpop.eup %7747  ;;  %v3857_v38 = vmul.f32 %v7746_v40, %v10264_v18  ;;  %v3672_v40 = vsel %vm10515_vm12, %v3669_v12, %v3666_v21  ;;  %4225 = vrot.lane.b32.xlu0 %v10511_v48, %s8255_s30  ;;  %v10531_v30 = vsel %vm3481_vm10, %v10252_v55, %v3721_v54  ;;  %7757 = vrsqrt.f32 %v10511_v48 }
 0x662   : > { %v3864_v57 = vmul.f32 %v7748_v61, %v10329_v28  ;;  %v3699_v14 = vsel %vm3698_vm11, %v3696_v39, %v3693_v9  ;;  %v7750_v63 = vpop.eup %7749  ;;  %v3861_v61 = vand.u32 2147483648, %v10264_v18  ;;  %v10542_v55 = vmul.f32 %v10056_v15, %v10456_v23 }
 0x663   : > { %v3859_v34 = vsel %vm3858_vm13, %v10264_v18, %v3857_v38  ;;  %v3723_v12 = vadd.f32 %v3699_v14, %v3467_v35  ;;  %v3684_v3 = vmul.f32 0.6931472, %v7750_v63  ;;  %v10546_v51 = vmul.f32 %v10052_v19, %v10511_v48  ;;  %v3962_v35 = vpop.permute.xlu0 %3961 }
 0x664   : > { %v3866_v24 = vsel %vm3865_vm14, %v10329_v28, %v3864_v57  ;;  %12583 = vst [vmem:[#allocation81_spill] sm:$0xff] %v10542_v55  ;;  %v10550_v52 = vsel %vm3860_vm15, %v3861_v61, %v3859_v34  ;;  %7759 = vrsqrt.f32 %v10456_v23  ;;  %v3687_v54 = vmul.f32 %v10423_v6, %v3686_v8  ;;  %4143 = vrot.lane.b32.xlu1 %v10542_v55, %s8255_s30  ;;  %v3960_v8 = vpop.permute.xlu1 %3959 }
 0x665   : > { %12584 = vst [vmem:[#allocation82_spill] sm:$0xff] %v10546_v51  ;;  %v10552_v9 = vsel %vm3867_vm1, %v3868_v0, %v3866_v24  ;;  %v3704_v39 = vadd.f32 1.0, %v3703_v47  ;;  %7761 = vrsqrt.f32 %v10531_v30  ;;  %4145 = vrot.lane.b32.xlu0 %v10546_v51, %s8255_s30  ;;  %v3720_v15 = vadd.f32 %v3672_v40, %v3464_v42 }
 0x666   : > { %12585 = vst [vmem:[#allocation83_spill] sm:$0xff] %v10552_v9  ;;  %vm10561_vm3 = vcmp.lt.f32.partialorder %v3688_v45, 0.0004427343  ;;  %v10566_v57 = vsel %vm3483_vm2, %v10267_v60, %v3723_v12  ;;  %v3706_v6 = vand.u32 2147483647, %v10444_v44  ;;  %v12376_v14 = vmov 1  }
 0x667   : > { %v7752_v16 = vpop.eup %7751  ;;  %7363 = vset.pattern.permute.xlu0 %v12376_v14  ;;  %v3690_v63 = vsel %vm10561_vm3, %v3687_v54, %v3684_v3  ;;  %v10573_v42 = vmul.f32 %v3960_v8, %v10550_v52  ;;  %v10576_v45 = vmul.f32 %v3962_v35, %v10552_v9  ;;  %v3466_v60 = vmax.f32 %v10286_v5, 0.0  ;;  %v3966_v8 = vpop.permute.xlu0 %3965 }
 0x668   : > { %v7754_v21 = vpop.eup %7753  ;;  %v3702_v47 = vmul.f32 0.6931472, %v7752_v16  ;;  %v3705_v40 = vmul.f32 %v10444_v44, %v3704_v39  ;;  %7763 = vrsqrt.f32 %v10566_v57  ;;  %v10590_v12 = vsel %vm3480_vm4, %v10260_v37, %v3720_v15 }
 0x669   : > { %v7756_v19 = vpop.eup %7755  ;;  %12588 = vst [vmem:[#allocation84_spill] sm:$0xff] %v10576_v45  ;;  %v3871_v34 = vmul.f32 %v7754_v21, %v10393_v17  ;;  %4055 = vrot.lane.b32.xlu1 %v10573_v42, %s8255_s30  ;;  %4057 = vrot.lane.b32.xlu0 %v10576_v45, %s8255_s30  ;;  %v3722_v61 = vadd.f32 %v3690_v63, %v3466_v60  ;;  %vm3707_vm5 = vcmp.lt.f32.partialorder %v3706_v6, 0.0004427343  ;;  %v3468_v44 = vmax.f32 %v10306_v4, 0.0 }
 0x66a   : > { %v3878_v24 = vmul.f32 %v7756_v19, %v10441_v2  ;;  %v3708_v0 = vsel %vm3707_vm5, %v3705_v40, %v3702_v47  ;;  %vm3872_vm6 = vcmp.eq.f32.partialorder %v10393_v17, inf  ;;  %vm3879_vm7 = vcmp.eq.f32.partialorder %v10441_v2, inf  ;;  %v3964_v47 = vpop.permute.xlu1 %3963 }
 0x66b   : > { %vm3482_vm8 = vcmp.ne.f32.partialorder %v10286_v5, %v10286_v5  ;;  %v3873_v3 = vsel %vm3872_vm6, %v10393_v17, %v3871_v34  ;;  %7765 = vrsqrt.f32 %v10590_v12  ;;  %v3724_v54 = vadd.f32 %v3708_v0, %v3468_v44  ;;  %v3970_v44 = vpop.permute.xlu0 %3969 }
 0x66c   : > { %v3880_v16 = vsel %vm3879_vm7, %v10441_v2, %v3878_v24  ;;  %v10605_v21 = vsel %vm3482_vm8, %v10286_v5, %v3722_v61  ;;  %v3875_v39 = vand.u32 2147483648, %v10393_v17  ;;  %v3882_v19 = vand.u32 2147483648, %v10441_v2 }
 0x66d   : > { %4227 = vrot.lane.b32.xlu1 %v10590_v12, %s8255_s30  ;;  %4229 = vrot.lane.b32.xlu0 %v10531_v30, %s8255_s30  ;;  %vm3874_vm9 = vcmp.eq.f32.partialorder %v10393_v17, 0.0  ;;  %vm3881_vm10 = vcmp.eq.f32.partialorder %v10441_v2, 0.0  ;;  %v10613_v15 = vmul.f32 %v10066_v10, %v10590_v12  ;;  %v10617_v38 = vmul.f32 %v10062_v22, %v10531_v30 }
 0x66e   : > { %v7758_v37 = vpop.eup %7757  ;;  %v10619_v6 = vsel %vm3874_vm9, %v3875_v39, %v3873_v3  ;;  %v10621_v5 = vsel %vm3881_vm10, %v3882_v19, %v3880_v16  ;;  %vm3484_vm11 = vcmp.ne.f32.partialorder %v10306_v4, %v10306_v4  ;;  %7767 = vrsqrt.f32 %v10605_v21 }
 0x66f   : > { %12589 = vst [vmem:[#allocation85_spill] sm:$0xff] %v10613_v15  ;;  %12590 = vst [vmem:[#allocation86_spill] sm:$0xff] %v10617_v38  ;;  %v3892_v63 = vmul.f32 %v7758_v37, %v10511_v48  ;;  %v10632_v10 = vsel %vm3484_vm11, %v10306_v4, %v3724_v54  ;;  %v10635_v60 = vmul.f32 %v3964_v47, %v10619_v6  ;;  %vm3893_vm12 = vcmp.eq.f32.partialorder %v10511_v48, inf  ;;  %v3968_v47 = vpop.permute.xlu1 %3967 }
 0x670   : > { %12591 = vst [vmem:[#allocation87_spill] sm:$0xff] %v10621_v5  ;;  %v10638_v40 = vmul.f32 %v3966_v8, %v10621_v5  ;;  %7769 = vrsqrt.f32 %v10632_v10  ;;  %v3896_v0 = vand.u32 2147483648, %v10511_v48  ;;  %vm3895_vm13 = vcmp.eq.f32.partialorder %v10511_v48, 0.0  ;;  %v12612_v5 = vld [vmem:[#allocation32_spill] sm:$0xff] }
 0x671   : > { %v7760_v35 = vpop.eup %7759  ;;  %4147 = vrot.lane.b32.xlu1 %v10613_v15, %s8255_s30  ;;  %4149 = vrot.lane.b32.xlu0 %v10617_v38, %s8255_s30  ;;  %12592 = vst [vmem:[#allocation88_spill] sm:$0xff] %v10635_v60  ;;  %v3894_v24 = vsel %vm3893_vm12, %v10511_v48, %v3892_v63  ;;  %v10653_v3 = vmul.f32 %v10073_v20, %v10566_v57  ;;  %vm3886_vm14 = vcmp.eq.f32.partialorder %v10456_v23, inf  ;;  %vm3907_vm15 = vcmp.eq.f32.partialorder %v10531_v30, inf }
 0x672   : > { %v7762_v22 = vpop.eup %7761  ;;  %12593 = vst [vmem:[#allocation89_spill] sm:$0xff] %v10638_v40  ;;  %v3885_v34 = vmul.f32 %v7760_v35, %v10456_v23  ;;  %v10656_v16 = vsel %vm3895_vm13, %v3896_v0, %v3894_v24  ;;  %v3889_v19 = vand.u32 2147483648, %v10456_v23  ;;  %v3910_v8 = vand.u32 2147483648, %v10531_v30  ;;  %v3974_v24 = vpop.permute.xlu0 %3973 }
 0x673   : > { %v3906_v61 = vmul.f32 %v7762_v22, %v10531_v30  ;;  %12594 = vst [vmem:[#allocation90_spill] sm:$0xff] %v10653_v3  ;;  %12595 = vst [vmem:[#allocation91_spill] sm:$0xff] %v10656_v16  ;;  %vm3888_vm1 = vcmp.eq.f32.partialorder %v10456_v23, 0.0  ;;  %v10670_v35 = vmul.f32 %v3970_v44, %v10656_v16  ;;  %vm3909_vm2 = vcmp.eq.f32.partialorder %v10531_v30, 0.0 }
 0x674   : > { %v3887_v37 = vsel %vm3886_vm14, %v10456_v23, %v3885_v34  ;;  %v10675_v63 = vmul.f32 %v10077_v33, %v10605_v21  ;;  %vm3921_vm3 = vcmp.eq.f32.partialorder %v10566_v57, inf  ;;  %v3924_v0 = vand.u32 2147483648, %v10566_v57 }
 0x675   : > { %4059 = vrot.lane.b32.xlu1 %v10635_v60, %s8255_s30  ;;  %4061 = vrot.lane.b32.xlu0 %v10638_v40, %s8255_s30  ;;  %v7764_v4 = vpop.eup %7763  ;;  %v3908_v54 = vsel %vm3907_vm15, %v10531_v30, %v3906_v61  ;;  %12596 = vst [vmem:[#allocation92_spill] sm:$0xff] %v10670_v35  ;;  %v10677_v22 = vsel %vm3888_vm1, %v3889_v19, %v3887_v37  ;;  %vm3923_vm4 = vcmp.eq.f32.partialorder %v10566_v57, 0.0  ;;  %vm3900_vm5 = vcmp.eq.f32.partialorder %v10590_v12, inf }
 0x676   : > { %v3920_v39 = vmul.f32 %v7764_v4, %v10566_v57  ;;  %12597 = vst [vmem:[#allocation93_spill] sm:$0xff] %v10675_v63  ;;  %12598 = vst [vmem:[#allocation94_spill] sm:$0xff] %v10677_v22  ;;  %v10679_v34 = vsel %vm3909_vm2, %v3910_v8, %v3908_v54  ;;  %v10690_v44 = vmul.f32 %v3968_v47, %v10677_v22  ;;  %v3903_v8 = vand.u32 2147483648, %v10590_v12  ;;  %v3972_v47 = vpop.permute.xlu1 %3971 }
 0x677   : > { %12599 = vst [vmem:[#allocation95_spill] sm:$0xff] %v10679_v34  ;;  %v10693_v37 = vmul.f32 %v3974_v24, %v10679_v34  ;;  %v3978_v24 = vpop.permute.xlu0 %3977  ;;  %vm3902_vm6 = vcmp.eq.f32.partialorder %v10590_v12, 0.0  ;;  %vm3914_vm7 = vcmp.eq.f32.partialorder %v10605_v21, inf  ;;  %vm3916_vm8 = vcmp.eq.f32.partialorder %v10605_v21, 0.0 }
 0x678   : > { %v7766_v20 = vpop.eup %7765  ;;  %v3922_v4 = vsel %vm3921_vm3, %v10566_v57, %v3920_v39  ;;  %12600 = vst [vmem:[#allocation96_spill] sm:$0xff] %v10690_v44  ;;  %vm3928_vm9 = vcmp.eq.f32.partialorder %v10632_v10, inf  ;;  %vm3930_vm10 = vcmp.eq.f32.partialorder %v10632_v10, 0.0  ;;  %v12611_v45 = vmov 1  }
 0x679   : > { %4231 = vrot.lane.b32.xlu1 %v10605_v21, %s8255_s30  ;;  %4153 = vrot.lane.b32.xlu0 %v10653_v3, %s8255_s30  ;;  %v3899_v61 = vmul.f32 %v7766_v20, %v10590_v12  ;;  %12601 = vst [vmem:[#allocation97_spill] sm:$0xff] %v10693_v37  ;;  %v10697_v54 = vsel %vm3923_vm4, %v3924_v0, %v3922_v4  ;;  %vm4269_vm11 = vcmask 15368   ;;  %vm5628_vm12 = vcmask 1041409  }
 0x67a   : > { %12602 = vst [vmem:[#allocation98_spill] sm:$0xff] %v10697_v54  ;;  %v10708_v4 = vmul.f32 %v3978_v24, %v10697_v54  ;;  %v3917_v24 = vand.u32 2147483648, %v10605_v21  ;;  %vm5630_vm13 = vcmask 1042434   ;;  %vm5632_vm14 = vcmask 1043459  }
 0x67b   : > { %v7768_v33 = vpop.eup %7767  ;;  %v3901_v39 = vsel %vm3900_vm5, %v10590_v12, %v3899_v61  ;;  %v10712_v61 = vmul.f32 %v10083_v46, %v10632_v10  ;;  %vm5634_vm15 = vcmask 1044484   ;;  %vm5636_vm1 = vcmask 1045509  }
 0x67c   : > { %v3913_v20 = vmul.f32 %v7768_v33, %v10605_v21  ;;  %12603 = vst [vmem:[#allocation99_spill] sm:$0xff] %v10708_v4  ;;  %v10714_v33 = vsel %vm3902_vm6, %v3903_v8, %v3901_v39  ;;  %v3976_v39 = vpop.permute.xlu1 %3975  ;;  %vm5638_vm2 = vcmask 1046534   ;;  %vm5640_vm3 = vcmask 1047559  }
 0x67d   : > { %4151 = vrot.lane.b32.xlu1 %v10675_v63, %s8255_s30  ;;  %4065 = vrot.lane.b32.xlu0 %v10670_v35, %s8255_s30  ;;  %v7770_v19 = vpop.eup %7769  ;;  %12604 = vst [vmem:[#allocation100_spill] sm:$0xff] %v10712_v61  ;;  %12605 = vst [vmem:[#allocation101_spill] sm:$0xff] %v10714_v33  ;;  %v10725_v3 = vmul.f32 %v3972_v47, %v10714_v33  ;;  %v8015_v35 = vld [vmem:[%s10088_s20 + $0x8] sm:$0xff]  ;;  %vm4561_vm6 = vcmask 130048  }
 0x67e   : > { %v3915_v0 = vsel %vm3914_vm7, %v10605_v21, %v3913_v20  ;;  %v3927_v14 = vmul.f32 %v7770_v19, %v10632_v10  ;;  %v3931_v19 = vand.u32 2147483648, %v10632_v10  ;;  %vm5563_vm7 = vcmask 130112  }
 0x67f   : > { %12606 = vst [vmem:[#allocation102_spill] sm:$0xff] %v10725_v3  ;;  %v10728_v46 = vsel %vm3916_vm8, %v3917_v24, %v3915_v0  ;;  %vm5999_vm8 = vcmask 23568  }
 0x680   : > { %12607 = vst [vmem:[#allocation103_spill] sm:$0xff] %v10728_v46  ;;  %v3929_v20 = vsel %vm3928_vm9, %v10632_v10, %v3927_v14  ;;  %v10738_v47 = vmul.f32 %v3976_v39, %v10728_v46  ;;  %v3980_v14 = vpop.permute.xlu1 %3979  ;;  %v8022_v46 = vld [vmem:[%s10088_s20 + $0x40] sm:$0xff]  ;;  %vm6660_vm9 = vcmask 261120  }
 0x681   : > { %4063 = vrot.lane.b32.xlu1 %v10690_v44, %s8255_s30  ;;  %4069 = vrot.lane.b32.xlu0 %v10693_v37, %s8255_s30  ;;  %v10741_v0 = vsel %vm3930_vm10, %v3931_v19, %v3929_v20  ;;  %vm6662_vm10 = vcmask 269312  }
 0x682   : > { %12608 = vst [vmem:[#allocation104_spill] sm:$0xff] %v10738_v47  ;;  %12609 = vst [vmem:[#allocation105_spill] sm:$0xff] %v10741_v0  ;;  %v10747_v24 = vmul.f32 %v3980_v14, %v10741_v0 }
 0x684   : > { %12610 = vst [vmem:[#allocation106_spill] sm:$0xff] %v10747_v24 }
 0x685   : > { %4155 = vrot.lane.b32.xlu1 %v10712_v61, %s8255_s30  ;;  %4073 = vrot.lane.b32.xlu0 %v10708_v4, %s8255_s30  ;;  %v4206_v8 = vpop.permute.xlu0 %4205  ;;  %v12614_v61 = vld [vmem:[#allocation37_spill] sm:$0xff] }
 0x689   : > { %4067 = vrot.lane.b32.xlu1 %v10725_v3, %s8255_s30  ;;  %4233 = vrot.lane.b32.xlu0 %v10566_v57, %s8255_s30  ;;  %v4126_v38 = vpop.permute.xlu0 %4125 }
 0x68c   : > { %v4208_v39 = vpop.permute.xlu1 %4207 }
 0x68d   : > { %4071 = vrot.lane.b32.xlu1 %v10738_v47, %s8255_s30  ;;  %4639 = vperm.xlu0 %7363, %v9218_v43  }
 0x68e   : > { %v4210_v20 = vpop.permute.xlu0 %4209 }
 0x690   : > { %v4128_v43 = vpop.permute.xlu1 %4127 }
 0x691   : > { %4075 = vrot.lane.b32.xlu1 %v10747_v24, %s8255_s30  ;;  %4651 = vperm.xlu0 %7363, %v9283_v32  }
 0x692   : > { %v4130_v19 = vpop.permute.xlu0 %4129 }
 0x695   : > { %4235 = vrot.lane.b32.xlu1 %v10632_v10, %s8255_s30  ;;  %4659 = vperm.xlu0 %7363, %v9322_v49  }
 0x696   : > { %v4212_v14 = vpop.permute.xlu1 %4211 }
 0x699   : > { %4486 = vperm.xlu1 %7361, %v9076_v59   ;;  %4667 = vperm.xlu0 %7363, %v9385_v27   ;;  %v8014_v27 = vld [vmem:[%s10088_s20] sm:$0xff] }
 0x69a   : > { %v4132_v51 = vpop.permute.xlu1 %4131  ;;  %v4013_v37 = vmul.f32 0.01, %v8014_v27 }
 0x69d   : > { %4490 = vperm.xlu1 %7361, %v9080_v7  }
 0x6a1   : > { %4498 = vperm.xlu1 %7361, %v9088_v36  }
 0x6a5   : > { %4506 = vperm.xlu1 %7361, %v9099_v58   ;;  %v4014_v58 = vmul.f32 0.01, %v8015_v35 }
 0x6a7   : > { %v10759_v32 = vpop.permute.xlu0 %4213 }
 0x6a9   : > { %4514 = vperm.xlu1 %7361, %v9123_v31  }
 0x6ad   : > { %v10765_v4 = vpop.permute.xlu1 %4215  ;;  %4522 = vperm.xlu1 %7361, %v9156_v25  }
 0x6b0   : > { %v10762_v49 = vpop.permute.xlu0 %4133 }
 0x6b1   : > { %4530 = vperm.xlu1 %7361, %v9203_v26   ;;  %v8016_v26 = vld [vmem:[%s10088_s20 + $0x10] sm:$0xff] }
 0x6b4   : > { %v4046_v7 = vpop.permute.xlu0 %4045  ;;  %v10770_v36 = vpop.permute.xlu1 %4135 }
 0x6b5   : > { %v4093_v54 = vmul.f32 %v4046_v7, %v4013_v37  ;;  %4538 = vperm.xlu1 %7361, %v9254_v11   ;;  %v4015_v11 = vmul.f32 0.01, %v8016_v26 }
 0x6b7   : > { %v4173_v31 = vadd.f32 %v4126_v38, %v4093_v54 }
 0x6b8   : > { %v10773_v34 = vpop.permute.xlu0 %4217 }
 0x6b9   : > { %7362 = vset.pattern.permute.xlu1 %v12611_v45  ;;  %v10777_v25 = vmul.f32 %v4206_v8, %v4173_v31 }
 0x6ba   : > { %4635 = vperm.xlu1 %7362, %v12612_v5  }
 0x6bb   : > { %v4342_v31 = vsel %vm4269_vm11, %v10777_v25, -inf }
 0x6bc   : > { %v4048_v40 = vpop.permute.xlu1 %4047  ;;  %v10782_v37 = vpop.permute.xlu0 %4137 }
 0x6bd   : > { %v4094_v16 = vmul.f32 %v4048_v40, %v4014_v58  ;;  %v4270_v58 = vsel %vm4269_vm11, %v10777_v25, inf  ;;  %v12613_v40 = vld [vmem:[#allocation35_spill] sm:$0xff] }
 0x6be   : > { %4643 = vperm.xlu1 %7362, %v12613_v40  }
 0x6bf   : > { %v4174_v27 = vadd.f32 %v4128_v43, %v4094_v16  ;;  %v8017_v43 = vld [vmem:[%s10088_s20 + $0x18] sm:$0xff] }
 0x6c0   : > { %v10780_v7 = vpop.permute.xlu1 %4219 }
 0x6c1   : > { %v10784_v35 = vmul.f32 %v4208_v39, %v4174_v27  ;;  %v4016_v27 = vmul.f32 0.01, %v8017_v43 }
 0x6c2   : > { %4647 = vperm.xlu1 %7362, %v12614_v61  }
 0x6c3   : > { %v4271_v38 = vsel %vm4269_vm11, %v10784_v35, inf  ;;  %v4343_v5 = vsel %vm4269_vm11, %v10784_v35, -inf  ;;  %v4050_v39 = vpop.permute.xlu0 %4049 }
 0x6c4   : > { %v4272_v16 = vmin.f32 %v4270_v58, %v4271_v38  ;;  %v4344_v54 = vmax.f32 %v4342_v31, %v4343_v5  ;;  %v4095_v26 = vmul.f32 %v4050_v39, %v4015_v11  ;;  %v12615_v5 = vld [vmem:[#allocation39_spill] sm:$0xff] }
 0x6c5   : > { %v10796_v8 = vpop.permute.xlu1 %4139 }
 0x6c6   : > { %v4273_v45 = vrot.slane %v4272_v16, 4  ;;  %v4345_v9 = vrot.slane %v4344_v54, 4  ;;  %v4175_v2 = vadd.f32 %v4130_v19, %v4095_v26  ;;  %4655 = vperm.xlu1 %7362, %v12615_v5  }
 0x6c7   : > { %v10800_v40 = vpop.permute.xlu0 %4221 }
 0x6c8   : > { %v4274_v63 = vmin.f32 %v4272_v16, %v4273_v45  ;;  %v4346_v15 = vmax.f32 %v4344_v54, %v4345_v9  ;;  %v10802_v58 = vmul.f32 %v4210_v20, %v4175_v2  ;;  %v12617_v16 = vld [vmem:[#allocation41_spill] sm:$0xff] }
 0x6c9   : > { %v4052_v55 = vpop.permute.xlu1 %4051 }
 0x6ca   : > { %v4096_v59 = vmul.f32 %v4052_v55, %v4016_v27  ;;  %v4275_v24 = vrot.slane %v4274_v63, 2  ;;  %v4347_v0 = vrot.slane %v4346_v15, 2  ;;  %v4279_v9 = vsel %vm4269_vm11, %v10802_v58, inf }
 0x6cb   : > { %v4351_v55 = vsel %vm4269_vm11, %v10802_v58, -inf  ;;  %v10816_v61 = vpop.permute.xlu0 %4141 }
 0x6cc   : > { %v4176_v31 = vadd.f32 %v4132_v51, %v4096_v59  ;;  %v4276_v38 = vmin.f32 %v4274_v63, %v4275_v24  ;;  %v4348_v11 = vmax.f32 %v4346_v15, %v4347_v0  ;;  %v12616_v51 = vld [vmem:[#allocation40_spill] sm:$0xff] }
 0x6cd   : > { %4663 = vperm.xlu1 %7362, %v12616_v51  }
 0x6ce   : > { %v10805_v39 = vmul.f32 %v4212_v14, %v4176_v31  ;;  %v4349_v19 = vrot.slane %v4348_v11, 1  ;;  %v4277_v26 = vrot.slane %v4276_v38, 1 }
 0x6cf   : > { %v4054_v27 = vpop.permute.xlu0 %4053 }
 0x6d0   : > { %v4280_v45 = vsel %vm4269_vm11, %v10805_v39, inf  ;;  %v4352_v59 = vsel %vm4269_vm11, %v10805_v39, -inf  ;;  %v4350_v2 = vmax.f32 %v4348_v11, %v4349_v19  ;;  %v4278_v0 = vmin.f32 %v4276_v38, %v4277_v26  ;;  %v10819_v19 = vpop.permute.xlu1 %4223 }
 0x6d1   : > { %v4281_v15 = vmin.f32 %v4279_v9, %v4280_v45  ;;  %v4353_v63 = vmax.f32 %v4351_v55, %v4352_v59  ;;  %4671 = vperm.xlu1 %7362, %v12617_v16   ;;  %v8018_v45 = vld [vmem:[%s10088_s20 + $0x20] sm:$0xff] }
 0x6d2   : > { %v4430_v14 = vsub.f32 %v4350_v2, %v4278_v0  ;;  %v4017_v59 = vmul.f32 0.01, %v8018_v45  ;;  %v4415_v47 = vsub.f32 %v10784_v35, %v4278_v0 }
 0x6d3   : > { %v4282_v24 = vrot.slane %v4281_v15, 4  ;;  %v4354_v20 = vrot.slane %v4353_v63, 4  ;;  %v10822_v38 = vpop.permute.xlu0 %4225 }
 0x6d4   : > { %v4438_v31 = vadd.f32 1e-08, %v4430_v14  ;;  %v4097_v16 = vmul.f32 %v4054_v27, %v4017_v59 }
 0x6d5   : > { %v4283_v54 = vmin.f32 %v4281_v15, %v4282_v24  ;;  %v4355_v43 = vmax.f32 %v4353_v63, %v4354_v20  ;;  %v8019_v20 = vld [vmem:[%s10088_s20 + $0x28] sm:$0xff] }
 0x6d6   : > { %7771 = vrcp.f32 %v4438_v31  ;;  %v10824_v63 = vpop.permute.xlu1 %4143  ;;  %v4018_v14 = vmul.f32 0.01, %v8019_v20 }
 0x6d7   : > { %v4284_v5 = vrot.slane %v4283_v54, 2  ;;  %v4356_v11 = vrot.slane %v4355_v43, 2  ;;  %v10826_v24 = vpop.permute.xlu0 %4145 }
 0x6d9   : > { %v4285_v9 = vmin.f32 %v4283_v54, %v4284_v5  ;;  %v4357_v55 = vmax.f32 %v4355_v43, %v4356_v11  ;;  %v4177_v54 = vadd.f32 %v10762_v49, %v4097_v16 }
 0x6db   : > { %v4358_v26 = vrot.slane %v4357_v55, 1  ;;  %v4286_v2 = vrot.slane %v4285_v9, 1  ;;  %v4056_v5 = vpop.permute.xlu1 %4055  ;;  %v4058_v11 = vpop.permute.xlu0 %4057 }
 0x6dc   : > { %v4098_v45 = vmul.f32 %v4056_v5, %v4018_v14 }
 0x6dd   : > { %v4359_v51 = vmax.f32 %v4357_v55, %v4358_v26  ;;  %v4287_v15 = vmin.f32 %v4285_v9, %v4286_v2  ;;  %v4414_v55 = vsub.f32 %v10777_v25, %v4278_v0  ;;  %v8020_v9 = vld [vmem:[%s10088_s20 + $0x30] sm:$0xff]  ;;  %v10834_v26 = vmul.f32 %v10759_v32, %v4177_v54 }
 0x6de   : > { %v4019_v59 = vmul.f32 0.01, %v8020_v9  ;;  %v4178_v2 = vadd.f32 %v10770_v36, %v4098_v45 }
 0x6df   : > { %v4431_v31 = vsub.f32 %v4359_v51, %v4287_v15  ;;  %v10837_v16 = vpop.permute.xlu1 %4227  ;;  %v10839_v20 = vpop.permute.xlu0 %4229  ;;  %v4288_v0 = vsel %vm4269_vm11, %v10834_v26, inf  ;;  %v4360_v32 = vsel %vm4269_vm11, %v10834_v26, -inf }
 0x6e0   : > { %v10842_v35 = vmul.f32 %v10765_v4, %v4178_v2  ;;  %v4099_v25 = vmul.f32 %v4058_v11, %v4019_v59 }
 0x6e1   : > { %v4439_v43 = vadd.f32 1e-08, %v4431_v31 }
 0x6e2   : > { %v4289_v36 = vsel %vm4269_vm11, %v10842_v35, inf }
 0x6e3   : > { %7773 = vrcp.f32 %v4439_v43  ;;  %v7772_v27 = vpop.eup %7771  ;;  %v4290_v14 = vmin.f32 %v4288_v0, %v4289_v36  ;;  %v10852_v54 = vpop.permute.xlu1 %4147  ;;  %v8021_v43 = vld [vmem:[%s10088_s20 + $0x38] sm:$0xff]  ;;  %v4416_v0 = vsub.f32 %v10802_v58, %v4287_v15 }
 0x6e4   : > { %v4455_v51 = vmul.f32 %v7772_v27, %v4415_v47  ;;  %v4454_v49 = vmul.f32 %v7772_v27, %v4414_v55  ;;  %v4361_v47 = vsel %vm4269_vm11, %v10842_v35, -inf  ;;  %v10854_v4 = vpop.permute.xlu0 %4149  ;;  %v4020_v5 = vmul.f32 0.01, %v8021_v43 }
 0x6e5   : > { %v4362_v31 = vmax.f32 %v4360_v32, %v4361_v47  ;;  %v4291_v11 = vrot.slane %v4290_v14, 4  ;;  %v4179_v55 = vadd.f32 %v10782_v37, %v4099_v25  ;;  %v4021_v37 = vmul.f32 0.01, %v8022_v46 }
 0x6e6   : > { %6079 = vperm.xlu1 %7362, %v4455_v51   ;;  %6074 = vperm.xlu0 %7363, %v4454_v49   ;;  %v4417_v49 = vsub.f32 %v10805_v39, %v4287_v15  ;;  %v8023_v15 = vld [vmem:[%s10088_s20 + $0x50] sm:$0xff] }
 0x6e7   : > { %v4363_v45 = vrot.slane %v4362_v31, 4  ;;  %v4292_v27 = vmin.f32 %v4290_v14, %v4291_v11  ;;  %v4060_v59 = vpop.permute.xlu1 %4059  ;;  %v10861_v43 = vmul.f32 %v10773_v34, %v4179_v55  ;;  %v4023_v46 = vmul.f32 0.01, %v8023_v15  ;;  %v8025_v15 = vld [vmem:[%s10088_s20 + $0x60] sm:$0xff] }
 0x6e8   : > { %v4062_v2 = vpop.permute.xlu0 %4061  ;;  %v4100_v51 = vmul.f32 %v4060_v59, %v4020_v5  ;;  %v4025_v44 = vmul.f32 0.01, %v8025_v15 }
 0x6e9   : > { %v4364_v9 = vmax.f32 %v4362_v31, %v4363_v45  ;;  %v4293_v36 = vrot.slane %v4292_v27, 2  ;;  %v4369_v55 = vsel %vm4269_vm11, %v10861_v43, -inf }
 0x6ea   : > { %v4180_v3 = vadd.f32 %v10796_v8, %v4100_v51  ;;  %v4297_v8 = vsel %vm4269_vm11, %v10861_v43, inf }
 0x6eb   : > { %v4365_v47 = vrot.slane %v4364_v9, 2  ;;  %v4294_v31 = vmin.f32 %v4292_v27, %v4293_v36  ;;  %v10865_v5 = vpop.permute.xlu1 %4231  ;;  %v8024_v36 = vld [vmem:[%s10088_s20 + $0x48] sm:$0xff] }
 0x6ec   : > { %v10867_v39 = vpop.permute.xlu0 %4153  ;;  %v10870_v58 = vmul.f32 %v10780_v7, %v4180_v3  ;;  %v4101_v7 = vmul.f32 %v4062_v2, %v4021_v37 }
 0x6ed   : > { %v4366_v11 = vmax.f32 %v4364_v9, %v4365_v47  ;;  %v4295_v45 = vrot.slane %v4294_v31, 1  ;;  %v4022_v47 = vmul.f32 0.01, %v8024_v36 }
 0x6ee   : > { %v4298_v27 = vsel %vm4269_vm11, %v10870_v58, inf  ;;  %v4370_v3 = vsel %vm4269_vm11, %v10870_v58, -inf  ;;  %v4181_v60 = vadd.f32 %v10816_v61, %v4101_v7 }
 0x6ef   : > { %v4367_v34 = vrot.slane %v4366_v11, 1  ;;  %v4299_v59 = vmin.f32 %v4297_v8, %v4298_v27  ;;  %v4371_v51 = vmax.f32 %v4369_v55, %v4370_v3 }
 0x6f0   : > { %v7774_v32 = vpop.eup %7773  ;;  %v10890_v3 = vmul.f32 %v10800_v40, %v4181_v60 }
 0x6f1   : > { %v4457_v25 = vmul.f32 %v7774_v32, %v4417_v49  ;;  %v4456_v14 = vmul.f32 %v7774_v32, %v4416_v0  ;;  %v4368_v9 = vmax.f32 %v4366_v11, %v4367_v34  ;;  %v10881_v49 = vpop.permute.xlu1 %4151  ;;  %v4066_v0 = vpop.permute.xlu0 %4065  ;;  %v10883_v32 = vmin.f32 %v4294_v31, %v4295_v45 }
 0x6f2   : > { %v4103_v11 = vmul.f32 %v4066_v0, %v4023_v46 }
 0x6f3   : > { %6089 = vperm.xlu1 %7362, %v4457_v25   ;;  %6084 = vperm.xlu0 %7363, %v4456_v14   ;;  %v4300_v25 = vrot.slane %v4299_v59, 4  ;;  %v4372_v14 = vrot.slane %v4371_v51, 4  ;;  %v4432_v33 = vsub.f32 %v4368_v9, %v10883_v32 }
 0x6f5   : > { %v4301_v22 = vmin.f32 %v4299_v59, %v4300_v25  ;;  %v4373_v2 = vmax.f32 %v4371_v51, %v4372_v14  ;;  %v4064_v37 = vpop.permute.xlu1 %4063  ;;  %v4070_v34 = vpop.permute.xlu0 %4069  ;;  %v4440_v8 = vadd.f32 1e-08, %v4432_v33  ;;  %v4183_v59 = vadd.f32 %v10826_v24, %v4103_v11  ;;  %v8026_v33 = vld [vmem:[%s10088_s20 + $0x58] sm:$0xff] }
 0x6f6   : > { %v4102_v55 = vmul.f32 %v4064_v37, %v4022_v47  ;;  %v4105_v27 = vmul.f32 %v4070_v34, %v4025_v44  ;;  %v4024_v51 = vmul.f32 0.01, %v8026_v33  ;;  %v8027_v47 = vld [vmem:[%s10088_s20 + $0x70] sm:$0xff]  ;;  %v8028_v34 = vld [vmem:[%s10088_s20 + $0x68] sm:$0xff] }
 0x6f7   : > { %v4302_v31 = vrot.slane %v4301_v22, 2  ;;  %v4374_v45 = vrot.slane %v4373_v2, 2  ;;  %7775 = vrcp.f32 %v4440_v8  ;;  %v4027_v60 = vmul.f32 0.01, %v8027_v47 }
 0x6f8   : > { %v4182_v9 = vadd.f32 %v10824_v63, %v4102_v55  ;;  %v4185_v44 = vadd.f32 %v10854_v4, %v4105_v27  ;;  %v4378_v63 = vsel %vm4269_vm11, %v10890_v3, -inf  ;;  %v4026_v8 = vmul.f32 0.01, %v8028_v34 }
 0x6f9   : > { %v4303_v36 = vmin.f32 %v4301_v22, %v4302_v31  ;;  %v4375_v61 = vmax.f32 %v4373_v2, %v4374_v45  ;;  %v10893_v7 = vpop.permute.xlu1 %4155  ;;  %v4306_v22 = vsel %vm4269_vm11, %v10890_v3, inf  ;;  %v4074_v25 = vpop.permute.xlu0 %4073  ;;  %v10911_v2 = vmul.f32 %v10822_v38, %v4183_v59 }
 0x6fa   : > { %v10897_v46 = vmul.f32 %v10819_v19, %v4182_v9  ;;  %v10917_v27 = vmul.f32 %v10839_v20, %v4185_v44  ;;  %v4107_v9 = vmul.f32 %v4074_v25, %v4027_v60  ;;  %v4419_v38 = vsub.f32 %v10842_v35, %v10883_v32 }
 0x6fb   : > { %v4376_v0 = vrot.slane %v4375_v61, 1  ;;  %v4304_v40 = vrot.slane %v4303_v36, 1  ;;  %v4418_v20 = vsub.f32 %v10834_v26, %v10883_v32  ;;  %v4387_v44 = vsel %vm4269_vm11, %v10911_v2, -inf }
 0x6fc   : > { %v4307_v24 = vsel %vm4269_vm11, %v10897_v46, inf  ;;  %v4379_v19 = vsel %vm4269_vm11, %v10897_v46, -inf }
 0x6fd   : > { %v4377_v14 = vmax.f32 %v4375_v61, %v4376_v0  ;;  %v4308_v15 = vmin.f32 %v4306_v22, %v4307_v24  ;;  %v4380_v4 = vmax.f32 %v4378_v63, %v4379_v19  ;;  %v4068_v37 = vpop.permute.xlu1 %4067  ;;  %v10914_v55 = vmin.f32 %v4303_v36, %v4304_v40  ;;  %v8029_v61 = vld [vmem:[%s10088_s20 + $0x78] sm:$0xff]  ;;  %v4234_v34 = vpop.permute.xlu0 %4233 }
 0x6fe   : > { %v4104_v11 = vmul.f32 %v4068_v37, %v4024_v51  ;;  %v4028_v0 = vmul.f32 0.01, %v8029_v61  ;;  %v4315_v36 = vsel %vm4269_vm11, %v10911_v2, inf  ;;  %v4324_v24 = vsel %vm4269_vm11, %v10917_v27, inf }
 0x6ff   : > { %v4309_v31 = vrot.slane %v4308_v15, 4  ;;  %v4381_v45 = vrot.slane %v4380_v4, 4  ;;  %v4433_v59 = vsub.f32 %v4377_v14, %v10914_v55  ;;  %v4187_v19 = vadd.f32 %v10867_v39, %v4107_v9 }
 0x700   : > { %v4184_v33 = vadd.f32 %v10852_v54, %v4104_v11 }
 0x701   : > { %v4310_v51 = vmin.f32 %v4308_v15, %v4309_v31  ;;  %v4382_v47 = vmax.f32 %v4380_v4, %v4381_v45  ;;  %v4072_v40 = vpop.permute.xlu1 %4071  ;;  %v4441_v22 = vadd.f32 1e-08, %v4433_v59 }
 0x702   : > { %v10931_v54 = vmul.f32 %v10837_v16, %v4184_v33  ;;  %v4106_v60 = vmul.f32 %v4072_v40, %v4026_v8 }
 0x703   : > { %v4311_v35 = vrot.slane %v4310_v51, 2  ;;  %v4383_v63 = vrot.slane %v4382_v47, 2  ;;  %7777 = vrcp.f32 %v4441_v22 }
 0x704   : > { %v7776_v25 = vpop.eup %7775  ;;  %v4316_v14 = vsel %vm4269_vm11, %v10931_v54, inf  ;;  %v4388_v26 = vsel %vm4269_vm11, %v10931_v54, -inf  ;;  %v4186_v32 = vadd.f32 %v10881_v49, %v4106_v60 }
 0x705   : > { %v4312_v16 = vmin.f32 %v4310_v51, %v4311_v35  ;;  %v4384_v15 = vmax.f32 %v4382_v47, %v4383_v63  ;;  %v4317_v4 = vmin.f32 %v4315_v36, %v4316_v14  ;;  %v4389_v37 = vmax.f32 %v4387_v44, %v4388_v26  ;;  %v4076_v11 = vpop.permute.xlu1 %4075 }
 0x706   : > { %v10942_v8 = vmul.f32 %v10865_v5, %v4186_v32  ;;  %v4108_v39 = vmul.f32 %v4076_v11, %v4028_v0  ;;  %v4459_v31 = vmul.f32 %v7776_v25, %v4419_v38  ;;  %v4458_v45 = vmul.f32 %v7776_v25, %v4418_v20 }
 0x707   : > { %v4385_v9 = vrot.slane %v4384_v15, 1  ;;  %v4318_v33 = vrot.slane %v4317_v4, 4  ;;  %v4390_v61 = vrot.slane %v4389_v37, 4  ;;  %v4313_v59 = vrot.slane %v4312_v16, 1 }
 0x708   : > { %v4325_v49 = vsel %vm4269_vm11, %v10942_v8, inf  ;;  %v4397_v51 = vsel %vm4269_vm11, %v10942_v8, -inf  ;;  %v10948_v47 = vmul.f32 %v4234_v34, %v4187_v19  ;;  %6099 = vperm.xlu1 %7362, %v4459_v31   ;;  %6094 = vperm.xlu0 %7363, %v4458_v45   ;;  %v4188_v5 = vadd.f32 %v10893_v7, %v4108_v39 }
 0x709   : > { %v4319_v36 = vmin.f32 %v4317_v4, %v4318_v33  ;;  %v4391_v0 = vmax.f32 %v4389_v37, %v4390_v61  ;;  %v4396_v38 = vsel %vm4269_vm11, %v10917_v27, -inf  ;;  %v4326_v40 = vmin.f32 %v4324_v24, %v4325_v49  ;;  %v4236_v20 = vpop.permute.xlu1 %4235 }
 0x70a   : > { %v4386_v44 = vmax.f32 %v4384_v15, %v4385_v9  ;;  %v4398_v60 = vmax.f32 %v4396_v38, %v4397_v51  ;;  %v10953_v22 = vmul.f32 %v4236_v20, %v4188_v5  ;;  %v10955_v35 = vmin.f32 %v4312_v16, %v4313_v59 }
 0x70b   : > { %v4320_v63 = vrot.slane %v4319_v36, 2  ;;  %v4392_v19 = vrot.slane %v4391_v0, 2  ;;  %v4327_v25 = vrot.slane %v4326_v40, 4  ;;  %v4333_v7 = vsel %vm4269_vm11, %v10948_v47, inf }
 0x70c   : > { %v4399_v14 = vrot.slane %v4398_v60, 4  ;;  %v4334_v26 = vsel %vm4269_vm11, %v10953_v22, inf  ;;  %v4406_v24 = vsel %vm4269_vm11, %v10953_v22, -inf  ;;  %v4405_v4 = vsel %vm4269_vm11, %v10948_v47, -inf }
 0x70d   : > { %v4393_v32 = vmax.f32 %v4391_v0, %v4392_v19  ;;  %v4328_v15 = vmin.f32 %v4326_v40, %v4327_v25  ;;  %v4335_v16 = vmin.f32 %v4333_v7, %v4334_v26  ;;  %v4407_v11 = vmax.f32 %v4405_v4, %v4406_v24 }
 0x70e   : > { %v4400_v37 = vmax.f32 %v4398_v60, %v4399_v14  ;;  %v4421_v34 = vsub.f32 %v10870_v58, %v10914_v55  ;;  %v4434_v39 = vsub.f32 %v4386_v44, %v10955_v35  ;;  %v4321_v31 = vmin.f32 %v4319_v36, %v4320_v63 }
 0x70f   : > { %v4329_v45 = vrot.slane %v4328_v15, 2  ;;  %v4336_v9 = vrot.slane %v4335_v16, 4  ;;  %v4420_v33 = vsub.f32 %v10861_v43, %v10914_v55  ;;  %v4394_v61 = vrot.slane %v4393_v32, 1 }
 0x710   : > { %v4401_v59 = vrot.slane %v4400_v37, 2  ;;  %v4408_v49 = vrot.slane %v4407_v11, 4  ;;  %v4442_v51 = vadd.f32 1e-08, %v4434_v39  ;;  %v7778_v5 = vpop.eup %7777  ;;  %v4322_v44 = vrot.slane %v4321_v31, 1 }
 0x711   : > { %v4330_v0 = vmin.f32 %v4328_v15, %v4329_v45  ;;  %v4337_v38 = vmin.f32 %v4335_v16, %v4336_v9  ;;  %v4461_v60 = vmul.f32 %v7778_v5, %v4421_v34  ;;  %v4460_v19 = vmul.f32 %v7778_v5, %v4420_v33 }
 0x712   : > { %v4402_v40 = vmax.f32 %v4400_v37, %v4401_v59  ;;  %v4409_v20 = vmax.f32 %v4407_v11, %v4408_v49  ;;  %7779 = vrcp.f32 %v4442_v51  ;;  %v4395_v36 = vmax.f32 %v4393_v32, %v4394_v61 }
 0x713   : > { %v4338_v58 = vrot.slane %v4337_v38, 2  ;;  %6109 = vperm.xlu1 %7362, %v4461_v60   ;;  %6104 = vperm.xlu0 %7363, %v4460_v19   ;;  %v4331_v43 = vrot.slane %v4330_v0, 1  ;;  %v4323_v14 = vmin.f32 %v4321_v31, %v4322_v44  ;;  %v4423_v33 = vsub.f32 %v10897_v46, %v10955_v35 }
 0x714   : > { %v4403_v63 = vrot.slane %v4402_v40, 1  ;;  %v4410_v25 = vrot.slane %v4409_v20, 2  ;;  %v4422_v31 = vsub.f32 %v10890_v3, %v10955_v35  ;;  %vm6664_vm11 = vcmask 277504  }
 0x715   : > { %v4339_v55 = vmin.f32 %v4337_v38, %v4338_v58  ;;  %v4332_v24 = vmin.f32 %v4330_v0, %v4331_v43  ;;  %v4435_v16 = vsub.f32 %v4395_v36, %v4323_v14  ;;  %v4425_v51 = vsub.f32 %v10931_v54, %v4323_v14  ;;  %v12618_v36 = vld [vmem:[#allocation43_spill] sm:$0xff] }
 0x716   : > { %v4404_v7 = vmax.f32 %v4402_v40, %v4403_v63  ;;  %v4411_v26 = vmax.f32 %v4409_v20, %v4410_v25  ;;  %v4424_v5 = vsub.f32 %v10911_v2, %v4323_v14  ;;  %v12620_v63 = vld [vmem:[#allocation45_spill] sm:$0xff]  ;;  %v12621_v25 = vld [vmem:[#allocation44_spill] sm:$0xff]  ;;  %v12622_v43 = vld [vmem:[#allocation47_spill] sm:$0xff] }
 0x717   : > { %v4340_v15 = vrot.slane %v4339_v55, 1  ;;  %v4443_v39 = vadd.f32 1e-08, %v4435_v16  ;;  %v4427_v60 = vsub.f32 %v10942_v8, %v4332_v24  ;;  %v4426_v46 = vsub.f32 %v10917_v27, %v4332_v24  ;;  %v12619_v8 = vld [vmem:[#allocation42_spill] sm:$0xff]  ;;  %v10982_v27 = vpop.permute.xlu1 %4486 }
 0x718   : > { %v4412_v4 = vrot.slane %v4411_v26, 1  ;;  %v4436_v11 = vsub.f32 %v4404_v7, %v4332_v24 }
 0x719   : > { %v4341_v37 = vmin.f32 %v4339_v55, %v4340_v15  ;;  %7781 = vrcp.f32 %v4443_v39  ;;  %v12624_v55 = vmov 0   ;;  %v12630_v15 = vld [vmem:[#allocation75_spill] sm:$0xff]  ;;  %v11060_v39 = vld [vmem:[#allocation5 + $0x8] sm:$0xff] }
 0x71a   : > { %v4413_v34 = vmax.f32 %v4411_v26, %v4412_v4  ;;  %v4444_v45 = vadd.f32 1e-08, %v4436_v11 }
 0x71b   : > { %v4429_v58 = vsub.f32 %v10953_v22, %v4341_v37  ;;  %v4428_v44 = vsub.f32 %v10948_v47, %v4341_v37  ;;  %v12623_v22 = vld [vmem:[#allocation46_spill] sm:$0xff]  ;;  %v10988_v47 = vpop.permute.xlu1 %4490 }
 0x71c   : > { %v4437_v9 = vsub.f32 %v4413_v34, %v4341_v37  ;;  %7783 = vrcp.f32 %v4444_v45  ;;  %v5063_v34 = vadd.f32 1e-06, %v10573_v42  ;;  %v11062_v45 = vld [vmem:[#allocation5] sm:$0xff] }
 0x71e   : > { %v4445_v32 = vadd.f32 1e-08, %v4437_v9 }
 0x71f   : > { %v7780_v61 = vpop.eup %7779  ;;  %v10993_v14 = vpop.permute.xlu1 %4498 }
 0x720   : > { %7785 = vrcp.f32 %v4445_v32  ;;  %v4463_v59 = vmul.f32 %v7780_v61, %v4423_v33  ;;  %v4462_v49 = vmul.f32 %v7780_v61, %v4422_v31  ;;  %v12640_v33 = vld [vmem:[#allocation88_spill] sm:$0xff] }
 0x721   : > { %v5065_v31 = vadd.f32 1e-06, %v12640_v33 }
 0x722   : > { %6119 = vperm.xlu1 %7362, %v4463_v59   ;;  %6114 = vperm.xlu0 %7363, %v4462_v49  }
 0x723   : > { %v10996_v7 = vpop.permute.xlu1 %4506 }
 0x726   : > { %v7782_v0 = vpop.eup %7781 }
 0x727   : > { %v4465_v40 = vmul.f32 %v7782_v0, %v4425_v51  ;;  %v4464_v20 = vmul.f32 %v7782_v0, %v4424_v5  ;;  %v11000_v26 = vpop.permute.xlu1 %4514 }
 0x729   : > { %v7784_v38 = vpop.eup %7783  ;;  %6129 = vperm.xlu1 %7362, %v4465_v40   ;;  %6124 = vperm.xlu0 %7363, %v4464_v20   ;;  %v12641_v40 = vld [vmem:[#allocation101_spill] sm:$0xff] }
 0x72a   : > { %v4467_v3 = vmul.f32 %v7784_v38, %v4427_v60  ;;  %v4466_v35 = vmul.f32 %v7784_v38, %v4426_v46 }
 0x72b   : > { %v11003_v24 = vpop.permute.xlu1 %4522 }
 0x72c   : > { %12625 = vst [vmem:[#allocation32_spill] sm:$0xff] %v11003_v24 }
 0x72d   : > { %v7786_v19 = vpop.eup %7785  ;;  %6139 = vperm.xlu1 %7362, %v4467_v3   ;;  %6134 = vperm.xlu0 %7363, %v4466_v35   ;;  %v12644_v3 = vld [vmem:[#allocation96_spill] sm:$0xff] }
 0x72e   : > { %v4469_v2 = vmul.f32 %v7786_v19, %v4429_v58  ;;  %v4468_v54 = vmul.f32 %v7786_v19, %v4428_v44  ;;  %v5067_v35 = vadd.f32 1e-06, %v12644_v3 }
 0x731   : > { %6149 = vperm.xlu1 %7362, %v4469_v2   ;;  %6144 = vperm.xlu0 %7363, %v4468_v54  }
 0x735   : > { %4679 = vperm.xlu1 %7362, %v12618_v36   ;;  %4675 = vperm.xlu0 %7363, %v12619_v8   ;;  %v12645_v8 = vld [vmem:[#allocation103_spill] sm:$0xff] }
 0x739   : > { %4687 = vperm.xlu1 %7362, %v12620_v63   ;;  %4683 = vperm.xlu0 %7363, %v12621_v25  }
 0x73d   : > { %4695 = vperm.xlu1 %7362, %v12622_v43   ;;  %4691 = vperm.xlu0 %7363, %v12623_v22   ;;  %v12646_v43 = vld [vmem:[#allocation102_spill] sm:$0xff] }
 0x73e   : > { %v5069_v22 = vadd.f32 1e-06, %v12646_v43 }
 0x741   : > { %7365 = vset.pattern.permute.xlu1 %v12624_v55  ;;  %7364 = vset.pattern.permute.xlu0 %v12624_v55 }
 0x742   : > { %4787 = vperm.xlu1 %7365, %v10140_v41   ;;  %v11007_v41 = vpop.permute.xlu1 %4530 }
 0x743   : > { %12626 = vst [vmem:[#allocation35_spill] sm:$0xff] %v11007_v41 }
 0x746   : > { %4791 = vperm.xlu1 %7365, %v10172_v13   ;;  %v11010_v13 = vpop.permute.xlu1 %4538 }
 0x747   : > { %12627 = vst [vmem:[#allocation37_spill] sm:$0xff] %v11010_v13 }
 0x74a   : > { %4795 = vperm.xlu1 %7365, %v10177_v1   ;;  %v11014_v1 = vpop.permute.xlu1 %4635 }
 0x74e   : > { %4799 = vperm.xlu1 %7365, %v10209_v56   ;;  %v11017_v56 = vpop.permute.xlu1 %4643 }
 0x752   : > { %4803 = vperm.xlu1 %7365, %v10244_v62   ;;  %v11021_v62 = vpop.permute.xlu0 %4639 }
 0x756   : > { %4807 = vperm.xlu1 %7365, %v10264_v18   ;;  %v11023_v18 = vpop.permute.xlu1 %4647 }
 0x75a   : > { %4811 = vperm.xlu1 %7365, %v10329_v28   ;;  %v11026_v28 = vpop.permute.xlu0 %4651 }
 0x75e   : > { %4815 = vperm.xlu1 %7365, %v10393_v17   ;;  %v11028_v17 = vpop.permute.xlu1 %4655 }
 0x762   : > { %4823 = vperm.xlu1 %7365, %v10456_v23   ;;  %v11032_v23 = vpop.permute.xlu0 %4659 }
 0x766   : > { %4827 = vperm.xlu1 %7365, %v10511_v48   ;;  %v11034_v48 = vpop.permute.xlu1 %4663 }
 0x76a   : > { %4831 = vperm.xlu1 %7365, %v10590_v12   ;;  %v11039_v12 = vpop.permute.xlu1 %4671 }
 0x76e   : > { %4835 = vperm.xlu1 %7365, %v10531_v30   ;;  %v11037_v30 = vpop.permute.xlu0 %4667 }
 0x772   : > { %4839 = vperm.xlu1 %7365, %v10605_v21   ;;  %v11044_v21 = vpop.permute.xlu0 %6074 }
 0x773   : > { %12629 = vst [vmem:[#allocation40_spill] sm:$0xff] %v11044_v21  ;;  %v6240_v5 = vmul.f32 %v11044_v21, %v11062_v45 }
 0x776   : > { %4843 = vperm.xlu1 %7365, %v10566_v57   ;;  %v11042_v57 = vpop.permute.xlu1 %6079  ;;  %v11050_v16 = vpop.permute.xlu0 %6084 }
 0x777   : > { %12628 = vst [vmem:[#allocation39_spill] sm:$0xff] %v11042_v57  ;;  %12633 = vst [vmem:[#allocation43_spill] sm:$0xff] %v11050_v16  ;;  %v6241_v51 = vmul.f32 %v11042_v57, %v11060_v39 }
 0x779   : > { %v6256_v2 = vadd.f32 %v6241_v51, %v6240_v5 }
 0x77a   : > { %4847 = vperm.xlu1 %7365, %v10632_v10   ;;  %v12631_v10 = vld [vmem:[#allocation71_spill] sm:$0xff]  ;;  %v11048_v4 = vpop.permute.xlu1 %6089 }
 0x77b   : > { %12632 = vst [vmem:[#allocation41_spill] sm:$0xff] %v11048_v4  ;;  %v6243_v61 = vmul.f32 %v11048_v4, %v11060_v39 }
 0x77e   : > { %4868 = vperm.xlu1 %7365, %v10298_v29   ;;  %v5059_v29 = vadd.f32 1e-06, %v12631_v10 }
 0x780   : > { %7787 = vlog2.f32 %v5059_v29 }
 0x782   : > { %4873 = vperm.xlu1 %7365, %v10350_v50   ;;  %v12634_v50 = vld [vmem:[#allocation76_spill] sm:$0xff] }
 0x783   : > { %v5061_v37 = vadd.f32 1e-06, %v12634_v50  ;;  %v11054_v11 = vpop.permute.xlu1 %6099 }
 0x784   : > { %12635 = vst [vmem:[#allocation42_spill] sm:$0xff] %v11054_v11  ;;  %v6245_v59 = vmul.f32 %v11054_v11, %v11060_v39 }
 0x785   : > { %7789 = vlog2.f32 %v5061_v37  ;;  %v6257_v37 = vrot.slane %v6256_v2, 4 }
 0x786   : > { %4878 = vperm.xlu1 %7365, %v10396_v53   ;;  %v11056_v53 = vpop.permute.xlu0 %6094  ;;  %7791 = vlog2.f32 %v5063_v34 }
 0x787   : > { %12636 = vst [vmem:[#allocation45_spill] sm:$0xff] %v11056_v53  ;;  %v6244_v49 = vmul.f32 %v11056_v53, %v11062_v45  ;;  %7793 = vlog2.f32 %v5065_v31 }
 0x788   : > { %7795 = vlog2.f32 %v5067_v35  ;;  %v6258_v35 = vadd.f32 %v6257_v37, %v6256_v2 }
 0x789   : > { %v6270_v19 = vadd.f32 %v6245_v59, %v6244_v49  ;;  %7797 = vlog2.f32 %v5069_v22  ;;  %v12651_v22 = vld [vmem:[#allocation106_spill] sm:$0xff] }
 0x78a   : > { %4883 = vperm.xlu1 %7365, %v12630_v15  }
 0x78b   : > { %v6271_v55 = vrot.slane %v6270_v19, 4 }
 0x78d   : > { %v7788_v44 = vpop.eup %7787  ;;  %v6272_v51 = vadd.f32 %v6271_v55, %v6270_v19  ;;  %v5073_v55 = vadd.f32 1e-06, %v12651_v22 }
 0x78e   : > { %4893 = vperm.xlu1 %7365, %v10550_v52   ;;  %v11064_v9 = vpop.permute.xlu1 %6109  ;;  %v11066_v32 = vpop.permute.xlu0 %6104  ;;  %v12639_v52 = vld [vmem:[#allocation94_spill] sm:$0xff]  ;;  %v5077_v15 = vmul.f32 0.6931472, %v7788_v44 }
 0x78f   : > { %12637 = vst [vmem:[#allocation44_spill] sm:$0xff] %v11064_v9  ;;  %12638 = vst [vmem:[#allocation47_spill] sm:$0xff] %v11066_v32  ;;  %v6247_v0 = vmul.f32 %v11064_v9, %v11060_v39  ;;  %v6246_v38 = vmul.f32 %v11066_v32, %v11062_v45 }
 0x791   : > { %v6277_v54 = vadd.f32 %v6247_v0, %v6246_v38  ;;  %v5107_v38 = vmul.f32 2.0, %v5077_v15 }
 0x792   : > { %4903 = vperm.xlu1 %7365, %v10619_v6   ;;  %v6242_v6 = vmul.f32 %v11050_v16, %v11062_v45  ;;  %v7790_v29 = vpop.eup %7789 }
 0x793   : > { %v6278_v34 = vrot.slane %v6277_v54, 4  ;;  %v7792_v49 = vpop.eup %7791 }
 0x794   : > { %v6263_v20 = vadd.f32 %v6243_v61, %v6242_v6  ;;  %v12648_v6 = vld [vmem:[#allocation105_spill] sm:$0xff]  ;;  %v7794_v19 = vpop.eup %7793 }
 0x796   : > { %4913 = vperm.xlu1 %7365, %v12639_v52   ;;  %v6264_v63 = vrot.slane %v6263_v20, 4  ;;  %v12647_v52 = vld [vmem:[#allocation104_spill] sm:$0xff] }
 0x797   : > { %v5071_v31 = vadd.f32 1e-06, %v12647_v52 }
 0x798   : > { %v6265_v59 = vadd.f32 %v6264_v63, %v6263_v20  ;;  %v5085_v63 = vmul.f32 0.6931472, %v7792_v49 }
 0x799   : > { %7799 = vlog2.f32 %v5071_v31 }
 0x79a   : > { %4923 = vperm.xlu1 %7365, %v12641_v40   ;;  %v5081_v40 = vmul.f32 0.6931472, %v7790_v29  ;;  %v6266_v20 = vrot.slane %v6265_v59, 2  ;;  %v6259_v29 = vrot.slane %v6258_v35, 2  ;;  %7801 = vlog2.f32 %v5073_v55 }
 0x79c   : > { %v6267_v49 = vadd.f32 %v6266_v20, %v6265_v59  ;;  %v6260_v32 = vadd.f32 %v6259_v29, %v6258_v35 }
 0x79d   : > { %v11087_v60 = vpop.permute.xlu1 %6119  ;;  %v11089_v46 = vpop.permute.xlu0 %6114 }
 0x79e   : > { %12642 = vst [vmem:[#allocation46_spill] sm:$0xff] %v11087_v60  ;;  %12643 = vst [vmem:[#allocation75_spill] sm:$0xff] %v11089_v46  ;;  %v6249_v58 = vmul.f32 %v11087_v60, %v11060_v39  ;;  %v6248_v36 = vmul.f32 %v11089_v46, %v11062_v45  ;;  %4933 = vperm.xlu1 %7365, %v12645_v8   ;;  %v7796_v60 = vpop.eup %7795 }
 0x79f   : > { %v7798_v35 = vpop.eup %7797 }
 0x7a0   : > { %v6284_v25 = vadd.f32 %v6249_v58, %v6248_v36  ;;  %v6279_v58 = vadd.f32 %v6278_v34, %v6277_v54  ;;  %v5109_v54 = vmul.f32 2.0, %v5081_v40  ;;  %v5111_v40 = vmul.f32 2.0, %v5085_v63 }
 0x7a2   : > { %v6285_v61 = vrot.slane %v6284_v25, 4  ;;  %4943 = vperm.xlu1 %7365, %v12648_v6   ;;  %v6273_v6 = vrot.slane %v6272_v51, 2  ;;  %v6280_v37 = vrot.slane %v6279_v58, 2 }
 0x7a4   : > { %v11100_v5 = vpop.permute.xlu1 %6129  ;;  %v11102_v0 = vpop.permute.xlu0 %6124  ;;  %v6286_v36 = vadd.f32 %v6285_v61, %v6284_v25  ;;  %v6281_v9 = vadd.f32 %v6280_v37, %v6279_v58  ;;  %v6261_v58 = vrot.slane %v6260_v32, 1 }
 0x7a5   : > { %12649 = vst [vmem:[#allocation71_spill] sm:$0xff] %v11100_v5  ;;  %12650 = vst [vmem:[#allocation76_spill] sm:$0xff] %v11102_v0  ;;  %v6251_v44 = vmul.f32 %v11100_v5, %v11060_v39  ;;  %v6250_v8 = vmul.f32 %v11102_v0, %v11062_v45 }
 0x7a6   : > { %5129 = vperm.xlu1 %7365, %v5107_v38   ;;  %v6287_v34 = vrot.slane %v6286_v36, 2  ;;  %v5089_v38 = vmul.f32 0.6931472, %v7794_v19 }
 0x7a7   : > { %v6291_v46 = vadd.f32 %v6251_v44, %v6250_v8  ;;  %v6274_v44 = vadd.f32 %v6273_v6, %v6272_v51  ;;  %v6268_v51 = vrot.slane %v6267_v49, 1  ;;  %v5093_v6 = vmul.f32 0.6931472, %v7796_v60 }
 0x7a8   : > { %v11109_v15 = vpop.permute.xlu1 %6139  ;;  %v11111_v2 = vpop.permute.xlu0 %6134  ;;  %v6288_v11 = vadd.f32 %v6287_v34, %v6286_v36  ;;  %v5113_v63 = vmul.f32 2.0, %v5089_v38  ;;  %v5097_v38 = vmul.f32 0.6931472, %v7798_v35  ;;  %v11133_v60 = vadd.f32 %v6261_v58, %v6260_v32 }
 0x7a9   : > { %12652 = vst [vmem:[#allocation94_spill] sm:$0xff] %v11109_v15  ;;  %12653 = vst [vmem:[#allocation88_spill] sm:$0xff] %v11111_v2  ;;  %v6253_v25 = vmul.f32 %v11109_v15, %v11060_v39  ;;  %v6292_v31 = vrot.slane %v6291_v46, 4  ;;  %v6252_v61 = vmul.f32 %v11111_v2, %v11062_v45  ;;  %v6275_v20 = vrot.slane %v6274_v44, 1  ;;  %v7800_v36 = vpop.eup %7799 }
 0x7aa   : > { %5139 = vperm.xlu1 %7365, %v5109_v54   ;;  %v6282_v54 = vrot.slane %v6281_v9, 1  ;;  %v5117_v32 = vmul.f32 2.0, %v5097_v38  ;;  %v6312_v35 = vand.u32 2147483647, %v11133_v60 }
 0x7ab   : > { %v6293_v8 = vadd.f32 %v6292_v31, %v6291_v46  ;;  %v6298_v15 = vadd.f32 %v6253_v25, %v6252_v61  ;;  %v11127_v25 = vadd.f32 %v6268_v51, %v6267_v49  ;;  %v11129_v61 = vadd.f32 %v6275_v20, %v6274_v44 }
 0x7ac   : > { %v11117_v0 = vpop.permute.xlu1 %6149  ;;  %v11119_v5 = vpop.permute.xlu0 %6144  ;;  %v5101_v49 = vmul.f32 0.6931472, %v7800_v36 }
 0x7ad   : > { %12654 = vst [vmem:[#allocation101_spill] sm:$0xff] %v11117_v0  ;;  %12655 = vst [vmem:[#allocation96_spill] sm:$0xff] %v11119_v5  ;;  %v6255_v53 = vmul.f32 %v11117_v0, %v11060_v39  ;;  %v6294_v2 = vrot.slane %v6293_v8, 2  ;;  %v6254_v59 = vmul.f32 %v11119_v5, %v11062_v45  ;;  %v6299_v46 = vrot.slane %v6298_v15, 4  ;;  %v12674_v5 = vld [vmem:[#allocation31_spill] sm:$0xff] }
 0x7ae   : > { %5149 = vperm.xlu1 %7365, %v5111_v40   ;;  %v6289_v39 = vrot.slane %v6288_v11, 1  ;;  %v11135_v40 = vadd.f32 %v6282_v54, %v6281_v9  ;;  %v6313_v51 = vand.u32 2147483647, %v11127_v25  ;;  %v7802_v9 = vpop.eup %7801  ;;  %v6963_v0 = vmul.f32 -1.442695, %v12674_v5 }
 0x7af   : > { %v6295_v19 = vadd.f32 %v6294_v2, %v6293_v8  ;;  %v6300_v29 = vadd.f32 %v6299_v46, %v6298_v15  ;;  %v6305_v37 = vadd.f32 %v6255_v53, %v6254_v59  ;;  %v5115_v8 = vmul.f32 2.0, %v5093_v6 }
 0x7b0   : > { %v11125_v55 = vpop.permute.xlu1 %4679  ;;  %v11137_v59 = vadd.f32 %v6289_v39, %v6288_v11  ;;  %v6315_v11 = vand.u32 2147483647, %v11135_v40  ;;  %v6328_v36 = vsel %vm5628_vm12, %v6313_v51, %v6312_v35 }
 0x7b1   : > { %v6296_v45 = vrot.slane %v6295_v19, 1  ;;  %v6301_v34 = vrot.slane %v6300_v29, 2  ;;  %v6306_v31 = vrot.slane %v6305_v37, 4 }
 0x7b2   : > { %5159 = vperm.xlu1 %7365, %v5113_v63   ;;  %v6314_v63 = vand.u32 2147483647, %v11129_v61 }
 0x7b3   : > { %v6302_v15 = vadd.f32 %v6301_v34, %v6300_v29  ;;  %v6307_v53 = vadd.f32 %v6306_v31, %v6305_v37  ;;  %v11140_v46 = vadd.f32 %v6296_v45, %v6295_v19  ;;  %v5119_v19 = vmul.f32 2.0, %v5101_v49 }
 0x7b4   : > { %v11131_v2 = vpop.permute.xlu1 %4687  ;;  %v6316_v29 = vand.u32 2147483647, %v11137_v59  ;;  %v6329_v34 = vsel %vm5630_vm13, %v6314_v63, %v6328_v36  ;;  %v5105_v31 = vmul.f32 0.6931472, %v7802_v9  ;;  %v12657_v9 = vld [vmem:[#allocation21_spill] sm:$0xff] }
 0x7b5   : > { %v6303_v44 = vrot.slane %v6302_v15, 1  ;;  %v6308_v20 = vrot.slane %v6307_v53, 2  ;;  %v6317_v39 = vand.u32 2147483647, %v11140_v46  ;;  %v6953_v35 = vmul.f32 -1.442695, %v12657_v9 }
 0x7b6   : > { %5169 = vperm.xlu1 %7365, %v5115_v8   ;;  %v12663_v36 = vld [vmem:[#allocation25_spill] sm:$0xff] }
 0x7b7   : > { %v6309_v58 = vadd.f32 %v6308_v20, %v6307_v53  ;;  %v11147_v54 = vadd.f32 %v6303_v44, %v6302_v15  ;;  %v6330_v15 = vsel %vm5632_vm14, %v6315_v11, %v6329_v34  ;;  %v5121_v20 = vmul.f32 2.0, %v5105_v31  ;;  %v12665_v31 = vld [vmem:[#allocation70_spill] sm:$0xff]  ;;  %v12670_v9 = vld [vmem:[#allocation29_spill] sm:$0xff] }
 0x7b8   : > { %v11143_v6 = vpop.permute.xlu1 %4695  ;;  %v6331_v53 = vsel %vm5634_vm15, %v6316_v29, %v6330_v15  ;;  %7803 = vpow2.f32 %v6953_v35  ;;  %v12666_v15 = vld [vmem:[#allocation27_spill] sm:$0xff]  ;;  %v6961_v35 = vmul.f32 -1.442695, %v12670_v9 }
 0x7b9   : > { %v6310_v37 = vrot.slane %v6309_v58, 1  ;;  %v6318_v45 = vand.u32 2147483647, %v11147_v54  ;;  %v6332_v51 = vsel %vm5636_vm1, %v6317_v39, %v6331_v53  ;;  %v12662_v39 = vld [vmem:[#allocation67_spill] sm:$0xff]  ;;  %v6959_v53 = vmul.f32 -1.442695, %v12666_v15 }
 0x7ba   : > { %5179 = vperm.xlu1 %7365, %v5117_v32  }
 0x7bb   : > { %v11156_v38 = vadd.f32 %v6310_v37, %v6309_v58  ;;  %v6333_v44 = vsel %vm5638_vm2, %v6318_v45, %v6332_v51  ;;  %v12659_v58 = vld [vmem:[#allocation65_spill] sm:$0xff]  ;;  %v6957_v45 = vmul.f32 -1.442695, %v12663_v36 }
 0x7bd   : > { %v11154_v8 = vpop.permute.xlu1 %4787  ;;  %v6319_v49 = vand.u32 2147483647, %v11156_v38 }
 0x7be   : > { %12656 = vst [vmem:[#allocation103_spill] sm:$0xff] %v11154_v8  ;;  %5189 = vperm.xlu1 %7365, %v5119_v19   ;;  %v12660_v19 = vld [vmem:[#allocation23_spill] sm:$0xff] }
 0x7bf   : > { %v6334_v63 = vsel %vm5640_vm3, %v6319_v49, %v6333_v44  ;;  %v6955_v29 = vmul.f32 -1.442695, %v12660_v19  ;;  %v7535_v49 = vld [vmem:[%s12277_s9 + $0x38] sm:$0xff]   ;;  %v12668_v44 = vld [vmem:[#allocation74_spill] sm:$0xff] }
 0x7c0   : > { %6336 = vadd.xlane.f32.xlu0 %v6334_v63  ;;  %7226 = vmatpush3.bf16.msra.mxu1 %v7535_v49  ;;  %v12676_v49 = vld [vmem:[#allocation85_spill] sm:$0xff] }
 0x7c1   : > { %v11164_v32 = vpop.permute.xlu1 %4791  ;;  %7805 = vpow2.f32 %v6955_v29  ;;  %v12672_v29 = vld [vmem:[#allocation81_spill] sm:$0xff] }
 0x7c2   : > { %5199 = vperm.xlu1 %7365, %v5121_v20   ;;  %7807 = vpow2.f32 %v6957_v45  ;;  %v12669_v20 = vmov 0.0  }
 0x7c3   : > { %7227 = vmatprep.subr.bf16.mxu1 %v12669_v20  ;;  %7809 = vpow2.f32 %v6959_v53  ;;  %v5219_v53 = vmul.f32 %v12631_v10, %v12631_v10 }
 0x7c4   : > { %7811 = vpow2.f32 %v6961_v35  ;;  %v12679_v35 = vld [vmem:[#allocation38_spill] sm:$0xff] }
 0x7c5   : > { %v11167_v11 = vpop.permute.xlu1 %4795  ;;  %v7804_v63 = vpop.eup %7803  ;;  %v6967_v57 = vmul.f32 -1.442695, %v12679_v35 }
 0x7c6   : > { %12658 = vst [vmem:[#allocation102_spill] sm:$0xff] %v11167_v11  ;;  %5239 = vperm.xlu1 %7365, %v12659_v58  }
 0x7c9   : > { %v11171_v37 = vpop.permute.xlu1 %4799 }
 0x7ca   : > { %12661 = vst [vmem:[#allocation104_spill] sm:$0xff] %v11171_v37  ;;  %5247 = vperm.xlu1 %7365, %v12662_v39   ;;  %v2766_v39 = vadd.f32 1.0, %v7804_v63 }
 0x7cc   : > { %7813 = vrcp.f32 %v2766_v39  ;;  %v7536_v39 = vld [vmem:[%s12277_s9 + $0x30] sm:$0xff]  }
 0x7cd   : > { %v11175_v34 = vpop.permute.xlu1 %4803  ;;  %7815 = vpow2.f32 %v6963_v0  ;;  %7228 = vmatpush3.bf16.msra.mxu1 %v7536_v39 }
 0x7ce   : > { %12664 = vst [vmem:[#allocation105_spill] sm:$0xff] %v11175_v34  ;;  %5255 = vperm.xlu1 %7365, %v12665_v31   ;;  %v7806_v45 = vpop.eup %7805  ;;  %v12673_v31 = vld [vmem:[#allocation20_spill] sm:$0xff]  ;;  %7229 = vmatprep.subr.bf16.mxu1 %v12669_v20  ;;  %v12709_v34 = vld [vmem:[#allocation95_spill] sm:$0xff] }
 0x7cf   : > { %v7808_v4 = vpop.eup %7807 }
 0x7d0   : > { %v2770_v10 = vadd.f32 1.0, %v7808_v4  ;;  %v7810_v0 = vpop.eup %7809  ;;  %v12682_v4 = vld [vmem:[#allocation93_spill] sm:$0xff] }
 0x7d1   : > { %v11182_v51 = vpop.permute.xlu1 %4807 }
 0x7d2   : > { %12667 = vst [vmem:[#allocation106_spill] sm:$0xff] %v11182_v51  ;;  %5263 = vperm.xlu1 %7365, %v12668_v44   ;;  %v2768_v44 = vadd.f32 1.0, %v7806_v45  ;;  %v5221_v45 = vmul.f32 %v12634_v50, %v12634_v50  ;;  %v2772_v50 = vadd.f32 1.0, %v7810_v0 }
 0x7d4   : > { %7817 = vrcp.f32 %v2768_v44  ;;  %v7812_v44 = vpop.eup %7811 }
 0x7d5   : > { %v11187_v58 = vpop.permute.xlu1 %4811 }
 0x7d6   : > { %12671 = vst [vmem:[#allocation21_spill] sm:$0xff] %v11187_v58  ;;  %5271 = vperm.xlu1 %7365, %v12672_v29   ;;  %4482 = vperm.xlu0 %7364, %v12673_v31   ;;  %v12677_v29 = vld [vmem:[#allocation34_spill] sm:$0xff] }
 0x7d7   : > { %v6965_v63 = vmul.f32 -1.442695, %v12677_v29 }
 0x7d9   : > { %v11192_v16 = vpop.permute.xlu1 %4815  ;;  %7819 = vpow2.f32 %v6965_v63  ;;  %v2774_v63 = vadd.f32 1.0, %v7812_v44  ;;  %v12686_v44 = vld [vmem:[#allocation100_spill] sm:$0xff] }
 0x7da   : > { %12675 = vst [vmem:[#allocation65_spill] sm:$0xff] %v11192_v16  ;;  %5279 = vperm.xlu1 %7365, %v12676_v49   ;;  %4494 = vperm.xlu0 %7364, %v12660_v19   ;;  %7821 = vpow2.f32 %v6967_v57  ;;  %v7537_v49 = vld [vmem:[%s12277_s9 + $0x28] sm:$0xff]   ;;  %v5223_v57 = vmul.f32 %v10573_v42, %v10573_v42 }
 0x7db   : > { %7823 = vrcp.f32 %v2770_v10  ;;  %7230 = vmatpush3.bf16.msra.mxu1 %v7537_v49 }
 0x7dc   : > { %7231 = vmatprep.subr.bf16.mxu1 %v12669_v20  ;;  %7825 = vrcp.f32 %v2772_v50  ;;  %v7539_v50 = vld [vmem:[%s12277_s9 + $0x18] sm:$0xff]  }
 0x7dd   : > { %v11199_v21 = vpop.permute.xlu1 %4823  ;;  %7827 = vrcp.f32 %v2774_v63 }
 0x7de   : > { %12678 = vst [vmem:[#allocation23_spill] sm:$0xff] %v11199_v21  ;;  %5337 = vperm.xlu1 %7365, %v5219_v53   ;;  %4502 = vperm.xlu0 %7364, %v12663_v36   ;;  %v7814_v53 = vpop.eup %7813 }
 0x7df   : > { %v7816_v39 = vpop.eup %7815  ;;  %v11227_v10 = vmul.f32 0.4, %v7814_v53 }
 0x7e0   : > { %v2776_v42 = vadd.f32 1.0, %v7816_v39 }
 0x7e1   : > { %v11208_v19 = vpop.permute.xlu1 %4827  ;;  %12684 = vst [vmem:[#allocation27_spill] sm:$0xff] %v11227_v10  ;;  %v7818_v0 = vpop.eup %7817 }
 0x7e2   : > { %12680 = vst [vmem:[#allocation67_spill] sm:$0xff] %v11208_v19  ;;  %5347 = vperm.xlu1 %7365, %v5221_v45   ;;  %4510 = vperm.xlu0 %7364, %v12666_v15   ;;  %v7538_v45 = vld [vmem:[%s12277_s9 + $0x20] sm:$0xff]   ;;  %v11238_v53 = vmul.f32 0.4, %v7818_v0  ;;  %7829 = vrcp.f32 %v2776_v42 }
 0x7e3   : > { %7232 = vmatpush3.bf16.msra.mxu1 %v7538_v45 }
 0x7e4   : > { %7233 = vmatprep.subr.bf16.mxu1 %v12669_v20  ;;  %12687 = vst [vmem:[#allocation29_spill] sm:$0xff] %v11238_v53  ;;  %v5762_v0 = vadd.f32 1e-06, %v11238_v53 }
 0x7e5   : > { %v11215_v36 = vpop.permute.xlu1 %4831 }
 0x7e6   : > { %12681 = vst [vmem:[#allocation25_spill] sm:$0xff] %v11215_v36  ;;  %5287 = vperm.xlu1 %7365, %v12682_v4   ;;  %4518 = vperm.xlu0 %7364, %v12670_v9   ;;  %v7820_v9 = vpop.eup %7819  ;;  %v5760_v4 = vadd.f32 1e-06, %v11227_v10  ;;  %v12712_v36 = vld [vmem:[#allocation98_spill] sm:$0xff] }
 0x7e7   : > { %7234 = vmatpush3.bf16.msra.mxu1 %v7539_v50  ;;  %v2778_v63 = vadd.f32 1.0, %v7820_v9 }
 0x7e8   : > { %7235 = vmatprep.subr.bf16.mxu1 %v12669_v20  ;;  %7831 = vlog2.f32 %v5760_v4  ;;  %v7541_v4 = vld [vmem:[%s12277_s9 + $0x8] sm:$0xff]  }
 0x7e9   : > { %v11222_v15 = vpop.permute.xlu1 %4835  ;;  %7833 = vrcp.f32 %v2778_v63 }
 0x7ea   : > { %12683 = vst [vmem:[#allocation70_spill] sm:$0xff] %v11222_v15  ;;  %5357 = vperm.xlu1 %7365, %v5223_v57   ;;  %4526 = vperm.xlu0 %7364, %v12674_v5   ;;  %v7822_v57 = vpop.eup %7821  ;;  %v5225_v5 = vmul.f32 %v12640_v33, %v12640_v33  ;;  %v5227_v33 = vmul.f32 %v12644_v3, %v12644_v3  ;;  %7835 = vlog2.f32 %v5762_v0  ;;  %v7542_v3 = vld [vmem:[%s12277_s9] sm:$0xff]  }
 0x7eb   : > { %v7824_v39 = vpop.eup %7823  ;;  %v2780_v42 = vadd.f32 1.0, %v7822_v57  ;;  %v12691_v57 = vld [vmem:[#allocation77_spill] sm:$0xff] }
 0x7ec   : > { %v7826_v9 = vpop.eup %7825  ;;  %v12693_v0 = vld [vmem:[#allocation69_spill] sm:$0xff] }
 0x7ed   : > { %v11231_v49 = vpop.permute.xlu1 %4839  ;;  %v11268_v63 = vmul.f32 0.4, %v7826_v9  ;;  %7837 = vrcp.f32 %v2780_v42 }
 0x7ee   : > { %12685 = vst [vmem:[#allocation74_spill] sm:$0xff] %v11231_v49  ;;  %5295 = vperm.xlu1 %7365, %v12686_v44   ;;  %4534 = vperm.xlu0 %7364, %v12677_v29   ;;  %v7540_v44 = vld [vmem:[%s12277_s9 + $0x10] sm:$0xff]   ;;  %v11253_v29 = vmul.f32 0.4, %v7824_v39  ;;  %v7828_v39 = vpop.eup %7827 }
 0x7ef   : > { %7236 = vmatpush3.bf16.msra.mxu1 %v7540_v44  ;;  %12692 = vst [vmem:[#allocation85_spill] sm:$0xff] %v11268_v63  ;;  %v11278_v9 = vmul.f32 0.4, %v7828_v39  ;;  %v7830_v42 = vpop.eup %7829 }
 0x7f0   : > { %12689 = vst [vmem:[#allocation20_spill] sm:$0xff] %v11253_v29  ;;  %7237 = vmatprep.subr.bf16.mxu1 %v12669_v20  ;;  %v11288_v39 = vmul.f32 0.4, %v7830_v42  ;;  %v12704_v42 = vld [vmem:[#allocation84_spill] sm:$0xff] }
 0x7f1   : > { %v11244_v45 = vpop.permute.xlu1 %4843  ;;  %12695 = vst [vmem:[#allocation34_spill] sm:$0xff] %v11278_v9  ;;  %v5064_v58 = vadd.f32 1e-06, %v12704_v42 }
 0x7f2   : > { %12688 = vst [vmem:[#allocation81_spill] sm:$0xff] %v11244_v45  ;;  %5367 = vperm.xlu1 %7365, %v5225_v5   ;;  %4542 = vperm.xlu0 %7364, %v12679_v35   ;;  %v5229_v35 = vmul.f32 %v12646_v43, %v12646_v43  ;;  %v5764_v5 = vadd.f32 1e-06, %v11253_v29  ;;  %v12694_v43 = vld [vmem:[#allocation79_spill] sm:$0xff]  ;;  %v12696_v29 = vld [vmem:[#allocation73_spill] sm:$0xff]  ;;  %12698 = vst [vmem:[#allocation38_spill] sm:$0xff] %v11288_v39 }
 0x7f3   : > { %7238 = vmatpush3.bf16.msra.mxu1 %v7541_v4  ;;  %v5231_v4 = vmul.f32 %v12647_v52, %v12647_v52  ;;  %v5060_v53 = vadd.f32 1e-06, %v12696_v29  ;;  %v5233_v52 = vmul.f32 %v12651_v22, %v12651_v22  ;;  %v12700_v45 = vld [vmem:[#allocation80_spill] sm:$0xff]  ;;  %v5770_v22 = vadd.f32 1e-06, %v11288_v39  ;;  %v12708_v39 = vld [vmem:[#allocation89_spill] sm:$0xff] }
 0x7f4   : > { %7239 = vmatprep.subr.bf16.mxu1 %v12669_v20  ;;  %7839 = vlog2.f32 %v5764_v5  ;;  %v5768_v5 = vadd.f32 1e-06, %v11278_v9 }
 0x7f5   : > { %v11256_v50 = vpop.permute.xlu1 %4847 }
 0x7f6   : > { %12690 = vst [vmem:[#allocation31_spill] sm:$0xff] %v11256_v50  ;;  %5377 = vperm.xlu1 %7365, %v5227_v33   ;;  %4819 = vperm.xlu0 %7364, %v12691_v57   ;;  %v5058_v33 = vadd.f32 1e-06, %v12693_v0  ;;  %v5766_v57 = vadd.f32 1e-06, %v11268_v63 }
 0x7f7   : > { %7240 = vmatpush3.bf16.msra.mxu1 %v7542_v3  ;;  %v7832_v3 = vpop.eup %7831  ;;  %v5066_v50 = vadd.f32 1e-06, %v12708_v39 }
 0x7f8   : > { %7245 = vmatprep.subr.bf16.mxu1 %v12669_v20  ;;  %7841 = vlog2.f32 %v5058_v33  ;;  %v5062_v33 = vadd.f32 1e-06, %v12700_v45  ;;  %v5778_v19 = vmul.f32 0.6931472, %v7832_v3 }
 0x7f9   : > { %v11271_v44 = vpop.permute.xlu1 %4868  ;;  %7843 = vlog2.f32 %v5766_v57 }
 0x7fa   : > { %5387 = vperm.xlu1 %7365, %v5229_v35   ;;  %4888 = vperm.xlu0 %7364, %v12694_v43   ;;  %v12697_v35 = vld [vmem:[#allocation83_spill] sm:$0xff]  ;;  %v7834_v43 = vpop.eup %7833  ;;  %7845 = vlog2.f32 %v5060_v53 }
 0x7fb   : > { %v7836_v15 = vpop.eup %7835  ;;  %7847 = vlog2.f32 %v5768_v5  ;;  %v12705_v53 = vld [vmem:[#allocation91_spill] sm:$0xff] }
 0x7fc   : > { %v7838_v57 = vpop.eup %7837  ;;  %7849 = vlog2.f32 %v5062_v33 }
 0x7fd   : > { %v11281_v10 = vpop.permute.xlu1 %4873  ;;  %7851 = vlog2.f32 %v5770_v22  ;;  %v11303_v5 = vmul.f32 0.4, %v7838_v57  ;;  %v12711_v57 = vld [vmem:[#allocation92_spill] sm:$0xff] }
 0x7fe   : > { %5397 = vperm.xlu1 %7365, %v5231_v4   ;;  %4898 = vperm.xlu0 %7364, %v12697_v35   ;;  %v12701_v4 = vld [vmem:[#allocation87_spill] sm:$0xff]  ;;  %v11295_v35 = vmul.f32 0.4, %v7834_v43  ;;  %7853 = vlog2.f32 %v5064_v58 }
 0x7ff   : > { %12706 = vst [vmem:[#allocation69_spill] sm:$0xff] %v11303_v5 }
 0x800   : > { %12702 = vst [vmem:[#allocation100_spill] sm:$0xff] %v11295_v35  ;;  %v5772_v3 = vadd.f32 1e-06, %v11295_v35  ;;  %v5068_v35 = vadd.f32 1e-06, %v12711_v57 }
 0x801   : > { %v11290_v63 = vpop.permute.xlu1 %4878 }
 0x802   : > { %12699 = vst [vmem:[#allocation93_spill] sm:$0xff] %v11290_v63  ;;  %5407 = vperm.xlu1 %7365, %v5233_v52   ;;  %4908 = vperm.xlu0 %7364, %v12701_v4   ;;  %v5782_v52 = vmul.f32 0.6931472, %v7836_v15  ;;  %v7840_v4 = vpop.eup %7839  ;;  %7855 = vlog2.f32 %v5772_v3  ;;  %v5774_v15 = vadd.f32 1e-06, %v11303_v5  ;;  %v12714_v3 = vld [vmem:[#allocation97_spill] sm:$0xff] }
 0x803   : > { %7857 = vlog2.f32 %v5066_v50 }
 0x804   : > { %7859 = vlog2.f32 %v5774_v15 }
 0x805   : > { %v11297_v9 = vpop.permute.xlu1 %4883  ;;  %v7842_v33 = vpop.eup %7841  ;;  %7861 = vlog2.f32 %v5068_v35 }
 0x806   : > { %12703 = vst [vmem:[#allocation77_spill] sm:$0xff] %v11297_v9  ;;  %5825 = vrot.lane.b32.xlu1 %v5778_v19, %s8257_s3  ;;  %4918 = vperm.xlu0 %7364, %v12705_v53   ;;  %v5786_v19 = vmul.f32 0.6931472, %v7840_v4  ;;  %v7844_v22 = vpop.eup %7843  ;;  %v5075_v58 = vmul.f32 0.6931472, %v7842_v33 }
 0x807   : > { %v7846_v49 = vpop.eup %7845  ;;  %v5070_v4 = vadd.f32 1e-06, %v12714_v3 }
 0x808   : > { %v7848_v11 = vpop.eup %7847  ;;  %v5106_v5 = vmul.f32 2.0, %v5075_v58  ;;  %v5079_v50 = vmul.f32 0.6931472, %v7846_v49 }
 0x809   : > { %v11305_v43 = vpop.permute.xlu1 %4893  ;;  %v7850_v21 = vpop.eup %7849  ;;  %v5794_v8 = vmul.f32 0.6931472, %v7848_v11  ;;  %7863 = vlog2.f32 %v5070_v4 }
 0x80a   : > { %12707 = vst [vmem:[#allocation79_spill] sm:$0xff] %v11305_v43  ;;  %5829 = vrot.lane.b32.xlu1 %v5782_v52, %s8257_s3  ;;  %4928 = vperm.xlu0 %7364, %v12709_v34   ;;  %v5790_v52 = vmul.f32 0.6931472, %v7844_v22  ;;  %v5108_v15 = vmul.f32 2.0, %v5079_v50  ;;  %v5083_v16 = vmul.f32 0.6931472, %v7850_v21 }
 0x80b   : > { %v8030_v43 = vld [vmem:[%s8478_s23] sm:$0xff]  ;;  %s6820_s23 = sshll.u32 %s8474_s19, 4 }
 0x80c   : > { %v5110_v11 = vmul.f32 2.0, %v5083_v16  ;;  %v11448_v9 = vmul.f32 0.5, %v8030_v43  ;;  %s11717_s5 = scalar_lea.vmem [#allocation11], %s6820_s23 }
 0x80d   : > { %v11311_v53 = vpop.permute.xlu1 %4903  ;;  %s6685_s2 = sshll.u32 %s11717_s5, 4  ;;  %s6686_s2 = int_to_ptr.vmem [resolvable:$true] %s6685_s2 }
 0x80e   : > { %12710 = vst [vmem:[#allocation73_spill] sm:$0xff] %v11311_v53  ;;  %5833 = vrot.lane.b32.xlu1 %v5786_v19, %s8257_s3  ;;  %4938 = vperm.xlu0 %7364, %v12712_v36   ;;  %v7852_v19 = vpop.eup %7851  ;;  %v12716_v36 = vld [vmem:[#allocation99_spill] sm:$0xff]  ;;  %s8164_s25 = scalar_lea.vmem %s6686_s2, 256  ;;  %p8171_p5 = scmp.lt.s32.totalorder %s6686_s2, %s8169_s18 }
 0x80f   : > { %v5072_v22 = vadd.f32 1e-06, %v12716_v36  ;;  %v7854_v35 = vpop.eup %7853  ;;  %v5798_v51 = vmul.f32 0.6931472, %v7852_v19  ;;  %p8165_p7 = scmp.ne.s32.totalorder %s6686_s2, %s8164_s25  ;;  %p8172_p9 = scmp.lt.s32.totalorder %s8170_s26, %s8164_s25 }
 0x810   : > { %v7856_v37 = vpop.eup %7855  ;;  %v5087_v49 = vmul.f32 0.6931472, %v7854_v35 }
 0x811   : > { %v11316_v34 = vpop.permute.xlu1 %4913  ;;  %7865 = vlog2.f32 %v5072_v22  ;;  %v5802_v58 = vmul.f32 0.6931472, %v7856_v37  ;;  %p8166_p0 = pnand %p8165_p7, %p12873_p10  ;;  %p8173_p11 = por %p8172_p9, %p8171_p5 }
 0x812   : > { %12713 = vst [vmem:[#allocation83_spill] sm:$0xff] %v11316_v34  ;;  %5837 = vrot.lane.b32.xlu1 %v5790_v52, %s8257_s3  ;;  %5124 = vperm.xlu0 %7364, %v5106_v5   ;;  %v7858_v5 = vpop.eup %7857  ;;  %v5112_v21 = vmul.f32 2.0, %v5087_v49  ;;  %v12720_v49 = vld [vmem:[#allocation22_spill] sm:$0xff] }
 0x813   : > { %v7860_v4 = vpop.eup %7859  ;;  %p8167_p12 = pneg %p8166_p0 }
 0x814   : > { %v7862_v50 = vpop.eup %7861  ;;  %v5806_v19 = vmul.f32 0.6931472, %v7860_v4 }
 0x815   : > { %v11320_v33 = vpop.permute.xlu1 %4923  ;;  %v5095_v16 = vmul.f32 0.6931472, %v7862_v50  ;;  %p8174_p13 = pnand %p8173_p11, %p8167_p12 }
 0x816   : > { %12715 = vst [vmem:[#allocation80_spill] sm:$0xff] %v11320_v33  ;;  %5841 = vrot.lane.b32.xlu1 %v5794_v8, %s8257_s3  ;;  %5134 = vperm.xlu0 %7364, %v5108_v15   ;;  %v5091_v8 = vmul.f32 0.6931472, %v7858_v5  ;;  %v7864_v22 = vpop.eup %7863  ;;  %v6954_v5 = vmul.f32 -1.442695, %v12720_v49 }
 0x817   : > { %v5116_v37 = vmul.f32 2.0, %v5095_v16  ;;  %v12724_v16 = vld [vmem:[#allocation19_spill] sm:$0xff] }
 0x819   : > { %v11324_v52 = vpop.permute.xlu1 %4933 }
 0x81a   : > { %12717 = vst [vmem:[#allocation87_spill] sm:$0xff] %v11324_v52  ;;  %5845 = vrot.lane.b32.xlu1 %v5798_v51, %s8257_s3  ;;  %5144 = vperm.xlu0 %7364, %v5110_v11   ;;  %v5114_v51 = vmul.f32 2.0, %v5091_v8  ;;  %v5099_v11 = vmul.f32 0.6931472, %v7864_v22  ;;  %v4472_v22 = vadd.s32 8, %v12724_v16 }
 0x81c   : > { %v5118_v4 = vmul.f32 2.0, %v5099_v11  ;;  %v12729_v11 = vld [vmem:[#allocation64_spill] sm:$0xff] }
 0x81d   : > { %v11327_v13 = vpop.permute.xlu1 %4943 }
 0x81e   : > { %12718 = vst [vmem:[#allocation84_spill] sm:$0xff] %v11327_v13  ;;  %5849 = vrot.lane.b32.xlu1 %v5802_v58, %s8257_s3  ;;  %5154 = vperm.xlu0 %7364, %v5112_v21   ;;  %v7866_v41 = vpop.eup %7865  ;;  %v6952_v58 = vmul.f32 -1.442695, %v12673_v31 }
 0x81f   : > { %v5103_v13 = vmul.f32 0.6931472, %v7866_v41 }
 0x820   : > { %7867 = vpow2.f32 %v6952_v58  ;;  %v12730_v58 = vld [vmem:[#allocation28_spill] sm:$0xff] }
 0x821   : > { %v11330_v15 = vpop.permute.xlu1 %5129  ;;  %7869 = vpow2.f32 %v6954_v5  ;;  %v12731_v5 = vld [vmem:[#allocation30_spill] sm:$0xff] }
 0x822   : > { %5853 = vrot.lane.b32.xlu1 %v5806_v19, %s8257_s3  ;;  %5164 = vperm.xlu0 %7364, %v5114_v51   ;;  %v12722_v19 = vld [vmem:[#allocation24_spill] sm:$0xff]  ;;  %v5120_v51 = vmul.f32 2.0, %v5103_v13  ;;  %v6960_v13 = vmul.f32 -1.442695, %v12730_v58 }
 0x823   : > { %v6956_v8 = vmul.f32 -1.442695, %v12722_v19  ;;  %v12736_v58 = vld [vmem:[#allocation36_spill] sm:$0xff] }
 0x825   : > { %v11333_v35 = vpop.permute.xlu1 %5139  ;;  %7871 = vpow2.f32 %v6956_v8 }
 0x826   : > { %12719 = vst [vmem:[#allocation91_spill] sm:$0xff] %v11333_v35  ;;  %5174 = vperm.xlu0 %7364, %v5116_v37   ;;  %v12725_v35 = vlaneseq  ;;  %v12727_v37 = vld [vmem:[#allocation26_spill] sm:$0xff] }
 0x827   : > { %v6958_v49 = vmul.f32 -1.442695, %v12727_v37  ;;  %v12735_v37 = vld [vmem:[#allocation33_spill] sm:$0xff] }
 0x828   : > { %v11344_v31 = vand.u32 127, %v12725_v35 }
 0x829   : > { %v11337_v21 = vpop.permute.xlu1 %5149  ;;  %7873 = vpow2.f32 %v6958_v49 }
 0x82a   : > { %12721 = vst [vmem:[#allocation89_spill] sm:$0xff] %v11337_v21  ;;  %5184 = vperm.xlu0 %7364, %v5118_v4   ;;  %12726 = vst [vmem:[#allocation92_spill] sm:$0xff] %v11344_v31  ;;  %vm4475_vm4 = vcmp.eq.s32.totalorder %v12724_v16, %v11344_v31  ;;  %vm4476_vm5 = vcmp.eq.s32.totalorder %v4472_v22, %v11344_v31  ;;  %v6962_v4 = vmul.f32 -1.442695, %v12731_v5  ;;  %v12734_v22 = vld [vmem:[#allocation66_spill] sm:$0xff]  ;;  %7875 = vpow2.f32 %v6960_v13 }
 0x82b   : > { %v11356_v19 = vsel %vm4475_vm4, 1.0, %v12669_v20  ;;  %v11359_v35 = vsel %vm4476_vm5, 1.0, %v12669_v20  ;;  %v6964_v31 = vmul.f32 -1.442695, %v12735_v37  ;;  %v6966_v16 = vmul.f32 -1.442695, %v12736_v58  ;;  %v11373_v58 = vpop.permute.xlu0 %4675 }
 0x82c   : > { %12732 = vst [vmem:[#allocation97_spill] sm:$0xff] %v11356_v19  ;;  %12733 = vst [vmem:[#allocation99_spill] sm:$0xff] %v11359_v35  ;;  %v4699_v5 = vmul.f32 %v11359_v35, %v11021_v62  ;;  %7877 = vpow2.f32 %v6962_v4  ;;  %v12740_v4 = vld [vmem:[#allocation72_spill] sm:$0xff] }
 0x82d   : > { %v11340_v50 = vpop.permute.xlu1 %5159  ;;  %v7868_v8 = vpop.eup %7867  ;;  %7879 = vpow2.f32 %v6964_v31 }
 0x82e   : > { %12723 = vst [vmem:[#allocation95_spill] sm:$0xff] %v11340_v50  ;;  %5194 = vperm.xlu0 %7364, %v5120_v51   ;;  %v4698_v51 = vmul.f32 %v11356_v19, %v11014_v1  ;;  %v2765_v49 = vadd.f32 1.0, %v7868_v8  ;;  %v12738_v1 = vld [vmem:[#allocation68_spill] sm:$0xff]  ;;  %7881 = vpow2.f32 %v6966_v16  ;;  %v4715_v13 = vsel %vm4561_vm6, %v4699_v5, 0.0 }
 0x830   : > { %v4714_v21 = vsel %vm4561_vm6, %v4698_v51, 0.0  ;;  %7883 = vrcp.f32 %v2765_v49  ;;  %v12743_v49 = vld [vmem:[#allocation82_spill] sm:$0xff] }
 0x831   : > { %v11350_v41 = vpop.permute.xlu1 %5169  ;;  %v4716_v37 = vadd.f32 %v4715_v13, %v4714_v21 }
 0x832   : > { %12728 = vst [vmem:[#allocation98_spill] sm:$0xff] %v11350_v41  ;;  %5235 = vperm.xlu0 %7364, %v12729_v11   ;;  %v7870_v11 = vpop.eup %7869 }
 0x833   : > { %v7872_v50 = vpop.eup %7871  ;;  %v4717_v8 = vrot.slane %v4716_v37, 4 }
 0x834   : > { %v2769_v62 = vadd.f32 1.0, %v7872_v50 }
 0x835   : > { %v11368_v41 = vpop.permute.xlu1 %5179  ;;  %v4718_v5 = vadd.f32 %v4717_v8, %v4716_v37 }
 0x836   : > { %5243 = vperm.xlu0 %7364, %v12734_v22   ;;  %12737 = vst [vmem:[#allocation22_spill] sm:$0xff] %v11368_v41  ;;  %v2767_v22 = vadd.f32 1.0, %v7870_v11  ;;  %v7874_v51 = vpop.eup %7873  ;;  %v12741_v41 = vld [vmem:[#allocation78_spill] sm:$0xff]  ;;  %v11379_v11 = vpop.permute.xlu0 %4683 }
 0x837   : > { %v7876_v16 = vpop.eup %7875 }
 0x838   : > { %7885 = vrcp.f32 %v2767_v22  ;;  %v2773_v13 = vadd.f32 1.0, %v7876_v16  ;;  %v5218_v22 = vmul.f32 %v12693_v0, %v12693_v0 }
 0x839   : > { %v11375_v52 = vpop.permute.xlu1 %5189  ;;  %7887 = vrcp.f32 %v2769_v62  ;;  %v7878_v21 = vpop.eup %7877 }
 0x83a   : > { %5251 = vperm.xlu0 %7364, %v12738_v1   ;;  %12739 = vst [vmem:[#allocation24_spill] sm:$0xff] %v11375_v52  ;;  %v2771_v1 = vadd.f32 1.0, %v7874_v51  ;;  %v7880_v50 = vpop.eup %7879  ;;  %v2775_v62 = vadd.f32 1.0, %v7878_v21  ;;  %v5220_v51 = vmul.f32 %v12696_v29, %v12696_v29 }
 0x83b   : > { %v7882_v52 = vpop.eup %7881 }
 0x83c   : > { %7889 = vrcp.f32 %v2771_v1  ;;  %v2779_v8 = vadd.f32 1.0, %v7882_v52  ;;  %v4546_v1 = vmul.f32 %v11359_v35, %v10982_v27 }
 0x83d   : > { %v11381_v31 = vpop.permute.xlu1 %5199  ;;  %v7884_v33 = vpop.eup %7883  ;;  %7891 = vrcp.f32 %v2773_v13 }
 0x83e   : > { %5259 = vperm.xlu0 %7364, %v12740_v4   ;;  %12742 = vst [vmem:[#allocation26_spill] sm:$0xff] %v11381_v31  ;;  %v11386_v4 = vpop.permute.xlu0 %4691  ;;  %v2777_v31 = vadd.f32 1.0, %v7880_v50  ;;  %7893 = vrcp.f32 %v2775_v62  ;;  %v11392_v0 = vmul.f32 0.4, %v7884_v33  ;;  %v4563_v27 = vsel %vm4561_vm6, %v4546_v1, 0.0 }
 0x840   : > { %12744 = vst [vmem:[#allocation64_spill] sm:$0xff] %v11392_v0  ;;  %7895 = vrcp.f32 %v2777_v31  ;;  %v5759_v29 = vadd.f32 1e-06, %v11392_v0  ;;  %v5222_v31 = vmul.f32 %v12700_v45, %v12700_v45 }
 0x841   : > { %v11388_v34 = vpop.permute.xlu1 %5239  ;;  %7897 = vrcp.f32 %v2779_v8 }
 0x842   : > { %5267 = vperm.xlu0 %7364, %v12741_v41   ;;  %v4719_v41 = vrot.slane %v4718_v5, 2 }
 0x844   : > { %v4720_v16 = vadd.f32 %v4719_v41, %v4718_v5 }
 0x845   : > { %v7886_v37 = vpop.eup %7885  ;;  %v11398_v50 = vpop.permute.xlu1 %5247 }
 0x846   : > { %5275 = vperm.xlu0 %7364, %v12743_v49   ;;  %v7888_v21 = vpop.eup %7887  ;;  %v11394_v53 = vmul.f32 0.4, %v7886_v37  ;;  %12746 = vst [vmem:[#allocation30_spill] sm:$0xff] %v11398_v50  ;;  %v4721_v52 = vrot.slane %v4720_v16, 1 }
 0x847   : > { %v11401_v5 = vmul.f32 0.4, %v7888_v21 }
 0x848   : > { %12745 = vst [vmem:[#allocation28_spill] sm:$0xff] %v11394_v53  ;;  %v5761_v62 = vadd.f32 1e-06, %v11394_v53  ;;  %v11410_v37 = vadd.f32 %v4721_v52, %v4720_v16 }
 0x849   : > { %v6337_v49 = vpop.xlane.xlu0 %6336  ;;  %12747 = vst [vmem:[#allocation66_spill] sm:$0xff] %v11401_v5  ;;  %v7890_v21 = vpop.eup %7889 }
 0x84a   : > { %5332 = vperm.xlu0 %7364, %v5218_v22   ;;  %7899 = vrcp.f32 %v6337_v49  ;;  %v12748_v22 = vld [vmem:[#allocation86_spill] sm:$0xff]  ;;  %v5763_v49 = vadd.f32 1e-06, %v11401_v5  ;;  %v4947_v45 = vmul.f32 %v11281_v10, %v11410_v37  ;;  %v7892_v1 = vpop.eup %7891  ;;  %v11421_v52 = vmul.f32 0.4, %v7890_v21 }
 0x84b   : > { %7901 = vlog2.f32 %v5759_v29  ;;  %v7894_v0 = vpop.eup %7893  ;;  %v12751_v29 = vld [vmem:[#allocation90_spill] sm:$0xff]  ;;  %v11424_v53 = vmul.f32 0.4, %v7892_v1  ;;  %v5224_v10 = vmul.f32 %v12704_v42, %v12704_v42  ;;  %v5226_v42 = vmul.f32 %v12708_v39, %v12708_v39 }
 0x84c   : > { %7903 = vlog2.f32 %v5761_v62  ;;  %12750 = vst [vmem:[#allocation36_spill] sm:$0xff] %v11421_v52  ;;  %v5765_v21 = vadd.f32 1e-06, %v11421_v52 }
 0x84d   : > { %7905 = vlog2.f32 %v5763_v49  ;;  %12752 = vst [vmem:[#allocation68_spill] sm:$0xff] %v11424_v53 }
 0x84e   : > { %5342 = vperm.xlu0 %7364, %v5220_v51  }
 0x851   : > { %v4483_v13 = vpop.permute.xlu0 %4482 }
 0x852   : > { %v4545_v33 = vmul.f32 %v11356_v19, %v4483_v13  ;;  %5283 = vperm.xlu0 %7364, %v12748_v22   ;;  %v11415_v13 = vpop.permute.xlu1 %5255 }
 0x853   : > { %12749 = vst [vmem:[#allocation33_spill] sm:$0xff] %v11415_v13  ;;  %v11430_v13 = vmul.f32 0.4, %v7894_v0 }
 0x854   : > { %v4562_v41 = vsel %vm4561_vm6, %v4545_v33, 0.0 }
 0x855   : > { %v4564_v8 = vadd.f32 %v4563_v27, %v4562_v41  ;;  %v11412_v51 = vpop.permute.xlu0 %4494  ;;  %v7896_v27 = vpop.eup %7895  ;;  %v4963_v41 = vadd.f32 1e-06, %v4947_v45  ;;  %12754 = vst [vmem:[#allocation78_spill] sm:$0xff] %v11430_v13 }
 0x856   : > { %5352 = vperm.xlu0 %7364, %v5222_v31   ;;  %v7898_v62 = vpop.eup %7897  ;;  %v11428_v31 = vpop.permute.xlu1 %5263  ;;  %v11435_v45 = vmul.f32 0.4, %v7896_v27 }
 0x857   : > { %v4565_v22 = vrot.slane %v4564_v8, 4  ;;  %12753 = vst [vmem:[#allocation72_spill] sm:$0xff] %v11428_v31  ;;  %7907 = vlog2.f32 %v4963_v41  ;;  %v11438_v50 = vmul.f32 0.4, %v7898_v62 }
 0x858   : > { %12755 = vst [vmem:[#allocation82_spill] sm:$0xff] %v11435_v45  ;;  %7909 = vlog2.f32 %v5765_v21  ;;  %v5771_v39 = vadd.f32 1e-06, %v11435_v45  ;;  %v5228_v21 = vmul.f32 %v12711_v57, %v12711_v57 }
 0x859   : > { %v4566_v33 = vadd.f32 %v4565_v22, %v4564_v8  ;;  %v11419_v16 = vpop.permute.xlu0 %4502  ;;  %v7900_v8 = vpop.eup %7899  ;;  %12756 = vst [vmem:[#allocation86_spill] sm:$0xff] %v11438_v50 }
 0x85a   : > { %5291 = vperm.xlu0 %7364, %v12751_v29   ;;  %v5767_v29 = vadd.f32 1e-06, %v11424_v53  ;;  %v6340_v0 = vrot.slane %v7900_v8, 1  ;;  %v7902_v27 = vpop.eup %7901  ;;  %v11450_v53 = vpop.permute.xlu1 %5271  ;;  %v6342_v62 = vrot.slane %v7900_v8, 3  ;;  %v6343_v24 = vrot.slane %v7900_v8, 4 }
 0x85b   : > { %v4567_v5 = vrot.slane %v4566_v33, 2  ;;  %12759 = vst [vmem:[#allocation108_spill] sm:$0xff] %v11450_v53  ;;  %v7904_v63 = vpop.eup %7903  ;;  %v6345_v43 = vrot.slane %v7900_v8, 6  ;;  %v6346_v53 = vrot.slane %v7900_v8, 7  ;;  %v6355_v57 = vmul.f32 %v7900_v8, %v11133_v60 }
 0x85c   : > { %7911 = vlog2.f32 %v5767_v29  ;;  %v6358_v29 = vmul.f32 %v6342_v62, %v11135_v40  ;;  %v6374_v60 = vrot.slane %v11448_v9, 2 }
 0x85d   : > { %v4568_v22 = vadd.f32 %v4567_v5, %v4566_v33  ;;  %v11432_v49 = vpop.permute.xlu0 %4510  ;;  %v5769_v5 = vadd.f32 1e-06, %v11430_v13  ;;  %v4979_v33 = vmul.f32 %v4963_v41, %v4963_v41  ;;  %v6356_v13 = vmul.f32 %v6340_v0, %v11127_v25 }
 0x85e   : > { %5362 = vperm.xlu0 %7364, %v5224_v10   ;;  %v6341_v10 = vrot.slane %v7900_v8, 2 }
 0x85f   : > { %v4569_v1 = vrot.slane %v4568_v22, 1  ;;  %7913 = vlog2.f32 %v5769_v5  ;;  %v11473_v5 = vpop.permute.xlu1 %5279  ;;  %v6364_v40 = vmul.f32 0.5, %v6356_v13  ;;  %v6363_v13 = vmul.f32 0.5, %v6355_v57 }
 0x860   : > { %7915 = vrcp.f32 %v4979_v33  ;;  %v6357_v45 = vmul.f32 %v6341_v10, %v11129_v61  ;;  %v5230_v61 = vmul.f32 %v12714_v3, %v12714_v3  ;;  %12760 = vst [vmem:[#allocation109_spill] sm:$0xff] %v11473_v5  ;;  %v6361_v33 = vmul.f32 %v6345_v43, %v11147_v54 }
 0x861   : > { %v11443_v31 = vadd.f32 %v4569_v1, %v4568_v22  ;;  %v11445_v52 = vpop.permute.xlu0 %4518  ;;  %v6344_v22 = vrot.slane %v7900_v8, 5  ;;  %v5773_v1 = vadd.f32 1e-06, %v11438_v50  ;;  %v6359_v50 = vmul.f32 %v6343_v24, %v11137_v59 }
 0x862   : > { %12758 = vst [vmem:[#allocation107_spill] sm:$0xff] %v11445_v52  ;;  %5372 = vperm.xlu0 %7364, %v5226_v42   ;;  %v11462_v52 = vmul.f32 0.6931472, %v7902_v27  ;;  %7917 = vlog2.f32 %v5771_v39  ;;  %v6373_v24 = vrot.slane %v11448_v9, 1  ;;  %v6375_v3 = vrot.slane %v11448_v9, 3 }
 0x863   : > { %12757 = vst [vmem:[#allocation90_spill] sm:$0xff] %v11443_v31  ;;  %v4851_v41 = vmul.f32 %v11164_v32, %v11443_v31  ;;  %v7906_v32 = vpop.eup %7905  ;;  %v11466_v31 = vmul.f32 0.6931472, %v7904_v63  ;;  %v6360_v0 = vmul.f32 %v6344_v22, %v11140_v46  ;;  %7919 = vlog2.f32 %v5773_v1  ;;  %v5338_v57 = vpop.permute.xlu1 %5337 }
 0x864   : > { %v6362_v63 = vmul.f32 %v6346_v53, %v11156_v38  ;;  %v11481_v8 = vmul.f32 0.6931472, %v7906_v32  ;;  %v6366_v46 = vmul.f32 0.5, %v6358_v29  ;;  %v6367_v10 = vmul.f32 0.5, %v6359_v50 }
 0x865   : > { %v11459_v42 = vpop.permute.xlu0 %4526  ;;  %v5299_v25 = vsub.f32 %v11388_v34, %v4851_v41  ;;  %v6365_v34 = vmul.f32 0.5, %v6357_v45  ;;  %v6376_v27 = vrot.slane %v11448_v9, 4  ;;  %v6368_v62 = vmul.f32 0.5, %v6360_v0  ;;  %v7908_v41 = vpop.eup %7907 }
 0x866   : > { %5382 = vperm.xlu0 %7364, %v5228_v21   ;;  %v6377_v39 = vrot.slane %v11448_v9, 5  ;;  %v5232_v38 = vmul.f32 %v12716_v36, %v12716_v36  ;;  %v6369_v53 = vmul.f32 0.5, %v6361_v33  ;;  %v6378_v45 = vrot.slane %v11448_v9, 6  ;;  %v7910_v29 = vpop.eup %7909 }
 0x867   : > { %v5315_v54 = vmul.f32 %v5299_v25, %v5299_v25  ;;  %v11489_v22 = vadd.f32 %v6373_v24, %v6364_v40  ;;  %v4702_v50 = vmul.f32 %v11356_v19, %v11026_v28  ;;  %v6370_v21 = vmul.f32 0.5, %v6362_v63 }
 0x868   : > { %v6379_v43 = vrot.slane %v11448_v9, 7  ;;  %v11496_v32 = vadd.f32 %v6374_v60, %v6365_v34  ;;  %v4704_v25 = vmul.f32 %v11356_v19, %v11032_v23  ;;  %v4701_v36 = vmul.f32 %v11359_v35, %v11023_v18 }
 0x869   : > { %v11477_v59 = vpop.permute.xlu0 %4534  ;;  %v11502_v0 = vadd.f32 %v6375_v3, %v6366_v46  ;;  %v5013_v28 = vmul.f32 0.6931472, %v7908_v41  ;;  %v5411_v33 = vadd.f32 %v5338_v57, %v5315_v54  ;;  %v11507_v40 = vadd.f32 %v11448_v9, %v6363_v13  ;;  %v11511_v63 = vpop.eup %7911 }
 0x86a   : > { %5392 = vperm.xlu0 %7364, %v5230_v61   ;;  %v11504_v61 = vadd.f32 %v6376_v27, %v6367_v10  ;;  %v11509_v24 = vadd.f32 %v6377_v39, %v6368_v62  ;;  %v4706_v23 = vmul.f32 %v11356_v19, %v11037_v30  ;;  %v4700_v18 = vmul.f32 %v11356_v19, %v11017_v56 }
 0x86b   : > { %v11517_v34 = vadd.f32 %v6378_v45, %v6369_v53  ;;  %v6397_v60 = vpack.c.bf16 %v11489_v22, %v11489_v22  ;;  %v11524_v9 = vsel %vm4561_vm6, %v4702_v50, 0.0  ;;  %v11526_v10 = vadd.f32 %v6379_v43, %v6370_v21 }
 0x86c   : > { %v11521_v46 = vpop.eup %7913  ;;  %v6398_v3 = vpack.c.bf16 %v11496_v32, %v11496_v32  ;;  %v11532_v30 = vmul.f32 0.6931472, %v7910_v29  ;;  %v11535_v54 = vsel %vm4561_vm6, %v4704_v25, 0.0  ;;  %v4724_v13 = vsel %vm4561_vm6, %v4701_v36, 0.0 }
 0x86d   : > { %v11493_v1 = vpop.permute.xlu0 %4542  ;;  %v7916_v56 = vpop.eup %7915  ;;  %v6399_v62 = vpack.c.bf16 %v11502_v0, %v11502_v0  ;;  %v6400_v39 = vpack.c.bf16 %v11504_v61, %v11504_v61  ;;  %v6396_v45 = vpack.c.bf16 %v11507_v40, %v11507_v40  ;;  %v6401_v50 = vpack.c.bf16 %v11509_v24, %v11509_v24 }
 0x86e   : > { %12761 = vst [vmem:[#allocation110_spill] sm:$0xff] %v11493_v1  ;;  %5402 = vperm.xlu0 %7364, %v5232_v38   ;;  %v5043_v38 = vmul.f32 2.0, %v5013_v28  ;;  %v5427_v53 = vmul.f32 %v7916_v56, %v5411_v33  ;;  %v12763_v21 = vmov 1   ;;  %v4750_v29 = vsel %vm4561_vm6, %v4706_v23, 0.0 }
 0x86f   : > { %v11544_v41 = vpop.eup %7917  ;;  %v4723_v25 = vsel %vm4561_vm6, %v4700_v18, 0.0  ;;  %v6417_v36 = vunpack.c.l.b16 %v6397_v60  ;;  %v6403_v33 = vpack.c.bf16 %v11526_v10, %v11526_v10  ;;  %v6418_v56 = vunpack.c.l.b16 %v6398_v3 }
 0x870   : > { %v11551_v43 = vpop.eup %7919  ;;  %v4725_v57 = vadd.f32 %v4724_v13, %v4723_v25  ;;  %v5203_v28 = vsub.f32 %v5043_v38, %v11330_v15  ;;  %v4705_v23 = vmul.f32 %v11359_v35, %v11034_v48  ;;  %v6419_v18 = vunpack.c.l.b16 %v6399_v62 }
 0x871   : > { %v11530_v27 = vpop.permute.xlu0 %4819  ;;  %v6420_v5 = vunpack.c.l.b16 %v6400_v39  ;;  %v6416_v13 = vunpack.c.l.b16 %v6396_v45  ;;  %v6421_v15 = vunpack.c.l.b16 %v6401_v50  ;;  %v6424_v38 = vrot.slane %v6417_v36, 7 }
 0x872   : > { %12762 = vst [vmem:[#allocation111_spill] sm:$0xff] %v11530_v27  ;;  %5823 = vrot.lane.b32.xlu0 %v11462_v52, %s8257_s3  ;;  %v6402_v52 = vpack.c.bf16 %v11517_v34, %v11517_v34  ;;  %v5443_v60 = vadd.f32 %v5427_v53, %v5203_v28  ;;  %v4707_v3 = vmul.f32 %v11359_v35, %v11039_v12  ;;  %v6423_v62 = vunpack.c.l.b16 %v6403_v33 }
 0x873   : > { %7366 = vset.pattern.permute.xlu0 %v12763_v21  ;;  %v4703_v21 = vmul.f32 %v11359_v35, %v11028_v17  ;;  %v4709_v25 = vmul.f32 %v11359_v35, %v11125_v55  ;;  %v6426_v17 = vrot.slane %v6418_v56, 6  ;;  %v4708_v48 = vmul.f32 %v11356_v19, %v11373_v58 }
 0x874   : > { %v6425_v39 = vsel %vm5628_vm12, %v6424_v38, %v6416_v13  ;;  %v6428_v1 = vrot.slane %v6419_v18, 5  ;;  %v4726_v53 = vrot.slane %v4725_v57, 4  ;;  %v6430_v12 = vrot.slane %v6420_v5, 4 }
 0x875   : > { %v11560_v27 = vpop.permute.xlu0 %4888  ;;  %v4733_v45 = vsel %vm4561_vm6, %v4703_v21, 0.0  ;;  %v6427_v50 = vsel %vm5630_vm13, %v6426_v17, %v6425_v39  ;;  %v4742_v55 = vsel %vm4561_vm6, %v4705_v23, 0.0  ;;  %v6432_v58 = vrot.slane %v6421_v15, 3 }
 0x876   : > { %12764 = vst [vmem:[#allocation112_spill] sm:$0xff] %v11560_v27  ;;  %5827 = vrot.lane.b32.xlu0 %v11466_v31, %s8257_s3  ;;  %v6422_v27 = vunpack.c.l.b16 %v6402_v52  ;;  %v6429_v52 = vsel %vm5632_vm14, %v6428_v1, %v6427_v50  ;;  %v6971_v36 = vadd.f32 -1.0, %v5443_v60  ;;  %v4751_v28 = vsel %vm4561_vm6, %v4707_v3, 0.0 }
 0x877   : > { %v4760_v33 = vsel %vm4561_vm6, %v4709_v25, 0.0  ;;  %v6431_v56 = vsel %vm5634_vm15, %v6430_v12, %v6429_v52  ;;  %v4759_v21 = vsel %vm4561_vm6, %v4708_v48, 0.0  ;;  %v6436_v13 = vrot.slane %v6423_v62, 1 }
 0x878   : > { %v6434_v18 = vrot.slane %v6422_v27, 2  ;;  %v6433_v5 = vsel %vm5636_vm1, %v6432_v58, %v6431_v56  ;;  %v5475_v38 = vand.u32 2147483647, %v6971_v36  ;;  %v4734_v23 = vadd.f32 %v4733_v45, %v11524_v9 }
 0x879   : > { %v11575_v31 = vpop.permute.xlu0 %4898  ;;  %v4711_v1 = vmul.f32 %v11359_v35, %v11131_v2  ;;  %v4710_v60 = vmul.f32 %v11356_v19, %v11379_v11  ;;  %v4713_v27 = vmul.f32 %v11359_v35, %v11143_v6  ;;  %v4712_v3 = vmul.f32 %v11356_v19, %v11386_v4 }
 0x87a   : > { %5831 = vrot.lane.b32.xlu0 %v11481_v8, %s8257_s3  ;;  %v6435_v15 = vsel %vm5638_vm2, %v6434_v18, %v6433_v5  ;;  %v5493_v9 = vsel %vm4561_vm6, %v5475_v38, 0.0  ;;  %v4743_v2 = vadd.f32 %v4742_v55, %v11535_v54  ;;  %v4752_v17 = vadd.f32 %v4751_v28, %v4750_v29 }
 0x87b   : > { %v6437_v25 = vsel %vm5640_vm3, %v6436_v13, %v6435_v15  ;;  %v4761_v48 = vadd.f32 %v4760_v33, %v4759_v21  ;;  %5494 = vadd.xlane.f32.xlu1 %v5493_v9  ;;  %v4727_v62 = vadd.f32 %v4726_v53, %v4725_v57  ;;  %v4769_v6 = vsel %vm4561_vm6, %v4711_v1, 0.0 }
 0x87c   : > { %v6438_v11 = vpack.c.b16 %v6437_v25, %v6437_v25  ;;  %v4768_v45 = vsel %vm4561_vm6, %v4710_v60, 0.0  ;;  %v4735_v4 = vrot.slane %v4734_v23, 4  ;;  %v4778_v50 = vsel %vm4561_vm6, %v4713_v27, 0.0 }
 0x87d   : > { %v11588_v8 = vpop.permute.xlu0 %4908  ;;  %v4777_v12 = vsel %vm4561_vm6, %v4712_v3, 0.0  ;;  %v4744_v54 = vrot.slane %v4743_v2, 4  ;;  %v4753_v29 = vrot.slane %v4752_v17, 4  ;;  %v4762_v57 = vrot.slane %v4761_v48, 4 }
 0x87e   : > { %5835 = vrot.lane.b32.xlu0 %v11532_v30, %s8257_s3  ;;  %v5792_v30 = vmul.f32 0.6931472, %v11511_v63  ;;  %7242 = vmatmul.mubr.bf16.vlgmr.msra.gmra.mxu1 %v6438_v11  ;;  %v4770_v53 = vadd.f32 %v4769_v6, %v4768_v45  ;;  %v4728_v63 = vrot.slane %v4727_v62, 2  ;;  %v5796_v52 = vmul.f32 0.6931472, %v11521_v46 }
 0x87f   : > { %7253 = vmatprep.mubr.msk.bf16.mxu1 %vm8248_vm0, %v12669_v20  ;;  %v4779_v58 = vadd.f32 %v4778_v50, %v4777_v12  ;;  %v4736_v36 = vadd.f32 %v4735_v4, %v4734_v23  ;;  %v4745_v28 = vadd.f32 %v4744_v54, %v4743_v2  ;;  %v4754_v33 = vadd.f32 %v4753_v29, %v4752_v17 }
 0x880   : > { %v4763_v56 = vadd.f32 %v4762_v57, %v4761_v48  ;;  %v4771_v18 = vrot.slane %v4770_v53, 4  ;;  %v4729_v21 = vadd.f32 %v4728_v63, %v4727_v62  ;;  %v5800_v13 = vmul.f32 0.6931472, %v11544_v41 }
 0x881   : > { %v11605_v39 = vpop.permute.xlu0 %4918  ;;  %v4780_v38 = vrot.slane %v4779_v58, 4  ;;  %v4737_v1 = vrot.slane %v4736_v36, 2  ;;  %v4746_v60 = vrot.slane %v4745_v28, 2  ;;  %v4755_v15 = vrot.slane %v4754_v33, 2 }
 0x882   : > { %5839 = vrot.lane.b32.xlu0 %v5792_v30, %s8257_s3  ;;  %v4764_v46 = vrot.slane %v4763_v56, 2  ;;  %v4772_v27 = vadd.f32 %v4771_v18, %v4770_v53  ;;  %v4730_v23 = vrot.slane %v4729_v21, 1  ;;  %v5804_v25 = vmul.f32 0.6931472, %v11551_v43 }
 0x883   : > { %v4781_v9 = vadd.f32 %v4780_v38, %v4779_v58  ;;  %v4547_v2 = vmul.f32 %v11356_v19, %v10988_v47  ;;  %v4549_v41 = vmul.f32 %v11356_v19, %v10993_v14  ;;  %v4738_v17 = vadd.f32 %v4737_v1, %v4736_v36 }
 0x884   : > { %v4548_v48 = vmul.f32 %v11359_v35, %v11412_v51  ;;  %v4747_v11 = vadd.f32 %v4746_v60, %v4745_v28  ;;  %v4756_v62 = vadd.f32 %v4755_v15, %v4754_v33  ;;  %v4765_v30 = vadd.f32 %v4764_v46, %v4763_v56 }
 0x885   : > { %v11615_v55 = vpop.permute.xlu0 %4928  ;;  %v4550_v6 = vmul.f32 %v11359_v35, %v11419_v16  ;;  %v4551_v43 = vmul.f32 %v11356_v19, %v10996_v7  ;;  %v4731_v45 = vadd.f32 %v4730_v23, %v4729_v21  ;;  %v4773_v47 = vrot.slane %v4772_v27, 2  ;;  %v12765_v16 = vld [vmem:[#allocation93_spill] sm:$0xff]  ;;  %v12766_v21 = vld [vmem:[#allocation32_spill] sm:$0xff] }
 0x886   : > { %5843 = vrot.lane.b32.xlu0 %v5796_v52, %s8257_s3  ;;  %v4552_v14 = vmul.f32 %v11359_v35, %v11432_v49  ;;  %v4553_v51 = vmul.f32 %v11356_v19, %v11000_v26  ;;  %v4946_v50 = vmul.f32 %v11271_v44, %v11410_v37  ;;  %v4782_v12 = vrot.slane %v4781_v9, 2 }
 0x887   : > { %v4571_v54 = vsel %vm4561_vm6, %v4547_v2, 0.0  ;;  %v4948_v29 = vmul.f32 %v12765_v16, %v4731_v45  ;;  %v4739_v57 = vrot.slane %v4738_v17, 1  ;;  %v4572_v7 = vsel %vm4561_vm6, %v4548_v48, 0.0 }
 0x888   : > { %v4748_v53 = vrot.slane %v4747_v11, 1  ;;  %v4757_v63 = vrot.slane %v4756_v62, 1  ;;  %v4766_v52 = vrot.slane %v4765_v30, 1  ;;  %v4581_v49 = vsel %vm4561_vm6, %v4550_v6, 0.0 }
 0x889   : > { %v11619_v5 = vpop.permute.xlu0 %4938  ;;  %v4580_v58 = vsel %vm4561_vm6, %v4549_v41, 0.0  ;;  %v4589_v26 = vsel %vm4561_vm6, %v4551_v43, 0.0  ;;  %v4774_v36 = vadd.f32 %v4773_v47, %v4772_v27  ;;  %v4590_v44 = vsel %vm4561_vm6, %v4552_v14, 0.0 }
 0x88a   : > { %5847 = vrot.lane.b32.xlu0 %v5800_v13, %s8257_s3  ;;  %v4598_v28 = vsel %vm4561_vm6, %v4553_v51, 0.0  ;;  %v4962_v33 = vadd.f32 1e-06, %v4946_v50  ;;  %v4783_v56 = vadd.f32 %v4782_v12, %v4781_v9  ;;  %v4573_v18 = vadd.f32 %v4572_v7, %v4571_v54  ;;  %v12769_v51 = vld [vmem:[#allocation107_spill] sm:$0xff]  ;;  %v12770_v54 = vld [vmem:[#allocation73_spill] sm:$0xff] }
 0x88b   : > { %v11657_v13 = vmul.f32 %v11356_v19, %v12766_v21  ;;  %v11659_v38 = vadd.f32 1e-06, %v4948_v29  ;;  %v11661_v1 = vadd.f32 %v4739_v57, %v4738_v17  ;;  %v4582_v60 = vadd.f32 %v4581_v49, %v4580_v58  ;;  %v12768_v17 = vld [vmem:[#allocation79_spill] sm:$0xff] }
 0x88c   : > { %v11663_v15 = vadd.f32 %v4748_v53, %v4747_v11  ;;  %v11665_v46 = vadd.f32 %v4757_v63, %v4756_v62  ;;  %v11667_v27 = vadd.f32 %v4766_v52, %v4765_v30  ;;  %v4591_v23 = vadd.f32 %v4590_v44, %v4589_v26 }
 0x88d   : > { %v11623_v3 = vpop.permute.xlu0 %5124  ;;  %v4775_v2 = vrot.slane %v4774_v36, 1  ;;  %v6645_v48 = vrot.slane %v11489_v22, 7  ;;  %v6647_v6 = vrot.slane %v11496_v32, 6  ;;  %7921 = vlog2.f32 %v4962_v33 }
 0x88e   : > { %5851 = vrot.lane.b32.xlu0 %v5804_v25, %s8257_s3  ;;  %v12767_v25 = vld [vmem:[#allocation77_spill] sm:$0xff]  ;;  %v4951_v11 = vmul.f32 %v12768_v17, %v11661_v1  ;;  %v4784_v43 = vrot.slane %v4783_v56, 1  ;;  %v4574_v62 = vrot.slane %v4573_v18, 4  ;;  %7923 = vlog2.f32 %v11659_v38 }
 0x88f   : > { %v4949_v9 = vmul.f32 %v12767_v25, %v4731_v45  ;;  %v4583_v30 = vrot.slane %v4582_v60, 4  ;;  %v6646_v47 = vsel %vm5628_vm12, %v6645_v48, %v11507_v40  ;;  %v6649_v45 = vrot.slane %v11502_v0, 5 }
 0x890   : > { %v4592_v14 = vrot.slane %v4591_v23, 4  ;;  %v4554_v22 = vmul.f32 %v11359_v35, %v12769_v51  ;;  %v6648_v32 = vsel %vm5630_vm13, %v6647_v6, %v6646_v47  ;;  %v6651_v50 = vrot.slane %v11504_v61, 4  ;;  %v12772_v61 = vld [vmem:[#allocation83_spill] sm:$0xff] }
 0x891   : > { %v11639_v4 = vpop.permute.xlu0 %5134  ;;  %v11685_v12 = vadd.f32 1e-06, %v4949_v9  ;;  %v4953_v16 = vmul.f32 %v12770_v54, %v11663_v15  ;;  %v6650_v40 = vsel %vm5632_vm14, %v6649_v45, %v6648_v32  ;;  %v6653_v0 = vrot.slane %v11509_v24, 3  ;;  %v12776_v45 = vld [vmem:[#allocation84_spill] sm:$0xff] }
 0x892   : > { %v11693_v57 = vadd.f32 1e-06, %v4951_v11  ;;  %v4575_v7 = vadd.f32 %v4574_v62, %v4573_v18  ;;  %v6652_v53 = vsel %vm5634_vm15, %v6651_v50, %v6650_v40  ;;  %v6655_v63 = vrot.slane %v11517_v34, 2  ;;  %v12773_v34 = vld [vmem:[#allocation80_spill] sm:$0xff]  ;;  %v11745_v40 = vpop.permute.xlu1 %5347 }
 0x893   : > { %v4955_v52 = vmul.f32 %v12772_v61, %v11665_v46  ;;  %v4584_v49 = vadd.f32 %v4583_v30, %v4582_v60  ;;  %v6654_v58 = vsel %vm5636_vm1, %v6653_v0, %v6652_v53  ;;  %v6657_v26 = vrot.slane %v11526_v10, 1  ;;  %v7543_v11 = vld [vmem:[%s12278_s10 + $0x18] sm:$0xff]  }
 0x894   : > { %v4593_v44 = vadd.f32 %v4592_v14, %v4591_v23  ;;  %v4599_v21 = vsel %vm4561_vm6, %v4554_v22, 0.0  ;;  %v4556_v24 = vmul.f32 %v11359_v35, %v11459_v42  ;;  %v6656_v18 = vsel %vm5638_vm2, %v6655_v63, %v6654_v58  ;;  %7246 = vmatpush3.bf16.msra.mxu1 %v7543_v11  ;;  %v12778_v22 = vld [vmem:[#allocation35_spill] sm:$0xff] }
 0x895   : > { %v11652_v37 = vpop.permute.xlu0 %5144  ;;  %v11705_v25 = vadd.f32 1e-06, %v4953_v16  ;;  %v4957_v9 = vmul.f32 %v12773_v34, %v11667_v27  ;;  %v11709_v48 = vadd.f32 %v4775_v2, %v4774_v36  ;;  %v6658_v6 = vsel %vm5640_vm3, %v6657_v26, %v6656_v18  ;;  %7247 = vmatprep.subr.bf16.mxu1 %v12669_v20 }
 0x896   : > { %v4978_v10 = vmul.f32 %v4962_v33, %v4962_v33  ;;  %7925 = vlog2.f32 %v11685_v12  ;;  %v11715_v23 = vadd.f32 %v4784_v43, %v4783_v56  ;;  %v4576_v17 = vrot.slane %v4575_v7, 2  ;;  %6669 = vst [vmem:[%s11717_s5 + $0x8] sm:$0xff] %v6658_v6  ;;  %v12775_v33 = vld [vmem:[#allocation87_spill] sm:$0xff]  ;;  %v7545_v6 = vld [vmem:[%s12278_s10 + $0x8] sm:$0xff]  }
 0x897   : > { %7927 = vlog2.f32 %v11693_v57  ;;  %v11721_v42 = vadd.f32 1e-06, %v4955_v52  ;;  %v4585_v36 = vrot.slane %v4584_v49, 2  ;;  %v4600_v2 = vadd.f32 %v4599_v21, %v4598_v28  ;;  %v12780_v21 = vld [vmem:[#allocation110_spill] sm:$0xff] }
 0x898   : > { %v4959_v62 = vmul.f32 %v12775_v33, %v11709_v48  ;;  %v4594_v56 = vrot.slane %v4593_v44, 2  ;;  %v4608_v43 = vsel %vm4561_vm6, %v4556_v24, 0.0  ;;  %v4558_v30 = vmul.f32 %v11359_v35, %v11477_v59 }
 0x899   : > { %v11670_v41 = vpop.permute.xlu0 %5154  ;;  %7929 = vlog2.f32 %v11705_v25  ;;  %v11732_v47 = vadd.f32 1e-06, %v4957_v9  ;;  %v4961_v28 = vmul.f32 %v12776_v45, %v11715_v23  ;;  %v4607_v51 = vsel %vm4561_vm6, %v11657_v13, 0.0  ;;  %v7544_v13 = vld [vmem:[%s12278_s10 + $0x10] sm:$0xff]  }
 0x89a   : > { %v4557_v32 = vmul.f32 %v11356_v19, %v12778_v22  ;;  %v4980_v50 = vmul.f32 %v11659_v38, %v11659_v38  ;;  %v4577_v59 = vadd.f32 %v4576_v17, %v4575_v7  ;;  %v7922_v54 = vpop.eup %7921  ;;  %7931 = vrcp.f32 %v4978_v10  ;;  %7248 = vmatpush3.bf16.msra.mxu1 %v7544_v13  ;;  %v12781_v10 = vld [vmem:[#allocation37_spill] sm:$0xff] }
 0x89b   : > { %v4586_v16 = vadd.f32 %v4585_v36, %v4584_v49  ;;  %v4601_v0 = vrot.slane %v4600_v2, 4  ;;  %v4609_v53 = vadd.f32 %v4608_v43, %v4607_v51  ;;  %v7924_v63 = vpop.eup %7923  ;;  %7933 = vlog2.f32 %v11721_v42  ;;  %7249 = vmatprep.subr.bf16.mxu1 %v12669_v20 }
 0x89c   : > { %v4975_v61 = vadd.f32 1e-06, %v4959_v62  ;;  %v4595_v52 = vadd.f32 %v4594_v56, %v4593_v44  ;;  %v4617_v38 = vsel %vm4561_vm6, %v4558_v30, 0.0  ;;  %7935 = vlog2.f32 %v11732_v47 }
 0x89d   : > { %v11689_v29 = vpop.permute.xlu0 %5164  ;;  %v4977_v7 = vadd.f32 1e-06, %v4961_v28  ;;  %v4616_v49 = vsel %vm4561_vm6, %v4557_v32, 0.0  ;;  %7937 = vrcp.f32 %v4980_v50  ;;  %v4578_v26 = vrot.slane %v4577_v59, 1 }
 0x89e   : > { %12771 = vst [vmem:[#allocation93_spill] sm:$0xff] %v11689_v29  ;;  %v4560_v24 = vmul.f32 %v11359_v35, %v12780_v21  ;;  %v4602_v18 = vadd.f32 %v4601_v0, %v4600_v2  ;;  %v4587_v34 = vrot.slane %v4586_v16, 1  ;;  %v4610_v44 = vrot.slane %v4609_v53, 4  ;;  %v11768_v2 = vpop.permute.xlu1 %5287  ;;  %7250 = vmatpush3.bf16.msra.mxu1 %v7545_v6 }
 0x89f   : > { %v4618_v9 = vadd.f32 %v4617_v38, %v4616_v49  ;;  %v4559_v17 = vmul.f32 %v11356_v19, %v12781_v10  ;;  %v4981_v36 = vmul.f32 %v11685_v12, %v11685_v12  ;;  %7939 = vlog2.f32 %v4975_v61  ;;  %7251 = vmatprep.subr.bf16.mxu1 %v12669_v20  ;;  %v12784_v10 = vld [vmem:[#allocation65_spill] sm:$0xff]  ;;  %v12788_v19 = vld [vmem:[#allocation72_spill] sm:$0xff] }
 0x8a0   : > { %v4596_v11 = vrot.slane %v4595_v52, 1  ;;  %v4983_v33 = vmul.f32 %v11693_v57, %v11693_v57  ;;  %7941 = vlog2.f32 %v4977_v7  ;;  %v4985_v56 = vmul.f32 %v11705_v25, %v11705_v25 }
 0x8a1   : > { %v11711_v60 = vpop.permute.xlu0 %5174  ;;  %v11774_v43 = vadd.f32 %v4578_v26, %v4577_v59  ;;  %v4626_v30 = vsel %vm4561_vm6, %v4560_v24, 0.0  ;;  %v5011_v45 = vmul.f32 0.6931472, %v7922_v54  ;;  %v4603_v28 = vrot.slane %v4602_v18, 2 }
 0x8a2   : > { %12774 = vst [vmem:[#allocation32_spill] sm:$0xff] %v11711_v60  ;;  %v11778_v51 = vadd.f32 %v4587_v34, %v4586_v16  ;;  %v4611_v57 = vadd.f32 %v4610_v44, %v4609_v53  ;;  %v4619_v22 = vrot.slane %v4618_v9, 4  ;;  %v4625_v50 = vsel %vm4561_vm6, %v4559_v17, 0.0  ;;  %v12782_v53 = vld [vmem:[#allocation104_spill] sm:$0xff]  ;;  %v5358_v21 = vpop.permute.xlu1 %5357 }
 0x8a3   : > { %v7926_v12 = vpop.eup %7925  ;;  %7943 = vrcp.f32 %v4981_v36  ;;  %v11781_v0 = vadd.f32 %v4596_v11, %v4595_v52  ;;  %v5015_v25 = vmul.f32 0.6931472, %v7924_v63  ;;  %v4987_v59 = vmul.f32 %v11721_v42, %v11721_v42  ;;  %v12783_v52 = vld [vmem:[#allocation106_spill] sm:$0xff] }
 0x8a4   : > { %v7928_v32 = vpop.eup %7927  ;;  %7945 = vrcp.f32 %v4983_v33  ;;  %v4627_v54 = vadd.f32 %v4626_v30, %v4625_v50  ;;  %v5017_v16 = vmul.f32 0.6931472, %v7926_v12  ;;  %v4853_v38 = vmul.f32 %v12782_v53, %v11774_v43 }
 0x8a5   : > { %v11736_v14 = vpop.permute.xlu0 %5184  ;;  %7947 = vrcp.f32 %v4985_v56  ;;  %v11789_v49 = vmul.f32 2.0, %v5011_v45  ;;  %v4604_v26 = vadd.f32 %v4603_v28, %v4602_v18  ;;  %v4855_v63 = vmul.f32 %v12783_v52, %v11778_v51  ;;  %v12785_v28 = vld [vmem:[#allocation30_spill] sm:$0xff] }
 0x8a6   : > { %12777 = vst [vmem:[#allocation77_spill] sm:$0xff] %v11736_v14  ;;  %v7930_v20 = vpop.eup %7929  ;;  %v4612_v24 = vrot.slane %v4611_v57, 2  ;;  %v4620_v34 = vadd.f32 %v4619_v22, %v4618_v9  ;;  %v4989_v42 = vmul.f32 %v11732_v47, %v11732_v47  ;;  %v5021_v6 = vmul.f32 0.6931472, %v7928_v32  ;;  %v12786_v47 = vld [vmem:[#allocation112_spill] sm:$0xff] }
 0x8a7   : > { %v11793_v44 = vpop.eup %7931  ;;  %v4857_v17 = vmul.f32 %v12784_v10, %v11781_v0  ;;  %v11799_v36 = vmul.f32 2.0, %v5015_v25  ;;  %7949 = vrcp.f32 %v4987_v59  ;;  %v4991_v18 = vmul.f32 %v4975_v61, %v4975_v61  ;;  %v12787_v25 = vld [vmem:[#allocation33_spill] sm:$0xff] }
 0x8a8   : > { %v7934_v11 = vpop.eup %7933  ;;  %v5025_v33 = vmul.f32 0.6931472, %v7930_v20  ;;  %v4628_v56 = vrot.slane %v4627_v54, 4  ;;  %v4993_v9 = vmul.f32 %v4977_v7, %v4977_v7  ;;  %v11803_v12 = vmul.f32 2.0, %v5017_v16 }
 0x8a9   : > { %v11753_v58 = vpop.permute.xlu0 %5194  ;;  %v7936_v45 = vpop.eup %7935  ;;  %v5301_v22 = vsub.f32 %v12785_v28, %v4853_v38  ;;  %v4950_v32 = vmul.f32 %v12786_v47, %v11661_v1  ;;  %v5303_v53 = vsub.f32 %v12787_v25, %v4855_v63  ;;  %v4613_v52 = vadd.f32 %v4612_v24, %v4611_v57  ;;  %v12789_v57 = vld [vmem:[#allocation91_spill] sm:$0xff] }
 0x8aa   : > { %12779 = vst [vmem:[#allocation79_spill] sm:$0xff] %v11753_v58  ;;  %v11808_v50 = vpop.eup %7937  ;;  %v4621_v59 = vrot.slane %v4620_v34, 2  ;;  %v4605_v61 = vrot.slane %v4604_v26, 1  ;;  %7951 = vrcp.f32 %v4989_v42  ;;  %v11811_v20 = vmul.f32 2.0, %v5021_v6  ;;  %v11816_v28 = vpop.permute.xlu1 %5295 }
 0x8ab   : > { %v5029_v10 = vmul.f32 0.6931472, %v7934_v11  ;;  %v5305_v7 = vsub.f32 %v12788_v19, %v4857_v17  ;;  %7953 = vrcp.f32 %v4991_v18  ;;  %v11814_v35 = vmul.f32 2.0, %v5025_v33  ;;  %v12790_v18 = vld [vmem:[#allocation89_spill] sm:$0xff] }
 0x8ac   : > { %v7940_v16 = vpop.eup %7939  ;;  %v5033_v38 = vmul.f32 0.6931472, %v7936_v45  ;;  %v4629_v1 = vadd.f32 %v4628_v56, %v4627_v54  ;;  %7955 = vrcp.f32 %v4993_v9  ;;  %v5205_v24 = vsub.f32 %v11803_v12, %v12789_v57 }
 0x8ad   : > { %v11770_v62 = vpop.permute.xlu0 %5235  ;;  %v7942_v63 = vpop.eup %7941  ;;  %v5317_v42 = vmul.f32 %v5301_v22, %v5301_v22  ;;  %v4966_v6 = vadd.f32 1e-06, %v4950_v32  ;;  %v5319_v11 = vmul.f32 %v5303_v53, %v5303_v53  ;;  %v4622_v25 = vadd.f32 %v4621_v59, %v4620_v34  ;;  %v12791_v34 = vld [vmem:[#allocation95_spill] sm:$0xff]  ;;  %v12792_v59 = vld [vmem:[#allocation90_spill] sm:$0xff] }
 0x8ae   : > { %v11822_v19 = vadd.f32 %v4605_v61, %v4604_v26  ;;  %v4614_v17 = vrot.slane %v4613_v52, 1  ;;  %v5207_v33 = vsub.f32 %v11811_v20, %v12790_v18  ;;  %v11826_v45 = vmul.f32 2.0, %v5029_v10  ;;  %v12793_v61 = vld [vmem:[#allocation103_spill] sm:$0xff] }
 0x8af   : > { %v5037_v54 = vmul.f32 0.6931472, %v7940_v16  ;;  %v5321_v56 = vmul.f32 %v5305_v7, %v5305_v7  ;;  %v11828_v14 = vmul.f32 2.0, %v5033_v38  ;;  %v5041_v9 = vmul.f32 0.6931472, %v7942_v63  ;;  %v5368_v16 = vpop.permute.xlu1 %5367  ;;  %v12794_v38 = vld [vmem:[#allocation23_spill] sm:$0xff] }
 0x8b0   : > { %v7944_v58 = vpop.eup %7943  ;;  %v4630_v60 = vrot.slane %v4629_v1, 2  ;;  %v4952_v12 = vmul.f32 %v11575_v31, %v11663_v15  ;;  %v5209_v32 = vsub.f32 %v11814_v35, %v12791_v34  ;;  %v5413_v53 = vadd.f32 %v11745_v40, %v5317_v42  ;;  %v12795_v15 = vld [vmem:[#allocation98_spill] sm:$0xff] }
 0x8b1   : > { %v11785_v13 = vpop.permute.xlu0 %5243  ;;  %v7946_v26 = vpop.eup %7945  ;;  %7957 = vlog2.f32 %v4966_v6  ;;  %v4850_v20 = vmul.f32 %v12793_v61, %v12792_v59  ;;  %v5415_v7 = vadd.f32 %v5358_v21, %v5319_v11  ;;  %v4859_v63 = vmul.f32 %v12794_v38, %v11822_v19  ;;  %v12796_v42 = vld [vmem:[#allocation22_spill] sm:$0xff] }
 0x8b2   : > { %v7948_v10 = vpop.eup %7947  ;;  %v11841_v57 = vadd.f32 %v4614_v17, %v4613_v52  ;;  %v4623_v31 = vrot.slane %v4622_v25, 1  ;;  %v11845_v29 = vmul.f32 2.0, %v5037_v54  ;;  %v5417_v35 = vadd.f32 %v5368_v16, %v5321_v56  ;;  %v12798_v56 = vld [vmem:[#allocation102_spill] sm:$0xff] }
 0x8b3   : > { %v5298_v40 = vsub.f32 %v11770_v62, %v4850_v20  ;;  %v11850_v59 = vmul.f32 2.0, %v5041_v9  ;;  %v4631_v21 = vadd.f32 %v4630_v60, %v4629_v1  ;;  %v4968_v11 = vadd.f32 1e-06, %v4952_v12  ;;  %v12799_v20 = vld [vmem:[#allocation108_spill] sm:$0xff]  ;;  %v12800_v9 = vld [vmem:[#allocation25_spill] sm:$0xff] }
 0x8b4   : > { %v11854_v52 = vpop.eup %7949  ;;  %v5429_v17 = vmul.f32 %v7944_v58, %v5413_v53  ;;  %v4982_v38 = vmul.f32 %v4966_v6, %v4966_v6  ;;  %v4954_v54 = vmul.f32 %v11588_v8, %v11665_v46  ;;  %v4852_v16 = vmul.f32 %v12798_v56, %v11774_v43  ;;  %v12801_v1 = vld [vmem:[#allocation24_spill] sm:$0xff]  ;;  %v12802_v8 = vld [vmem:[#allocation26_spill] sm:$0xff] }
 0x8b5   : > { %v11801_v30 = vpop.permute.xlu0 %5251  ;;  %v5431_v62 = vmul.f32 %v7946_v26, %v5415_v7  ;;  %v5307_v18 = vsub.f32 %v12799_v20, %v4859_v63  ;;  %v4861_v34 = vmul.f32 %v12800_v9, %v11841_v57  ;;  %v11863_v60 = vadd.f32 %v4623_v31, %v4622_v25  ;;  %v7546_v25 = vld [vmem:[%s12278_s10] sm:$0xff]   ;;  %v5378_v31 = vpop.permute.xlu1 %5377 }
 0x8b6   : > { %v5314_v58 = vmul.f32 %v5298_v40, %v5298_v40  ;;  %v5300_v6 = vsub.f32 %v11785_v13, %v4852_v16  ;;  %7959 = vlog2.f32 %v4968_v11  ;;  %v4632_v43 = vrot.slane %v4631_v21, 1  ;;  %v12803_v20 = vld [vmem:[#allocation109_spill] sm:$0xff]  ;;  %7252 = vmatpush3.bf16.msra.mxu1 %v7546_v25 }
 0x8b7   : > { %v11868_v53 = vpop.eup %7951  ;;  %v4956_v26 = vmul.f32 %v11605_v39, %v11667_v27  ;;  %7961 = vrcp.f32 %v4982_v38  ;;  %v4970_v13 = vadd.f32 1e-06, %v4954_v54  ;;  %v5447_v56 = vadd.f32 %v5431_v62, %v5207_v33  ;;  %v12804_v39 = vld [vmem:[#allocation74_spill] sm:$0xff] }
 0x8b8   : > { %v11877_v63 = vpop.eup %7953  ;;  %v5323_v16 = vmul.f32 %v5307_v18, %v5307_v18  ;;  %v5309_v9 = vsub.f32 %v12803_v20, %v4861_v34  ;;  %v4863_v27 = vmul.f32 %v12804_v39, %v11863_v60  ;;  %v5202_v12 = vsub.f32 %v11789_v49, %v11623_v3  ;;  %v12805_v34 = vld [vmem:[#allocation105_spill] sm:$0xff] }
 0x8b9   : > { %v11818_v47 = vpop.permute.xlu0 %5259  ;;  %v11879_v40 = vpop.eup %7955  ;;  %v4984_v38 = vmul.f32 %v4968_v11, %v4968_v11  ;;  %v11889_v54 = vadd.f32 %v4632_v43, %v4631_v21  ;;  %v4958_v33 = vmul.f32 %v11615_v55, %v11709_v48  ;;  %7963 = vlog2.f32 %v4970_v13  ;;  %v12806_v43 = vld [vmem:[#allocation31_spill] sm:$0xff] }
 0x8ba   : > { %v4854_v62 = vmul.f32 %v12805_v34, %v11778_v51  ;;  %v5419_v25 = vadd.f32 %v5378_v31, %v5323_v16  ;;  %v5325_v3 = vmul.f32 %v5309_v9, %v5309_v9  ;;  %v5311_v49 = vsub.f32 %v11768_v2, %v4863_v27  ;;  %v5388_v11 = vpop.permute.xlu1 %5387 }
 0x8bb   : > { %v5204_v21 = vsub.f32 %v11799_v36, %v11639_v4  ;;  %v4865_v51 = vmul.f32 %v12806_v43, %v11889_v54  ;;  %vm6557_vm0 = vcmask 523264  }
 0x8bc   : > { %v5435_v4 = vmul.f32 %v11854_v52, %v5419_v25  ;;  %v5421_v36 = vadd.f32 %v5388_v11, %v5325_v3  ;;  %v12807_v52 = vld [vmem:[#allocation21_spill] sm:$0xff] }
 0x8bd   : > { %v11832_v22 = vpop.permute.xlu0 %5267  ;;  %v5313_v39 = vsub.f32 %v11816_v28, %v4865_v51 }
 0x8c1   : > { %v11852_v61 = vpop.permute.xlu0 %5275 }
 0x8c2   : > { %12797 = vst [vmem:[#allocation107_spill] sm:$0xff] %v11852_v61  ;;  %v5433_v61 = vmul.f32 %v7948_v10, %v5417_v35  ;;  %v5445_v10 = vadd.f32 %v5429_v17, %v5205_v24  ;;  %v5316_v24 = vmul.f32 %v5300_v6, %v5300_v6  ;;  %v5302_v6 = vsub.f32 %v11801_v30, %v4854_v62 }
 0x8c3   : > { %v5327_v30 = vmul.f32 %v5311_v49, %v5311_v49  ;;  %v5437_v62 = vmul.f32 %v11868_v53, %v5421_v36  ;;  %v5329_v49 = vmul.f32 %v5313_v39, %v5313_v39  ;;  %v12808_v53 = vsub.f32 %v11826_v45, %v12795_v15 }
 0x8c4   : > { %v11884_v46 = vadd.f32 %v5433_v61, %v5209_v32  ;;  %v5318_v16 = vmul.f32 %v5302_v6, %v5302_v6 }
 0x8c5   : > { %v5333_v7 = vpop.permute.xlu0 %5332 }
 0x8c6   : > { %v5410_v35 = vadd.f32 %v5333_v7, %v5314_v58  ;;  %v4972_v58 = vadd.f32 1e-06, %v4956_v26  ;;  %v7958_v7 = vpop.eup %7957  ;;  %v4960_v26 = vmul.f32 %v11619_v5, %v11715_v23 }
 0x8c7   : > { %v5019_v2 = vmul.f32 0.6931472, %v7958_v7  ;;  %v6975_v7 = vadd.f32 -1.0, %v5447_v56  ;;  %v12809_v56 = vld [vmem:[#allocation111_spill] sm:$0xff] }
 0x8c8   : > { %v5426_v17 = vmul.f32 %v11793_v44, %v5410_v35  ;;  %v4986_v44 = vmul.f32 %v4970_v13, %v4970_v13  ;;  %7965 = vlog2.f32 %v4972_v58  ;;  %v4988_v27 = vmul.f32 %v4972_v58, %v4972_v58 }
 0x8c9   : > { %v5343_v18 = vpop.permute.xlu0 %5342  ;;  %7967 = vrcp.f32 %v4984_v38  ;;  %v4976_v5 = vadd.f32 1e-06, %v4960_v26  ;;  %v5046_v38 = vmul.f32 2.0, %v5019_v2  ;;  %v4858_v6 = vmul.f32 %v12809_v56, %v11822_v19 }
 0x8ca   : > { %v5442_v32 = vadd.f32 %v5426_v17, %v5202_v12  ;;  %v5412_v61 = vadd.f32 %v5343_v18, %v5316_v24  ;;  %v4974_v12 = vadd.f32 1e-06, %v4958_v33  ;;  %7969 = vrcp.f32 %v4986_v44  ;;  %v7960_v24 = vpop.eup %7959  ;;  %v5398_v17 = vpop.permute.xlu1 %5397 }
 0x8cb   : > { %v4856_v33 = vmul.f32 %v12807_v52, %v11781_v0  ;;  %v7962_v34 = vpop.eup %7961  ;;  %v5206_v28 = vsub.f32 %v5046_v38, %v11652_v37  ;;  %v5023_v11 = vmul.f32 0.6931472, %v7960_v24  ;;  %v5479_v51 = vand.u32 2147483647, %v6975_v7 }
 0x8cc   : > { %v5428_v55 = vmul.f32 %v11808_v50, %v5412_v61  ;;  %v6970_v48 = vadd.f32 -1.0, %v5442_v32  ;;  %v6973_v50 = vadd.f32 -1.0, %v5445_v10  ;;  %7971 = vlog2.f32 %v4974_v12 }
 0x8cd   : > { %v11904_v31 = vpop.permute.xlu0 %5283  ;;  %v5423_v32 = vadd.f32 %v5398_v17, %v5327_v30  ;;  %v5304_v58 = vsub.f32 %v11818_v47, %v4856_v33  ;;  %7973 = vrcp.f32 %v4988_v27  ;;  %v4990_v44 = vmul.f32 %v4974_v12, %v4974_v12  ;;  %v7964_v47 = vpop.eup %7963  ;;  %v12813_v33 = vld [vmem:[#allocation70_spill] sm:$0xff] }
 0x8ce   : > { %v5444_v13 = vadd.f32 %v5428_v55, %v5204_v21  ;;  %v5474_v35 = vand.u32 2147483647, %v6970_v48  ;;  %v5477_v61 = vand.u32 2147483647, %v6973_v50  ;;  %v5451_v21 = vadd.f32 %v5435_v4, %v12808_v53  ;;  %v5408_v26 = vpop.permute.xlu1 %5407 }
 0x8cf   : > { %7975 = vlog2.f32 %v4976_v5  ;;  %v12810_v55 = vsub.f32 %v11828_v14, %v12796_v42  ;;  %v5439_v43 = vmul.f32 %v11877_v63, %v5423_v32  ;;  %v6977_v12 = vadd.f32 -1.0, %v11884_v46  ;;  %v12811_v63 = vld [vmem:[#allocation67_spill] sm:$0xff] }
 0x8d0   : > { %v5490_v20 = vsel %vm4561_vm6, %v5474_v35, 0.0  ;;  %v6972_v9 = vadd.f32 -1.0, %v5444_v13  ;;  %v5320_v2 = vmul.f32 %v5304_v58, %v5304_v58  ;;  %v5306_v45 = vsub.f32 %v11832_v22, %v4858_v6 }
 0x8d1   : > { %5491 = vadd.xlane.f32.xlu0 %v5490_v20  ;;  %v5353_v23 = vpop.permute.xlu0 %5352  ;;  %v5453_v48 = vadd.f32 %v5437_v62, %v12810_v55  ;;  %v5499_v15 = vsel %vm4561_vm6, %v5477_v61, 0.0  ;;  %v5425_v19 = vadd.f32 %v5408_v26, %v5329_v49  ;;  %7977 = vrcp.f32 %v4990_v44 }
 0x8d2   : > { %v5414_v18 = vadd.f32 %v5353_v23, %v5318_v16  ;;  %v5476_v10 = vand.u32 2147483647, %v6972_v9  ;;  %v4992_v35 = vmul.f32 %v4976_v5, %v4976_v5  ;;  %v5048_v4 = vmul.f32 2.0, %v5023_v11  ;;  %v12812_v23 = vld [vmem:[#allocation107_spill] sm:$0xff] }
 0x8d3   : > { %v5027_v42 = vmul.f32 0.6931472, %v7964_v47  ;;  %v4860_v30 = vmul.f32 %v12811_v63, %v11841_v57  ;;  %v5505_v22 = vsel %vm4561_vm6, %v5479_v51, 0.0  ;;  %v5481_v9 = vand.u32 2147483647, %v6977_v12  ;;  %v12818_v12 = vld [vmem:[#allocation32_spill] sm:$0xff] }
 0x8d4   : > { %v5430_v25 = vmul.f32 %v7962_v34, %v5414_v18  ;;  %v5496_v3 = vsel %vm4561_vm6, %v5476_v10, 0.0  ;;  %v5208_v20 = vsub.f32 %v5048_v4, %v11670_v41  ;;  %v6979_v39 = vadd.f32 -1.0, %v5451_v21 }
 0x8d5   : > { %5497 = vadd.xlane.f32.xlu0 %v5496_v3  ;;  %v11915_v0 = vpop.permute.xlu0 %5291  ;;  %v7966_v14 = vpop.eup %7965  ;;  %v5322_v27 = vmul.f32 %v5306_v45, %v5306_v45  ;;  %v5308_v5 = vsub.f32 %v12812_v23, %v4860_v30  ;;  %v5441_v52 = vmul.f32 %v11879_v40, %v5425_v19  ;;  %7979 = vrcp.f32 %v4992_v35  ;;  %v12815_v3 = vld [vmem:[#allocation93_spill] sm:$0xff] }
 0x8d6   : > { %v5446_v37 = vadd.f32 %v5430_v25, %v5206_v28  ;;  %v7968_v16 = vpop.eup %7967  ;;  %v5031_v57 = vmul.f32 0.6931472, %v7966_v14  ;;  %v4862_v18 = vmul.f32 %v12813_v33, %v11863_v60  ;;  %v5050_v34 = vmul.f32 2.0, %v5027_v42  ;;  %v12819_v30 = vld [vmem:[#allocation77_spill] sm:$0xff]  ;;  %v12820_v33 = vld [vmem:[#allocation79_spill] sm:$0xff] }
 0x8d7   : > { %v7970_v38 = vpop.eup %7969  ;;  %v6981_v61 = vadd.f32 -1.0, %v5453_v48  ;;  %v12814_v7 = vsub.f32 %v11845_v29, %v12801_v1  ;;  %v5511_v40 = vsel %vm4561_vm6, %v5481_v9, 0.0  ;;  %v5483_v25 = vand.u32 2147483647, %v6979_v39 }
 0x8d8   : > { %v6974_v13 = vadd.f32 -1.0, %v5446_v37  ;;  %v5310_v58 = vsub.f32 %v11904_v31, %v4862_v18  ;;  %v5210_v49 = vsub.f32 %v5050_v34, %v12815_v3  ;;  %v5324_v60 = vmul.f32 %v5308_v5, %v5308_v5  ;;  %v12817_v37 = vld [vmem:[#allocation81_spill] sm:$0xff] }
 0x8d9   : > { %5500 = vadd.xlane.f32.xlu0 %v5499_v15  ;;  %v5363_v36 = vpop.permute.xlu0 %5362  ;;  %v7972_v10 = vpop.eup %7971  ;;  %v5455_v28 = vadd.f32 %v5439_v43, %v12814_v7  ;;  %v12816_v53 = vsub.f32 %v11850_v59, %v12802_v8  ;;  %v5052_v56 = vmul.f32 2.0, %v5031_v57  ;;  %v4864_v29 = vmul.f32 %v12817_v37, %v11889_v54 }
 0x8da   : > { %v5416_v50 = vadd.f32 %v5363_v36, %v5320_v2  ;;  %v5478_v46 = vand.u32 2147483647, %v6974_v13  ;;  %v5035_v6 = vmul.f32 0.6931472, %v7972_v10  ;;  %v7974_v31 = vpop.eup %7973  ;;  %v5485_v43 = vand.u32 2147483647, %v6981_v61 }
 0x8db   : > { %v5457_v21 = vadd.f32 %v5441_v52, %v12816_v53  ;;  %v5212_v26 = vsub.f32 %v5052_v56, %v12818_v12  ;;  %v5326_v2 = vmul.f32 %v5310_v58, %v5310_v58  ;;  %v5517_v45 = vsel %vm4561_vm6, %v5483_v25, 0.0  ;;  %v12821_v25 = vld [vmem:[#allocation48_spill] sm:$0xff]  ;;  %v12824_v53 = vld [vmem:[#allocation51_spill] sm:$0xff] }
 0x8dc   : > { %v5432_v24 = vmul.f32 %v7968_v16, %v5416_v50  ;;  %v5502_v17 = vsel %vm4561_vm6, %v5478_v46, 0.0  ;;  %v7976_v51 = vpop.eup %7975  ;;  %v6983_v59 = vadd.f32 -1.0, %v5455_v28  ;;  %v5312_v8 = vsub.f32 %v11915_v0, %v4864_v29  ;;  %v12825_v56 = vld [vmem:[#allocation52_spill] sm:$0xff] }
 0x8dd   : > { %5506 = vadd.xlane.f32.xlu0 %v5505_v22  ;;  %5503 = vadd.xlane.f32.xlu1 %v5502_v17  ;;  %v5373_v41 = vpop.permute.xlu0 %5372  ;;  %v5054_v19 = vmul.f32 2.0, %v5035_v6  ;;  %v5039_v36 = vmul.f32 0.6931472, %v7976_v51  ;;  %v5523_v46 = vsel %vm4561_vm6, %v5485_v43, 0.0  ;;  %v5711_v3 = vadd.f32 1e-06, %v12821_v25 }
 0x8de   : > { %v5448_v62 = vadd.f32 %v5432_v24, %v5208_v20  ;;  %v5418_v32 = vadd.f32 %v5373_v41, %v5322_v27  ;;  %v7978_v4 = vpop.eup %7977  ;;  %v5487_v16 = vand.u32 2147483647, %v6983_v59  ;;  %v6985_v20 = vadd.f32 -1.0, %v5457_v21 }
 0x8df   : > { %v5214_v50 = vsub.f32 %v5054_v19, %v12819_v30  ;;  %v5328_v0 = vmul.f32 %v5312_v8, %v5312_v8  ;;  %v5056_v5 = vmul.f32 2.0, %v5039_v36  ;;  %7981 = vlog2.f32 %v5711_v3 }
 0x8e0   : > { %v5434_v44 = vmul.f32 %v7970_v38, %v5418_v32  ;;  %v6976_v11 = vadd.f32 -1.0, %v5448_v62  ;;  %v5529_v52 = vsel %vm4561_vm6, %v5487_v16, 0.0  ;;  %v5489_v57 = vand.u32 2147483647, %v6985_v20 }
 0x8e1   : > { %5512 = vadd.xlane.f32.xlu0 %v5511_v40  ;;  %v5383_v1 = vpop.permute.xlu0 %5382  ;;  %v5216_v18 = vsub.f32 %v5056_v5, %v12820_v33  ;;  %v5714_v21 = vadd.f32 1e-06, %v12824_v53  ;;  %v5715_v6 = vadd.f32 1e-06, %v12825_v56 }
 0x8e2   : > { %v5450_v47 = vadd.f32 %v5434_v44, %v5210_v49  ;;  %v5420_v55 = vadd.f32 %v5383_v1, %v5324_v60  ;;  %v5480_v48 = vand.u32 2147483647, %v6976_v11  ;;  %v7980_v23 = vpop.eup %7979  ;;  %v5535_v61 = vsel %vm4561_vm6, %v5489_v57, 0.0  ;;  %v12822_v49 = vld [vmem:[#allocation50_spill] sm:$0xff]  ;;  %v12823_v44 = vld [vmem:[#allocation49_spill] sm:$0xff] }
 0x8e3   : > { %v5713_v60 = vadd.f32 1e-06, %v12822_v49  ;;  %v5712_v11 = vadd.f32 1e-06, %v12823_v44  ;;  %v12826_v1 = vld [vmem:[#allocation53_spill] sm:$0xff] }
 0x8e4   : > { %v5436_v15 = vmul.f32 %v7974_v31, %v5420_v55  ;;  %v5508_v13 = vsel %vm4561_vm6, %v5480_v48, 0.0  ;;  %v6978_v54 = vadd.f32 -1.0, %v5450_v47  ;;  %v5716_v31 = vadd.f32 1e-06, %v12826_v1  ;;  %v12827_v55 = vld [vmem:[#allocation54_spill] sm:$0xff] }
 0x8e5   : > { %5518 = vadd.xlane.f32.xlu0 %v5517_v45  ;;  %5509 = vadd.xlane.f32.xlu1 %v5508_v13  ;;  %v5393_v35 = vpop.permute.xlu0 %5392  ;;  %7983 = vlog2.f32 %v5713_v60  ;;  %v5717_v48 = vadd.f32 1e-06, %v12827_v55  ;;  %v12828_v13 = vld [vmem:[#allocation55_spill] sm:$0xff] }
 0x8e6   : > { %v5452_v14 = vadd.f32 %v5436_v15, %v5212_v26  ;;  %v5422_v42 = vadd.f32 %v5393_v35, %v5326_v2  ;;  %v5482_v63 = vand.u32 2147483647, %v6978_v54  ;;  %7985 = vlog2.f32 %v5712_v11  ;;  %v5826_v2 = vpop.permute.xlu1 %5825  ;;  %v12829_v35 = vld [vmem:[#allocation56_spill] sm:$0xff] }
 0x8e7   : > { %7987 = vlog2.f32 %v5714_v21  ;;  %v5718_v54 = vadd.f32 1e-06, %v12828_v13 }
 0x8e8   : > { %v5438_v22 = vmul.f32 %v7978_v4, %v5422_v42  ;;  %v5514_v9 = vsel %vm4561_vm6, %v5482_v63, 0.0  ;;  %v6980_v39 = vadd.f32 -1.0, %v5452_v14  ;;  %7989 = vlog2.f32 %v5715_v6  ;;  %v12836_v6 = vld [vmem:[#allocation63_spill] sm:$0xff] }
 0x8e9   : > { %5524 = vadd.xlane.f32.xlu0 %v5523_v46  ;;  %5515 = vadd.xlane.f32.xlu1 %v5514_v9  ;;  %v5403_v27 = vpop.permute.xlu0 %5402  ;;  %7991 = vlog2.f32 %v5716_v31  ;;  %v5719_v4 = vadd.f32 1e-06, %v12829_v35 }
 0x8ea   : > { %v5454_v24 = vadd.f32 %v5438_v22, %v5214_v50  ;;  %v5424_v17 = vadd.f32 %v5403_v27, %v5328_v0  ;;  %v5484_v38 = vand.u32 2147483647, %v6980_v39  ;;  %7993 = vlog2.f32 %v5717_v48  ;;  %v5830_v42 = vpop.permute.xlu1 %5829  ;;  %v12830_v22 = vld [vmem:[#allocation57_spill] sm:$0xff]  ;;  %v12831_v27 = vld [vmem:[#allocation58_spill] sm:$0xff] }
 0x8eb   : > { %7995 = vlog2.f32 %v5718_v54  ;;  %v5720_v9 = vadd.f32 1e-06, %v12830_v22 }
 0x8ec   : > { %v5440_v41 = vmul.f32 %v7980_v23, %v5424_v17  ;;  %v5520_v10 = vsel %vm4561_vm6, %v5484_v38, 0.0  ;;  %v6982_v34 = vadd.f32 -1.0, %v5454_v24  ;;  %v7982_v37 = vpop.eup %7981  ;;  %7997 = vlog2.f32 %v5719_v4 }
 0x8ed   : > { %5530 = vadd.xlane.f32.xlu0 %v5529_v52  ;;  %5521 = vadd.xlane.f32.xlu1 %v5520_v10  ;;  %v5824_v29 = vpop.permute.xlu0 %5823  ;;  %v5728_v47 = vmul.f32 0.6931472, %v7982_v37  ;;  %v5721_v23 = vadd.f32 1e-06, %v12831_v27  ;;  %7999 = vlog2.f32 %v5720_v9  ;;  %v5726_v37 = vadd.f32 1e-06, %v12836_v6 }
 0x8ee   : > { %v5456_v62 = vadd.f32 %v5440_v41, %v5216_v18  ;;  %v5486_v32 = vand.u32 2147483647, %v6982_v34  ;;  %v5834_v17 = vpop.permute.xlu1 %5833  ;;  %v12832_v18 = vld [vmem:[#allocation60_spill] sm:$0xff] }
 0x8ef   : > { %v5871_v51 = vsub.f32 %v5728_v47, %v5824_v29  ;;  %8001 = vlog2.f32 %v5721_v23  ;;  %v5723_v41 = vadd.f32 1e-06, %v12832_v18 }
 0x8f0   : > { %v5526_v7 = vsel %vm4561_vm6, %v5486_v32, 0.0  ;;  %v6984_v28 = vadd.f32 -1.0, %v5456_v62  ;;  %v12833_v62 = vld [vmem:[#allocation59_spill] sm:$0xff] }
 0x8f1   : > { %5536 = vadd.xlane.f32.xlu0 %v5535_v61  ;;  %5527 = vadd.xlane.f32.xlu1 %v5526_v7  ;;  %v5828_v12 = vpop.permute.xlu0 %5827  ;;  %v5887_v59 = vmul.f32 %v5871_v51, %v12821_v25  ;;  %v5722_v32 = vadd.f32 1e-06, %v12833_v62  ;;  %8003 = vlog2.f32 %v5723_v41  ;;  %v12834_v7 = vld [vmem:[#allocation62_spill] sm:$0xff] }
 0x8f2   : > { %v5488_v58 = vand.u32 2147483647, %v6984_v28  ;;  %v7984_v43 = vpop.eup %7983  ;;  %v5725_v28 = vadd.f32 1e-06, %v12834_v7  ;;  %v5838_v3 = vpop.permute.xlu1 %5837 }
 0x8f3   : > { %v7986_v26 = vpop.eup %7985  ;;  %v5732_v45 = vmul.f32 0.6931472, %v7984_v43  ;;  %8005 = vlog2.f32 %v5722_v32 }
 0x8f4   : > { %v5532_v40 = vsel %vm4561_vm6, %v5488_v58, 0.0  ;;  %v5730_v15 = vmul.f32 0.6931472, %v7986_v26  ;;  %v7988_v19 = vpop.eup %7987  ;;  %8007 = vlog2.f32 %v5725_v28 }
 0x8f5   : > { %5533 = vadd.xlane.f32.xlu1 %v5532_v40  ;;  %v5873_v8 = vsub.f32 %v5732_v45, %v5828_v12  ;;  %v7990_v36 = vpop.eup %7989  ;;  %v5734_v30 = vmul.f32 0.6931472, %v7988_v19  ;;  %v5832_v50 = vpop.permute.xlu0 %5831 }
 0x8f6   : > { %v5872_v14 = vsub.f32 %v5730_v15, %v5826_v2  ;;  %v5736_v46 = vmul.f32 0.6931472, %v7990_v36  ;;  %v7992_v39 = vpop.eup %7991  ;;  %v5842_v31 = vpop.permute.xlu1 %5841 }
 0x8f7   : > { %v5889_v63 = vmul.f32 %v5873_v8, %v12822_v49  ;;  %v5874_v20 = vsub.f32 %v5734_v30, %v5830_v42  ;;  %v7994_v5 = vpop.eup %7993  ;;  %v5738_v52 = vmul.f32 0.6931472, %v7992_v39 }
 0x8f8   : > { %v5888_v16 = vmul.f32 %v5872_v14, %v12823_v44  ;;  %v5875_v0 = vsub.f32 %v5736_v46, %v5832_v50  ;;  %v5740_v33 = vmul.f32 0.6931472, %v7994_v5  ;;  %v7996_v61 = vpop.eup %7995 }
 0x8f9   : > { %v5890_v24 = vmul.f32 %v5874_v20, %v12824_v53  ;;  %v5836_v57 = vpop.permute.xlu0 %5835  ;;  %v5876_v10 = vsub.f32 %v5738_v52, %v5834_v17  ;;  %v7998_v58 = vpop.eup %7997  ;;  %v5742_v60 = vmul.f32 0.6931472, %v7996_v61 }
 0x8fa   : > { %v5891_v38 = vmul.f32 %v5875_v0, %v12825_v56  ;;  %v5877_v34 = vsub.f32 %v5740_v33, %v5836_v57  ;;  %v5846_v45 = vpop.permute.xlu1 %5845  ;;  %v12837_v0 = vld [vmem:[#allocation19_spill] sm:$0xff] }
 0x8fb   : > { %v5892_v40 = vmul.f32 %v5876_v10, %v12826_v1  ;;  %v5878_v21 = vsub.f32 %v5742_v60, %v5838_v3  ;;  %v12838_v60 = vld [vmem:[#allocation92_spill] sm:$0xff] }
 0x8fe   : > { %v5850_v42 = vpop.permute.xlu1 %5849 }
 0x906   : > { %5647 = vrot.lane.b32.xlu1 %v12821_v25, %s8252_s11  ;;  %v5840_v25 = vpop.permute.xlu0 %5839 }
 0x907   : > { %5649 = vrot.lane.b32.xlu0 %v12823_v44, %s8252_s11  ;;  %v12835_v44 = vld [vmem:[#allocation61_spill] sm:$0xff] }
 0x908   : > { %v5724_v11 = vadd.f32 1e-06, %v12835_v44 }
 0x90a   : > { %5651 = vrot.lane.b32.xlu1 %v12822_v49, %s8252_s11  ;;  %v5893_v49 = vmul.f32 %v5877_v34, %v12827_v55  ;;  %8009 = vlog2.f32 %v5724_v11  ;;  %v5844_v29 = vpop.permute.xlu0 %5843 }
 0x90b   : > { %5655 = vrot.lane.b32.xlu0 %v12825_v56, %s8252_s11  ;;  %8011 = vlog2.f32 %v5726_v37 }
 0x90e   : > { %5653 = vrot.lane.b32.xlu1 %v12824_v53, %s8252_s11  ;;  %v5744_v53 = vmul.f32 0.6931472, %v7998_v58  ;;  %v5848_v2 = vpop.permute.xlu0 %5847 }
 0x90f   : > { %5659 = vrot.lane.b32.xlu0 %v12827_v55, %s8252_s11  ;;  %v5894_v55 = vmul.f32 %v5878_v21, %v12828_v13 }
 0x910   : > { %v5879_v56 = vsub.f32 %v5744_v53, %v5840_v25 }
 0x912   : > { %5657 = vrot.lane.b32.xlu1 %v12826_v1, %s8252_s11  ;;  %v8000_v1 = vpop.eup %7999  ;;  %v5895_v48 = vmul.f32 %v5879_v56, %v12829_v35  ;;  %v5852_v36 = vpop.permute.xlu0 %5851  ;;  %v5556_v56 = vsub.s32 %v12838_v60, %v12837_v0 }
 0x913   : > { %5919 = vrot.lane.b32.xlu0 %v5887_v59, %s8252_s11  ;;  %v8002_v47 = vpop.eup %8001  ;;  %v5746_v43 = vmul.f32 0.6931472, %v8000_v1 }
 0x914   : > { %v5748_v51 = vmul.f32 0.6931472, %v8002_v47  ;;  %v8004_v12 = vpop.eup %8003 }
 0x915   : > { %v5880_v26 = vsub.f32 %v5746_v43, %v5842_v31  ;;  %v8006_v8 = vpop.eup %8005  ;;  %v5752_v15 = vmul.f32 0.6931472, %v8004_v12 }
 0x916   : > { %5661 = vrot.lane.b32.xlu1 %v12828_v13, %s8252_s11  ;;  %v5881_v59 = vsub.f32 %v5748_v51, %v5844_v29  ;;  %v8008_v13 = vpop.eup %8007  ;;  %v5750_v4 = vmul.f32 0.6931472, %v8006_v8 }
 0x917   : > { %5923 = vrot.lane.b32.xlu0 %v5889_v63, %s8252_s11  ;;  %v5896_v54 = vmul.f32 %v5880_v26, %v12830_v22  ;;  %v8010_v14 = vpop.eup %8009  ;;  %v5756_v63 = vmul.f32 0.6931472, %v8008_v13 }
 0x918   : > { %v5897_v19 = vmul.f32 %v5881_v59, %v12831_v27  ;;  %v5882_v30 = vsub.f32 %v5750_v4, %v5846_v45  ;;  %v8012_v20 = vpop.eup %8011 }
 0x919   : > { %v5885_v46 = vsub.f32 %v5756_v63, %v5852_v36  ;;  %v5758_v5 = vmul.f32 0.6931472, %v8012_v20 }
 0x91a   : > { %5921 = vrot.lane.b32.xlu1 %v5888_v16, %s8252_s11  ;;  %v5754_v16 = vmul.f32 0.6931472, %v8010_v14  ;;  %v5898_v9 = vmul.f32 %v5882_v30, %v12833_v62 }
 0x91b   : > { %5663 = vrot.lane.b32.xlu0 %v12829_v35, %s8252_s11  ;;  %v5883_v35 = vsub.f32 %v5752_v15, %v5848_v2  ;;  %v5901_v23 = vmul.f32 %v5885_v46, %v12834_v7 }
 0x91c   : > { %v5884_v39 = vsub.f32 %v5754_v16, %v5850_v42 }
 0x91d   : > { %v5899_v50 = vmul.f32 %v5883_v35, %v12832_v18 }
 0x91e   : > { %5925 = vrot.lane.b32.xlu1 %v5890_v24, %s8252_s11  ;;  %v12038_v24 = vld [vmem:[#allocation10] sm:$0xff] }
 0x91f   : > { %5927 = vrot.lane.b32.xlu0 %v5891_v38, %s8252_s11  ;;  %v5900_v38 = vmul.f32 %v5884_v39, %v12835_v44 }
 0x922   : > { %5665 = vrot.lane.b32.xlu1 %v12830_v22, %s8252_s11  ;;  %v6406_v22 = vsub.s32 5, %v12837_v0 }
 0x923   : > { %5667 = vrot.lane.b32.xlu0 %v12831_v27, %s8252_s11  ;;  %v5854_v27 = vpop.permute.xlu1 %5853 }
 0x924   : > { %v6407_v17 = vrot.slane %v12038_v24, %v6406_v22  ;;  %v5886_v52 = vsub.f32 %v5758_v5, %v5854_v27 }
 0x926   : > { %5929 = vrot.lane.b32.xlu1 %v5892_v40, %s8252_s11 }
 0x927   : > { %5931 = vrot.lane.b32.xlu0 %v5893_v49, %s8252_s11  ;;  %v5495_v28 = vpop.xlane.xlu1 %5494 }
 0x92a   : > { %5669 = vrot.lane.b32.xlu1 %v12833_v62, %s8252_s11 }
 0x92b   : > { %5671 = vrot.lane.b32.xlu0 %v12832_v18, %s8252_s11  ;;  %v5902_v18 = vmul.f32 %v5886_v52, %v12836_v6 }
 0x92e   : > { %5933 = vrot.lane.b32.xlu1 %v5894_v55, %s8252_s11 }
 0x92f   : > { %5935 = vrot.lane.b32.xlu0 %v5895_v48, %s8252_s11 }
 0x932   : > { %5673 = vrot.lane.b32.xlu1 %v12835_v44, %s8252_s11  ;;  %v5558_v44 = vadd.s32 4294967288, %v12838_v60  ;;  %v12844_v60 = vld [vmem:[#allocation43_spill] sm:$0xff] }
 0x933   : > { %5675 = vrot.lane.b32.xlu0 %v12834_v7, %s8252_s11 }
 0x934   : > { %v5561_v21 = vsub.s32 %v5558_v44, %v12837_v0 }
 0x936   : > { %5937 = vrot.lane.b32.xlu1 %v5896_v54, %s8252_s11  ;;  %v5562_v51 = vrot.slane %v5495_v28, %v5561_v21 }
 0x937   : > { %5939 = vrot.lane.b32.xlu0 %v5897_v19, %s8252_s11 }
 0x93a   : > { %5677 = vrot.lane.b32.xlu1 %v12836_v6, %s8252_s11 }
 0x93b   : > { %5943 = vrot.lane.b32.xlu0 %v5899_v50, %s8252_s11 }
 0x93e   : > { %5941 = vrot.lane.b32.xlu1 %v5898_v9, %s8252_s11  ;;  %v6522_v57 = vpop.f32.mrf.mxu1 }
 0x93f   : > { %5947 = vrot.lane.b32.xlu0 %v5901_v23, %s8252_s11  ;;  %v6523_v33 = vadd.f32 %v6522_v57, %v6407_v17 }
 0x940   : > { %v7243_v41 = vpop.f32.mrf.mxu1 }
 0x941   : > { %v6528_v10 = vpack.c.bf16 %v6523_v33, %v6523_v33 }
 0x942   : > { %5945 = vrot.lane.b32.xlu1 %v5900_v38, %s8252_s11  ;;  %v6525_v34 = vpop.f32.mrf.mxu1 }
 0x943   : > { %7254 = vmatmul.mubr.msk.bf16.vlgmr.msra.gmra.mxu1 %vm6557_vm0, %v6528_v10  ;;  %v12839_v10 = vld [vmem:[#allocation39_spill] sm:$0xff] }
 0x944   : > { %v7244_v62 = vpop.f32.mrf.mxu1  ;;  %v12840_v34 = vld [vmem:[#allocation99_spill] sm:$0xff] }
 0x945   : > { %v6153_v62 = vmul.f32 %v12840_v34, %v12839_v10 }
 0x946   : > { %5949 = vrot.lane.b32.xlu1 %v5902_v18, %s8252_s11  ;;  %s8258_s11 = smov 31  }
 0x95a   : > { %v5492_v32 = vpop.xlane.xlu0 %5491 }
 0x95b   : > { %v5557_v47 = vrot.slane %v5492_v32, %v5556_v56  ;;  %v12841_v32 = vld [vmem:[#allocation40_spill] sm:$0xff] }
 0x95d   : > { %v5564_v13 = vsel %vm5563_vm7, %v5562_v51, %v5557_v47 }
 0x95e   : > { %v5498_v61 = vpop.xlane.xlu0 %5497 }
 0x95f   : > { %v5568_v55 = vrot.slane %v5498_v61, %v5556_v56  ;;  %v12842_v61 = vld [vmem:[#allocation97_spill] sm:$0xff] }
 0x960   : > { %v6154_v44 = vmul.f32 %v12842_v61, %v12844_v60 }
 0x962   : > { %v5501_v7 = vpop.xlane.xlu0 %5500 }
 0x963   : > { %v5572_v6 = vrot.slane %v5501_v7, %v5561_v21  ;;  %v6152_v7 = vmul.f32 %v12842_v61, %v12841_v32 }
 0x965   : > { %v5573_v12 = vsel %vm5563_vm7, %v5572_v6, %v5568_v55  ;;  %v6177_v6 = vsel %vm4561_vm6, %v6154_v44, 0.0  ;;  %v12852_v44 = vld [vmem:[#allocation28_spill] sm:$0xff] }
 0x966   : > { %v5507_v58 = vpop.xlane.xlu0 %5506  ;;  %v5504_v40 = vpop.xlane.xlu1 %5503  ;;  %v5629_v4 = vsel %vm5628_vm12, %v5573_v12, %v5564_v13 }
 0x967   : > { %v5577_v37 = vrot.slane %v5504_v40, %v5556_v56  ;;  %v5581_v29 = vrot.slane %v5507_v58, %v5561_v21  ;;  %v6169_v40 = vsel %vm4561_vm6, %v6153_v62, 0.0 }
 0x969   : > { %v5582_v45 = vsel %vm5563_vm7, %v5581_v29, %v5577_v37  ;;  %v12845_v37 = vld [vmem:[#allocation42_spill] sm:$0xff] }
 0x96a   : > { %v5513_v25 = vpop.xlane.xlu0 %5512  ;;  %v5631_v42 = vsel %vm5630_vm13, %v5582_v45, %v5629_v4  ;;  %v6157_v29 = vmul.f32 %v12840_v34, %v12845_v37 }
 0x96b   : > { %v5590_v26 = vrot.slane %v5513_v25, %v5561_v21  ;;  %v6168_v25 = vsel %vm4561_vm6, %v6152_v7, 0.0 }
 0x96c   : > { %v6187_v51 = vsel %vm4561_vm6, %v6157_v29, 0.0  ;;  %v12854_v29 = vld [vmem:[#allocation27_spill] sm:$0xff] }
 0x96e   : > { %v5510_v3 = vpop.xlane.xlu1 %5509  ;;  %v5519_v49 = vpop.xlane.xlu0 %5518 }
 0x96f   : > { %v5586_v48 = vrot.slane %v5510_v3, %v5556_v56  ;;  %v5599_v59 = vrot.slane %v5519_v49, %v5561_v21  ;;  %v12843_v3 = vld [vmem:[#allocation41_spill] sm:$0xff] }
 0x970   : > { %v6155_v49 = vmul.f32 %v12840_v34, %v12843_v3 }
 0x971   : > { %v5591_v54 = vsel %vm5563_vm7, %v5590_v26, %v5586_v48 }
 0x972   : > { %v5516_v11 = vpop.xlane.xlu1 %5515  ;;  %v5525_v53 = vpop.xlane.xlu0 %5524  ;;  %v5633_v30 = vsel %vm5632_vm14, %v5591_v54, %v5631_v42  ;;  %v12848_v54 = vld [vmem:[#allocation47_spill] sm:$0xff] }
 0x973   : > { %v5595_v43 = vrot.slane %v5516_v11, %v5556_v56  ;;  %v5608_v19 = vrot.slane %v5525_v53, %v5561_v21 }
 0x975   : > { %v5600_v36 = vsel %vm5563_vm7, %v5599_v59, %v5595_v43 }
 0x976   : > { %v5522_v1 = vpop.xlane.xlu1 %5521  ;;  %v5531_v31 = vpop.xlane.xlu0 %5530  ;;  %v5635_v20 = vsel %vm5634_vm15, %v5600_v36, %v5633_v30 }
 0x977   : > { %v5604_v2 = vrot.slane %v5522_v1, %v5556_v56  ;;  %v5617_v14 = vrot.slane %v5531_v31, %v5561_v21  ;;  %v12846_v1 = vld [vmem:[#allocation45_spill] sm:$0xff] }
 0x978   : > { %v6156_v31 = vmul.f32 %v12842_v61, %v12846_v1 }
 0x979   : > { %v5609_v63 = vsel %vm5563_vm7, %v5608_v19, %v5604_v2  ;;  %v6158_v19 = vmul.f32 %v12842_v61, %v12848_v54  ;;  %v12859_v54 = vld [vmem:[#allocation36_spill] sm:$0xff] }
 0x97a   : > { %v5528_v8 = vpop.xlane.xlu1 %5527  ;;  %v5537_v15 = vpop.xlane.xlu0 %5536  ;;  %v5637_v39 = vsel %vm5636_vm1, %v5609_v63, %v5635_v20  ;;  %v6186_v12 = vsel %vm4561_vm6, %v6156_v31, 0.0  ;;  %v12855_v31 = vld [vmem:[#allocation85_spill] sm:$0xff] }
 0x97b   : > { %v5613_v35 = vrot.slane %v5528_v8, %v5556_v56  ;;  %v5626_v22 = vrot.slane %v5537_v15, %v5561_v21  ;;  %v6170_v21 = vadd.f32 %v6169_v40, %v6168_v25  ;;  %v6188_v8 = vadd.f32 %v6187_v51, %v6186_v12  ;;  %v12847_v15 = vld [vmem:[#allocation44_spill] sm:$0xff]  ;;  %v12851_v25 = vld [vmem:[#allocation29_spill] sm:$0xff]  ;;  %v12856_v51 = vld [vmem:[#allocation71_spill] sm:$0xff] }
 0x97c   : > { %v6159_v13 = vmul.f32 %v12840_v34, %v12847_v15  ;;  %v6195_v30 = vsel %vm4561_vm6, %v6158_v19, 0.0  ;;  %v6163_v12 = vmul.f32 %v12840_v34, %v12856_v51 }
 0x97d   : > { %v5618_v50 = vsel %vm5563_vm7, %v5617_v14, %v5613_v35  ;;  %v6171_v48 = vrot.slane %v6170_v21, 4  ;;  %v6189_v42 = vrot.slane %v6188_v8, 4 }
 0x97e   : > { %v5534_v46 = vpop.xlane.xlu1 %5533  ;;  %v12060_v16 = vpop.permute.xlu0 %5649  ;;  %v5639_v23 = vsel %vm5638_vm2, %v5618_v50, %v5637_v39  ;;  %v6196_v63 = vsel %vm4561_vm6, %v6159_v13, 0.0 }
 0x97f   : > { %v5622_v9 = vrot.slane %v5534_v46, %v5556_v56  ;;  %v6178_v56 = vsel %vm4561_vm6, %v6155_v49, 0.0  ;;  %v6172_v45 = vadd.f32 %v6171_v48, %v6170_v21  ;;  %v6197_v39 = vadd.f32 %v6196_v63, %v6195_v30  ;;  %v12861_v63 = vld [vmem:[#allocation68_spill] sm:$0xff] }
 0x980   : > { %v6179_v43 = vadd.f32 %v6178_v56, %v6177_v6  ;;  %v12853_v56 = vld [vmem:[#allocation20_spill] sm:$0xff]  ;;  %v5696_v1 = vsub.f32 %v12854_v29, %v12060_v16 }
 0x981   : > { %v5627_v27 = vsel %vm5563_vm7, %v5626_v22, %v5622_v9  ;;  %v6173_v36 = vrot.slane %v6172_v45, 2  ;;  %v6190_v9 = vadd.f32 %v6189_v42, %v6188_v8  ;;  %v6198_v49 = vrot.slane %v6197_v39, 4 }
 0x982   : > { %v12066_v5 = vpop.permute.xlu1 %5647  ;;  %v12068_v17 = vpop.permute.xlu0 %5655  ;;  %v5641_v38 = vsel %vm5640_vm3, %v5627_v27, %v5639_v23  ;;  %v6180_v59 = vrot.slane %v6179_v43, 4  ;;  %v12849_v27 = vld [vmem:[#allocation46_spill] sm:$0xff] }
 0x983   : > { %v5643_v52 = vsel %vm4561_vm6, %v5641_v38, 0.0  ;;  %v12110_v20 = vadd.f32 %v6173_v36, %v6172_v45  ;;  %v6161_v23 = vmul.f32 %v12840_v34, %v12849_v27  ;;  %v12850_v38 = vld [vmem:[#allocation75_spill] sm:$0xff]  ;;  %v6191_v40 = vrot.slane %v6190_v9, 2 }
 0x984   : > { %5644 = vadd.xlane.f32.xlu0 %v5643_v52  ;;  %v6181_v14 = vadd.f32 %v6180_v59, %v6179_v43  ;;  %v6160_v52 = vmul.f32 %v12842_v61, %v12850_v38 }
 0x985   : > { %v6175_v32 = vrot.slane %v12110_v20, 1  ;;  %v6205_v60 = vsel %vm4561_vm6, %v6161_v23, 0.0  ;;  %v12141_v36 = vadd.f32 %v6191_v40, %v6190_v9  ;;  %v6214_v9 = vsel %vm4561_vm6, %v6163_v12, 0.0  ;;  %v12866_v12 = vld [vmem:[#allocation96_spill] sm:$0xff] }
 0x986   : > { %v12072_v57 = vpop.permute.xlu1 %5651  ;;  %v12074_v33 = vpop.permute.xlu0 %5659  ;;  %v6182_v22 = vrot.slane %v6181_v14, 2  ;;  %v6204_v37 = vsel %vm4561_vm6, %v6160_v52, 0.0 }
 0x987   : > { %v5697_v21 = vsub.f32 %v12852_v44, %v12072_v57  ;;  %v5701_v16 = vsub.f32 %v12859_v54, %v12074_v33  ;;  %v6206_v33 = vadd.f32 %v6205_v60, %v6204_v37 }
 0x988   : > { %v12119_v7 = vadd.f32 %v6182_v22, %v6181_v14  ;;  %v12860_v14 = vld [vmem:[#allocation76_spill] sm:$0xff]  ;;  %v12148_v22 = vadd.f32 %v6198_v49, %v6197_v39  ;;  %v12863_v49 = vld [vmem:[#allocation34_spill] sm:$0xff] }
 0x989   : > { %v6207_v54 = vrot.slane %v6206_v33, 4 }
 0x98a   : > { %v5654_v18 = vpop.permute.xlu1 %5653  ;;  %v12076_v41 = vpop.permute.xlu0 %5919 }
 0x98b   : > { %v5698_v3 = vsub.f32 %v12851_v25, %v5654_v18  ;;  %v12857_v18 = vld [vmem:[#allocation66_spill] sm:$0xff] }
 0x98c   : > { %v5699_v45 = vsub.f32 %v12857_v18, %v12068_v17  ;;  %v6162_v17 = vmul.f32 %v12842_v61, %v12860_v14 }
 0x98e   : > { %v5658_v28 = vpop.permute.xlu1 %5657  ;;  %v5924_v58 = vpop.permute.xlu0 %5923 }
 0x98f   : > { %v5700_v6 = vsub.f32 %v12853_v56, %v5658_v28  ;;  %v5969_v59 = vadd.f32 %v5924_v58, %v5697_v21  ;;  %v12858_v28 = vld [vmem:[#allocation64_spill] sm:$0xff] }
 0x990   : > { %v5695_v13 = vsub.f32 %v12858_v28, %v12066_v5  ;;  %v12864_v21 = vld [vmem:[#allocation88_spill] sm:$0xff] }
 0x991   : > { %v6164_v56 = vmul.f32 %v12842_v61, %v12864_v21 }
 0x992   : > { %v5662_v11 = vpop.permute.xlu1 %5661  ;;  %v12088_v53 = vpop.permute.xlu0 %5663  ;;  %v5967_v42 = vadd.f32 %v12076_v41, %v5695_v13  ;;  %v12862_v41 = vld [vmem:[#allocation94_spill] sm:$0xff] }
 0x993   : > { %v5702_v48 = vsub.f32 %v12855_v31, %v5662_v11  ;;  %v5703_v30 = vsub.f32 %v12861_v63, %v12088_v53  ;;  %v6165_v25 = vmul.f32 %v12840_v34, %v12862_v41 }
 0x994   : > { %v5983_v39 = vand.u32 2147483647, %v5967_v42 }
 0x996   : > { %v5922_v47 = vpop.permute.xlu1 %5921  ;;  %v5928_v55 = vpop.permute.xlu0 %5927 }
 0x997   : > { %v5968_v19 = vadd.f32 %v5922_v47, %v5696_v1  ;;  %v5971_v58 = vadd.f32 %v5928_v55, %v5699_v45  ;;  %v5985_v47 = vand.u32 2147483647, %v5969_v59  ;;  %v6213_v55 = vsel %vm4561_vm6, %v6162_v17, 0.0  ;;  %v12867_v59 = vld [vmem:[#allocation78_spill] sm:$0xff] }
 0x999   : > { %v5984_v38 = vand.u32 2147483647, %v5968_v19  ;;  %v5987_v53 = vand.u32 2147483647, %v5971_v58  ;;  %v6009_v37 = vsel %vm5999_vm8, %v5985_v47, 0.0  ;;  %v6215_v58 = vadd.f32 %v6214_v9, %v6213_v55  ;;  %v12869_v9 = vld [vmem:[#allocation38_spill] sm:$0xff] }
 0x99a   : > { %v5926_v26 = vpop.permute.xlu1 %5925  ;;  %v12098_v2 = vpop.permute.xlu0 %5667 }
 0x99b   : > { %v5970_v43 = vadd.f32 %v5926_v26, %v5698_v3  ;;  %v6184_v26 = vrot.slane %v12119_v7, 1  ;;  %v6001_v31 = vsel %vm5999_vm8, %v5984_v38, 0.0  ;;  %v6018_v18 = vsel %vm5999_vm8, %v5987_v53, 0.0 }
 0x99e   : > { %v12104_v35 = vpop.permute.xlu1 %5665  ;;  %v5932_v4 = vpop.permute.xlu0 %5931 }
 0x99f   : > { %v5973_v5 = vadd.f32 %v5932_v4, %v5701_v16  ;;  %v5704_v60 = vsub.f32 %v12863_v49, %v12104_v35  ;;  %v6166_v35 = vmul.f32 %v12842_v61, %v12866_v12  ;;  %v6223_v61 = vsel %vm4561_vm6, %v6165_v25, 0.0 }
 0x9a1   : > { %v5989_v44 = vand.u32 2147483647, %v5973_v5  ;;  %v6231_v38 = vsel %vm4561_vm6, %v6166_v35, 0.0 }
 0x9a2   : > { %v5930_v50 = vpop.permute.xlu1 %5929  ;;  %v12108_v46 = vpop.permute.xlu0 %5671 }
 0x9a3   : > { %v5972_v8 = vadd.f32 %v5930_v50, %v5700_v6  ;;  %v5986_v50 = vand.u32 2147483647, %v5970_v43 }
 0x9a5   : > { %v5988_v27 = vand.u32 2147483647, %v5972_v8  ;;  %v6010_v3 = vsel %vm5999_vm8, %v5986_v50, 0.0  ;;  %v6000_v8 = vsel %vm5999_vm8, %v5983_v39, 0.0  ;;  %v12868_v50 = vld [vmem:[#allocation82_spill] sm:$0xff]  ;;  %v6200_v39 = vrot.slane %v12148_v22, 2 }
 0x9a6   : > { %v12116_v10 = vpop.permute.xlu1 %5669  ;;  %v5936_v62 = vpop.permute.xlu0 %5935  ;;  %v6011_v45 = vadd.f32 %v6010_v3, %v6009_v37  ;;  %v6002_v16 = vadd.f32 %v6001_v31, %v6000_v8  ;;  %v5707_v5 = vsub.f32 %v12868_v50, %v12108_v46  ;;  %v12185_v3 = vadd.f32 %v6207_v54, %v6206_v33  ;;  %v12870_v37 = vld [vmem:[#allocation86_spill] sm:$0xff]  ;;  %v12872_v54 = vld [vmem:[#allocation69_spill] sm:$0xff] }
 0x9a7   : > { %v5975_v52 = vadd.f32 %v5936_v62, %v5703_v30  ;;  %v12865_v62 = vld [vmem:[#allocation101_spill] sm:$0xff]  ;;  %v6019_v29 = vsel %vm5999_vm8, %v5988_v27, 0.0 }
 0x9a8   : > { %v6167_v6 = vmul.f32 %v12840_v34, %v12865_v62  ;;  %v5705_v34 = vsub.f32 %v12867_v59, %v12098_v2  ;;  %v6020_v28 = vadd.f32 %v6019_v29, %v6018_v18  ;;  %v6222_v2 = vsel %vm4561_vm6, %v6164_v56, 0.0  ;;  %v12871_v29 = vld [vmem:[#allocation100_spill] sm:$0xff] }
 0x9a9   : > { %v6012_v30 = vrot.slane %v6011_v45, 4  ;;  %v6003_v55 = vrot.slane %v6002_v16, 4 }
 0x9aa   : > { %v5934_v15 = vpop.permute.xlu1 %5933  ;;  %v12134_v57 = vpop.permute.xlu0 %5675  ;;  %v6232_v27 = vsel %vm4561_vm6, %v6167_v6, 0.0 }
 0x9ab   : > { %v5974_v11 = vadd.f32 %v5934_v15, %v5702_v48  ;;  %v5991_v48 = vand.u32 2147483647, %v5975_v52  ;;  %v6027_v15 = vsel %vm5999_vm8, %v5989_v44, 0.0  ;;  %v6021_v52 = vrot.slane %v6020_v28, 4 }
 0x9ac   : > { %v6224_v44 = vadd.f32 %v6223_v61, %v6222_v2  ;;  %v6233_v21 = vadd.f32 %v6232_v27, %v6231_v38  ;;  %v6013_v56 = vadd.f32 %v6012_v30, %v6011_v45 }
 0x9ad   : > { %v5990_v40 = vand.u32 2147483647, %v5974_v11  ;;  %v6036_v42 = vsel %vm5999_vm8, %v5991_v48, 0.0  ;;  %v6022_v6 = vadd.f32 %v6021_v52, %v6020_v28  ;;  %v6004_v48 = vadd.f32 %v6003_v55, %v6002_v16 }
 0x9ae   : > { %v12150_v23 = vpop.permute.xlu1 %5673  ;;  %v5940_v4 = vpop.permute.xlu0 %5939  ;;  %v6225_v8 = vrot.slane %v6224_v44, 4 }
 0x9af   : > { %v6028_v43 = vsel %vm5999_vm8, %v5990_v40, 0.0  ;;  %v5977_v11 = vadd.f32 %v5940_v4, %v5705_v34  ;;  %v5706_v40 = vsub.f32 %v12869_v9, %v12116_v10  ;;  %v5709_v10 = vsub.f32 %v12870_v37, %v12134_v57 }
 0x9b0   : > { %v6029_v19 = vadd.f32 %v6028_v43, %v6027_v15  ;;  %v6014_v15 = vrot.slane %v6013_v56, 2  ;;  %v6234_v57 = vrot.slane %v6233_v21, 4  ;;  %v6005_v16 = vrot.slane %v6004_v48, 2 }
 0x9b1   : > { %v5993_v25 = vand.u32 2147483647, %v5977_v11  ;;  %v6226_v38 = vadd.f32 %v6225_v8, %v6224_v44 }
 0x9b2   : > { %v5938_v1 = vpop.permute.xlu1 %5937  ;;  %v5944_v14 = vpop.permute.xlu0 %5943  ;;  %v6030_v41 = vrot.slane %v6029_v19, 4  ;;  %v6235_v52 = vadd.f32 %v6234_v57, %v6233_v21 }
 0x9b3   : > { %v5976_v51 = vadd.f32 %v5938_v1, %v5704_v60  ;;  %v5979_v53 = vadd.f32 %v5944_v14, %v5707_v5  ;;  %v6216_v60 = vrot.slane %v6215_v58, 4  ;;  %v5708_v1 = vsub.f32 %v12871_v29, %v12150_v23 }
 0x9b4   : > { %v6031_v43 = vadd.f32 %v6030_v41, %v6029_v19  ;;  %v6045_v33 = vsel %vm5999_vm8, %v5993_v25, 0.0  ;;  %v6015_v5 = vadd.f32 %v6014_v15, %v6013_v56  ;;  %v6227_v44 = vrot.slane %v6226_v38, 2 }
 0x9b5   : > { %v5992_v13 = vand.u32 2147483647, %v5976_v51  ;;  %v5995_v51 = vand.u32 2147483647, %v5979_v53  ;;  %v6217_v34 = vadd.f32 %v6216_v60, %v6215_v58  ;;  %v6209_v58 = vrot.slane %v12185_v3, 2 }
 0x9b6   : > { %v5678_v17 = vpop.permute.xlu1 %5677  ;;  %v5948_v62 = vpop.permute.xlu0 %5947  ;;  %v6032_v19 = vrot.slane %v6031_v43, 2  ;;  %v6016_v60 = vrot.slane %v6015_v5, 1  ;;  %v6236_v21 = vrot.slane %v6235_v52, 2  ;;  %v6228_v15 = vadd.f32 %v6227_v44, %v6226_v38 }
 0x9b7   : > { %v6037_v63 = vsel %vm5999_vm8, %v5992_v13, 0.0  ;;  %v5981_v18 = vadd.f32 %v5948_v62, %v5709_v10  ;;  %v6023_v13 = vrot.slane %v6022_v6, 2  ;;  %v5710_v23 = vsub.f32 %v12872_v54, %v5678_v17 }
 0x9b8   : > { %v6038_v47 = vadd.f32 %v6037_v63, %v6036_v42  ;;  %v6054_v14 = vsel %vm5999_vm8, %v5995_v51, 0.0  ;;  %v6033_v55 = vadd.f32 %v6032_v19, %v6031_v43  ;;  %v6218_v53 = vrot.slane %v6217_v34, 2 }
 0x9b9   : > { %v5997_v2 = vand.u32 2147483647, %v5981_v18  ;;  %v6024_v17 = vadd.f32 %v6023_v13, %v6022_v6  ;;  %v6201_v10 = vadd.f32 %v6200_v39, %v12148_v22  ;;  %v6193_v43 = vrot.slane %v12141_v36, 1 }
 0x9ba   : > { %v5942_v4 = vpop.permute.xlu1 %5941  ;;  %v6039_v49 = vrot.slane %v6038_v47, 4  ;;  %v6219_v51 = vadd.f32 %v6218_v53, %v6217_v34  ;;  %v6237_v39 = vadd.f32 %v6236_v21, %v6235_v52 }
 0x9bb   : > { %v5978_v46 = vadd.f32 %v5942_v4, %v5706_v40  ;;  %v6006_v40 = vadd.f32 %v6005_v16, %v6004_v48  ;;  %v6025_v6 = vrot.slane %v6024_v17, 1  ;;  %v6202_v8 = vrot.slane %v6201_v10, 1 }
 0x9bc   : > { %v6040_v35 = vadd.f32 %v6039_v49, %v6038_v47  ;;  %v6063_v49 = vsel %vm5999_vm8, %v5997_v2, 0.0  ;;  %v6220_v16 = vrot.slane %v6219_v51, 1 }
 0x9bd   : > { %v5994_v31 = vand.u32 2147483647, %v5978_v46  ;;  %v6007_v29 = vrot.slane %v6006_v40, 1  ;;  %v6026_v22 = vadd.f32 %v6025_v6, %v6024_v17 }
 0x9be   : > { %v5946_v12 = vpop.permute.xlu1 %5945  ;;  %v6041_v63 = vrot.slane %v6040_v35, 2 }
 0x9bf   : > { %v6046_v59 = vsel %vm5999_vm8, %v5994_v31, 0.0  ;;  %v5980_v45 = vadd.f32 %v5946_v12, %v5708_v1  ;;  %v6034_v1 = vrot.slane %v6033_v55, 1 }
 0x9c0   : > { %v6047_v28 = vadd.f32 %v6046_v59, %v6045_v33  ;;  %v6042_v4 = vadd.f32 %v6041_v63, %v6040_v35  ;;  %v6210_v33 = vadd.f32 %v6209_v58, %v12185_v3  ;;  %v6017_v35 = vadd.f32 %v6016_v60, %v6015_v5 }
 0x9c1   : > { %v5996_v11 = vand.u32 2147483647, %v5980_v45  ;;  %v6035_v57 = vadd.f32 %v6034_v1, %v6033_v55  ;;  %v6185_v3 = vadd.f32 %v6184_v26, %v12119_v7 }
 0x9c2   : > { %v6048_v61 = vrot.slane %v6047_v28, 4  ;;  %v5950_v42 = vpop.permute.xlu1 %5949  ;;  %v6043_v12 = vrot.slane %v6042_v4, 1  ;;  %v6211_v34 = vrot.slane %v6210_v33, 1 }
 0x9c3   : > { %v6055_v30 = vsel %vm5999_vm8, %v5996_v11, 0.0  ;;  %v5982_v50 = vadd.f32 %v5950_v42, %v5710_v23  ;;  %v6176_v23 = vadd.f32 %v6175_v32, %v12110_v20  ;;  %v6194_v42 = vadd.f32 %v6193_v43, %v12141_v36 }
 0x9c4   : > { %v6049_v47 = vadd.f32 %v6048_v61, %v6047_v28  ;;  %v6056_v27 = vadd.f32 %v6055_v30, %v6054_v14  ;;  %v6008_v28 = vadd.f32 %v6007_v29, %v6006_v40  ;;  %v6044_v11 = vadd.f32 %v6043_v12, %v6042_v4 }
 0x9c5   : > { %v5998_v9 = vand.u32 2147483647, %v5982_v50  ;;  %v6229_v30 = vrot.slane %v6228_v15, 1  ;;  %v6203_v50 = vadd.f32 %v6202_v8, %v6201_v10  ;;  %v6238_v32 = vrot.slane %v6237_v39, 1 }
 0x9c6   : > { %v6050_v41 = vrot.slane %v6049_v47, 2  ;;  %v6057_v25 = vrot.slane %v6056_v27, 4  ;;  %v6609_v19 = vsel %vm5628_vm12, %v6017_v35, %v6008_v28  ;;  %v6212_v5 = vadd.f32 %v6211_v34, %v6210_v33 }
 0x9c7   : > { %v6064_v46 = vsel %vm5999_vm8, %v5998_v9, 0.0  ;;  %v6610_v63 = vsel %vm5630_vm13, %v6026_v22, %v6609_v19  ;;  %v6627_v38 = vsel %vm5628_vm12, %v6185_v3, %v6176_v23  ;;  %v6230_v52 = vadd.f32 %v6229_v30, %v6228_v15 }
 0x9c8   : > { %v6051_v62 = vadd.f32 %v6050_v41, %v6049_v47  ;;  %v6058_v37 = vadd.f32 %v6057_v25, %v6056_v27  ;;  %v6065_v56 = vadd.f32 %v6064_v46, %v6063_v49  ;;  %v6611_v20 = vsel %vm5632_vm14, %v6035_v57, %v6610_v63 }
 0x9c9   : > { %v6612_v7 = vsel %vm5634_vm15, %v6044_v11, %v6611_v20  ;;  %v6221_v27 = vadd.f32 %v6220_v16, %v6219_v51  ;;  %v6628_v17 = vsel %vm5630_vm13, %v6194_v42, %v6627_v38  ;;  %v6239_v40 = vadd.f32 %v6238_v32, %v6237_v39 }
 0x9ca   : > { %v6059_v31 = vrot.slane %v6058_v37, 2  ;;  %v6066_v48 = vrot.slane %v6065_v56, 4  ;;  %v6052_v18 = vrot.slane %v6051_v62, 1  ;;  %v6629_v55 = vsel %vm5632_vm14, %v6203_v50, %v6628_v17 }
 0x9cb   : > { %v6630_v41 = vsel %vm5634_vm15, %v6212_v5, %v6629_v55  ;;  %vm6666_vm12 = vcmask 408576  }
 0x9cc   : > { %v6060_v59 = vadd.f32 %v6059_v31, %v6058_v37  ;;  %v6067_v45 = vadd.f32 %v6066_v48, %v6065_v56  ;;  %v6053_v14 = vadd.f32 %v6052_v18, %v6051_v62  ;;  %v6631_v25 = vsel %vm5636_vm1, %v6221_v27, %v6630_v41 }
 0x9cd   : > { %v6632_v53 = vsel %vm5638_vm2, %v6230_v52, %v6631_v25  ;;  %v6531_v37 = vsub.s32 6, %v12837_v0 }
 0x9ce   : > { %v6061_v13 = vrot.slane %v6060_v59, 1  ;;  %v6068_v54 = vrot.slane %v6067_v45, 2  ;;  %v6613_v47 = vsel %vm5636_vm1, %v6053_v14, %v6612_v7  ;;  %v6633_v4 = vsel %vm5640_vm3, %v6239_v40, %v6632_v53 }
 0x9cf   : > { %v6532_v10 = vrot.slane %v12038_v24, %v6531_v37 }
 0x9d0   : > { %v6069_v61 = vadd.f32 %v6068_v54, %v6067_v45  ;;  %v6062_v2 = vadd.f32 %v6061_v13, %v6060_v59 }
 0x9d2   : > { %v6070_v58 = vrot.slane %v6069_v61, 1  ;;  %v6614_v36 = vsel %vm5638_vm2, %v6062_v2, %v6613_v47 }
 0x9d4   : > { %v6071_v26 = vadd.f32 %v6070_v58, %v6069_v61 }
 0x9d6   : > { %v6615_v9 = vsel %vm5640_vm3, %v6071_v26, %v6614_v36 }
 0x9d7   : > { %6616 = vrot.lane.b32.xlu1 %v6615_v9, %s8258_s11 }
 0x9db   : > { %6634 = vrot.lane.b32.xlu1 %v6633_v4, %s8259_s16 }
 0xa03   : > { %v6595_v49 = vpop.f32.mrf.mxu1 }
 0xa04   : > { %v6596_v6 = vadd.f32 %v6595_v49, %v6532_v10 }
 0xa05   : > { %v7255_v46 = vpop.f32.mrf.mxu1 }
 0xa07   : > { %v6598_v60 = vpop.f32.mrf.mxu1 }
 0xa09   : > { %v7256_v62 = vpop.f32.mrf.mxu1 }
 0xa0d   : > { %v5645_v56 = vpop.xlane.xlu0 %5644 }
 0xa0e   : > { %v5646_v44 = vmul.f32 0.5, %v5645_v56 }
 0xa10   : > { %v6661_v29 = vsel %vm6660_vm9, %v6596_v6, %v5646_v44 }
 0xa49   : > { %v6617_v21 = vpop.permute.xlu1 %6616 }
 0xa4a   : > { %v6663_v1 = vsel %vm6662_vm10, %v6661_v29, %v6617_v21 }
 0xa4d   : > { %v6635_v31 = vpop.permute.xlu1 %6634 }
 0xa4e   : > { %v6665_v48 = vsel %vm6664_vm11, %v6663_v1, %v6635_v31 }
 0xa4f   : > { %v6667_v0 = vsel %vm6666_vm12, %v6665_v48, 0.0 }
 0xa50   : > { %6668 = vst [vmem:[%s11717_s5] sm:$0xff] %v6667_v0 }
 0xa51   : > { %8177 = shalt.err (!%p8174_p13)
}
 0xa52   : > { %s8178_s5 = scalar_lea.hbm %s12230_s28, 256  ;;  %s8182_s20 = scalar_lea.hbm %s12280_s12, 512 }
 0xa53   : > { %p8179_p1 = scmp.ne.s32.totalorder %s12230_s28, %s8178_s5  ;;  %p8183_p6 = scmp.lt.s32.totalorder %s12230_s28, %s12280_s12 }
 0xa54   : > { %p8184_p2 = scmp.lt.s32.totalorder %s8182_s20, %s8178_s5 }
 0xa55   : > { %p8180_p3 = pnand %p8179_p1, %p12873_p10 }
 0xa56   : > { %p8185_p8 = por %p8184_p2, %p8183_p6 }
 0xa57   : > { %p8181_p4 = pneg %p8180_p3 }
 0xa59   : > { %p8186_p7 = pnand %p8185_p8, %p8181_p4 }
 0xa5b   : > { %8189 = shalt.err (!%p8186_p7)
}
 0xa5c   : > { %7275 = dma.vmem_to_hbm [thread:$0]  (%p12873_p10), %s6686_s2, 256, %s12230_s28, %s6671_s13  }
 0xa5d PF: > { %s6697_s16 = sand.u32 1, %s8224_s21   ;;  %p12874_p0 = scmp.ne.s32.totalorder %s12483_s14, 0 }
 0xa5e   : > { %p12875_p12 = scmp.ge.s32.totalorder %s8236_s24, 2  ;;  %s6698_s17 = scalar_lea.sflag [#allocation4], %s6697_s16 }
 0xa60   : > { %p7295_p5 = pnand %p12875_p12, %p12874_p0 }
 0xa62   : > { %p7296_p9 = pneg %p7295_p5 }
 0xa64   : > { %8219 = dma.done.wait (%p7296_p9), %s6698_s17, 256  }
 0xa65   : > { %8221 = vsyncadd (%p7296_p9), %s6698_s17, 4294967040  ;;  %s12876_s24 = sld [smem:[#allocation17_spill]]  ;;  %s12879_s21 = smov %s8228_s22 }
 0xa66   : > { %s12877_s3 = sld [smem:[#allocation16_spill]] }
 0xa67   : > { %s12878_s23 = sld [smem:[#allocation18_spill]] }
 0xa6b   : > { %p27_p11 = scmp.ge.s32.totalorder %s12876_s24, 4  }
 0xa6c   : > { %s12880_s22 = smov %s12877_s3 }
 0xa6d   :  { %29 = sbr.rel (!%p27_p11) target bundleno = 12 (0xc), region = 132 }
 0xa72   :  { %6703 = vsyncpa [#allocation3], 1 }
 0xa73   :  { %6705 = vsyncpa [#allocation3 + $0x1], 1 }
 0xa74   :  { %6706 = vsyncpa [#allocation6], 1 }
 0xa75   :  { %6707 = vsyncpa [#allocation9], 1 }
 0xa76   :  { %6708 = vsyncpa [#allocation4], 1 }
 0xa77   :  { %6710 = vsyncpa [#allocation4 + $0x1], 1 }

</bundles_post_ra>
